<compile_context>
chip_gen: v7x
topology: tpu7x:2x2x1
jax: 0.10.0
libtpu: 0.0.40
codegen_flags: <defaults>
</compile_context>

<pallas_src>
import jax
import jax.numpy as jnp
from jax.experimental import pallas as pl
from jax.experimental.pallas import tpu as pltpu

EPS = 1e-5
NEG_SLOPE = 0.2
OUT_CLASSES = 40


def _vmem_limit_bytes():
    # v5e/v6e have 128 MiB physical VMEM; v7x only 64 MiB.  Size the scoped
    # limit off the detected chip, leaving headroom.
    try:
        cap = int(pltpu.get_tpu_info().vmem_capacity_bytes)
    except Exception:
        cap = 64 * 1024 * 1024
    return min(max(cap - 16 * 1024 * 1024, 32 * 1024 * 1024), 112 * 1024 * 1024)


VMEM_LIMIT_BYTES = _vmem_limit_bytes()


# ---------------------------------------------------------------------------
# Small helpers
# ---------------------------------------------------------------------------
def _pick_tile(n, cap):
    """Largest row-tile <= cap that divides n; prefer multiples of 16 (bf16)."""
    for t in range(min(n, cap), 0, -1):
        if n % t == 0 and (t % 16 == 0 or t == n):
            return t
    return n


def _leaky(x):
    return jnp.where(x >= 0, x, NEG_SLOPE * x)


def _reduce_stats(st):
    """(R, 2, C) per-tile partials -> (2, C) totals (static small R unrolled)."""
    r = st.shape[0]
    if r <= 16:
        s = st[0]
        for i in range(1, r):
            s = s + st[i]
        return s
    return jnp.sum(st, axis=0)


def _scale_shift(stats, gb, n_total):
    """Fold partial (sum, sum-sq) stats + (gamma, beta) into per-channel
    BatchNorm scale/shift (training-mode batch stats, biased variance)."""
    s = _reduce_stats(stats)                                  # (2, C)
    inv_n = 1.0 / float(n_total)
    mean = s[0:1, :] * inv_n                                  # (1, C)
    var = jnp.maximum(s[1:2, :] * inv_n - mean * mean, 0.0)   # (1, C)
    inv = jax.lax.rsqrt(var + EPS)
    scale = gb[0:1, :] * inv                                  # gamma * inv
    shift = gb[1:2, :] - mean * scale                         # beta - mean*scale
    return scale, shift


def _batchnorm(z, gamma, beta):
    # training-mode BatchNorm1d over axis 0 (head only; tiny batch)
    mean = jnp.mean(z, axis=0, keepdims=True)
    var = jnp.mean(jnp.square(z - mean), axis=0, keepdims=True)
    return (z - mean) * jax.lax.rsqrt(var + EPS) * gamma + beta


# ---------------------------------------------------------------------------
# Pallas kernels
# ---------------------------------------------------------------------------
def _make_conv_kernel(num_x, has_bn, col_offs, n_total):
    """GCNConv tile kernel.

    If has_bn, the previous layer's BN + LeakyReLU is applied to the raw input
    slab(s) in-kernel (per-channel scale/shift derived from the prefetched
    per-tile stats), then z = Ahat_tile @ Xcat @ W, plus per-tile BN partial
    statistics for THIS layer's output.  GCNConv bias is omitted — it cancels
    exactly through the following training-mode BatchNorm.
    """

    def kernel(*refs):
        pos = 0
        a_ref = refs[pos]; pos += 1
        x_refs = refs[pos:pos + num_x]; pos += num_x
        if has_bn:
            st_refs = refs[pos:pos + num_x]; pos += num_x
            gb_ref = refs[pos]; pos += 1
        w_ref = refs[pos]; pos += 1
        z_ref, st_out_ref = refs[pos], refs[pos + 1]

        a = a_ref[...]                                        # (TM, N) bf16
        if has_bn:
            gb = gb_ref[...]                                  # (2, sum C_in)
            parts = []
            for i in range(num_x):
                scale, shift = _scale_shift(
                    st_refs[i][...], gb[:, col_offs[i]:col_offs[i + 1]], n_total)
                xi = x_refs[i][...].astype(jnp.float32) * scale + shift
                parts.append(_leaky(xi).astype(jnp.bfloat16))
            x = parts[0] if num_x == 1 else jnp.concatenate(parts, axis=-1)
        else:
            x = x_refs[0][...]                                # raw bf16 input

        # (Ahat @ X) @ W — Ahat applied on the narrow C_in side (always cheaper
        # here since C_in <= C_out for every layer, incl. layer 1).
        ax = jnp.dot(a, x, preferred_element_type=jnp.float32)
        z = jnp.dot(ax.astype(jnp.bfloat16), w_ref[...],
                    preferred_element_type=jnp.float32)       # (TM, C_out) f32

        z_ref[...] = z.astype(z_ref.dtype)                    # bf16 writeback
        st_out_ref[0:1, :] = jnp.sum(z, axis=0, keepdims=True)
        st_out_ref[1:2, :] = jnp.sum(z * z, axis=0, keepdims=True)

    return kernel


def _make_pool_kernel(n_total):
    """Fused BN5 + LeakyReLU + per-graph add-pool (h5 never hits HBM)."""

    def kernel(x_ref, st_ref, gb_ref, o_ref):
        scale, shift = _scale_shift(st_ref[...], gb_ref[...], n_total)
        h = _leaky(x_ref[...].astype(jnp.float32) * scale + shift)
        o_ref[...] = jnp.sum(h, axis=0, keepdims=True)        # (1, C)

    return kernel


def _head_kernel(xb_ref, w1_ref, g6_ref, b6_ref, w2_ref, bb2_ref,
                 g7_ref, b7_ref, w3_ref, bb3_ref, o_ref):
    """Pooled features -> linear1 -> bn6 -> lrelu -> linear2 -> bn7 -> lrelu
    -> linear3 (mean-pool folded into w1; weights in bf16, accum f32)."""
    xb = xb_ref[...].astype(jnp.bfloat16)
    h = jnp.dot(xb, w1_ref[...], preferred_element_type=jnp.float32)
    h = _leaky(_batchnorm(h, g6_ref[...], b6_ref[...]))
    # TODO(synk): nn.Dropout training-mode randomness not reproduced; identity (eval) here.
    h = jnp.dot(h.astype(jnp.bfloat16), w2_ref[...],
                preferred_element_type=jnp.float32) + bb2_ref[...]
    h = _leaky(_batchnorm(h, g7_ref[...], b7_ref[...]))
    o_ref[...] = jnp.dot(h.astype(jnp.bfloat16), w3_ref[...],
                         preferred_element_type=jnp.float32) + bb3_ref[...]


# ---------------------------------------------------------------------------
# Wrappers (pallas_call plumbing)
# ---------------------------------------------------------------------------
def gcn_conv(a_hat, xs, w, stats=None, gbs=None, *, tm_cap=512):
    """One GCNConv layer over the block-diagonal batched graph.

    a_hat: (B, N, N) bf16 normalized adjacency per graph.
    xs:    list of raw (pre-BN) bf16 slabs, each (B*N, Cin_i).
    w:     (sum Cin_i, Cout) bf16 weight.
    stats: matching list of (R, 2, Cin_i) per-tile BN partials for each slab
           (None => no input BN, e.g. layer 1 whose input is the raw points).
    gbs:   (2, sum Cin_i) concatenated [gamma; beta] rows for the input slabs.
    Returns z (B*N, Cout) bf16 (raw, pre-BN) and stats (B*Mt, 2, Cout) f32.
    """
    B, N, _ = a_hat.shape
    n_total = B * N
    cout = w.shape[1]
    tm = _pick_tile(N, tm_cap)
    m_tiles = N // tm
    has_bn = stats is not None
    num_x = len(xs)
    col_offs = [0]
    for x in xs:
        col_offs.append(col_offs[-1] + x.shape[1])
    cin_total = col_offs[-1]

    in_specs = [pl.BlockSpec((None, tm, N), lambda b, m: (b, m, 0))]
    operands = [a_hat]
    for x in xs:
        in_specs.append(pl.BlockSpec((N, x.shape[1]), lambda b, m: (b, 0)))
        operands.append(x)
    if has_bn:
        for s in stats:
            in_specs.append(pl.BlockSpec(s.shape, lambda b, m: (0, 0, 0)))
            operands.append(s)
        in_specs.append(pl.BlockSpec(gbs.shape, lambda b, m: (0, 0)))
        operands.append(gbs)
    in_specs.append(pl.BlockSpec(w.shape, lambda b, m: (0, 0)))
    operands.append(w)

    out_specs = [
        pl.BlockSpec((tm, cout), lambda b, m: (b * m_tiles + m, 0)),
        pl.BlockSpec((None, 2, cout), lambda b, m: (b * m_tiles + m, 0, 0)),
    ]
    out_shape = [
        jax.ShapeDtypeStruct((n_total, cout), jnp.bfloat16),
        jax.ShapeDtypeStruct((B * m_tiles, 2, cout), jnp.float32),
    ]

    flops = 2 * B * (N * N * cin_total + N * cin_total * cout)
    bytes_accessed = (a_hat.size * 2 + sum(x.size for x in xs) * 2
                      + (sum(s.size for s in stats) * 4 if has_bn else 0)
                      + w.size * 2
                      + n_total * cout * 2 + B * m_tiles * 2 * cout * 4)

    z, st = pl.pallas_call(
        _make_conv_kernel(num_x, has_bn, col_offs, n_total),
        grid=(B, m_tiles),
        in_specs=in_specs,
        out_specs=out_specs,
        out_shape=out_shape,
        compiler_params=pltpu.CompilerParams(
            dimension_semantics=("parallel", "parallel"),
            vmem_limit_bytes=VMEM_LIMIT_BYTES),
        cost_estimate=pl.CostEstimate(flops=flops, transcendentals=0,
                                      bytes_accessed=bytes_accessed),
    )(*operands)
    return z, st


def global_pool_bn(z, stats, gb, B, N):
    """Per-graph global_add_pool of LeakyReLU(BN(z)) — one parallel pass."""
    n_total, c = z.shape
    out = pl.pallas_call(
        _make_pool_kernel(n_total),
        grid=(B,),
        in_specs=[pl.BlockSpec((N, c), lambda b: (b, 0)),
                  pl.BlockSpec(stats.shape, lambda b: (0, 0, 0)),
                  pl.BlockSpec(gb.shape, lambda b: (0, 0))],
        out_specs=pl.BlockSpec((None, 1, c), lambda b: (b, 0, 0)),
        out_shape=jax.ShapeDtypeStruct((B, 1, c), jnp.float32),
        compiler_params=pltpu.CompilerParams(
            dimension_semantics=("parallel",),
            vmem_limit_bytes=VMEM_LIMIT_BYTES),
    )(z, stats, gb)
    return out.reshape(B, c)


def mlp_head(xb, w1_eff, params):
    B = xb.shape[0]
    vmem = pl.BlockSpec(memory_space=pltpu.MemorySpace.VMEM)
    return pl.pallas_call(
        _head_kernel,
        out_shape=jax.ShapeDtypeStruct((B, OUT_CLASSES), jnp.float32),
        in_specs=[vmem] * 10,
        out_specs=vmem,
        compiler_params=pltpu.CompilerParams(
            vmem_limit_bytes=VMEM_LIMIT_BYTES),
    )(xb, w1_eff,
      params['g6'].reshape(1, -1), params['b6'].reshape(1, -1),
      params['w2'].astype(jnp.bfloat16), params['bias2'].reshape(1, -1),
      params['g7'].reshape(1, -1), params['b7'].reshape(1, -1),
      params['w3'].astype(jnp.bfloat16), params['bias3'].reshape(1, -1))


# ---------------------------------------------------------------------------
# Graph construction (glue; mirrors knn() + get_graph() + gcn_norm).
# Ahat is kept block-diagonal per graph: (B, N, N) in bf16.
# TODO(synk): for large N the dense (B,N,N) Ahat (re-read 5x/forward) should
#             become a gather-based sparse SpMM (scalar-prefetch neighbor ids);
#             on v7x an fp8(e4m3) Ahat would also halve adjacency traffic.
# ---------------------------------------------------------------------------
def build_graph(points, k):
    """points: (B, 3, N) — same layout the torch knn() receives."""
    B, C, N = points.shape
    feats = jnp.transpose(points, (0, 2, 1))                  # (B, N, 3)
    sq = jnp.sum(feats * feats, axis=-1)                      # (B, N)
    inner = jnp.einsum('bic,bjc->bij', feats, feats)          # (B, N, N)
    pd = -(sq[:, :, None] - 2.0 * inner + sq[:, None, :])     # -||xi - xj||^2
    _, idx = jax.lax.top_k(pd, k)                             # (B, N, k)

    # edges: source = query node, target = neighbor (matches get_graph order);
    # degree = row-sum after self-loops, matching torch_geometric gcn_norm.
    b_idx = jnp.arange(B)[:, None, None]
    src = jnp.broadcast_to(jnp.arange(N)[None, :, None], (B, N, k))
    a = jnp.zeros((B, N, N), jnp.float32).at[b_idx, idx, src].set(1.0)
    a = jnp.maximum(a, jnp.eye(N, dtype=jnp.float32)[None])   # self loops
    deg = jnp.sum(a, axis=2)
    dinv = jnp.where(deg > 0, jax.lax.rsqrt(deg), 0.0)
    a_hat = (dinv[:, :, None] * a * dinv[:, None, :]).astype(jnp.bfloat16)

    x_nodes = feats.reshape(B * N, C)                         # node order b*N+n
    return x_nodes, a_hat


# ---------------------------------------------------------------------------
# Parameters (deterministic synthetic init)
# ---------------------------------------------------------------------------
def _glorot(key, shape):
    fin, fout = shape
    lim = (6.0 / (fin + fout)) ** 0.5
    return jax.random.uniform(key, shape, jnp.float32, -lim, lim)


def init_params(key):
    conv_dims = [(3, 64), (64, 64), (64, 128), (128, 256), (512, 1024)]
    keys = jax.random.split(key, 16)
    convs = []
    for i, (fi, fo) in enumerate(conv_dims):
        convs.append(dict(
            w=_glorot(keys[i], (fi, fo)),
            b=jnp.zeros((fo,), jnp.float32),      # GCNConv bias: cancels exactly
            gamma=jnp.ones((fo,), jnp.float32),   # through training-mode BN, so
            beta=jnp.zeros((fo,), jnp.float32),   # it is never added in-kernel.
        ))
    emb2 = 2 * 1024
    params = dict(
        convs=convs,
        w1=_glorot(keys[5], (emb2, 512)),         # linear1, bias=False
        g6=jnp.ones((512,), jnp.float32), b6=jnp.zeros((512,), jnp.float32),
        w2=_glorot(keys[6], (512, 256)),
        bias2=jax.random.uniform(keys[7], (256,), jnp.float32, -0.05, 0.05),
        g7=jnp.ones((256,), jnp.float32), b7=jnp.zeros((256,), jnp.float32),
        w3=_glorot(keys[8], (256, OUT_CLASSES)),
        bias3=jax.random.uniform(keys[9], (OUT_CLASSES,), jnp.float32, -0.05, 0.05),
    )
    return params


# ---------------------------------------------------------------------------
# Full forward (mirrors GCN_r.forward)
# ---------------------------------------------------------------------------
def gcn_r_forward(x, params, k):
    B, C, N = x.shape
    nodes, a_hat = build_graph(x, k)               # (B*N, 3) f32, (B,N,N) bf16
    convs = params['convs']
    gbs = [jnp.stack([c['gamma'], c['beta']]) for c in convs]   # (2, C_out)

    # Layer 1: pad C_in 3 -> 8 (zero rows in W keep it exact); no input BN.
    cin_pad = 8
    h0 = jnp.pad(nodes, ((0, 0), (0, cin_pad - C))).astype(jnp.bfloat16)
    w1c = jnp.pad(convs[0]['w'], ((0, cin_pad - C), (0, 0))).astype(jnp.bfloat16)
    z1, st1 = gcn_conv(a_hat, [h0], w1c)

    # Layers 2-4: input = previous raw z; its BN + LeakyReLU is fused in-kernel.
    z2, st2 = gcn_conv(a_hat, [z1], convs[1]['w'].astype(jnp.bfloat16),
                       stats=[st1], gbs=gbs[0])
    z3, st3 = gcn_conv(a_hat, [z2], convs[2]['w'].astype(jnp.bfloat16),
                       stats=[st2], gbs=gbs[1])
    z4, st4 = gcn_conv(a_hat, [z3], convs[3]['w'].astype(jnp.bfloat16),
                       stats=[st3], gbs=gbs[2])

    # conv5: BN_i+LReLU of x1..x4 applied in-kernel, concat in VMEM, single
    # K=512 MXU matmul — cat(x1..x4) never materialized in HBM.
    gb_cat = jnp.concatenate(gbs[:4], axis=1)                    # (2, 512)
    z5, st5 = gcn_conv(a_hat, [z1, z2, z3, z4],
                       convs[4]['w'].astype(jnp.bfloat16),
                       stats=[st1, st2, st3, st4], gbs=gb_cat)

    # BN5 + LReLU fused into per-graph add-pool; h5 never hits HBM.
    xb = global_pool_bn(z5, st5, gbs[4], B, N)                   # (B, 1024) f32

    # mean-pool folded into weights: xa = xb / N  =>  cat(xa, xb) @ W1 == xb @ w1_eff
    emb = convs[4]['w'].shape[1]
    w1_eff = (params['w1'][:emb] / float(N) + params['w1'][emb:]).astype(jnp.bfloat16)
    return mlp_head(xb, w1_eff, params)


if __name__ == "__main__":
    key = jax.random.PRNGKey(0)
    kx, kp = jax.random.split(key)

    B, C, N, K = 2, 3, 64, 8          # small shapes: batch=2, 3-D points, 64 points, k=8
    x = jax.random.normal(kx, (B, C, N), jnp.float32)   # same (B, C, N) layout as torch input
    params = init_params(kp)

    fwd = jax.jit(gcn_r_forward, static_argnames=("k",))
    out = jax.block_until_ready(fwd(x, params, k=K))
    assert out.shape == (B, OUT_CLASSES)
    assert bool(jnp.all(jnp.isfinite(out)))
    print("KERNEL_OK")
</pallas_src>

<mosaic_0001>
module attributes {stable_mosaic.version = 11 : i64} {
  func.func @kernel(%arg0: i32, %arg1: i32, %arg2: memref<1x64x64xbf16, #tpu.memory_space<vmem>>, %arg3: memref<64x8xbf16, #tpu.memory_space<vmem>>, %arg4: memref<8x64xbf16, #tpu.memory_space<vmem>>, %arg5: memref<64x64xbf16, #tpu.memory_space<vmem>>, %arg6: memref<1x2x64xf32, #tpu.memory_space<vmem>>) attributes {dimension_semantics = [#tpu.dimension_semantics<parallel>, #tpu.dimension_semantics<parallel>], iteration_bounds = array<i64: 2, 1>, scalar_prefetch = 0 : i64, scratch_operands = 0 : i64, tpu.core_type = #tpu.core_type<tc>, window_params = [{transform_indices = @transform_0, window_bounds = array<i64: 1, 64, 64>}, {transform_indices = @transform_1, window_bounds = array<i64: 64, 8>}, {pipeline_mode = #tpu.pipeline_mode<synchronous>, transform_indices = @transform_2, window_bounds = array<i64: 8, 64>}, {transform_indices = @transform_3, window_bounds = array<i64: 64, 64>}, {transform_indices = @transform_4, window_bounds = array<i64: 1, 2, 64>}]} {
    %c0 = arith.constant 0 : index
    %c0_0 = arith.constant 0 : index
    %c0_1 = arith.constant 0 : index
    %0 = vector.load %arg2[%c0, %c0_0, %c0_1] : memref<1x64x64xbf16, #tpu.memory_space<vmem>>, vector<1x64x64xbf16>
    %1 = vector.shape_cast %0 : vector<1x64x64xbf16> to vector<64x64xbf16>
    %c0_2 = arith.constant 0 : index
    %c0_3 = arith.constant 0 : index
    %2 = vector.load %arg3[%c0_2, %c0_3] : memref<64x8xbf16, #tpu.memory_space<vmem>>, vector<64x8xbf16>
    %cst = arith.constant dense<0.000000e+00> : vector<64x8xf32>
    %3 = tpu.matmul %1, %2, %cst {dimension_numbers = #tpu.dot_dimension_numbers<[1], [0], [0], [1], [0, 0, 1, 1], [], []>} : vector<64x64xbf16>, vector<64x8xbf16>, vector<64x8xf32> -> vector<64x8xf32>
    %4 = arith.truncf %3 : vector<64x8xf32> to vector<64x8xbf16>
    %c0_4 = arith.constant 0 : index
    %c0_5 = arith.constant 0 : index
    %5 = vector.load %arg4[%c0_4, %c0_5] : memref<8x64xbf16, #tpu.memory_space<vmem>>, vector<8x64xbf16>
    %cst_6 = arith.constant dense<0.000000e+00> : vector<64x64xf32>
    %6 = tpu.matmul %4, %5, %cst_6 {dimension_numbers = #tpu.dot_dimension_numbers<[1], [0], [0], [1], [0, 0, 1, 1], [], []>} : vector<64x8xbf16>, vector<8x64xbf16>, vector<64x64xf32> -> vector<64x64xf32>
    %7 = arith.truncf %6 : vector<64x64xf32> to vector<64x64xbf16>
    %c0_7 = arith.constant 0 : index
    %c0_8 = arith.constant 0 : index
    %8 = vector.load %arg5[%c0_7, %c0_8] : memref<64x64xbf16, #tpu.memory_space<vmem>>, vector<64x64xbf16>
    tpu.vector_store %arg5[%c0_7, %c0_8], %7 {strides = array<i32>} : memref<64x64xbf16, #tpu.memory_space<vmem>>, vector<64x64xbf16>,
    %cst_9 = arith.constant dense<0.000000e+00> : vector<64xf32>
    %9 = vector.multi_reduction <add>, %6, %cst_9 [0] : vector<64x64xf32> to vector<64xf32>
    %10 = vector.shape_cast %9 : vector<64xf32> to vector<1x64xf32>
    %c0_10 = arith.constant 0 : index
    %c0_11 = arith.constant 0 : index
    %c0_12 = arith.constant 0 : index
    %11 = vector.load %arg6[%c0_10, %c0_11, %c0_12] : memref<1x2x64xf32, #tpu.memory_space<vmem>>, vector<1x1x64xf32>
    %12 = vector.shape_cast %11 : vector<1x1x64xf32> to vector<1x64xf32>
    %13 = vector.shape_cast %10 : vector<1x64xf32> to vector<1x1x64xf32>
    tpu.vector_store %arg6[%c0_10, %c0_11, %c0_12], %13 {strides = array<i32>} : memref<1x2x64xf32, #tpu.memory_space<vmem>>, vector<1x1x64xf32>,
    %14 = arith.mulf %6, %6 : vector<64x64xf32>
    %cst_13 = arith.constant dense<0.000000e+00> : vector<64xf32>
    %15 = vector.multi_reduction <add>, %14, %cst_13 [0] : vector<64x64xf32> to vector<64xf32>
    %16 = vector.shape_cast %15 : vector<64xf32> to vector<1x64xf32>
    %c0_14 = arith.constant 0 : index
    %c1 = arith.constant 1 : index
    %c0_15 = arith.constant 0 : index
    %17 = vector.load %arg6[%c0_14, %c1, %c0_15] : memref<1x2x64xf32, #tpu.memory_space<vmem>>, vector<1x1x64xf32>
    %18 = vector.shape_cast %17 : vector<1x1x64xf32> to vector<1x64xf32>
    %19 = vector.shape_cast %16 : vector<1x64xf32> to vector<1x1x64xf32>
    tpu.vector_store %arg6[%c0_14, %c1, %c0_15], %19 {strides = array<i32>} : memref<1x2x64xf32, #tpu.memory_space<vmem>>, vector<1x1x64xf32>,
    return
  }
  func.func @transform_0(%arg0: i32, %arg1: i32) -> (i32, i32, i32) {
    %c0_i32 = arith.constant 0 : i32
    %c0_i32_0 = arith.constant 0 : i32
    return %arg0, %arg1, %c0_i32 : i32, i32, i32
  }
  func.func @transform_1(%arg0: i32, %arg1: i32) -> (i32, i32) {
    %c0_i32 = arith.constant 0 : i32
    %c0_i32_0 = arith.constant 0 : i32
    return %arg0, %c0_i32 : i32, i32
  }
  func.func @transform_2(%arg0: i32, %arg1: i32) -> (i32, i32) {
    %c0_i32 = arith.constant 0 : i32
    %c0_i32_0 = arith.constant 0 : i32
    %c0_i32_1 = arith.constant 0 : i32
    return %c0_i32, %c0_i32_0 : i32, i32
  }
  func.func @transform_3(%arg0: i32, %arg1: i32) -> (i32, i32) {
    %c1_i32 = arith.constant 1 : i32
    %0 = arith.muli %arg0, %c1_i32 : i32
    %1 = arith.addi %0, %arg1 : i32
    %c0_i32 = arith.constant 0 : i32
    %c0_i32_0 = arith.constant 0 : i32
    return %1, %c0_i32 : i32, i32
  }
  func.func @transform_4(%arg0: i32, %arg1: i32) -> (i32, i32, i32) {
    %c1_i32 = arith.constant 1 : i32
    %0 = arith.muli %arg0, %c1_i32 : i32
    %1 = arith.addi %0, %arg1 : i32
    %c0_i32 = arith.constant 0 : i32
    %c0_i32_0 = arith.constant 0 : i32
    %c0_i32_1 = arith.constant 0 : i32
    return %1, %c0_i32, %c0_i32_0 : i32, i32, i32
  }
}

module attributes {stable_mosaic.version = 11 : i64} {
  func.func @kernel(%arg0: i32, %arg1: i32, %arg2: memref<1x64x64xbf16, #tpu.memory_space<vmem>>, %arg3: memref<64x64xbf16, #tpu.memory_space<vmem>>, %arg4: memref<2x2x64xf32, #tpu.memory_space<vmem>>, %arg5: memref<2x64xf32, #tpu.memory_space<vmem>>, %arg6: memref<64x64xbf16, #tpu.memory_space<vmem>>, %arg7: memref<64x64xbf16, #tpu.memory_space<vmem>>, %arg8: memref<1x2x64xf32, #tpu.memory_space<vmem>>) attributes {dimension_semantics = [#tpu.dimension_semantics<parallel>, #tpu.dimension_semantics<parallel>], iteration_bounds = array<i64: 2, 1>, scalar_prefetch = 0 : i64, scratch_operands = 0 : i64, tpu.core_type = #tpu.core_type<tc>, window_params = [{transform_indices = @transform_0, window_bounds = array<i64: 1, 64, 64>}, {transform_indices = @transform_1, window_bounds = array<i64: 64, 64>}, {pipeline_mode = #tpu.pipeline_mode<synchronous>, transform_indices = @transform_2, window_bounds = array<i64: 2, 2, 64>}, {pipeline_mode = #tpu.pipeline_mode<synchronous>, transform_indices = @transform_3, window_bounds = array<i64: 2, 64>}, {pipeline_mode = #tpu.pipeline_mode<synchronous>, transform_indices = @transform_4, window_bounds = array<i64: 64, 64>}, {transform_indices = @transform_5, window_bounds = array<i64: 64, 64>}, {transform_indices = @transform_6, window_bounds = array<i64: 1, 2, 64>}]} {
    %c0 = arith.constant 0 : index
    %c0_0 = arith.constant 0 : index
    %c0_1 = arith.constant 0 : index
    %0 = vector.load %arg2[%c0, %c0_0, %c0_1] : memref<1x64x64xbf16, #tpu.memory_space<vmem>>, vector<1x64x64xbf16>
    %1 = vector.shape_cast %0 : vector<1x64x64xbf16> to vector<64x64xbf16>
    %c0_2 = arith.constant 0 : index
    %c0_3 = arith.constant 0 : index
    %2 = vector.load %arg5[%c0_2, %c0_3] : memref<2x64xf32, #tpu.memory_space<vmem>>, vector<2x64xf32>
    %c0_4 = arith.constant 0 : index
    %c0_5 = arith.constant 0 : index
    %c0_6 = arith.constant 0 : index
    %3 = vector.load %arg4[%c0_4, %c0_5, %c0_6] : memref<2x2x64xf32, #tpu.memory_space<vmem>>, vector<2x2x64xf32>
    %4 = vector.extract_strided_slice %3 {offsets = [0, 0, 0], sizes = [1, 2, 64], strides = [1, 1, 1]} : vector<2x2x64xf32> to vector<1x2x64xf32>
    %5 = vector.shape_cast %4 : vector<1x2x64xf32> to vector<2x64xf32>
    %6 = vector.extract_strided_slice %3 {offsets = [1, 0, 0], sizes = [1, 2, 64], strides = [1, 1, 1]} : vector<2x2x64xf32> to vector<1x2x64xf32>
    %7 = vector.shape_cast %6 : vector<1x2x64xf32> to vector<2x64xf32>
    %8 = arith.addf %5, %7 : vector<2x64xf32>
    %9 = vector.extract_strided_slice %8 {offsets = [0, 0], sizes = [1, 64], strides = [1, 1]} : vector<2x64xf32> to vector<1x64xf32>
    %cst = arith.constant 7.812500e-03 : f32
    %10 = vector.broadcast %cst : f32 to vector<1x64xf32>
    %11 = arith.mulf %9, %10 : vector<1x64xf32>
    %12 = vector.extract_strided_slice %8 {offsets = [1, 0], sizes = [1, 64], strides = [1, 1]} : vector<2x64xf32> to vector<1x64xf32>
    %cst_7 = arith.constant 7.812500e-03 : f32
    %13 = vector.broadcast %cst_7 : f32 to vector<1x64xf32>
    %14 = arith.mulf %12, %13 : vector<1x64xf32>
    %15 = arith.mulf %11, %11 : vector<1x64xf32>
    %16 = arith.subf %14, %15 : vector<1x64xf32>
    %cst_8 = arith.constant 0.000000e+00 : f32
    %17 = vector.broadcast %cst_8 : f32 to vector<1x64xf32>
    %18 = arith.maximumf %16, %17 : vector<1x64xf32>
    %cst_9 = arith.constant 9.99999974E-6 : f32
    %19 = vector.broadcast %cst_9 : f32 to vector<1x64xf32>
    %20 = arith.addf %18, %19 : vector<1x64xf32>
    %21 = math.rsqrt %20 : vector<1x64xf32>
    %22 = vector.extract_strided_slice %2 {offsets = [0, 0], sizes = [1, 64], strides = [1, 1]} : vector<2x64xf32> to vector<1x64xf32>
    %23 = arith.mulf %22, %21 : vector<1x64xf32>
    %24 = vector.extract_strided_slice %2 {offsets = [1, 0], sizes = [1, 64], strides = [1, 1]} : vector<2x64xf32> to vector<1x64xf32>
    %25 = arith.mulf %11, %23 : vector<1x64xf32>
    %26 = arith.subf %24, %25 : vector<1x64xf32>
    %c0_10 = arith.constant 0 : index
    %c0_11 = arith.constant 0 : index
    %27 = vector.load %arg3[%c0_10, %c0_11] : memref<64x64xbf16, #tpu.memory_space<vmem>>, vector<64x64xbf16>
    %28 = arith.extf %27 : vector<64x64xbf16> to vector<64x64xf32>
    %29 = vector.broadcast %23 : vector<1x64xf32> to vector<64x64xf32>
    %30 = arith.mulf %28, %29 : vector<64x64xf32>
    %31 = vector.broadcast %26 : vector<1x64xf32> to vector<64x64xf32>
    %32 = arith.addf %30, %31 : vector<64x64xf32>
    %cst_12 = arith.constant 0.000000e+00 : f32
    %33 = vector.broadcast %cst_12 : f32 to vector<64x64xf32>
    %34 = arith.cmpf oge, %32, %33 : vector<64x64xf32>
    %cst_13 = arith.constant 2.000000e-01 : f32
    %35 = vector.broadcast %cst_13 : f32 to vector<64x64xf32>
    %36 = arith.mulf %35, %32 : vector<64x64xf32>
    %37 = arith.select %34, %32, %36 : vector<64x64xi1>, vector<64x64xf32>
    %38 = arith.truncf %37 : vector<64x64xf32> to vector<64x64xbf16>
    %cst_14 = arith.constant dense<0.000000e+00> : vector<64x64xf32>
    %39 = tpu.matmul %1, %38, %cst_14 {dimension_numbers = #tpu.dot_dimension_numbers<[1], [0], [0], [1], [0, 0, 1, 1], [], []>} : vector<64x64xbf16>, vector<64x64xbf16>, vector<64x64xf32> -> vector<64x64xf32>
    %40 = arith.truncf %39 : vector<64x64xf32> to vector<64x64xbf16>
    %c0_15 = arith.constant 0 : index
    %c0_16 = arith.constant 0 : index
    %41 = vector.load %arg6[%c0_15, %c0_16] : memref<64x64xbf16, #tpu.memory_space<vmem>>, vector<64x64xbf16>
    %cst_17 = arith.constant dense<0.000000e+00> : vector<64x64xf32>
    %42 = tpu.matmul %40, %41, %cst_17 {dimension_numbers = #tpu.dot_dimension_numbers<[1], [0], [0], [1], [0, 0, 1, 1], [], []>} : vector<64x64xbf16>, vector<64x64xbf16>, vector<64x64xf32> -> vector<64x64xf32>
    %43 = arith.truncf %42 : vector<64x64xf32> to vector<64x64xbf16>
    %c0_18 = arith.constant 0 : index
    %c0_19 = arith.constant 0 : index
    %44 = vector.load %arg7[%c0_18, %c0_19] : memref<64x64xbf16, #tpu.memory_space<vmem>>, vector<64x64xbf16>
    tpu.vector_store %arg7[%c0_18, %c0_19], %43 {strides = array<i32>} : memref<64x64xbf16, #tpu.memory_space<vmem>>, vector<64x64xbf16>,
    %cst_20 = arith.constant dense<0.000000e+00> : vector<64xf32>
    %45 = vector.multi_reduction <add>, %42, %cst_20 [0] : vector<64x64xf32> to vector<64xf32>
    %46 = vector.shape_cast %45 : vector<64xf32> to vector<1x64xf32>
    %c0_21 = arith.constant 0 : index
    %c0_22 = arith.constant 0 : index
    %c0_23 = arith.constant 0 : index
    %47 = vector.load %arg8[%c0_21, %c0_22, %c0_23] : memref<1x2x64xf32, #tpu.memory_space<vmem>>, vector<1x1x64xf32>
    %48 = vector.shape_cast %47 : vector<1x1x64xf32> to vector<1x64xf32>
    %49 = vector.shape_cast %46 : vector<1x64xf32> to vector<1x1x64xf32>
    tpu.vector_store %arg8[%c0_21, %c0_22, %c0_23], %49 {strides = array<i32>} : memref<1x2x64xf32, #tpu.memory_space<vmem>>, vector<1x1x64xf32>,
    %50 = arith.mulf %42, %42 : vector<64x64xf32>
    %cst_24 = arith.constant dense<0.000000e+00> : vector<64xf32>
    %51 = vector.multi_reduction <add>, %50, %cst_24 [0] : vector<64x64xf32> to vector<64xf32>
    %52 = vector.shape_cast %51 : vector<64xf32> to vector<1x64xf32>
    %c0_25 = arith.constant 0 : index
    %c1 = arith.constant 1 : index
    %c0_26 = arith.constant 0 : index
    %53 = vector.load %arg8[%c0_25, %c1, %c0_26] : memref<1x2x64xf32, #tpu.memory_space<vmem>>, vector<1x1x64xf32>
    %54 = vector.shape_cast %53 : vector<1x1x64xf32> to vector<1x64xf32>
    %55 = vector.shape_cast %52 : vector<1x64xf32> to vector<1x1x64xf32>
    tpu.vector_store %arg8[%c0_25, %c1, %c0_26], %55 {strides = array<i32>} : memref<1x2x64xf32, #tpu.memory_space<vmem>>, vector<1x1x64xf32>,
    return
  }
  func.func @transform_0(%arg0: i32, %arg1: i32) -> (i32, i32, i32) {
    %c0_i32 = arith.constant 0 : i32
    %c0_i32_0 = arith.constant 0 : i32
    return %arg0, %arg1, %c0_i32 : i32, i32, i32
  }
  func.func @transform_1(%arg0: i32, %arg1: i32) -> (i32, i32) {
    %c0_i32 = arith.constant 0 : i32
    %c0_i32_0 = arith.constant 0 : i32
    return %arg0, %c0_i32 : i32, i32
  }
  func.func @transform_2(%arg0: i32, %arg1: i32) -> (i32, i32, i32) {
    %c0_i32 = arith.constant 0 : i32
    %c0_i32_0 = arith.constant 0 : i32
    %c0_i32_1 = arith.constant 0 : i32
    %c0_i32_2 = arith.constant 0 : i32
    return %c0_i32, %c0_i32_0, %c0_i32_1 : i32, i32, i32
  }
  func.func @transform_3(%arg0: i32, %arg1: i32) -> (i32, i32) {
    %c0_i32 = arith.constant 0 : i32
    %c0_i32_0 = arith.constant 0 : i32
    %c0_i32_1 = arith.constant 0 : i32
    return %c0_i32, %c0_i32_0 : i32, i32
  }
  func.func @transform_4(%arg0: i32, %arg1: i32) -> (i32, i32) {
    %c0_i32 = arith.constant 0 : i32
    %c0_i32_0 = arith.constant 0 : i32
    %c0_i32_1 = arith.constant 0 : i32
    return %c0_i32, %c0_i32_0 : i32, i32
  }
  func.func @transform_5(%arg0: i32, %arg1: i32) -> (i32, i32) {
    %c1_i32 = arith.constant 1 : i32
    %0 = arith.muli %arg0, %c1_i32 : i32
    %1 = arith.addi %0, %arg1 : i32
    %c0_i32 = arith.constant 0 : i32
    %c0_i32_0 = arith.constant 0 : i32
    return %1, %c0_i32 : i32, i32
  }
  func.func @transform_6(%arg0: i32, %arg1: i32) -> (i32, i32, i32) {
    %c1_i32 = arith.constant 1 : i32
    %0 = arith.muli %arg0, %c1_i32 : i32
    %1 = arith.addi %0, %arg1 : i32
    %c0_i32 = arith.constant 0 : i32
    %c0_i32_0 = arith.constant 0 : i32
    %c0_i32_1 = arith.constant 0 : i32
    return %1, %c0_i32, %c0_i32_0 : i32, i32, i32
  }
}

module attributes {stable_mosaic.version = 11 : i64} {
  func.func @kernel(%arg0: i32, %arg1: i32, %arg2: memref<1x64x64xbf16, #tpu.memory_space<vmem>>, %arg3: memref<64x64xbf16, #tpu.memory_space<vmem>>, %arg4: memref<2x2x64xf32, #tpu.memory_space<vmem>>, %arg5: memref<2x64xf32, #tpu.memory_space<vmem>>, %arg6: memref<64x128xbf16, #tpu.memory_space<vmem>>, %arg7: memref<64x128xbf16, #tpu.memory_space<vmem>>, %arg8: memref<1x2x128xf32, #tpu.memory_space<vmem>>) attributes {dimension_semantics = [#tpu.dimension_semantics<parallel>, #tpu.dimension_semantics<parallel>], iteration_bounds = array<i64: 2, 1>, scalar_prefetch = 0 : i64, scratch_operands = 0 : i64, tpu.core_type = #tpu.core_type<tc>, window_params = [{transform_indices = @transform_0, window_bounds = array<i64: 1, 64, 64>}, {transform_indices = @transform_1, window_bounds = array<i64: 64, 64>}, {pipeline_mode = #tpu.pipeline_mode<synchronous>, transform_indices = @transform_2, window_bounds = array<i64: 2, 2, 64>}, {pipeline_mode = #tpu.pipeline_mode<synchronous>, transform_indices = @transform_3, window_bounds = array<i64: 2, 64>}, {pipeline_mode = #tpu.pipeline_mode<synchronous>, transform_indices = @transform_4, window_bounds = array<i64: 64, 128>}, {transform_indices = @transform_5, window_bounds = array<i64: 64, 128>}, {transform_indices = @transform_6, window_bounds = array<i64: 1, 2, 128>}]} {
    %c0 = arith.constant 0 : index
    %c0_0 = arith.constant 0 : index
    %c0_1 = arith.constant 0 : index
    %0 = vector.load %arg2[%c0, %c0_0, %c0_1] : memref<1x64x64xbf16, #tpu.memory_space<vmem>>, vector<1x64x64xbf16>
    %1 = vector.shape_cast %0 : vector<1x64x64xbf16> to vector<64x64xbf16>
    %c0_2 = arith.constant 0 : index
    %c0_3 = arith.constant 0 : index
    %2 = vector.load %arg5[%c0_2, %c0_3] : memref<2x64xf32, #tpu.memory_space<vmem>>, vector<2x64xf32>
    %c0_4 = arith.constant 0 : index
    %c0_5 = arith.constant 0 : index
    %c0_6 = arith.constant 0 : index
    %3 = vector.load %arg4[%c0_4, %c0_5, %c0_6] : memref<2x2x64xf32, #tpu.memory_space<vmem>>, vector<2x2x64xf32>
    %4 = vector.extract_strided_slice %3 {offsets = [0, 0, 0], sizes = [1, 2, 64], strides = [1, 1, 1]} : vector<2x2x64xf32> to vector<1x2x64xf32>
    %5 = vector.shape_cast %4 : vector<1x2x64xf32> to vector<2x64xf32>
    %6 = vector.extract_strided_slice %3 {offsets = [1, 0, 0], sizes = [1, 2, 64], strides = [1, 1, 1]} : vector<2x2x64xf32> to vector<1x2x64xf32>
    %7 = vector.shape_cast %6 : vector<1x2x64xf32> to vector<2x64xf32>
    %8 = arith.addf %5, %7 : vector<2x64xf32>
    %9 = vector.extract_strided_slice %8 {offsets = [0, 0], sizes = [1, 64], strides = [1, 1]} : vector<2x64xf32> to vector<1x64xf32>
    %cst = arith.constant 7.812500e-03 : f32
    %10 = vector.broadcast %cst : f32 to vector<1x64xf32>
    %11 = arith.mulf %9, %10 : vector<1x64xf32>
    %12 = vector.extract_strided_slice %8 {offsets = [1, 0], sizes = [1, 64], strides = [1, 1]} : vector<2x64xf32> to vector<1x64xf32>
    %cst_7 = arith.constant 7.812500e-03 : f32
    %13 = vector.broadcast %cst_7 : f32 to vector<1x64xf32>
    %14 = arith.mulf %12, %13 : vector<1x64xf32>
    %15 = arith.mulf %11, %11 : vector<1x64xf32>
    %16 = arith.subf %14, %15 : vector<1x64xf32>
    %cst_8 = arith.constant 0.000000e+00 : f32
    %17 = vector.broadcast %cst_8 : f32 to vector<1x64xf32>
    %18 = arith.maximumf %16, %17 : vector<1x64xf32>
    %cst_9 = arith.constant 9.99999974E-6 : f32
    %19 = vector.broadcast %cst_9 : f32 to vector<1x64xf32>
    %20 = arith.addf %18, %19 : vector<1x64xf32>
    %21 = math.rsqrt %20 : vector<1x64xf32>
    %22 = vector.extract_strided_slice %2 {offsets = [0, 0], sizes = [1, 64], strides = [1, 1]} : vector<2x64xf32> to vector<1x64xf32>
    %23 = arith.mulf %22, %21 : vector<1x64xf32>
    %24 = vector.extract_strided_slice %2 {offsets = [1, 0], sizes = [1, 64], strides = [1, 1]} : vector<2x64xf32> to vector<1x64xf32>
    %25 = arith.mulf %11, %23 : vector<1x64xf32>
    %26 = arith.subf %24, %25 : vector<1x64xf32>
    %c0_10 = arith.constant 0 : index
    %c0_11 = arith.constant 0 : index
    %27 = vector.load %arg3[%c0_10, %c0_11] : memref<64x64xbf16, #tpu.memory_space<vmem>>, vector<64x64xbf16>
    %28 = arith.extf %27 : vector<64x64xbf16> to vector<64x64xf32>
    %29 = vector.broadcast %23 : vector<1x64xf32> to vector<64x64xf32>
    %30 = arith.mulf %28, %29 : vector<64x64xf32>
    %31 = vector.broadcast %26 : vector<1x64xf32> to vector<64x64xf32>
    %32 = arith.addf %30, %31 : vector<64x64xf32>
    %cst_12 = arith.constant 0.000000e+00 : f32
    %33 = vector.broadcast %cst_12 : f32 to vector<64x64xf32>
    %34 = arith.cmpf oge, %32, %33 : vector<64x64xf32>
    %cst_13 = arith.constant 2.000000e-01 : f32
    %35 = vector.broadcast %cst_13 : f32 to vector<64x64xf32>
    %36 = arith.mulf %35, %32 : vector<64x64xf32>
    %37 = arith.select %34, %32, %36 : vector<64x64xi1>, vector<64x64xf32>
    %38 = arith.truncf %37 : vector<64x64xf32> to vector<64x64xbf16>
    %cst_14 = arith.constant dense<0.000000e+00> : vector<64x64xf32>
    %39 = tpu.matmul %1, %38, %cst_14 {dimension_numbers = #tpu.dot_dimension_numbers<[1], [0], [0], [1], [0, 0, 1, 1], [], []>} : vector<64x64xbf16>, vector<64x64xbf16>, vector<64x64xf32> -> vector<64x64xf32>
    %40 = arith.truncf %39 : vector<64x64xf32> to vector<64x64xbf16>
    %c0_15 = arith.constant 0 : index
    %c0_16 = arith.constant 0 : index
    %41 = vector.load %arg6[%c0_15, %c0_16] : memref<64x128xbf16, #tpu.memory_space<vmem>>, vector<64x128xbf16>
    %cst_17 = arith.constant dense<0.000000e+00> : vector<64x128xf32>
    %42 = tpu.matmul %40, %41, %cst_17 {dimension_numbers = #tpu.dot_dimension_numbers<[1], [0], [0], [1], [0, 0, 1, 1], [], []>} : vector<64x64xbf16>, vector<64x128xbf16>, vector<64x128xf32> -> vector<64x128xf32>
    %43 = arith.truncf %42 : vector<64x128xf32> to vector<64x128xbf16>
    %c0_18 = arith.constant 0 : index
    %c0_19 = arith.constant 0 : index
    %44 = vector.load %arg7[%c0_18, %c0_19] : memref<64x128xbf16, #tpu.memory_space<vmem>>, vector<64x128xbf16>
    tpu.vector_store %arg7[%c0_18, %c0_19], %43 {strides = array<i32>} : memref<64x128xbf16, #tpu.memory_space<vmem>>, vector<64x128xbf16>,
    %cst_20 = arith.constant dense<0.000000e+00> : vector<128xf32>
    %45 = vector.multi_reduction <add>, %42, %cst_20 [0] : vector<64x128xf32> to vector<128xf32>
    %46 = vector.shape_cast %45 : vector<128xf32> to vector<1x128xf32>
    %c0_21 = arith.constant 0 : index
    %c0_22 = arith.constant 0 : index
    %c0_23 = arith.constant 0 : index
    %47 = vector.load %arg8[%c0_21, %c0_22, %c0_23] : memref<1x2x128xf32, #tpu.memory_space<vmem>>, vector<1x1x128xf32>
    %48 = vector.shape_cast %47 : vector<1x1x128xf32> to vector<1x128xf32>
    %49 = vector.shape_cast %46 : vector<1x128xf32> to vector<1x1x128xf32>
    tpu.vector_store %arg8[%c0_21, %c0_22, %c0_23], %49 {strides = array<i32>} : memref<1x2x128xf32, #tpu.memory_space<vmem>>, vector<1x1x128xf32>,
    %50 = arith.mulf %42, %42 : vector<64x128xf32>
    %cst_24 = arith.constant dense<0.000000e+00> : vector<128xf32>
    %51 = vector.multi_reduction <add>, %50, %cst_24 [0] : vector<64x128xf32> to vector<128xf32>
    %52 = vector.shape_cast %51 : vector<128xf32> to vector<1x128xf32>
    %c0_25 = arith.constant 0 : index
    %c1 = arith.constant 1 : index
    %c0_26 = arith.constant 0 : index
    %53 = vector.load %arg8[%c0_25, %c1, %c0_26] : memref<1x2x128xf32, #tpu.memory_space<vmem>>, vector<1x1x128xf32>
    %54 = vector.shape_cast %53 : vector<1x1x128xf32> to vector<1x128xf32>
    %55 = vector.shape_cast %52 : vector<1x128xf32> to vector<1x1x128xf32>
    tpu.vector_store %arg8[%c0_25, %c1, %c0_26], %55 {strides = array<i32>} : memref<1x2x128xf32, #tpu.memory_space<vmem>>, vector<1x1x128xf32>,
    return
  }
  func.func @transform_0(%arg0: i32, %arg1: i32) -> (i32, i32, i32) {
    %c0_i32 = arith.constant 0 : i32
    %c0_i32_0 = arith.constant 0 : i32
    return %arg0, %arg1, %c0_i32 : i32, i32, i32
  }
  func.func @transform_1(%arg0: i32, %arg1: i32) -> (i32, i32) {
    %c0_i32 = arith.constant 0 : i32
    %c0_i32_0 = arith.constant 0 : i32
    return %arg0, %c0_i32 : i32, i32
  }
  func.func @transform_2(%arg0: i32, %arg1: i32) -> (i32, i32, i32) {
    %c0_i32 = arith.constant 0 : i32
    %c0_i32_0 = arith.constant 0 : i32
    %c0_i32_1 = arith.constant 0 : i32
    %c0_i32_2 = arith.constant 0 : i32
    return %c0_i32, %c0_i32_0, %c0_i32_1 : i32, i32, i32
  }
  func.func @transform_3(%arg0: i32, %arg1: i32) -> (i32, i32) {
    %c0_i32 = arith.constant 0 : i32
    %c0_i32_0 = arith.constant 0 : i32
    %c0_i32_1 = arith.constant 0 : i32
    return %c0_i32, %c0_i32_0 : i32, i32
  }
  func.func @transform_4(%arg0: i32, %arg1: i32) -> (i32, i32) {
    %c0_i32 = arith.constant 0 : i32
    %c0_i32_0 = arith.constant 0 : i32
    %c0_i32_1 = arith.constant 0 : i32
    return %c0_i32, %c0_i32_0 : i32, i32
  }
  func.func @transform_5(%arg0: i32, %arg1: i32) -> (i32, i32) {
    %c1_i32 = arith.constant 1 : i32
    %0 = arith.muli %arg0, %c1_i32 : i32
    %1 = arith.addi %0, %arg1 : i32
    %c0_i32 = arith.constant 0 : i32
    %c0_i32_0 = arith.constant 0 : i32
    return %1, %c0_i32 : i32, i32
  }
  func.func @transform_6(%arg0: i32, %arg1: i32) -> (i32, i32, i32) {
    %c1_i32 = arith.constant 1 : i32
    %0 = arith.muli %arg0, %c1_i32 : i32
    %1 = arith.addi %0, %arg1 : i32
    %c0_i32 = arith.constant 0 : i32
    %c0_i32_0 = arith.constant 0 : i32
    %c0_i32_1 = arith.constant 0 : i32
    return %1, %c0_i32, %c0_i32_0 : i32, i32, i32
  }
}

module attributes {stable_mosaic.version = 11 : i64} {
  func.func @kernel(%arg0: i32, %arg1: i32, %arg2: memref<1x64x64xbf16, #tpu.memory_space<vmem>>, %arg3: memref<64x128xbf16, #tpu.memory_space<vmem>>, %arg4: memref<2x2x128xf32, #tpu.memory_space<vmem>>, %arg5: memref<2x128xf32, #tpu.memory_space<vmem>>, %arg6: memref<128x256xbf16, #tpu.memory_space<vmem>>, %arg7: memref<64x256xbf16, #tpu.memory_space<vmem>>, %arg8: memref<1x2x256xf32, #tpu.memory_space<vmem>>) attributes {dimension_semantics = [#tpu.dimension_semantics<parallel>, #tpu.dimension_semantics<parallel>], iteration_bounds = array<i64: 2, 1>, scalar_prefetch = 0 : i64, scratch_operands = 0 : i64, tpu.core_type = #tpu.core_type<tc>, window_params = [{transform_indices = @transform_0, window_bounds = array<i64: 1, 64, 64>}, {transform_indices = @transform_1, window_bounds = array<i64: 64, 128>}, {pipeline_mode = #tpu.pipeline_mode<synchronous>, transform_indices = @transform_2, window_bounds = array<i64: 2, 2, 128>}, {pipeline_mode = #tpu.pipeline_mode<synchronous>, transform_indices = @transform_3, window_bounds = array<i64: 2, 128>}, {pipeline_mode = #tpu.pipeline_mode<synchronous>, transform_indices = @transform_4, window_bounds = array<i64: 128, 256>}, {transform_indices = @transform_5, window_bounds = array<i64: 64, 256>}, {transform_indices = @transform_6, window_bounds = array<i64: 1, 2, 256>}]} {
    %c0 = arith.constant 0 : index
    %c0_0 = arith.constant 0 : index
    %c0_1 = arith.constant 0 : index
    %0 = vector.load %arg2[%c0, %c0_0, %c0_1] : memref<1x64x64xbf16, #tpu.memory_space<vmem>>, vector<1x64x64xbf16>
    %1 = vector.shape_cast %0 : vector<1x64x64xbf16> to vector<64x64xbf16>
    %c0_2 = arith.constant 0 : index
    %c0_3 = arith.constant 0 : index
    %2 = vector.load %arg5[%c0_2, %c0_3] : memref<2x128xf32, #tpu.memory_space<vmem>>, vector<2x128xf32>
    %c0_4 = arith.constant 0 : index
    %c0_5 = arith.constant 0 : index
    %c0_6 = arith.constant 0 : index
    %3 = vector.load %arg4[%c0_4, %c0_5, %c0_6] : memref<2x2x128xf32, #tpu.memory_space<vmem>>, vector<2x2x128xf32>
    %4 = vector.extract_strided_slice %3 {offsets = [0, 0, 0], sizes = [1, 2, 128], strides = [1, 1, 1]} : vector<2x2x128xf32> to vector<1x2x128xf32>
    %5 = vector.shape_cast %4 : vector<1x2x128xf32> to vector<2x128xf32>
    %6 = vector.extract_strided_slice %3 {offsets = [1, 0, 0], sizes = [1, 2, 128], strides = [1, 1, 1]} : vector<2x2x128xf32> to vector<1x2x128xf32>
    %7 = vector.shape_cast %6 : vector<1x2x128xf32> to vector<2x128xf32>
    %8 = arith.addf %5, %7 : vector<2x128xf32>
    %9 = vector.extract_strided_slice %8 {offsets = [0, 0], sizes = [1, 128], strides = [1, 1]} : vector<2x128xf32> to vector<1x128xf32>
    %cst = arith.constant 7.812500e-03 : f32
    %10 = vector.broadcast %cst : f32 to vector<1x128xf32>
    %11 = arith.mulf %9, %10 : vector<1x128xf32>
    %12 = vector.extract_strided_slice %8 {offsets = [1, 0], sizes = [1, 128], strides = [1, 1]} : vector<2x128xf32> to vector<1x128xf32>
    %cst_7 = arith.constant 7.812500e-03 : f32
    %13 = vector.broadcast %cst_7 : f32 to vector<1x128xf32>
    %14 = arith.mulf %12, %13 : vector<1x128xf32>
    %15 = arith.mulf %11, %11 : vector<1x128xf32>
    %16 = arith.subf %14, %15 : vector<1x128xf32>
    %cst_8 = arith.constant 0.000000e+00 : f32
    %17 = vector.broadcast %cst_8 : f32 to vector<1x128xf32>
    %18 = arith.maximumf %16, %17 : vector<1x128xf32>
    %cst_9 = arith.constant 9.99999974E-6 : f32
    %19 = vector.broadcast %cst_9 : f32 to vector<1x128xf32>
    %20 = arith.addf %18, %19 : vector<1x128xf32>
    %21 = math.rsqrt %20 : vector<1x128xf32>
    %22 = vector.extract_strided_slice %2 {offsets = [0, 0], sizes = [1, 128], strides = [1, 1]} : vector<2x128xf32> to vector<1x128xf32>
    %23 = arith.mulf %22, %21 : vector<1x128xf32>
    %24 = vector.extract_strided_slice %2 {offsets = [1, 0], sizes = [1, 128], strides = [1, 1]} : vector<2x128xf32> to vector<1x128xf32>
    %25 = arith.mulf %11, %23 : vector<1x128xf32>
    %26 = arith.subf %24, %25 : vector<1x128xf32>
    %c0_10 = arith.constant 0 : index
    %c0_11 = arith.constant 0 : index
    %27 = vector.load %arg3[%c0_10, %c0_11] : memref<64x128xbf16, #tpu.memory_space<vmem>>, vector<64x128xbf16>
    %28 = arith.extf %27 : vector<64x128xbf16> to vector<64x128xf32>
    %29 = vector.broadcast %23 : vector<1x128xf32> to vector<64x128xf32>
    %30 = arith.mulf %28, %29 : vector<64x128xf32>
    %31 = vector.broadcast %26 : vector<1x128xf32> to vector<64x128xf32>
    %32 = arith.addf %30, %31 : vector<64x128xf32>
    %cst_12 = arith.constant 0.000000e+00 : f32
    %33 = vector.broadcast %cst_12 : f32 to vector<64x128xf32>
    %34 = arith.cmpf oge, %32, %33 : vector<64x128xf32>
    %cst_13 = arith.constant 2.000000e-01 : f32
    %35 = vector.broadcast %cst_13 : f32 to vector<64x128xf32>
    %36 = arith.mulf %35, %32 : vector<64x128xf32>
    %37 = arith.select %34, %32, %36 : vector<64x128xi1>, vector<64x128xf32>
    %38 = arith.truncf %37 : vector<64x128xf32> to vector<64x128xbf16>
    %cst_14 = arith.constant dense<0.000000e+00> : vector<64x128xf32>
    %39 = tpu.matmul %1, %38, %cst_14 {dimension_numbers = #tpu.dot_dimension_numbers<[1], [0], [0], [1], [0, 0, 1, 1], [], []>} : vector<64x64xbf16>, vector<64x128xbf16>, vector<64x128xf32> -> vector<64x128xf32>
    %40 = arith.truncf %39 : vector<64x128xf32> to vector<64x128xbf16>
    %c0_15 = arith.constant 0 : index
    %c0_16 = arith.constant 0 : index
    %41 = vector.load %arg6[%c0_15, %c0_16] : memref<128x256xbf16, #tpu.memory_space<vmem>>, vector<128x256xbf16>
    %cst_17 = arith.constant dense<0.000000e+00> : vector<64x256xf32>
    %42 = tpu.matmul %40, %41, %cst_17 {dimension_numbers = #tpu.dot_dimension_numbers<[1], [0], [0], [1], [0, 0, 1, 1], [], []>} : vector<64x128xbf16>, vector<128x256xbf16>, vector<64x256xf32> -> vector<64x256xf32>
    %43 = arith.truncf %42 : vector<64x256xf32> to vector<64x256xbf16>
    %c0_18 = arith.constant 0 : index
    %c0_19 = arith.constant 0 : index
    %44 = vector.load %arg7[%c0_18, %c0_19] : memref<64x256xbf16, #tpu.memory_space<vmem>>, vector<64x256xbf16>
    tpu.vector_store %arg7[%c0_18, %c0_19], %43 {strides = array<i32>} : memref<64x256xbf16, #tpu.memory_space<vmem>>, vector<64x256xbf16>,
    %cst_20 = arith.constant dense<0.000000e+00> : vector<256xf32>
    %45 = vector.multi_reduction <add>, %42, %cst_20 [0] : vector<64x256xf32> to vector<256xf32>
    %46 = vector.shape_cast %45 : vector<256xf32> to vector<1x256xf32>
    %c0_21 = arith.constant 0 : index
    %c0_22 = arith.constant 0 : index
    %c0_23 = arith.constant 0 : index
    %47 = vector.load %arg8[%c0_21, %c0_22, %c0_23] : memref<1x2x256xf32, #tpu.memory_space<vmem>>, vector<1x1x256xf32>
    %48 = vector.shape_cast %47 : vector<1x1x256xf32> to vector<1x256xf32>
    %49 = vector.shape_cast %46 : vector<1x256xf32> to vector<1x1x256xf32>
    tpu.vector_store %arg8[%c0_21, %c0_22, %c0_23], %49 {strides = array<i32>} : memref<1x2x256xf32, #tpu.memory_space<vmem>>, vector<1x1x256xf32>,
    %50 = arith.mulf %42, %42 : vector<64x256xf32>
    %cst_24 = arith.constant dense<0.000000e+00> : vector<256xf32>
    %51 = vector.multi_reduction <add>, %50, %cst_24 [0] : vector<64x256xf32> to vector<256xf32>
    %52 = vector.shape_cast %51 : vector<256xf32> to vector<1x256xf32>
    %c0_25 = arith.constant 0 : index
    %c1 = arith.constant 1 : index
    %c0_26 = arith.constant 0 : index
    %53 = vector.load %arg8[%c0_25, %c1, %c0_26] : memref<1x2x256xf32, #tpu.memory_space<vmem>>, vector<1x1x256xf32>
    %54 = vector.shape_cast %53 : vector<1x1x256xf32> to vector<1x256xf32>
    %55 = vector.shape_cast %52 : vector<1x256xf32> to vector<1x1x256xf32>
    tpu.vector_store %arg8[%c0_25, %c1, %c0_26], %55 {strides = array<i32>} : memref<1x2x256xf32, #tpu.memory_space<vmem>>, vector<1x1x256xf32>,
    return
  }
  func.func @transform_0(%arg0: i32, %arg1: i32) -> (i32, i32, i32) {
    %c0_i32 = arith.constant 0 : i32
    %c0_i32_0 = arith.constant 0 : i32
    return %arg0, %arg1, %c0_i32 : i32, i32, i32
  }
  func.func @transform_1(%arg0: i32, %arg1: i32) -> (i32, i32) {
    %c0_i32 = arith.constant 0 : i32
    %c0_i32_0 = arith.constant 0 : i32
    return %arg0, %c0_i32 : i32, i32
  }
  func.func @transform_2(%arg0: i32, %arg1: i32) -> (i32, i32, i32) {
    %c0_i32 = arith.constant 0 : i32
    %c0_i32_0 = arith.constant 0 : i32
    %c0_i32_1 = arith.constant 0 : i32
    %c0_i32_2 = arith.constant 0 : i32
    return %c0_i32, %c0_i32_0, %c0_i32_1 : i32, i32, i32
  }
  func.func @transform_3(%arg0: i32, %arg1: i32) -> (i32, i32) {
    %c0_i32 = arith.constant 0 : i32
    %c0_i32_0 = arith.constant 0 : i32
    %c0_i32_1 = arith.constant 0 : i32
    return %c0_i32, %c0_i32_0 : i32, i32
  }
  func.func @transform_4(%arg0: i32, %arg1: i32) -> (i32, i32) {
    %c0_i32 = arith.constant 0 : i32
    %c0_i32_0 = arith.constant 0 : i32
    %c0_i32_1 = arith.constant 0 : i32
    return %c0_i32, %c0_i32_0 : i32, i32
  }
  func.func @transform_5(%arg0: i32, %arg1: i32) -> (i32, i32) {
    %c1_i32 = arith.constant 1 : i32
    %0 = arith.muli %arg0, %c1_i32 : i32
    %1 = arith.addi %0, %arg1 : i32
    %c0_i32 = arith.constant 0 : i32
    %c0_i32_0 = arith.constant 0 : i32
    return %1, %c0_i32 : i32, i32
  }
  func.func @transform_6(%arg0: i32, %arg1: i32) -> (i32, i32, i32) {
    %c1_i32 = arith.constant 1 : i32
    %0 = arith.muli %arg0, %c1_i32 : i32
    %1 = arith.addi %0, %arg1 : i32
    %c0_i32 = arith.constant 0 : i32
    %c0_i32_0 = arith.constant 0 : i32
    %c0_i32_1 = arith.constant 0 : i32
    return %1, %c0_i32, %c0_i32_0 : i32, i32, i32
  }
}

module attributes {stable_mosaic.version = 11 : i64} {
  func.func @kernel(%arg0: i32, %arg1: i32, %arg2: memref<1x64x64xbf16, #tpu.memory_space<vmem>>, %arg3: memref<64x64xbf16, #tpu.memory_space<vmem>>, %arg4: memref<64x64xbf16, #tpu.memory_space<vmem>>, %arg5: memref<64x128xbf16, #tpu.memory_space<vmem>>, %arg6: memref<64x256xbf16, #tpu.memory_space<vmem>>, %arg7: memref<2x2x64xf32, #tpu.memory_space<vmem>>, %arg8: memref<2x2x64xf32, #tpu.memory_space<vmem>>, %arg9: memref<2x2x128xf32, #tpu.memory_space<vmem>>, %arg10: memref<2x2x256xf32, #tpu.memory_space<vmem>>, %arg11: memref<2x512xf32, #tpu.memory_space<vmem>>, %arg12: memref<512x1024xbf16, #tpu.memory_space<vmem>>, %arg13: memref<64x1024xbf16, #tpu.memory_space<vmem>>, %arg14: memref<1x2x1024xf32, #tpu.memory_space<vmem>>) attributes {dimension_semantics = [#tpu.dimension_semantics<parallel>, #tpu.dimension_semantics<parallel>], iteration_bounds = array<i64: 2, 1>, scalar_prefetch = 0 : i64, scratch_operands = 0 : i64, tpu.core_type = #tpu.core_type<tc>, window_params = [{transform_indices = @transform_0, window_bounds = array<i64: 1, 64, 64>}, {transform_indices = @transform_1, window_bounds = array<i64: 64, 64>}, {transform_indices = @transform_2, window_bounds = array<i64: 64, 64>}, {transform_indices = @transform_3, window_bounds = array<i64: 64, 128>}, {transform_indices = @transform_4, window_bounds = array<i64: 64, 256>}, {pipeline_mode = #tpu.pipeline_mode<synchronous>, transform_indices = @transform_5, window_bounds = array<i64: 2, 2, 64>}, {pipeline_mode = #tpu.pipeline_mode<synchronous>, transform_indices = @transform_6, window_bounds = array<i64: 2, 2, 64>}, {pipeline_mode = #tpu.pipeline_mode<synchronous>, transform_indices = @transform_7, window_bounds = array<i64: 2, 2, 128>}, {pipeline_mode = #tpu.pipeline_mode<synchronous>, transform_indices = @transform_8, window_bounds = array<i64: 2, 2, 256>}, {pipeline_mode = #tpu.pipeline_mode<synchronous>, transform_indices = @transform_9, window_bounds = array<i64: 2, 512>}, {pipeline_mode = #tpu.pipeline_mode<synchronous>, transform_indices = @transform_10, window_bounds = array<i64: 512, 1024>}, {transform_indices = @transform_11, window_bounds = array<i64: 64, 1024>}, {transform_indices = @transform_12, window_bounds = array<i64: 1, 2, 1024>}]} {
    %c0 = arith.constant 0 : index
    %c0_0 = arith.constant 0 : index
    %c0_1 = arith.constant 0 : index
    %0 = vector.load %arg2[%c0, %c0_0, %c0_1] : memref<1x64x64xbf16, #tpu.memory_space<vmem>>, vector<1x64x64xbf16>
    %1 = vector.shape_cast %0 : vector<1x64x64xbf16> to vector<64x64xbf16>
    %c0_2 = arith.constant 0 : index
    %c0_3 = arith.constant 0 : index
    %2 = vector.load %arg11[%c0_2, %c0_3] : memref<2x512xf32, #tpu.memory_space<vmem>>, vector<2x512xf32>
    %c0_4 = arith.constant 0 : index
    %c0_5 = arith.constant 0 : index
    %c0_6 = arith.constant 0 : index
    %3 = vector.load %arg7[%c0_4, %c0_5, %c0_6] : memref<2x2x64xf32, #tpu.memory_space<vmem>>, vector<2x2x64xf32>
    %4 = vector.extract_strided_slice %2 {offsets = [0, 0], sizes = [2, 64], strides = [1, 1]} : vector<2x512xf32> to vector<2x64xf32>
    %5 = vector.extract_strided_slice %3 {offsets = [0, 0, 0], sizes = [1, 2, 64], strides = [1, 1, 1]} : vector<2x2x64xf32> to vector<1x2x64xf32>
    %6 = vector.shape_cast %5 : vector<1x2x64xf32> to vector<2x64xf32>
    %7 = vector.extract_strided_slice %3 {offsets = [1, 0, 0], sizes = [1, 2, 64], strides = [1, 1, 1]} : vector<2x2x64xf32> to vector<1x2x64xf32>
    %8 = vector.shape_cast %7 : vector<1x2x64xf32> to vector<2x64xf32>
    %9 = arith.addf %6, %8 : vector<2x64xf32>
    %10 = vector.extract_strided_slice %9 {offsets = [0, 0], sizes = [1, 64], strides = [1, 1]} : vector<2x64xf32> to vector<1x64xf32>
    %cst = arith.constant 7.812500e-03 : f32
    %11 = vector.broadcast %cst : f32 to vector<1x64xf32>
    %12 = arith.mulf %10, %11 : vector<1x64xf32>
    %13 = vector.extract_strided_slice %9 {offsets = [1, 0], sizes = [1, 64], strides = [1, 1]} : vector<2x64xf32> to vector<1x64xf32>
    %cst_7 = arith.constant 7.812500e-03 : f32
    %14 = vector.broadcast %cst_7 : f32 to vector<1x64xf32>
    %15 = arith.mulf %13, %14 : vector<1x64xf32>
    %16 = arith.mulf %12, %12 : vector<1x64xf32>
    %17 = arith.subf %15, %16 : vector<1x64xf32>
    %cst_8 = arith.constant 0.000000e+00 : f32
    %18 = vector.broadcast %cst_8 : f32 to vector<1x64xf32>
    %19 = arith.maximumf %17, %18 : vector<1x64xf32>
    %cst_9 = arith.constant 9.99999974E-6 : f32
    %20 = vector.broadcast %cst_9 : f32 to vector<1x64xf32>
    %21 = arith.addf %19, %20 : vector<1x64xf32>
    %22 = math.rsqrt %21 : vector<1x64xf32>
    %23 = vector.extract_strided_slice %4 {offsets = [0, 0], sizes = [1, 64], strides = [1, 1]} : vector<2x64xf32> to vector<1x64xf32>
    %24 = arith.mulf %23, %22 : vector<1x64xf32>
    %25 = vector.extract_strided_slice %4 {offsets = [1, 0], sizes = [1, 64], strides = [1, 1]} : vector<2x64xf32> to vector<1x64xf32>
    %26 = arith.mulf %12, %24 : vector<1x64xf32>
    %27 = arith.subf %25, %26 : vector<1x64xf32>
    %c0_10 = arith.constant 0 : index
    %c0_11 = arith.constant 0 : index
    %28 = vector.load %arg3[%c0_10, %c0_11] : memref<64x64xbf16, #tpu.memory_space<vmem>>, vector<64x64xbf16>
    %29 = arith.extf %28 : vector<64x64xbf16> to vector<64x64xf32>
    %30 = vector.broadcast %24 : vector<1x64xf32> to vector<64x64xf32>
    %31 = arith.mulf %29, %30 : vector<64x64xf32>
    %32 = vector.broadcast %27 : vector<1x64xf32> to vector<64x64xf32>
    %33 = arith.addf %31, %32 : vector<64x64xf32>
    %cst_12 = arith.constant 0.000000e+00 : f32
    %34 = vector.broadcast %cst_12 : f32 to vector<64x64xf32>
    %35 = arith.cmpf oge, %33, %34 : vector<64x64xf32>
    %cst_13 = arith.constant 2.000000e-01 : f32
    %36 = vector.broadcast %cst_13 : f32 to vector<64x64xf32>
    %37 = arith.mulf %36, %33 : vector<64x64xf32>
    %38 = arith.select %35, %33, %37 : vector<64x64xi1>, vector<64x64xf32>
    %39 = arith.truncf %38 : vector<64x64xf32> to vector<64x64xbf16>
    %c0_14 = arith.constant 0 : index
    %c0_15 = arith.constant 0 : index
    %c0_16 = arith.constant 0 : index
    %40 = vector.load %arg8[%c0_14, %c0_15, %c0_16] : memref<2x2x64xf32, #tpu.memory_space<vmem>>, vector<2x2x64xf32>
    %41 = vector.extract_strided_slice %2 {offsets = [0, 64], sizes = [2, 64], strides = [1, 1]} : vector<2x512xf32> to vector<2x64xf32>
    %42 = vector.extract_strided_slice %40 {offsets = [0, 0, 0], sizes = [1, 2, 64], strides = [1, 1, 1]} : vector<2x2x64xf32> to vector<1x2x64xf32>
    %43 = vector.shape_cast %42 : vector<1x2x64xf32> to vector<2x64xf32>
    %44 = vector.extract_strided_slice %40 {offsets = [1, 0, 0], sizes = [1, 2, 64], strides = [1, 1, 1]} : vector<2x2x64xf32> to vector<1x2x64xf32>
    %45 = vector.shape_cast %44 : vector<1x2x64xf32> to vector<2x64xf32>
    %46 = arith.addf %43, %45 : vector<2x64xf32>
    %47 = vector.extract_strided_slice %46 {offsets = [0, 0], sizes = [1, 64], strides = [1, 1]} : vector<2x64xf32> to vector<1x64xf32>
    %cst_17 = arith.constant 7.812500e-03 : f32
    %48 = vector.broadcast %cst_17 : f32 to vector<1x64xf32>
    %49 = arith.mulf %47, %48 : vector<1x64xf32>
    %50 = vector.extract_strided_slice %46 {offsets = [1, 0], sizes = [1, 64], strides = [1, 1]} : vector<2x64xf32> to vector<1x64xf32>
    %cst_18 = arith.constant 7.812500e-03 : f32
    %51 = vector.broadcast %cst_18 : f32 to vector<1x64xf32>
    %52 = arith.mulf %50, %51 : vector<1x64xf32>
    %53 = arith.mulf %49, %49 : vector<1x64xf32>
    %54 = arith.subf %52, %53 : vector<1x64xf32>
    %cst_19 = arith.constant 0.000000e+00 : f32
    %55 = vector.broadcast %cst_19 : f32 to vector<1x64xf32>
    %56 = arith.maximumf %54, %55 : vector<1x64xf32>
    %cst_20 = arith.constant 9.99999974E-6 : f32
    %57 = vector.broadcast %cst_20 : f32 to vector<1x64xf32>
    %58 = arith.addf %56, %57 : vector<1x64xf32>
    %59 = math.rsqrt %58 : vector<1x64xf32>
    %60 = vector.extract_strided_slice %41 {offsets = [0, 0], sizes = [1, 64], strides = [1, 1]} : vector<2x64xf32> to vector<1x64xf32>
    %61 = arith.mulf %60, %59 : vector<1x64xf32>
    %62 = vector.extract_strided_slice %41 {offsets = [1, 0], sizes = [1, 64], strides = [1, 1]} : vector<2x64xf32> to vector<1x64xf32>
    %63 = arith.mulf %49, %61 : vector<1x64xf32>
    %64 = arith.subf %62, %63 : vector<1x64xf32>
    %c0_21 = arith.constant 0 : index
    %c0_22 = arith.constant 0 : index
    %65 = vector.load %arg4[%c0_21, %c0_22] : memref<64x64xbf16, #tpu.memory_space<vmem>>, vector<64x64xbf16>
    %66 = arith.extf %65 : vector<64x64xbf16> to vector<64x64xf32>
    %67 = vector.broadcast %61 : vector<1x64xf32> to vector<64x64xf32>
    %68 = arith.mulf %66, %67 : vector<64x64xf32>
    %69 = vector.broadcast %64 : vector<1x64xf32> to vector<64x64xf32>
    %70 = arith.addf %68, %69 : vector<64x64xf32>
    %cst_23 = arith.constant 0.000000e+00 : f32
    %71 = vector.broadcast %cst_23 : f32 to vector<64x64xf32>
    %72 = arith.cmpf oge, %70, %71 : vector<64x64xf32>
    %cst_24 = arith.constant 2.000000e-01 : f32
    %73 = vector.broadcast %cst_24 : f32 to vector<64x64xf32>
    %74 = arith.mulf %73, %70 : vector<64x64xf32>
    %75 = arith.select %72, %70, %74 : vector<64x64xi1>, vector<64x64xf32>
    %76 = arith.truncf %75 : vector<64x64xf32> to vector<64x64xbf16>
    %c0_25 = arith.constant 0 : index
    %c0_26 = arith.constant 0 : index
    %c0_27 = arith.constant 0 : index
    %77 = vector.load %arg9[%c0_25, %c0_26, %c0_27] : memref<2x2x128xf32, #tpu.memory_space<vmem>>, vector<2x2x128xf32>
    %78 = vector.extract_strided_slice %2 {offsets = [0, 128], sizes = [2, 128], strides = [1, 1]} : vector<2x512xf32> to vector<2x128xf32>
    %79 = vector.extract_strided_slice %77 {offsets = [0, 0, 0], sizes = [1, 2, 128], strides = [1, 1, 1]} : vector<2x2x128xf32> to vector<1x2x128xf32>
    %80 = vector.shape_cast %79 : vector<1x2x128xf32> to vector<2x128xf32>
    %81 = vector.extract_strided_slice %77 {offsets = [1, 0, 0], sizes = [1, 2, 128], strides = [1, 1, 1]} : vector<2x2x128xf32> to vector<1x2x128xf32>
    %82 = vector.shape_cast %81 : vector<1x2x128xf32> to vector<2x128xf32>
    %83 = arith.addf %80, %82 : vector<2x128xf32>
    %84 = vector.extract_strided_slice %83 {offsets = [0, 0], sizes = [1, 128], strides = [1, 1]} : vector<2x128xf32> to vector<1x128xf32>
    %cst_28 = arith.constant 7.812500e-03 : f32
    %85 = vector.broadcast %cst_28 : f32 to vector<1x128xf32>
    %86 = arith.mulf %84, %85 : vector<1x128xf32>
    %87 = vector.extract_strided_slice %83 {offsets = [1, 0], sizes = [1, 128], strides = [1, 1]} : vector<2x128xf32> to vector<1x128xf32>
    %cst_29 = arith.constant 7.812500e-03 : f32
    %88 = vector.broadcast %cst_29 : f32 to vector<1x128xf32>
    %89 = arith.mulf %87, %88 : vector<1x128xf32>
    %90 = arith.mulf %86, %86 : vector<1x128xf32>
    %91 = arith.subf %89, %90 : vector<1x128xf32>
    %cst_30 = arith.constant 0.000000e+00 : f32
    %92 = vector.broadcast %cst_30 : f32 to vector<1x128xf32>
    %93 = arith.maximumf %91, %92 : vector<1x128xf32>
    %cst_31 = arith.constant 9.99999974E-6 : f32
    %94 = vector.broadcast %cst_31 : f32 to vector<1x128xf32>
    %95 = arith.addf %93, %94 : vector<1x128xf32>
    %96 = math.rsqrt %95 : vector<1x128xf32>
    %97 = vector.extract_strided_slice %78 {offsets = [0, 0], sizes = [1, 128], strides = [1, 1]} : vector<2x128xf32> to vector<1x128xf32>
    %98 = arith.mulf %97, %96 : vector<1x128xf32>
    %99 = vector.extract_strided_slice %78 {offsets = [1, 0], sizes = [1, 128], strides = [1, 1]} : vector<2x128xf32> to vector<1x128xf32>
    %100 = arith.mulf %86, %98 : vector<1x128xf32>
    %101 = arith.subf %99, %100 : vector<1x128xf32>
    %c0_32 = arith.constant 0 : index
    %c0_33 = arith.constant 0 : index
    %102 = vector.load %arg5[%c0_32, %c0_33] : memref<64x128xbf16, #tpu.memory_space<vmem>>, vector<64x128xbf16>
    %103 = arith.extf %102 : vector<64x128xbf16> to vector<64x128xf32>
    %104 = vector.broadcast %98 : vector<1x128xf32> to vector<64x128xf32>
    %105 = arith.mulf %103, %104 : vector<64x128xf32>
    %106 = vector.broadcast %101 : vector<1x128xf32> to vector<64x128xf32>
    %107 = arith.addf %105, %106 : vector<64x128xf32>
    %cst_34 = arith.constant 0.000000e+00 : f32
    %108 = vector.broadcast %cst_34 : f32 to vector<64x128xf32>
    %109 = arith.cmpf oge, %107, %108 : vector<64x128xf32>
    %cst_35 = arith.constant 2.000000e-01 : f32
    %110 = vector.broadcast %cst_35 : f32 to vector<64x128xf32>
    %111 = arith.mulf %110, %107 : vector<64x128xf32>
    %112 = arith.select %109, %107, %111 : vector<64x128xi1>, vector<64x128xf32>
    %113 = arith.truncf %112 : vector<64x128xf32> to vector<64x128xbf16>
    %c0_36 = arith.constant 0 : index
    %c0_37 = arith.constant 0 : index
    %c0_38 = arith.constant 0 : index
    %114 = vector.load %arg10[%c0_36, %c0_37, %c0_38] : memref<2x2x256xf32, #tpu.memory_space<vmem>>, vector<2x2x256xf32>
    %115 = vector.extract_strided_slice %2 {offsets = [0, 256], sizes = [2, 256], strides = [1, 1]} : vector<2x512xf32> to vector<2x256xf32>
    %116 = vector.extract_strided_slice %114 {offsets = [0, 0, 0], sizes = [1, 2, 256], strides = [1, 1, 1]} : vector<2x2x256xf32> to vector<1x2x256xf32>
    %117 = vector.shape_cast %116 : vector<1x2x256xf32> to vector<2x256xf32>
    %118 = vector.extract_strided_slice %114 {offsets = [1, 0, 0], sizes = [1, 2, 256], strides = [1, 1, 1]} : vector<2x2x256xf32> to vector<1x2x256xf32>
    %119 = vector.shape_cast %118 : vector<1x2x256xf32> to vector<2x256xf32>
    %120 = arith.addf %117, %119 : vector<2x256xf32>
    %121 = vector.extract_strided_slice %120 {offsets = [0, 0], sizes = [1, 256], strides = [1, 1]} : vector<2x256xf32> to vector<1x256xf32>
    %cst_39 = arith.constant 7.812500e-03 : f32
    %122 = vector.broadcast %cst_39 : f32 to vector<1x256xf32>
    %123 = arith.mulf %121, %122 : vector<1x256xf32>
    %124 = vector.extract_strided_slice %120 {offsets = [1, 0], sizes = [1, 256], strides = [1, 1]} : vector<2x256xf32> to vector<1x256xf32>
    %cst_40 = arith.constant 7.812500e-03 : f32
    %125 = vector.broadcast %cst_40 : f32 to vector<1x256xf32>
    %126 = arith.mulf %124, %125 : vector<1x256xf32>
    %127 = arith.mulf %123, %123 : vector<1x256xf32>
    %128 = arith.subf %126, %127 : vector<1x256xf32>
    %cst_41 = arith.constant 0.000000e+00 : f32
    %129 = vector.broadcast %cst_41 : f32 to vector<1x256xf32>
    %130 = arith.maximumf %128, %129 : vector<1x256xf32>
    %cst_42 = arith.constant 9.99999974E-6 : f32
    %131 = vector.broadcast %cst_42 : f32 to vector<1x256xf32>
    %132 = arith.addf %130, %131 : vector<1x256xf32>
    %133 = math.rsqrt %132 : vector<1x256xf32>
    %134 = vector.extract_strided_slice %115 {offsets = [0, 0], sizes = [1, 256], strides = [1, 1]} : vector<2x256xf32> to vector<1x256xf32>
    %135 = arith.mulf %134, %133 : vector<1x256xf32>
    %136 = vector.extract_strided_slice %115 {offsets = [1, 0], sizes = [1, 256], strides = [1, 1]} : vector<2x256xf32> to vector<1x256xf32>
    %137 = arith.mulf %123, %135 : vector<1x256xf32>
    %138 = arith.subf %136, %137 : vector<1x256xf32>
    %c0_43 = arith.constant 0 : index
    %c0_44 = arith.constant 0 : index
    %139 = vector.load %arg6[%c0_43, %c0_44] : memref<64x256xbf16, #tpu.memory_space<vmem>>, vector<64x256xbf16>
    %140 = arith.extf %139 : vector<64x256xbf16> to vector<64x256xf32>
    %141 = vector.broadcast %135 : vector<1x256xf32> to vector<64x256xf32>
    %142 = arith.mulf %140, %141 : vector<64x256xf32>
    %143 = vector.broadcast %138 : vector<1x256xf32> to vector<64x256xf32>
    %144 = arith.addf %142, %143 : vector<64x256xf32>
    %cst_45 = arith.constant 0.000000e+00 : f32
    %145 = vector.broadcast %cst_45 : f32 to vector<64x256xf32>
    %146 = arith.cmpf oge, %144, %145 : vector<64x256xf32>
    %cst_46 = arith.constant 2.000000e-01 : f32
    %147 = vector.broadcast %cst_46 : f32 to vector<64x256xf32>
    %148 = arith.mulf %147, %144 : vector<64x256xf32>
    %149 = arith.select %146, %144, %148 : vector<64x256xi1>, vector<64x256xf32>
    %150 = arith.truncf %149 : vector<64x256xf32> to vector<64x256xbf16>
    %151 = tpu.concatenate %39, %76, %113, %150 in 1 : vector<64x64xbf16>, vector<64x64xbf16>, vector<64x128xbf16>, vector<64x256xbf16> -> vector<64x512xbf16>
    %cst_47 = arith.constant dense<0.000000e+00> : vector<64x512xf32>
    %152 = tpu.matmul %1, %151, %cst_47 {dimension_numbers = #tpu.dot_dimension_numbers<[1], [0], [0], [1], [0, 0, 1, 1], [], []>} : vector<64x64xbf16>, vector<64x512xbf16>, vector<64x512xf32> -> vector<64x512xf32>
    %153 = arith.truncf %152 : vector<64x512xf32> to vector<64x512xbf16>
    %c0_48 = arith.constant 0 : index
    %c0_49 = arith.constant 0 : index
    %154 = vector.load %arg12[%c0_48, %c0_49] : memref<512x1024xbf16, #tpu.memory_space<vmem>>, vector<512x1024xbf16>
    %cst_50 = arith.constant dense<0.000000e+00> : vector<64x1024xf32>
    %155 = tpu.matmul %153, %154, %cst_50 {dimension_numbers = #tpu.dot_dimension_numbers<[1], [0], [0], [1], [0, 0, 1, 1], [], []>} : vector<64x512xbf16>, vector<512x1024xbf16>, vector<64x1024xf32> -> vector<64x1024xf32>
    %156 = arith.truncf %155 : vector<64x1024xf32> to vector<64x1024xbf16>
    %c0_51 = arith.constant 0 : index
    %c0_52 = arith.constant 0 : index
    %157 = vector.load %arg13[%c0_51, %c0_52] : memref<64x1024xbf16, #tpu.memory_space<vmem>>, vector<64x1024xbf16>
    tpu.vector_store %arg13[%c0_51, %c0_52], %156 {strides = array<i32>} : memref<64x1024xbf16, #tpu.memory_space<vmem>>, vector<64x1024xbf16>,
    %cst_53 = arith.constant dense<0.000000e+00> : vector<1024xf32>
    %158 = vector.multi_reduction <add>, %155, %cst_53 [0] : vector<64x1024xf32> to vector<1024xf32>
    %159 = vector.shape_cast %158 : vector<1024xf32> to vector<1x1024xf32>
    %c0_54 = arith.constant 0 : index
    %c0_55 = arith.constant 0 : index
    %c0_56 = arith.constant 0 : index
    %160 = vector.load %arg14[%c0_54, %c0_55, %c0_56] : memref<1x2x1024xf32, #tpu.memory_space<vmem>>, vector<1x1x1024xf32>
    %161 = vector.shape_cast %160 : vector<1x1x1024xf32> to vector<1x1024xf32>
    %162 = vector.shape_cast %159 : vector<1x1024xf32> to vector<1x1x1024xf32>
    tpu.vector_store %arg14[%c0_54, %c0_55, %c0_56], %162 {strides = array<i32>} : memref<1x2x1024xf32, #tpu.memory_space<vmem>>, vector<1x1x1024xf32>,
    %163 = arith.mulf %155, %155 : vector<64x1024xf32>
    %cst_57 = arith.constant dense<0.000000e+00> : vector<1024xf32>
    %164 = vector.multi_reduction <add>, %163, %cst_57 [0] : vector<64x1024xf32> to vector<1024xf32>
    %165 = vector.shape_cast %164 : vector<1024xf32> to vector<1x1024xf32>
    %c0_58 = arith.constant 0 : index
    %c1 = arith.constant 1 : index
    %c0_59 = arith.constant 0 : index
    %166 = vector.load %arg14[%c0_58, %c1, %c0_59] : memref<1x2x1024xf32, #tpu.memory_space<vmem>>, vector<1x1x1024xf32>
    %167 = vector.shape_cast %166 : vector<1x1x1024xf32> to vector<1x1024xf32>
    %168 = vector.shape_cast %165 : vector<1x1024xf32> to vector<1x1x1024xf32>
    tpu.vector_store %arg14[%c0_58, %c1, %c0_59], %168 {strides = array<i32>} : memref<1x2x1024xf32, #tpu.memory_space<vmem>>, vector<1x1x1024xf32>,
    return
  }
  func.func @transform_0(%arg0: i32, %arg1: i32) -> (i32, i32, i32) {
    %c0_i32 = arith.constant 0 : i32
    %c0_i32_0 = arith.constant 0 : i32
    return %arg0, %arg1, %c0_i32 : i32, i32, i32
  }
  func.func @transform_1(%arg0: i32, %arg1: i32) -> (i32, i32) {
    %c0_i32 = arith.constant 0 : i32
    %c0_i32_0 = arith.constant 0 : i32
    return %arg0, %c0_i32 : i32, i32
  }
  func.func @transform_2(%arg0: i32, %arg1: i32) -> (i32, i32) {
    %c0_i32 = arith.constant 0 : i32
    %c0_i32_0 = arith.constant 0 : i32
    return %arg0, %c0_i32 : i32, i32
  }
  func.func @transform_3(%arg0: i32, %arg1: i32) -> (i32, i32) {
    %c0_i32 = arith.constant 0 : i32
    %c0_i32_0 = arith.constant 0 : i32
    return %arg0, %c0_i32 : i32, i32
  }
  func.func @transform_4(%arg0: i32, %arg1: i32) -> (i32, i32) {
    %c0_i32 = arith.constant 0 : i32
    %c0_i32_0 = arith.constant 0 : i32
    return %arg0, %c0_i32 : i32, i32
  }
  func.func @transform_5(%arg0: i32, %arg1: i32) -> (i32, i32, i32) {
    %c0_i32 = arith.constant 0 : i32
    %c0_i32_0 = arith.constant 0 : i32
    %c0_i32_1 = arith.constant 0 : i32
    %c0_i32_2 = arith.constant 0 : i32
    return %c0_i32, %c0_i32_0, %c0_i32_1 : i32, i32, i32
  }
  func.func @transform_6(%arg0: i32, %arg1: i32) -> (i32, i32, i32) {
    %c0_i32 = arith.constant 0 : i32
    %c0_i32_0 = arith.constant 0 : i32
    %c0_i32_1 = arith.constant 0 : i32
    %c0_i32_2 = arith.constant 0 : i32
    return %c0_i32, %c0_i32_0, %c0_i32_1 : i32, i32, i32
  }
  func.func @transform_7(%arg0: i32, %arg1: i32) -> (i32, i32, i32) {
    %c0_i32 = arith.constant 0 : i32
    %c0_i32_0 = arith.constant 0 : i32
    %c0_i32_1 = arith.constant 0 : i32
    %c0_i32_2 = arith.constant 0 : i32
    return %c0_i32, %c0_i32_0, %c0_i32_1 : i32, i32, i32
  }
  func.func @transform_8(%arg0: i32, %arg1: i32) -> (i32, i32, i32) {
    %c0_i32 = arith.constant 0 : i32
    %c0_i32_0 = arith.constant 0 : i32
    %c0_i32_1 = arith.constant 0 : i32
    %c0_i32_2 = arith.constant 0 : i32
    return %c0_i32, %c0_i32_0, %c0_i32_1 : i32, i32, i32
  }
  func.func @transform_9(%arg0: i32, %arg1: i32) -> (i32, i32) {
    %c0_i32 = arith.constant 0 : i32
    %c0_i32_0 = arith.constant 0 : i32
    %c0_i32_1 = arith.constant 0 : i32
    return %c0_i32, %c0_i32_0 : i32, i32
  }
  func.func @transform_10(%arg0: i32, %arg1: i32) -> (i32, i32) {
    %c0_i32 = arith.constant 0 : i32
    %c0_i32_0 = arith.constant 0 : i32
    %c0_i32_1 = arith.constant 0 : i32
    return %c0_i32, %c0_i32_0 : i32, i32
  }
  func.func @transform_11(%arg0: i32, %arg1: i32) -> (i32, i32) {
    %c1_i32 = arith.constant 1 : i32
    %0 = arith.muli %arg0, %c1_i32 : i32
    %1 = arith.addi %0, %arg1 : i32
    %c0_i32 = arith.constant 0 : i32
    %c0_i32_0 = arith.constant 0 : i32
    return %1, %c0_i32 : i32, i32
  }
  func.func @transform_12(%arg0: i32, %arg1: i32) -> (i32, i32, i32) {
    %c1_i32 = arith.constant 1 : i32
    %0 = arith.muli %arg0, %c1_i32 : i32
    %1 = arith.addi %0, %arg1 : i32
    %c0_i32 = arith.constant 0 : i32
    %c0_i32_0 = arith.constant 0 : i32
    %c0_i32_1 = arith.constant 0 : i32
    return %1, %c0_i32, %c0_i32_0 : i32, i32, i32
  }
}

module attributes {stable_mosaic.version = 11 : i64} {
  func.func @kernel(%arg0: i32, %arg1: memref<64x1024xbf16, #tpu.memory_space<vmem>>, %arg2: memref<2x2x1024xf32, #tpu.memory_space<vmem>>, %arg3: memref<2x1024xf32, #tpu.memory_space<vmem>>, %arg4: memref<1x1x1024xf32, #tpu.memory_space<vmem>>) attributes {dimension_semantics = [#tpu.dimension_semantics<parallel>], iteration_bounds = array<i64: 2>, scalar_prefetch = 0 : i64, scratch_operands = 0 : i64, tpu.core_type = #tpu.core_type<tc>, window_params = [{transform_indices = @transform_0, window_bounds = array<i64: 64, 1024>}, {pipeline_mode = #tpu.pipeline_mode<synchronous>, transform_indices = @transform_1, window_bounds = array<i64: 2, 2, 1024>}, {pipeline_mode = #tpu.pipeline_mode<synchronous>, transform_indices = @transform_2, window_bounds = array<i64: 2, 1024>}, {transform_indices = @transform_3, window_bounds = array<i64: 1, 1, 1024>}]} {
    %c0 = arith.constant 0 : index
    %c0_0 = arith.constant 0 : index
    %c0_1 = arith.constant 0 : index
    %0 = vector.load %arg2[%c0, %c0_0, %c0_1] : memref<2x2x1024xf32, #tpu.memory_space<vmem>>, vector<2x2x1024xf32>
    %c0_2 = arith.constant 0 : index
    %c0_3 = arith.constant 0 : index
    %1 = vector.load %arg3[%c0_2, %c0_3] : memref<2x1024xf32, #tpu.memory_space<vmem>>, vector<2x1024xf32>
    %2 = vector.extract_strided_slice %0 {offsets = [0, 0, 0], sizes = [1, 2, 1024], strides = [1, 1, 1]} : vector<2x2x1024xf32> to vector<1x2x1024xf32>
    %3 = vector.shape_cast %2 : vector<1x2x1024xf32> to vector<2x1024xf32>
    %4 = vector.extract_strided_slice %0 {offsets = [1, 0, 0], sizes = [1, 2, 1024], strides = [1, 1, 1]} : vector<2x2x1024xf32> to vector<1x2x1024xf32>
    %5 = vector.shape_cast %4 : vector<1x2x1024xf32> to vector<2x1024xf32>
    %6 = arith.addf %3, %5 : vector<2x1024xf32>
    %7 = vector.extract_strided_slice %6 {offsets = [0, 0], sizes = [1, 1024], strides = [1, 1]} : vector<2x1024xf32> to vector<1x1024xf32>
    %cst = arith.constant 7.812500e-03 : f32
    %8 = vector.broadcast %cst : f32 to vector<1x1024xf32>
    %9 = arith.mulf %7, %8 : vector<1x1024xf32>
    %10 = vector.extract_strided_slice %6 {offsets = [1, 0], sizes = [1, 1024], strides = [1, 1]} : vector<2x1024xf32> to vector<1x1024xf32>
    %cst_4 = arith.constant 7.812500e-03 : f32
    %11 = vector.broadcast %cst_4 : f32 to vector<1x1024xf32>
    %12 = arith.mulf %10, %11 : vector<1x1024xf32>
    %13 = arith.mulf %9, %9 : vector<1x1024xf32>
    %14 = arith.subf %12, %13 : vector<1x1024xf32>
    %cst_5 = arith.constant 0.000000e+00 : f32
    %15 = vector.broadcast %cst_5 : f32 to vector<1x1024xf32>
    %16 = arith.maximumf %14, %15 : vector<1x1024xf32>
    %cst_6 = arith.constant 9.99999974E-6 : f32
    %17 = vector.broadcast %cst_6 : f32 to vector<1x1024xf32>
    %18 = arith.addf %16, %17 : vector<1x1024xf32>
    %19 = math.rsqrt %18 : vector<1x1024xf32>
    %20 = vector.extract_strided_slice %1 {offsets = [0, 0], sizes = [1, 1024], strides = [1, 1]} : vector<2x1024xf32> to vector<1x1024xf32>
    %21 = arith.mulf %20, %19 : vector<1x1024xf32>
    %22 = vector.extract_strided_slice %1 {offsets = [1, 0], sizes = [1, 1024], strides = [1, 1]} : vector<2x1024xf32> to vector<1x1024xf32>
    %23 = arith.mulf %9, %21 : vector<1x1024xf32>
    %24 = arith.subf %22, %23 : vector<1x1024xf32>
    %c0_7 = arith.constant 0 : index
    %c0_8 = arith.constant 0 : index
    %25 = vector.load %arg1[%c0_7, %c0_8] : memref<64x1024xbf16, #tpu.memory_space<vmem>>, vector<64x1024xbf16>
    %26 = arith.extf %25 : vector<64x1024xbf16> to vector<64x1024xf32>
    %27 = vector.broadcast %21 : vector<1x1024xf32> to vector<64x1024xf32>
    %28 = arith.mulf %26, %27 : vector<64x1024xf32>
    %29 = vector.broadcast %24 : vector<1x1024xf32> to vector<64x1024xf32>
    %30 = arith.addf %28, %29 : vector<64x1024xf32>
    %cst_9 = arith.constant 0.000000e+00 : f32
    %31 = vector.broadcast %cst_9 : f32 to vector<64x1024xf32>
    %32 = arith.cmpf oge, %30, %31 : vector<64x1024xf32>
    %cst_10 = arith.constant 2.000000e-01 : f32
    %33 = vector.broadcast %cst_10 : f32 to vector<64x1024xf32>
    %34 = arith.mulf %33, %30 : vector<64x1024xf32>
    %35 = arith.select %32, %30, %34 : vector<64x1024xi1>, vector<64x1024xf32>
    %cst_11 = arith.constant dense<0.000000e+00> : vector<1024xf32>
    %36 = vector.multi_reduction <add>, %35, %cst_11 [0] : vector<64x1024xf32> to vector<1024xf32>
    %37 = vector.shape_cast %36 : vector<1024xf32> to vector<1x1024xf32>
    %c0_12 = arith.constant 0 : index
    %c0_13 = arith.constant 0 : index
    %c0_14 = arith.constant 0 : index
    %38 = vector.load %arg4[%c0_12, %c0_13, %c0_14] : memref<1x1x1024xf32, #tpu.memory_space<vmem>>, vector<1x1x1024xf32>
    %39 = vector.shape_cast %38 : vector<1x1x1024xf32> to vector<1x1024xf32>
    %40 = vector.shape_cast %37 : vector<1x1024xf32> to vector<1x1x1024xf32>
    tpu.vector_store %arg4[%c0_12, %c0_13, %c0_14], %40 {strides = array<i32>} : memref<1x1x1024xf32, #tpu.memory_space<vmem>>, vector<1x1x1024xf32>,
    return
  }
  func.func @transform_0(%arg0: i32) -> (i32, i32) {
    %c0_i32 = arith.constant 0 : i32
    %c0_i32_0 = arith.constant 0 : i32
    return %arg0, %c0_i32 : i32, i32
  }
  func.func @transform_1(%arg0: i32) -> (i32, i32, i32) {
    %c0_i32 = arith.constant 0 : i32
    %c0_i32_0 = arith.constant 0 : i32
    %c0_i32_1 = arith.constant 0 : i32
    %c0_i32_2 = arith.constant 0 : i32
    return %c0_i32, %c0_i32_0, %c0_i32_1 : i32, i32, i32
  }
  func.func @transform_2(%arg0: i32) -> (i32, i32) {
    %c0_i32 = arith.constant 0 : i32
    %c0_i32_0 = arith.constant 0 : i32
    %c0_i32_1 = arith.constant 0 : i32
    return %c0_i32, %c0_i32_0 : i32, i32
  }
  func.func @transform_3(%arg0: i32) -> (i32, i32, i32) {
    %c0_i32 = arith.constant 0 : i32
    %c0_i32_0 = arith.constant 0 : i32
    %c0_i32_1 = arith.constant 0 : i32
    return %arg0, %c0_i32, %c0_i32_0 : i32, i32, i32
  }
}

module attributes {stable_mosaic.version = 11 : i64} {
  func.func @_head_kernel(%arg0: memref<2x1024xf32, #tpu.memory_space<vmem>>, %arg1: memref<1024x512xbf16, #tpu.memory_space<vmem>>, %arg2: memref<1x512xf32, #tpu.memory_space<vmem>>, %arg3: memref<1x512xf32, #tpu.memory_space<vmem>>, %arg4: memref<512x256xbf16, #tpu.memory_space<vmem>>, %arg5: memref<1x256xf32, #tpu.memory_space<vmem>>, %arg6: memref<1x256xf32, #tpu.memory_space<vmem>>, %arg7: memref<1x256xf32, #tpu.memory_space<vmem>>, %arg8: memref<256x40xbf16, #tpu.memory_space<vmem>>, %arg9: memref<1x40xf32, #tpu.memory_space<vmem>>, %arg10: memref<2x40xf32, #tpu.memory_space<vmem>>) attributes {dimension_semantics = [], scalar_prefetch = 0 : i64, scratch_operands = 0 : i64, tpu.core_type = #tpu.core_type<tc>} {
    %c0 = arith.constant 0 : index
    %c0_0 = arith.constant 0 : index
    %0 = vector.load %arg0[%c0, %c0_0] : memref<2x1024xf32, #tpu.memory_space<vmem>>, vector<2x1024xf32>
    %1 = arith.truncf %0 : vector<2x1024xf32> to vector<2x1024xbf16>
    %c0_1 = arith.constant 0 : index
    %c0_2 = arith.constant 0 : index
    %2 = vector.load %arg1[%c0_1, %c0_2] : memref<1024x512xbf16, #tpu.memory_space<vmem>>, vector<1024x512xbf16>
    %cst = arith.constant dense<0.000000e+00> : vector<2x512xf32>
    %3 = tpu.matmul %1, %2, %cst {dimension_numbers = #tpu.dot_dimension_numbers<[1], [0], [0], [1], [0, 0, 1, 1], [], []>} : vector<2x1024xbf16>, vector<1024x512xbf16>, vector<2x512xf32> -> vector<2x512xf32>
    %c0_3 = arith.constant 0 : index
    %c0_4 = arith.constant 0 : index
    %4 = vector.load %arg2[%c0_3, %c0_4] : memref<1x512xf32, #tpu.memory_space<vmem>>, vector<1x512xf32>
    %c0_5 = arith.constant 0 : index
    %c0_6 = arith.constant 0 : index
    %5 = vector.load %arg3[%c0_5, %c0_6] : memref<1x512xf32, #tpu.memory_space<vmem>>, vector<1x512xf32>
    %cst_7 = arith.constant dense<0.000000e+00> : vector<512xf32>
    %6 = vector.multi_reduction <add>, %3, %cst_7 [0] : vector<2x512xf32> to vector<512xf32>
    %7 = vector.shape_cast %6 : vector<512xf32> to vector<1x512xf32>
    %cst_8 = arith.constant 2.000000e+00 : f32
    %8 = vector.broadcast %cst_8 : f32 to vector<1x512xf32>
    %9 = arith.divf %7, %8 : vector<1x512xf32>
    %10 = vector.broadcast %9 : vector<1x512xf32> to vector<2x512xf32>
    %11 = arith.subf %3, %10 : vector<2x512xf32>
    %12 = arith.mulf %11, %11 : vector<2x512xf32>
    %cst_9 = arith.constant dense<0.000000e+00> : vector<512xf32>
    %13 = vector.multi_reduction <add>, %12, %cst_9 [0] : vector<2x512xf32> to vector<512xf32>
    %14 = vector.shape_cast %13 : vector<512xf32> to vector<1x512xf32>
    %cst_10 = arith.constant 2.000000e+00 : f32
    %15 = vector.broadcast %cst_10 : f32 to vector<1x512xf32>
    %16 = arith.divf %14, %15 : vector<1x512xf32>
    %17 = vector.broadcast %9 : vector<1x512xf32> to vector<2x512xf32>
    %18 = arith.subf %3, %17 : vector<2x512xf32>
    %cst_11 = arith.constant 9.99999974E-6 : f32
    %19 = vector.broadcast %cst_11 : f32 to vector<1x512xf32>
    %20 = arith.addf %16, %19 : vector<1x512xf32>
    %21 = math.rsqrt %20 : vector<1x512xf32>
    %22 = vector.broadcast %21 : vector<1x512xf32> to vector<2x512xf32>
    %23 = arith.mulf %18, %22 : vector<2x512xf32>
    %24 = vector.broadcast %4 : vector<1x512xf32> to vector<2x512xf32>
    %25 = arith.mulf %23, %24 : vector<2x512xf32>
    %26 = vector.broadcast %5 : vector<1x512xf32> to vector<2x512xf32>
    %27 = arith.addf %25, %26 : vector<2x512xf32>
    %cst_12 = arith.constant 0.000000e+00 : f32
    %28 = vector.broadcast %cst_12 : f32 to vector<2x512xf32>
    %29 = arith.cmpf oge, %27, %28 : vector<2x512xf32>
    %cst_13 = arith.constant 2.000000e-01 : f32
    %30 = vector.broadcast %cst_13 : f32 to vector<2x512xf32>
    %31 = arith.mulf %30, %27 : vector<2x512xf32>
    %32 = arith.select %29, %27, %31 : vector<2x512xi1>, vector<2x512xf32>
    %33 = arith.truncf %32 : vector<2x512xf32> to vector<2x512xbf16>
    %c0_14 = arith.constant 0 : index
    %c0_15 = arith.constant 0 : index
    %34 = vector.load %arg4[%c0_14, %c0_15] : memref<512x256xbf16, #tpu.memory_space<vmem>>, vector<512x256xbf16>
    %cst_16 = arith.constant dense<0.000000e+00> : vector<2x256xf32>
    %35 = tpu.matmul %33, %34, %cst_16 {dimension_numbers = #tpu.dot_dimension_numbers<[1], [0], [0], [1], [0, 0, 1, 1], [], []>} : vector<2x512xbf16>, vector<512x256xbf16>, vector<2x256xf32> -> vector<2x256xf32>
    %c0_17 = arith.constant 0 : index
    %c0_18 = arith.constant 0 : index
    %36 = vector.load %arg5[%c0_17, %c0_18] : memref<1x256xf32, #tpu.memory_space<vmem>>, vector<1x256xf32>
    %37 = vector.broadcast %36 : vector<1x256xf32> to vector<2x256xf32>
    %38 = arith.addf %35, %37 : vector<2x256xf32>
    %c0_19 = arith.constant 0 : index
    %c0_20 = arith.constant 0 : index
    %39 = vector.load %arg6[%c0_19, %c0_20] : memref<1x256xf32, #tpu.memory_space<vmem>>, vector<1x256xf32>
    %c0_21 = arith.constant 0 : index
    %c0_22 = arith.constant 0 : index
    %40 = vector.load %arg7[%c0_21, %c0_22] : memref<1x256xf32, #tpu.memory_space<vmem>>, vector<1x256xf32>
    %cst_23 = arith.constant dense<0.000000e+00> : vector<256xf32>
    %41 = vector.multi_reduction <add>, %38, %cst_23 [0] : vector<2x256xf32> to vector<256xf32>
    %42 = vector.shape_cast %41 : vector<256xf32> to vector<1x256xf32>
    %cst_24 = arith.constant 2.000000e+00 : f32
    %43 = vector.broadcast %cst_24 : f32 to vector<1x256xf32>
    %44 = arith.divf %42, %43 : vector<1x256xf32>
    %45 = vector.broadcast %44 : vector<1x256xf32> to vector<2x256xf32>
    %46 = arith.subf %38, %45 : vector<2x256xf32>
    %47 = arith.mulf %46, %46 : vector<2x256xf32>
    %cst_25 = arith.constant dense<0.000000e+00> : vector<256xf32>
    %48 = vector.multi_reduction <add>, %47, %cst_25 [0] : vector<2x256xf32> to vector<256xf32>
    %49 = vector.shape_cast %48 : vector<256xf32> to vector<1x256xf32>
    %cst_26 = arith.constant 2.000000e+00 : f32
    %50 = vector.broadcast %cst_26 : f32 to vector<1x256xf32>
    %51 = arith.divf %49, %50 : vector<1x256xf32>
    %52 = vector.broadcast %44 : vector<1x256xf32> to vector<2x256xf32>
    %53 = arith.subf %38, %52 : vector<2x256xf32>
    %cst_27 = arith.constant 9.99999974E-6 : f32
    %54 = vector.broadcast %cst_27 : f32 to vector<1x256xf32>
    %55 = arith.addf %51, %54 : vector<1x256xf32>
    %56 = math.rsqrt %55 : vector<1x256xf32>
    %57 = vector.broadcast %56 : vector<1x256xf32> to vector<2x256xf32>
    %58 = arith.mulf %53, %57 : vector<2x256xf32>
    %59 = vector.broadcast %39 : vector<1x256xf32> to vector<2x256xf32>
    %60 = arith.mulf %58, %59 : vector<2x256xf32>
    %61 = vector.broadcast %40 : vector<1x256xf32> to vector<2x256xf32>
    %62 = arith.addf %60, %61 : vector<2x256xf32>
    %cst_28 = arith.constant 0.000000e+00 : f32
    %63 = vector.broadcast %cst_28 : f32 to vector<2x256xf32>
    %64 = arith.cmpf oge, %62, %63 : vector<2x256xf32>
    %cst_29 = arith.constant 2.000000e-01 : f32
    %65 = vector.broadcast %cst_29 : f32 to vector<2x256xf32>
    %66 = arith.mulf %65, %62 : vector<2x256xf32>
    %67 = arith.select %64, %62, %66 : vector<2x256xi1>, vector<2x256xf32>
    %68 = arith.truncf %67 : vector<2x256xf32> to vector<2x256xbf16>
    %c0_30 = arith.constant 0 : index
    %c0_31 = arith.constant 0 : index
    %69 = vector.load %arg8[%c0_30, %c0_31] : memref<256x40xbf16, #tpu.memory_space<vmem>>, vector<256x40xbf16>
    %cst_32 = arith.constant dense<0.000000e+00> : vector<2x40xf32>
    %70 = tpu.matmul %68, %69, %cst_32 {dimension_numbers = #tpu.dot_dimension_numbers<[1], [0], [0], [1], [0, 0, 1, 1], [], []>} : vector<2x256xbf16>, vector<256x40xbf16>, vector<2x40xf32> -> vector<2x40xf32>
    %c0_33 = arith.constant 0 : index
    %c0_34 = arith.constant 0 : index
    %71 = vector.load %arg9[%c0_33, %c0_34] : memref<1x40xf32, #tpu.memory_space<vmem>>, vector<1x40xf32>
    %72 = vector.broadcast %71 : vector<1x40xf32> to vector<2x40xf32>
    %73 = arith.addf %70, %72 : vector<2x40xf32>
    %c0_35 = arith.constant 0 : index
    %c0_36 = arith.constant 0 : index
    %74 = vector.load %arg10[%c0_35, %c0_36] : memref<2x40xf32, #tpu.memory_space<vmem>>, vector<2x40xf32>
    tpu.vector_store %arg10[%c0_35, %c0_36], %73 {strides = array<i32>} : memref<2x40xf32, #tpu.memory_space<vmem>>, vector<2x40xf32>,
    return
  }
}

</mosaic_0001>

<bundles_post_ra>
// kernel: gcn_r_forward.7
= control target key start
LH: loop header
LB: loop body
LE: loop exit
PB: predicated region body
PF: predicated region fallthrough
CT: control target
= control target key end

     0   :  { %s878_s15 = smov 0   ;;  %s880_s16 = smov 0   ;;  %s969_s0 = inlined_call_operand.vmem [shape: bf16[2,64,64], index: 0, kind: input, shape index: {}]   ;;  %s970_s1 = inlined_call_operand.vmem [shape: bf16[128,8], index: 1, kind: input, shape index: {}]   ;;  %s971_s2 = inlined_call_operand.vmem [shape: bf16[8,64], index: 2, kind: input, shape index: {}]   ;;  %s972_s3 = inlined_call_operand.vmem [shape: bf16[128,64], index: 3, kind: output, shape index: {0}]   ;;  %s973_s4 = inlined_call_operand.vmem [shape: f32[2,2,64], index: 4, kind: output, shape index: {1}]  }
   0x1   :  { %s882_s17 = smov 0  }
   0x2 LB: > { %s27_s18 = sadd.s32 1, %s847_s16  ;;  %p714_p0 = scmp.ge.s32.totalorder %s851_s17, 1  ;;  %s851_s17 = sphi %s882_s17, %s15_s17   ;;  %s847_s16 = sphi %s880_s16, %s975_s16   ;;  %s843_s15 = sphi %s878_s15, %s974_s15  }
   0x3   : > { %p29_p1 = scmp.ge.s32.totalorder %s27_s18, 2  ;;  %p199_p2 = scmp.lt.s32.totalorder %s851_s17, 3 }
   0x5   : > { %s977_s18 = smov (%p29_p1, %s27_s18), 0  ;;  %p200_p3 = pnand %p714_p0, %p199_p2 }
   0x6   : > { %s717_s19 = sshll.u32 (!%p200_p3), %s843_s15, 3  ;;  %p241_p4 = scmp.lt.s32.totalorder (!%p200_p3), %s843_s15, 1  ;;  %vm331_vm0 = vcmask (!%p200_p3), 523264   ;;  %v413_v8 = vld [vmem:[%s971_s2] sm:$0xf] (!%p200_p3)  ;;  %vm427_vm1 = vcmask (!%p200_p3), 1043456  }
   0x7   : > { %203 = sbr.rel (%p200_p3) target bundleno = 498 (0x1f2), region = 32  ;;  %p251_p5 = scmp.lt.s32.totalorder (!%p200_p3), %s717_s19, 15  ;;  %796 = vmatprep.subr.msk.bf16.mxu1 (!%p200_p3), %vm427_vm1, %v413_v8  ;;  %v429_v9 = vsel (!%p200_p3), %vm427_vm1, %v413_v8, 0  ;;  %vm414_vm2 = vcmask (!%p200_p3), 64512   ;;  %vm528_vm3 = vcmask (!%p200_p3), 519168   ;;  %vm558_vm4 = vcmask (!%p200_p3), 516096  }
   0x8   : > { %787 = vmatpush3.bf16.msra.mxu1 (!%p200_p3), %v429_v9 }
   0xe   : > { %s979_s15 = smov (!%p241_p4, %s843_s15), 1  ;;  %s981_s19 = smov (!%p251_p5, %s717_s19), 15 }
   0xf   : > { %s748_s20 = sshll.u32 %s979_s15, 5  ;;  %s718_s21 = sshll.u32 %s981_s19, 2 }
  0x10   : > { %s248_s24 = scalar_lea.vmem %s969_s0, %s748_s20  ;;  %s254_s27 = scalar_lea.vmem %s970_s1, %s718_s21 }
  0x11   : > { %v825_v0 = vld [vmem:[%s248_s24] sm:$0xff]   ;;  %v822_v2 = vld [vmem:[%s254_s27 + $0x8] sm:$0xff]   ;;  %v823_v3 = vld [vmem:[%s254_s27 + $0x10] sm:$0xff]   ;;  %s922_s6 = scalar_lea.vmem %s972_s3, %s718_s21  ;;  %s721_s7 = sshll.u32 %s979_s15, 1 }
  0x12   : > { %v821_v1 = vld [vmem:[%s254_s27] sm:$0xff]   ;;  %778 = vmatprep.mubr.msk.bf16.mxu0 %vm331_vm0, %v825_v0  ;;  %v824_v4 = vld [vmem:[%s254_s27 + $0x18] sm:$0xff]   ;;  %v826_v5 = vld [vmem:[%s248_s24 + $0x8] sm:$0xff]   ;;  %s268_s10 = scalar_lea.vmem %s973_s4, %s721_s7 }
  0x13   : > { %770 = vmatprep.subr.bf16.mxu0 %v821_v1  ;;  %v827_v6 = vld [vmem:[%s248_s24 + $0x10] sm:$0xff]   ;;  %v828_v7 = vld [vmem:[%s248_s24 + $0x18] sm:$0xff]  }
  0x14   : > { %771 = vmatpush3.bf16.msra.mxu0 %v821_v1 }
  0x15   : > { %772 = vmatprep.subr.bf16.mxu0 %v822_v2 }
  0x18   : > { %773 = vmatpush3.bf16.msra.mxu0 %v822_v2 }
  0x19   : > { %774 = vmatprep.subr.bf16.mxu0 %v823_v3 }
  0x1c   : > { %775 = vmatpush3.bf16.msra.mxu0 %v823_v3 }
  0x1d   : > { %776 = vmatprep.subr.bf16.mxu0 %v824_v4 }
  0x20   : > { %777 = vmatpush3.bf16.msra.mxu0 %v824_v4 }
  0x23   : > { %779 = vmatmul.mubr.msk.bf16.vlgmr.msra.gmra.mrb[0].mxu0 %vm331_vm0, %v826_v5 }
  0x24   : > { %782 = vmatprep.mubr.msk.bf16.mxu0 %vm331_vm0, %v827_v6 }
  0x2b   : > { %783 = vmatmul.mubr.msk.bf16.gmra.mrb[4].mxu0 %vm331_vm0, %v828_v7 }
  0xf6   : > { %v780_v10 = vpop.f32.mrb[0].mxu0 }
  0xf7   : > { %v378_v11 = vpop.f32.mrb[1].mxu0 }
  0xf8   : > { %v781_v12 = vpop.f32.mrb[2].mxu0 }
  0xf9   : > { %v410_v13 = vpack.c.bf16 %v781_v12, %v780_v10  ;;  %v381_v14 = vpop.f32.mrb[3].mxu0 }
  0xfa   : > { %v409_v15 = vpack.c.bf16 %v381_v14, %v378_v11 }
  0xfc   : > { %788 = vmatprep.mubr.msk.bf16.mxu1 %vm414_vm2, %v409_v15 }
  0xfd   : > { %789 = vmatmul.mubr.msk.bf16.vlgmr.msra.gmra.mrb[0].mxu1 %vm414_vm2, %v410_v13 }
  0xfe   : > { %v784_v16 = vpop.f32.mrb[4].mxu0 }
  0xff   : > { %v394_v17 = vpop.f32.mrb[5].mxu0 }
 0x100   : > { %v785_v18 = vpop.f32.mrb[6].mxu0 }
 0x101   : > { %v412_v19 = vpack.c.bf16 %v785_v18, %v784_v16  ;;  %v397_v20 = vpop.f32.mrb[7].mxu0 }
 0x102   : > { %v411_v21 = vpack.c.bf16 %v397_v20, %v394_v17 }
 0x104   : > { %792 = vmatprep.mubr.msk.bf16.mxu1 %vm414_vm2, %v411_v21 }
 0x105   : > { %793 = vmatmul.mubr.msk.bf16.gmra.mrb[4].mxu1 %vm414_vm2, %v412_v19 }
 0x1d0   : > { %v790_v22 = vpop.f32.mrb[0].mxu1 }
 0x1d1   : > { %v751_v23 = vpack.c.bf16 %v790_v22, %v790_v22  ;;  %v465_v24 = vpop.f32.mrb[1].mxu1  ;;  %v562_v28 = vmul.f32 %v790_v22, %v790_v22  ;;  %v540_v37 = vsel %vm331_vm0, %v790_v22, 0.0 }
 0x1d2   : > { %v749_v25 = vpack.c.bf16 %v465_v24, %v465_v24  ;;  %v560_v26 = vmul.f32 %v465_v24, %v465_v24  ;;  %v791_v27 = vpop.f32.mrb[2].mxu1  ;;  %v537_v31 = vsel %vm331_vm0, %v465_v24, 0.0 }
 0x1d3   : > { %531 = vst.msk [vmem:[%s922_s6 + $0x8] sm:$0xf] %vm528_vm3, %v751_v23  ;;  %v752_v29 = vpack.c.bf16 %v791_v27, %v791_v27  ;;  %v468_v30 = vpop.f32.mrb[3].mxu1  ;;  %v563_v35 = vmul.f32 %v791_v27, %v791_v27  ;;  %v571_v42 = vsel %vm331_vm0, %v562_v28, 0.0  ;;  %v542_v44 = vsel %vm331_vm0, %v791_v27, 0.0 }
 0x1d4   : > { %529 = vst.msk [vmem:[%s922_s6] sm:$0xf] %vm528_vm3, %v749_v25  ;;  %v750_v32 = vpack.c.bf16 %v468_v30, %v468_v30  ;;  %v538_v33 = vsel %vm331_vm0, %v468_v30, 0.0  ;;  %v561_v34 = vmul.f32 %v468_v30, %v468_v30  ;;  %v568_v38 = vsel %vm331_vm0, %v560_v26, 0.0 }
 0x1d5   : > { %532 = vst.msk [vmem:[%s922_s6 + $0xc] sm:$0xf] %vm528_vm3, %v752_v29  ;;  %v539_v36 = vadd.f32 %v538_v33, %v537_v31  ;;  %v573_v45 = vsel %vm331_vm0, %v563_v35, 0.0 }
 0x1d6   : > { %530 = vst.msk [vmem:[%s922_s6 + $0x4] sm:$0xf] %vm528_vm3, %v750_v32  ;;  %v569_v39 = vsel %vm331_vm0, %v561_v34, 0.0 }
 0x1d7   : > { %v541_v40 = vadd.f32 %v540_v37, %v539_v36  ;;  %v570_v41 = vadd.f32 %v569_v39, %v568_v38 }
 0x1d8   : > { %v794_v43 = vpop.f32.mrb[4].mxu1 }
 0x1d9   : > { %v572_v46 = vadd.f32 %v571_v42, %v570_v41  ;;  %v755_v47 = vpack.c.bf16 %v794_v43, %v794_v43  ;;  %v481_v48 = vpop.f32.mrb[5].mxu1  ;;  %v543_v50 = vadd.f32 %v542_v44, %v541_v40  ;;  %v566_v60 = vmul.f32 %v794_v43, %v794_v43 }
 0x1da   : > { %v753_v49 = vpack.c.bf16 %v481_v48, %v481_v48  ;;  %v544_v51 = vsel %vm331_vm0, %v481_v48, 0.0  ;;  %v564_v52 = vmul.f32 %v481_v48, %v481_v48  ;;  %v795_v53 = vpop.f32.mrb[6].mxu1  ;;  %v548_v1 = vsel %vm331_vm0, %v794_v43, 0.0 }
 0x1db   : > { %535 = vst.msk [vmem:[%s922_s6 + $0x18] sm:$0xf] %vm528_vm3, %v755_v47  ;;  %v574_v54 = vadd.f32 %v573_v45, %v572_v46  ;;  %v756_v55 = vpack.c.bf16 %v795_v53, %v795_v53  ;;  %v484_v56 = vpop.f32.mrb[7].mxu1  ;;  %v545_v57 = vadd.f32 %v544_v51, %v543_v50  ;;  %v567_v2 = vmul.f32 %v795_v53, %v795_v53 }
 0x1dc   : > { %533 = vst.msk [vmem:[%s922_s6 + $0x10] sm:$0xf] %vm528_vm3, %v753_v49  ;;  %v575_v58 = vsel %vm331_vm0, %v564_v52, 0.0  ;;  %v754_v59 = vpack.c.bf16 %v484_v56, %v484_v56  ;;  %v546_v62 = vsel %vm331_vm0, %v484_v56, 0.0  ;;  %v565_v63 = vmul.f32 %v484_v56, %v484_v56 }
 0x1dd   : > { %v576_v61 = vadd.f32 %v575_v58, %v574_v54  ;;  %536 = vst.msk [vmem:[%s922_s6 + $0x1c] sm:$0xf] %vm528_vm3, %v756_v55  ;;  %v547_v0 = vadd.f32 %v546_v62, %v545_v57  ;;  %v579_v6 = vsel %vm331_vm0, %v566_v60, 0.0  ;;  %v550_v7 = vsel %vm331_vm0, %v795_v53, 0.0 }
 0x1de   : > { %534 = vst.msk [vmem:[%s922_s6 + $0x14] sm:$0xf] %vm528_vm3, %v754_v59  ;;  %v577_v3 = vsel %vm331_vm0, %v565_v63, 0.0  ;;  %v581_v10 = vsel %vm331_vm0, %v567_v2, 0.0 }
 0x1df   : > { %v549_v4 = vadd.f32 %v548_v1, %v547_v0  ;;  %v578_v5 = vadd.f32 %v577_v3, %v576_v61 }
 0x1e1   : > { %v551_v8 = vadd.f32 %v550_v7, %v549_v4  ;;  %v580_v9 = vadd.f32 %v579_v6, %v578_v5 }
 0x1e3   : > { %v552_v11 = vrot.slane %v551_v8, 4  ;;  %v582_v12 = vadd.f32 %v581_v10, %v580_v9 }
 0x1e5   : > { %v553_v13 = vadd.f32 %v552_v11, %v551_v8  ;;  %v583_v14 = vrot.slane %v582_v12, 4 }
 0x1e7   : > { %v554_v15 = vrot.slane %v553_v13, 2  ;;  %v584_v16 = vadd.f32 %v583_v14, %v582_v12 }
 0x1e9   : > { %v555_v17 = vadd.f32 %v554_v15, %v553_v13  ;;  %v585_v18 = vrot.slane %v584_v16, 2 }
 0x1eb   : > { %v556_v19 = vrot.slane %v555_v17, 1  ;;  %v586_v20 = vadd.f32 %v585_v18, %v584_v16 }
 0x1ed   : > { %v557_v21 = vadd.f32 %v556_v19, %v555_v17  ;;  %v587_v22 = vrot.slane %v586_v20, 1 }
 0x1ef   : > { %559 = vst.msk [vmem:[%s268_s10] sm:$0x1] %vm558_vm4, %v557_v21  ;;  %v588_v23 = vadd.f32 %v587_v22, %v586_v20 }
 0x1f1   : > { %589 = vst.msk [vmem:[%s268_s10 + $0x1] sm:$0x1] %vm558_vm4, %v588_v23 }
 0x1f2 PF: > { %s15_s17 = sadd.s32 1, %s851_s17   ;;  %s974_s15 = smov %s847_s16 }
 0x1f3   : > { %p12_p6 = scmp.ge.s32.totalorder %s15_s17, 4   ;;  %s975_s16 = smov %s977_s18 }
 0x1f5   :  { %14 = sbr.rel (!%p12_p6) target bundleno = 2 (0x2), region = 77 }

// kernel: gcn_r_forward.8
= control target key start
LH: loop header
LB: loop body
LE: loop exit
PB: predicated region body
PF: predicated region fallthrough
CT: control target
= control target key end

     0   :  { %s1055_s21 = smov 0   ;;  %s1057_s22 = smov 0   ;;  %s1179_s0 = inlined_call_operand.vmem [shape: bf16[2,64,64], index: 0, kind: input, shape index: {}]   ;;  %s1180_s1 = inlined_call_operand.vmem [shape: bf16[128,64], index: 1, kind: input, shape index: {}]   ;;  %s1181_s2 = inlined_call_operand.vmem [shape: f32[2,2,64], index: 2, kind: input, shape index: {}]   ;;  %s1182_s3 = inlined_call_operand.vmem [shape: f32[2,64], index: 3, kind: input, shape index: {}]   ;;  %s1183_s4 = inlined_call_operand.vmem [shape: bf16[64,64], index: 4, kind: input, shape index: {}]   ;;  %s1184_s5 = inlined_call_operand.vmem [shape: bf16[128,64], index: 5, kind: output, shape index: {0}]   ;;  %s1185_s6 = inlined_call_operand.vmem [shape: f32[2,2,64], index: 6, kind: output, shape index: {1}]  }
   0x1   :  { %s1059_s23 = smov 0  }
   0x2 LB: > { %s29_s24 = sadd.s32 1, %s1014_s22  ;;  %p852_p0 = scmp.ge.s32.totalorder %s1018_s23, 1  ;;  %s1018_s23 = sphi %s1059_s23, %s17_s23   ;;  %s1014_s22 = sphi %s1057_s22, %s1187_s22   ;;  %s1010_s21 = sphi %s1055_s21, %s1186_s21  }
   0x3   : > { %p31_p1 = scmp.ge.s32.totalorder %s29_s24, 2  ;;  %p249_p2 = scmp.lt.s32.totalorder %s1018_s23, 3 }
   0x5   : > { %s1189_s24 = smov (%p31_p1, %s29_s24), 0  ;;  %p250_p3 = pnand %p852_p0, %p249_p2 }
   0x6   : > { %v334_v0 = vld [vmem:[%s1181_s2] sm:$0x3] (!%p250_p3)  ;;  %p295_p4 = scmp.lt.s32.totalorder (!%p250_p3), %s1010_s21, 1  ;;  %v335_v1 = vld [vmem:[%s1181_s2 + $0x2] sm:$0x3] (!%p250_p3)  ;;  %v991_v4 = vld [vmem:[%s1183_s4 + $0x8] sm:$0xff] (!%p250_p3)   ;;  %v371_v13 = vlaneseq (!%p250_p3) }
   0x7   : > { %253 = sbr.rel (%p250_p3) target bundleno = 530 (0x212), region = 40  ;;  %v336_v2 = vadd.f32 (!%p250_p3), %v335_v1, %v334_v0  ;;  %v990_v3 = vld [vmem:[%s1183_s4] sm:$0xff] (!%p250_p3)   ;;  %vm443_vm0 = vcmask (!%p250_p3), 523264   ;;  %v992_v6 = vld [vmem:[%s1183_s4 + $0x10] sm:$0xff] (!%p250_p3)   ;;  %s855_s16 = sshll.u32 (!%p250_p3), %s1010_s21, 3  ;;  %vm666_vm9 = vcmask (!%p250_p3), 519168  }
   0x8   : > { %946 = vmatprep.subr.bf16.mxu1 (!%p250_p3), %v990_v3  ;;  %p305_p5 = scmp.lt.s32.totalorder (!%p250_p3), %s855_s16, 15  ;;  %v372_v14 = vshrl.u32 (!%p250_p3), %v371_v13, 7  ;;  %v333_v16 = vld [vmem:[%s1182_s3] sm:$0x3] (!%p250_p3)  ;;  %v993_v13 = vld [vmem:[%s1183_s4 + $0x18] sm:$0xff] (!%p250_p3)   ;;  %vm696_vm10 = vcmask (!%p250_p3), 516096  }
   0x9   : > { %v337_v5 = vmul.f32 (!%p250_p3), 0.0078125, %v336_v2  ;;  %947 = vmatpush3.bf16.msra.mxu1 (!%p250_p3), %v990_v3 }
   0xa   : > { %948 = vmatprep.subr.bf16.mxu1 (!%p250_p3), %v991_v4  ;;  %v373_v19 = vsub.s32 (!%p250_p3), 0, %v372_v14  ;;  %v385_v35 = vsub.s32 (!%p250_p3), 1, %v372_v14 }
   0xb   : > { %v338_v7 = vmul.f32 (!%p250_p3), %v337_v5, %v337_v5 }
   0xd   : > { %v340_v9 = vrot.slane (!%p250_p3), %v338_v7, 7  ;;  %949 = vmatpush3.bf16.msra.mxu1 (!%p250_p3), %v991_v4 }
   0xe   : > { %s1083_s29 = scalar_select %p295_p4, %s1010_s21, 1  ;;  %950 = vmatprep.subr.bf16.mxu1 %v992_v6 }
   0xf   : > { %v342_v10 = vsub.f32 %v337_v5, %v340_v9  ;;  %s1191_s16 = smov (!%p305_p5, %s855_s16), 15 }
  0x10   : > { %s886_s10 = sshll.u32 %s1083_s29, 5  ;;  %s856_s17 = sshll.u32 %s1191_s16, 2 }
  0x11   : > { %s1095_s13 = scalar_lea.vmem %s1179_s0, %s886_s10  ;;  %v343_v11 = vmax.f32 %v342_v10, 0.0  ;;  %951 = vmatpush3.bf16.msra.mxu1 %v992_v6  ;;  %s308_s20 = scalar_lea.vmem %s1180_s1, %s856_s17 }
  0x12   : > { %v986_v8 = vld [vmem:[%s1095_s13] sm:$0xff]   ;;  %v911_v20 = vld [vmem:[%s308_s20 + $0x8] sm:$0xff]   ;;  %v912_v22 = vld [vmem:[%s308_s20 + $0x10] sm:$0xff]   ;;  %952 = vmatprep.subr.bf16.mxu1 %v993_v13  ;;  %s1132_s7 = scalar_lea.vmem %s1184_s5, %s856_s17  ;;  %s859_s8 = sshll.u32 %s1083_s29, 1 }
  0x13   : > { %938 = vmatprep.mubr.msk.bf16.mxu0 %vm443_vm0, %v986_v8  ;;  %v344_v12 = vadd.f32 1e-05, %v343_v11  ;;  %v896_v18 = vld [vmem:[%s308_s20] sm:$0xff]   ;;  %v913_v23 = vld [vmem:[%s308_s20 + $0x18] sm:$0xff]   ;;  %v901_v28 = vunpack.c.l.bf16 %v911_v20  ;;  %v902_v29 = vunpack.c.h.bf16 %v911_v20  ;;  %v905_v30 = vunpack.c.l.bf16 %v912_v22  ;;  %v987_v10 = vld [vmem:[%s1095_s13 + $0x8] sm:$0xff]   ;;  %s322_s11 = scalar_lea.vmem %s1185_s6, %s859_s8 }
  0x14   : > { %v897_v24 = vunpack.c.l.bf16 %v896_v18  ;;  %v898_v25 = vunpack.c.h.bf16 %v896_v18  ;;  %v906_v31 = vunpack.c.h.bf16 %v912_v22  ;;  %v909_v32 = vunpack.c.l.bf16 %v913_v23  ;;  %v988_v11 = vld [vmem:[%s1095_s13 + $0x10] sm:$0xff]  }
  0x15   : > { %994 = vrsqrt.f32 %v344_v12  ;;  %v910_v33 = vunpack.c.h.bf16 %v913_v23  ;;  %v989_v12 = vld [vmem:[%s1095_s13 + $0x18] sm:$0xff]   ;;  %953 = vmatpush3.bf16.msra.mxu1 %v993_v13 }
  0x1f   : > { %v995_v15 = vpop.eup %994 }
  0x20   : > { %v347_v17 = vrot.slane %v995_v15, 1 }
  0x22   : > { %v349_v21 = vmul.f32 %v347_v17, %v333_v16 }
  0x24   : > { %v350_v26 = vmul.f32 %v349_v21, %v337_v5  ;;  %v374_v27 = vrot.slane %v349_v21, %v373_v19 }
  0x26   : > { %v352_v34 = vrot.slane %v350_v26, 7  ;;  %v375_v36 = vmul.f32 %v897_v24, %v374_v27  ;;  %v376_v38 = vmul.f32 %v898_v25, %v374_v27  ;;  %v377_v39 = vmul.f32 %v901_v28, %v374_v27 }
  0x27   : > { %v378_v40 = vmul.f32 %v902_v29, %v374_v27  ;;  %v379_v41 = vmul.f32 %v905_v30, %v374_v27  ;;  %v380_v42 = vmul.f32 %v906_v31, %v374_v27  ;;  %v381_v43 = vmul.f32 %v909_v32, %v374_v27 }
  0x28   : > { %v354_v37 = vsub.f32 %v333_v16, %v352_v34  ;;  %v382_v44 = vmul.f32 %v910_v33, %v374_v27 }
  0x2a   : > { %v386_v45 = vrot.slane %v354_v37, %v385_v35 }
  0x2c   : > { %v387_v46 = vadd.f32 %v386_v45, %v375_v36  ;;  %v388_v47 = vadd.f32 %v386_v45, %v376_v38  ;;  %v389_v48 = vadd.f32 %v386_v45, %v377_v39  ;;  %v390_v49 = vadd.f32 %v386_v45, %v378_v40 }
  0x2d   : > { %v391_v50 = vadd.f32 %v386_v45, %v379_v41  ;;  %v392_v51 = vadd.f32 %v386_v45, %v380_v42  ;;  %v393_v52 = vadd.f32 %v386_v45, %v381_v43  ;;  %v394_v53 = vadd.f32 %v386_v45, %v382_v44 }
  0x2e   : > { %vm395_vm1 = vcmp.ge.f32.partialorder %v387_v46, 0.0  ;;  %vm396_vm2 = vcmp.ge.f32.partialorder %v388_v47, 0.0  ;;  %v403_v54 = vmul.f32 0.2, %v387_v46  ;;  %v404_v55 = vmul.f32 0.2, %v388_v47 }
  0x2f   : > { %vm397_vm3 = vcmp.ge.f32.partialorder %v389_v48, 0.0  ;;  %vm398_vm4 = vcmp.ge.f32.partialorder %v390_v49, 0.0  ;;  %v405_v56 = vmul.f32 0.2, %v389_v48  ;;  %v406_v57 = vmul.f32 0.2, %v390_v49 }
  0x30   : > { %v411_v58 = vsel %vm395_vm1, %v387_v46, %v403_v54  ;;  %v412_v59 = vsel %vm396_vm2, %v388_v47, %v404_v55  ;;  %vm399_vm5 = vcmp.ge.f32.partialorder %v391_v50, 0.0  ;;  %vm400_vm6 = vcmp.ge.f32.partialorder %v392_v51, 0.0 }
  0x31   : > { %v419_v60 = vpack.c.bf16 %v412_v59, %v411_v58  ;;  %v413_v61 = vsel %vm397_vm3, %v389_v48, %v405_v56  ;;  %v414_v62 = vsel %vm398_vm4, %v390_v49, %v406_v57  ;;  %v407_v63 = vmul.f32 0.2, %v391_v50 }
  0x32   : > { %v420_v0 = vpack.c.bf16 %v414_v62, %v413_v61  ;;  %v408_v1 = vmul.f32 0.2, %v392_v51  ;;  %vm401_vm7 = vcmp.ge.f32.partialorder %v393_v52, 0.0  ;;  %vm402_vm8 = vcmp.ge.f32.partialorder %v394_v53, 0.0 }
  0x33   : > { %930 = vmatprep.subr.bf16.mxu0 %v419_v60  ;;  %v415_v2 = vsel %vm399_vm5, %v391_v50, %v407_v63  ;;  %v409_v3 = vmul.f32 0.2, %v393_v52  ;;  %v410_v4 = vmul.f32 0.2, %v394_v53 }
  0x34   : > { %931 = vmatpush3.bf16.msra.mxu0 %v419_v60  ;;  %v416_v5 = vsel %vm400_vm6, %v392_v51, %v408_v1 }
  0x35   : > { %932 = vmatprep.subr.bf16.mxu0 %v420_v0  ;;  %v421_v6 = vpack.c.bf16 %v416_v5, %v415_v2  ;;  %v417_v7 = vsel %vm401_vm7, %v393_v52, %v409_v3  ;;  %v418_v8 = vsel %vm402_vm8, %v394_v53, %v410_v4 }
  0x36   : > { %v422_v9 = vpack.c.bf16 %v418_v8, %v417_v7 }
  0x38   : > { %933 = vmatpush3.bf16.msra.mxu0 %v420_v0 }
  0x39   : > { %934 = vmatprep.subr.bf16.mxu0 %v421_v6 }
  0x3c   : > { %935 = vmatpush3.bf16.msra.mxu0 %v421_v6 }
  0x3d   : > { %936 = vmatprep.subr.bf16.mxu0 %v422_v9 }
  0x40   : > { %937 = vmatpush3.bf16.msra.mxu0 %v422_v9 }
  0x43   : > { %939 = vmatmul.mubr.msk.bf16.vlgmr.msra.gmra.mrb[0].mxu0 %vm443_vm0, %v987_v10 }
  0x44   : > { %942 = vmatprep.mubr.msk.bf16.mxu0 %vm443_vm0, %v988_v11 }
  0x4b   : > { %943 = vmatmul.mubr.msk.bf16.gmra.mrb[4].mxu0 %vm443_vm0, %v989_v12 }
 0x116   : > { %v940_v14 = vpop.f32.mrb[0].mxu0 }
 0x117   : > { %v490_v15 = vpop.f32.mrb[1].mxu0 }
 0x118   : > { %v941_v16 = vpop.f32.mrb[2].mxu0 }
 0x119   : > { %v522_v17 = vpack.c.bf16 %v941_v16, %v940_v14  ;;  %v493_v18 = vpop.f32.mrb[3].mxu0 }
 0x11a   : > { %v521_v19 = vpack.c.bf16 %v493_v18, %v490_v15 }
 0x11c   : > { %954 = vmatprep.mubr.msk.bf16.mxu1 %vm443_vm0, %v521_v19 }
 0x11d   : > { %955 = vmatmul.mubr.msk.bf16.vlgmr.msra.gmra.mrb[0].mxu1 %vm443_vm0, %v522_v17 }
 0x11e   : > { %v944_v20 = vpop.f32.mrb[4].mxu0 }
 0x11f   : > { %v506_v21 = vpop.f32.mrb[5].mxu0 }
 0x120   : > { %v945_v22 = vpop.f32.mrb[6].mxu0 }
 0x121   : > { %v524_v23 = vpack.c.bf16 %v945_v22, %v944_v20  ;;  %v509_v24 = vpop.f32.mrb[7].mxu0 }
 0x122   : > { %v523_v25 = vpack.c.bf16 %v509_v24, %v506_v21 }
 0x124   : > { %958 = vmatprep.mubr.msk.bf16.mxu1 %vm443_vm0, %v523_v25 }
 0x125   : > { %959 = vmatmul.mubr.msk.bf16.gmra.mrb[4].mxu1 %vm443_vm0, %v524_v23 }
 0x1f0   : > { %v956_v26 = vpop.f32.mrb[0].mxu1 }
 0x1f1   : > { %v889_v27 = vpack.c.bf16 %v956_v26, %v956_v26  ;;  %v603_v28 = vpop.f32.mrb[1].mxu1  ;;  %v700_v32 = vmul.f32 %v956_v26, %v956_v26  ;;  %v678_v41 = vsel %vm443_vm0, %v956_v26, 0.0 }
 0x1f2   : > { %v887_v29 = vpack.c.bf16 %v603_v28, %v603_v28  ;;  %v698_v30 = vmul.f32 %v603_v28, %v603_v28  ;;  %v957_v31 = vpop.f32.mrb[2].mxu1  ;;  %v675_v35 = vsel %vm443_vm0, %v603_v28, 0.0 }
 0x1f3   : > { %669 = vst.msk [vmem:[%s1132_s7 + $0x8] sm:$0xf] %vm666_vm9, %v889_v27  ;;  %v890_v33 = vpack.c.bf16 %v957_v31, %v957_v31  ;;  %v606_v34 = vpop.f32.mrb[3].mxu1  ;;  %v701_v39 = vmul.f32 %v957_v31, %v957_v31  ;;  %v709_v46 = vsel %vm443_vm0, %v700_v32, 0.0  ;;  %v680_v48 = vsel %vm443_vm0, %v957_v31, 0.0 }
 0x1f4   : > { %667 = vst.msk [vmem:[%s1132_s7] sm:$0xf] %vm666_vm9, %v887_v29  ;;  %v888_v36 = vpack.c.bf16 %v606_v34, %v606_v34  ;;  %v676_v37 = vsel %vm443_vm0, %v606_v34, 0.0  ;;  %v699_v38 = vmul.f32 %v606_v34, %v606_v34  ;;  %v706_v42 = vsel %vm443_vm0, %v698_v30, 0.0 }
 0x1f5   : > { %670 = vst.msk [vmem:[%s1132_s7 + $0xc] sm:$0xf] %vm666_vm9, %v890_v33  ;;  %v677_v40 = vadd.f32 %v676_v37, %v675_v35  ;;  %v711_v49 = vsel %vm443_vm0, %v701_v39, 0.0 }
 0x1f6   : > { %668 = vst.msk [vmem:[%s1132_s7 + $0x4] sm:$0xf] %vm666_vm9, %v888_v36  ;;  %v707_v43 = vsel %vm443_vm0, %v699_v38, 0.0 }
 0x1f7   : > { %v679_v44 = vadd.f32 %v678_v41, %v677_v40  ;;  %v708_v45 = vadd.f32 %v707_v43, %v706_v42 }
 0x1f8   : > { %v960_v47 = vpop.f32.mrb[4].mxu1 }
 0x1f9   : > { %v710_v50 = vadd.f32 %v709_v46, %v708_v45  ;;  %v893_v51 = vpack.c.bf16 %v960_v47, %v960_v47  ;;  %v619_v52 = vpop.f32.mrb[5].mxu1  ;;  %v681_v54 = vadd.f32 %v680_v48, %v679_v44  ;;  %v704_v0 = vmul.f32 %v960_v47, %v960_v47 }
 0x1fa   : > { %v891_v53 = vpack.c.bf16 %v619_v52, %v619_v52  ;;  %v682_v55 = vsel %vm443_vm0, %v619_v52, 0.0  ;;  %v702_v56 = vmul.f32 %v619_v52, %v619_v52  ;;  %v961_v57 = vpop.f32.mrb[6].mxu1  ;;  %v686_v5 = vsel %vm443_vm0, %v960_v47, 0.0 }
 0x1fb   : > { %673 = vst.msk [vmem:[%s1132_s7 + $0x18] sm:$0xf] %vm666_vm9, %v893_v51  ;;  %v712_v58 = vadd.f32 %v711_v49, %v710_v50  ;;  %v894_v59 = vpack.c.bf16 %v961_v57, %v961_v57  ;;  %v622_v60 = vpop.f32.mrb[7].mxu1  ;;  %v683_v61 = vadd.f32 %v682_v55, %v681_v54  ;;  %v705_v6 = vmul.f32 %v961_v57, %v961_v57 }
 0x1fc   : > { %671 = vst.msk [vmem:[%s1132_s7 + $0x10] sm:$0xf] %vm666_vm9, %v891_v53  ;;  %v713_v62 = vsel %vm443_vm0, %v702_v56, 0.0  ;;  %v892_v63 = vpack.c.bf16 %v622_v60, %v622_v60  ;;  %v684_v2 = vsel %vm443_vm0, %v622_v60, 0.0  ;;  %v703_v3 = vmul.f32 %v622_v60, %v622_v60 }
 0x1fd   : > { %v714_v1 = vadd.f32 %v713_v62, %v712_v58  ;;  %674 = vst.msk [vmem:[%s1132_s7 + $0x1c] sm:$0xf] %vm666_vm9, %v894_v59  ;;  %v685_v4 = vadd.f32 %v684_v2, %v683_v61  ;;  %v717_v10 = vsel %vm443_vm0, %v704_v0, 0.0  ;;  %v688_v11 = vsel %vm443_vm0, %v961_v57, 0.0 }
 0x1fe   : > { %672 = vst.msk [vmem:[%s1132_s7 + $0x14] sm:$0xf] %vm666_vm9, %v892_v63  ;;  %v715_v7 = vsel %vm443_vm0, %v703_v3, 0.0  ;;  %v719_v14 = vsel %vm443_vm0, %v705_v6, 0.0 }
 0x1ff   : > { %v687_v8 = vadd.f32 %v686_v5, %v685_v4  ;;  %v716_v9 = vadd.f32 %v715_v7, %v714_v1 }
 0x201   : > { %v689_v12 = vadd.f32 %v688_v11, %v687_v8  ;;  %v718_v13 = vadd.f32 %v717_v10, %v716_v9 }
 0x203   : > { %v690_v15 = vrot.slane %v689_v12, 4  ;;  %v720_v16 = vadd.f32 %v719_v14, %v718_v13 }
 0x205   : > { %v691_v17 = vadd.f32 %v690_v15, %v689_v12  ;;  %v721_v18 = vrot.slane %v720_v16, 4 }
 0x207   : > { %v692_v19 = vrot.slane %v691_v17, 2  ;;  %v722_v20 = vadd.f32 %v721_v18, %v720_v16 }
 0x209   : > { %v693_v21 = vadd.f32 %v692_v19, %v691_v17  ;;  %v723_v22 = vrot.slane %v722_v20, 2 }
 0x20b   : > { %v694_v23 = vrot.slane %v693_v21, 1  ;;  %v724_v24 = vadd.f32 %v723_v22, %v722_v20 }
 0x20d   : > { %v695_v25 = vadd.f32 %v694_v23, %v693_v21  ;;  %v725_v26 = vrot.slane %v724_v24, 1 }
 0x20f   : > { %697 = vst.msk [vmem:[%s322_s11] sm:$0x1] %vm696_vm10, %v695_v25  ;;  %v726_v27 = vadd.f32 %v725_v26, %v724_v24 }
 0x211   : > { %727 = vst.msk [vmem:[%s322_s11 + $0x1] sm:$0x1] %vm696_vm10, %v726_v27 }
 0x212 PF: > { %s17_s23 = sadd.s32 1, %s1018_s23   ;;  %s1186_s21 = smov %s1014_s22 }
 0x213   : > { %p14_p6 = scmp.ge.s32.totalorder %s17_s23, 4   ;;  %s1187_s22 = smov %s1189_s24 }
 0x215   :  { %16 = sbr.rel (!%p14_p6) target bundleno = 2 (0x2), region = 85 }

// kernel: gcn_r_forward.9
= control target key start
LH: loop header
LB: loop body
LE: loop exit
PB: predicated region body
PF: predicated region fallthrough
CT: control target
= control target key end

     0   :  { %s1060_s21 = smov 0   ;;  %s1062_s22 = smov 0   ;;  %s1150_s0 = inlined_call_operand.vmem [shape: bf16[2,64,64], index: 0, kind: input, shape index: {}]   ;;  %s1151_s1 = inlined_call_operand.vmem [shape: bf16[128,64], index: 1, kind: input, shape index: {}]   ;;  %s1152_s2 = inlined_call_operand.vmem [shape: f32[2,2,64], index: 2, kind: input, shape index: {}]   ;;  %s1153_s3 = inlined_call_operand.vmem [shape: f32[2,64], index: 3, kind: input, shape index: {}]   ;;  %s1154_s4 = inlined_call_operand.vmem [shape: bf16[64,128], index: 4, kind: input, shape index: {}]   ;;  %s1155_s5 = inlined_call_operand.vmem [shape: bf16[128,128], index: 5, kind: output, shape index: {0}]   ;;  %s1156_s6 = inlined_call_operand.vmem [shape: f32[2,2,128], index: 6, kind: output, shape index: {1}]  }
   0x1   :  { %s1064_s23 = smov 0  }
   0x2 LB: > { %s29_s24 = sadd.s32 1, %s1019_s22  ;;  %p834_p0 = scmp.ge.s32.totalorder %s1023_s23, 1  ;;  %s1023_s23 = sphi %s1064_s23, %s17_s23   ;;  %s1019_s22 = sphi %s1062_s22, %s1158_s22   ;;  %s1015_s21 = sphi %s1060_s21, %s1157_s21  }
   0x3   : > { %p31_p1 = scmp.ge.s32.totalorder %s29_s24, 2  ;;  %p249_p2 = scmp.lt.s32.totalorder %s1023_s23, 3 }
   0x5   : > { %s1160_s24 = smov (%p31_p1, %s29_s24), 0  ;;  %p250_p3 = pnand %p834_p0, %p249_p2 }
   0x6   : > { %v334_v0 = vld [vmem:[%s1152_s2] sm:$0x3] (!%p250_p3)  ;;  %p295_p4 = scmp.lt.s32.totalorder (!%p250_p3), %s1015_s21, 1  ;;  %v335_v1 = vld [vmem:[%s1152_s2 + $0x2] sm:$0x3] (!%p250_p3)  ;;  %v996_v4 = vld [vmem:[%s1154_s4 + $0x8] sm:$0xff] (!%p250_p3)   ;;  %v371_v13 = vlaneseq (!%p250_p3) }
   0x7   : > { %253 = sbr.rel (%p250_p3) target bundleno = 529 (0x211), region = 40  ;;  %v336_v2 = vadd.f32 (!%p250_p3), %v335_v1, %v334_v0  ;;  %v995_v3 = vld [vmem:[%s1154_s4] sm:$0xff] (!%p250_p3)   ;;  %vm443_vm0 = vcmask (!%p250_p3), 523264   ;;  %v997_v6 = vld [vmem:[%s1154_s4 + $0x10] sm:$0xff] (!%p250_p3)   ;;  %s837_s16 = sshll.u32 (!%p250_p3), %s1015_s21, 3 }
   0x8   : > { %951 = vmatprep.subr.bf16.mxu1 (!%p250_p3), %v995_v3  ;;  %p305_p5 = scmp.lt.s32.totalorder (!%p250_p3), %s837_s16, 15  ;;  %v372_v14 = vshrl.u32 (!%p250_p3), %v371_v13, 7  ;;  %v333_v16 = vld [vmem:[%s1153_s3] sm:$0x3] (!%p250_p3)  ;;  %v998_v13 = vld [vmem:[%s1154_s4 + $0x18] sm:$0xff] (!%p250_p3)  }
   0x9   : > { %v337_v5 = vmul.f32 (!%p250_p3), 0.0078125, %v336_v2  ;;  %952 = vmatpush3.bf16.msra.mxu1 (!%p250_p3), %v995_v3 }
   0xa   : > { %953 = vmatprep.subr.bf16.mxu1 (!%p250_p3), %v996_v4  ;;  %v373_v19 = vsub.s32 (!%p250_p3), 0, %v372_v14  ;;  %v385_v35 = vsub.s32 (!%p250_p3), 1, %v372_v14 }
   0xb   : > { %v338_v7 = vmul.f32 (!%p250_p3), %v337_v5, %v337_v5 }
   0xd   : > { %v340_v9 = vrot.slane (!%p250_p3), %v338_v7, 7  ;;  %954 = vmatpush3.bf16.msra.mxu1 (!%p250_p3), %v996_v4 }
   0xe   : > { %s1088_s29 = scalar_select %p295_p4, %s1015_s21, 1  ;;  %955 = vmatprep.subr.bf16.mxu1 %v997_v6 }
   0xf   : > { %v342_v10 = vsub.f32 %v337_v5, %v340_v9  ;;  %s1162_s16 = smov (!%p305_p5, %s837_s16), 15 }
  0x10   : > { %s868_s10 = sshll.u32 %s1088_s29, 5  ;;  %s838_s17 = sshll.u32 %s1162_s16, 2 }
  0x11   : > { %s1100_s13 = scalar_lea.vmem %s1150_s0, %s868_s10  ;;  %v343_v11 = vmax.f32 %v342_v10, 0.0  ;;  %956 = vmatpush3.bf16.msra.mxu1 %v997_v6  ;;  %s308_s20 = scalar_lea.vmem %s1151_s1, %s838_s17 }
  0x12   : > { %v991_v8 = vld [vmem:[%s1100_s13] sm:$0xff]   ;;  %v913_v20 = vld [vmem:[%s308_s20 + $0x8] sm:$0xff]   ;;  %v914_v22 = vld [vmem:[%s308_s20 + $0x10] sm:$0xff]   ;;  %957 = vmatprep.subr.bf16.mxu1 %v998_v13  ;;  %s315_s7 = scalar_lea.vmem %s1155_s5, %s838_s17  ;;  %s841_s8 = sshll.u32 %s1088_s29, 1 }
  0x13   : > { %943 = vmatprep.mubr.msk.bf16.mxu0 %vm443_vm0, %v991_v8  ;;  %v344_v12 = vadd.f32 1e-05, %v343_v11  ;;  %v878_v18 = vld [vmem:[%s308_s20] sm:$0xff]   ;;  %v915_v23 = vld [vmem:[%s308_s20 + $0x18] sm:$0xff]   ;;  %v883_v28 = vunpack.c.l.bf16 %v913_v20  ;;  %v884_v29 = vunpack.c.h.bf16 %v913_v20  ;;  %v887_v30 = vunpack.c.l.bf16 %v914_v22  ;;  %v992_v10 = vld [vmem:[%s1100_s13 + $0x8] sm:$0xff]   ;;  %s322_s11 = scalar_lea.vmem %s1156_s6, %s841_s8 }
  0x14   : > { %v879_v24 = vunpack.c.l.bf16 %v878_v18  ;;  %v880_v25 = vunpack.c.h.bf16 %v878_v18  ;;  %v888_v31 = vunpack.c.h.bf16 %v914_v22  ;;  %v891_v32 = vunpack.c.l.bf16 %v915_v23  ;;  %v993_v11 = vld [vmem:[%s1100_s13 + $0x10] sm:$0xff]  }
  0x15   : > { %999 = vrsqrt.f32 %v344_v12  ;;  %v892_v33 = vunpack.c.h.bf16 %v915_v23  ;;  %v994_v12 = vld [vmem:[%s1100_s13 + $0x18] sm:$0xff]   ;;  %958 = vmatpush3.bf16.msra.mxu1 %v998_v13 }
  0x1f   : > { %v1000_v15 = vpop.eup %999 }
  0x20   : > { %v347_v17 = vrot.slane %v1000_v15, 1 }
  0x22   : > { %v349_v21 = vmul.f32 %v347_v17, %v333_v16 }
  0x24   : > { %v350_v26 = vmul.f32 %v349_v21, %v337_v5  ;;  %v374_v27 = vrot.slane %v349_v21, %v373_v19 }
  0x26   : > { %v352_v34 = vrot.slane %v350_v26, 7  ;;  %v375_v36 = vmul.f32 %v879_v24, %v374_v27  ;;  %v376_v38 = vmul.f32 %v880_v25, %v374_v27  ;;  %v377_v39 = vmul.f32 %v883_v28, %v374_v27 }
  0x27   : > { %v378_v40 = vmul.f32 %v884_v29, %v374_v27  ;;  %v379_v41 = vmul.f32 %v887_v30, %v374_v27  ;;  %v380_v42 = vmul.f32 %v888_v31, %v374_v27  ;;  %v381_v43 = vmul.f32 %v891_v32, %v374_v27 }
  0x28   : > { %v354_v37 = vsub.f32 %v333_v16, %v352_v34  ;;  %v382_v44 = vmul.f32 %v892_v33, %v374_v27 }
  0x2a   : > { %v386_v45 = vrot.slane %v354_v37, %v385_v35 }
  0x2c   : > { %v387_v46 = vadd.f32 %v386_v45, %v375_v36  ;;  %v388_v47 = vadd.f32 %v386_v45, %v376_v38  ;;  %v389_v48 = vadd.f32 %v386_v45, %v377_v39  ;;  %v390_v49 = vadd.f32 %v386_v45, %v378_v40 }
  0x2d   : > { %v391_v50 = vadd.f32 %v386_v45, %v379_v41  ;;  %v392_v51 = vadd.f32 %v386_v45, %v380_v42  ;;  %v393_v52 = vadd.f32 %v386_v45, %v381_v43  ;;  %v394_v53 = vadd.f32 %v386_v45, %v382_v44 }
  0x2e   : > { %vm395_vm1 = vcmp.ge.f32.partialorder %v387_v46, 0.0  ;;  %vm396_vm2 = vcmp.ge.f32.partialorder %v388_v47, 0.0  ;;  %v403_v54 = vmul.f32 0.2, %v387_v46  ;;  %v404_v55 = vmul.f32 0.2, %v388_v47 }
  0x2f   : > { %vm397_vm3 = vcmp.ge.f32.partialorder %v389_v48, 0.0  ;;  %vm398_vm4 = vcmp.ge.f32.partialorder %v390_v49, 0.0  ;;  %v405_v56 = vmul.f32 0.2, %v389_v48  ;;  %v406_v57 = vmul.f32 0.2, %v390_v49 }
  0x30   : > { %v411_v58 = vsel %vm395_vm1, %v387_v46, %v403_v54  ;;  %v412_v59 = vsel %vm396_vm2, %v388_v47, %v404_v55  ;;  %vm399_vm5 = vcmp.ge.f32.partialorder %v391_v50, 0.0  ;;  %vm400_vm6 = vcmp.ge.f32.partialorder %v392_v51, 0.0 }
  0x31   : > { %v419_v60 = vpack.c.bf16 %v412_v59, %v411_v58  ;;  %v413_v61 = vsel %vm397_vm3, %v389_v48, %v405_v56  ;;  %v414_v62 = vsel %vm398_vm4, %v390_v49, %v406_v57  ;;  %v407_v63 = vmul.f32 0.2, %v391_v50 }
  0x32   : > { %v420_v0 = vpack.c.bf16 %v414_v62, %v413_v61  ;;  %v408_v1 = vmul.f32 0.2, %v392_v51  ;;  %vm401_vm7 = vcmp.ge.f32.partialorder %v393_v52, 0.0  ;;  %vm402_vm8 = vcmp.ge.f32.partialorder %v394_v53, 0.0 }
  0x33   : > { %935 = vmatprep.subr.bf16.mxu0 %v419_v60  ;;  %v415_v2 = vsel %vm399_vm5, %v391_v50, %v407_v63  ;;  %v409_v3 = vmul.f32 0.2, %v393_v52  ;;  %v410_v4 = vmul.f32 0.2, %v394_v53 }
  0x34   : > { %936 = vmatpush3.bf16.msra.mxu0 %v419_v60  ;;  %v416_v5 = vsel %vm400_vm6, %v392_v51, %v408_v1 }
  0x35   : > { %937 = vmatprep.subr.bf16.mxu0 %v420_v0  ;;  %v421_v6 = vpack.c.bf16 %v416_v5, %v415_v2  ;;  %v417_v7 = vsel %vm401_vm7, %v393_v52, %v409_v3  ;;  %v418_v8 = vsel %vm402_vm8, %v394_v53, %v410_v4 }
  0x36   : > { %v422_v9 = vpack.c.bf16 %v418_v8, %v417_v7 }
  0x38   : > { %938 = vmatpush3.bf16.msra.mxu0 %v420_v0 }
  0x39   : > { %939 = vmatprep.subr.bf16.mxu0 %v421_v6 }
  0x3c   : > { %940 = vmatpush3.bf16.msra.mxu0 %v421_v6 }
  0x3d   : > { %941 = vmatprep.subr.bf16.mxu0 %v422_v9 }
  0x40   : > { %942 = vmatpush3.bf16.msra.mxu0 %v422_v9 }
  0x43   : > { %944 = vmatmul.mubr.msk.bf16.vlgmr.msra.gmra.mrb[0].mxu0 %vm443_vm0, %v992_v10 }
  0x44   : > { %947 = vmatprep.mubr.msk.bf16.mxu0 %vm443_vm0, %v993_v11 }
  0x4b   : > { %948 = vmatmul.mubr.msk.bf16.gmra.mrb[4].mxu0 %vm443_vm0, %v994_v12 }
 0x116   : > { %v945_v14 = vpop.f32.mrb[0].mxu0 }
 0x117   : > { %v490_v15 = vpop.f32.mrb[1].mxu0 }
 0x118   : > { %v946_v16 = vpop.f32.mrb[2].mxu0 }
 0x119   : > { %v522_v17 = vpack.c.bf16 %v946_v16, %v945_v14  ;;  %v493_v18 = vpop.f32.mrb[3].mxu0 }
 0x11a   : > { %v521_v19 = vpack.c.bf16 %v493_v18, %v490_v15 }
 0x11c   : > { %959 = vmatprep.mubr.msk.bf16.mxu1 %vm443_vm0, %v521_v19 }
 0x11d   : > { %960 = vmatmul.mubr.msk.bf16.vlgmr.msra.gmra.mrb[0].mxu1 %vm443_vm0, %v522_v17 }
 0x11e   : > { %v949_v20 = vpop.f32.mrb[4].mxu0 }
 0x11f   : > { %v506_v21 = vpop.f32.mrb[5].mxu0 }
 0x120   : > { %v950_v22 = vpop.f32.mrb[6].mxu0 }
 0x121   : > { %v524_v23 = vpack.c.bf16 %v950_v22, %v949_v20  ;;  %v509_v24 = vpop.f32.mrb[7].mxu0 }
 0x122   : > { %v523_v25 = vpack.c.bf16 %v509_v24, %v506_v21 }
 0x124   : > { %963 = vmatprep.mubr.msk.bf16.mxu1 %vm443_vm0, %v523_v25 }
 0x125   : > { %964 = vmatmul.mubr.msk.bf16.gmra.mrb[4].mxu1 %vm443_vm0, %v524_v23 }
 0x1f0   : > { %v961_v26 = vpop.f32.mrb[0].mxu1 }
 0x1f1   : > { %v603_v27 = vpop.f32.mrb[1].mxu1  ;;  %v690_v35 = vmul.f32 %v961_v26, %v961_v26 }
 0x1f2   : > { %v962_v28 = vpop.f32.mrb[2].mxu1  ;;  %v688_v31 = vmul.f32 %v603_v27, %v603_v27 }
 0x1f3   : > { %v901_v29 = vpack.c.bf16 %v962_v28, %v961_v26  ;;  %v606_v30 = vpop.f32.mrb[3].mxu1  ;;  %v691_v38 = vmul.f32 %v962_v28, %v962_v28 }
 0x1f4   : > { %v896_v32 = vpack.c.bf16 %v606_v30, %v603_v27  ;;  %v674_v33 = vadd.f32 %v606_v30, %v603_v27  ;;  %v689_v34 = vmul.f32 %v606_v30, %v606_v30 }
 0x1f5   : > { %916 = vst [vmem:[%s315_s7 + $0x8] sm:$0xff] %v901_v29  }
 0x1f6   : > { %897 = vst [vmem:[%s315_s7] sm:$0xff] %v896_v32   ;;  %v675_v36 = vadd.f32 %v961_v26, %v674_v33  ;;  %v696_v37 = vadd.f32 %v689_v34, %v688_v31 }
 0x1f8   : > { %v697_v39 = vadd.f32 %v696_v37, %v690_v35  ;;  %v965_v40 = vpop.f32.mrb[4].mxu1  ;;  %v676_v41 = vadd.f32 %v962_v28, %v675_v36 }
 0x1f9   : > { %v619_v42 = vpop.f32.mrb[5].mxu1  ;;  %v694_v53 = vmul.f32 %v965_v40, %v965_v40 }
 0x1fa   : > { %v677_v43 = vadd.f32 %v676_v41, %v619_v42  ;;  %v692_v44 = vmul.f32 %v619_v42, %v619_v42  ;;  %v698_v45 = vadd.f32 %v697_v39, %v691_v38  ;;  %v966_v46 = vpop.f32.mrb[6].mxu1 }
 0x1fb   : > { %v911_v47 = vpack.c.bf16 %v966_v46, %v965_v40  ;;  %v622_v48 = vpop.f32.mrb[7].mxu1  ;;  %v695_v56 = vmul.f32 %v966_v46, %v966_v46 }
 0x1fc   : > { %v699_v49 = vadd.f32 %v698_v45, %v692_v44  ;;  %v906_v50 = vpack.c.bf16 %v622_v48, %v619_v42  ;;  %v678_v51 = vadd.f32 %v677_v43, %v622_v48  ;;  %v693_v52 = vmul.f32 %v622_v48, %v622_v48 }
 0x1fd   : > { %918 = vst [vmem:[%s315_s7 + $0x18] sm:$0xff] %v911_v47  }
 0x1fe   : > { %917 = vst [vmem:[%s315_s7 + $0x10] sm:$0xff] %v906_v50   ;;  %v679_v54 = vadd.f32 %v965_v40, %v678_v51  ;;  %v700_v55 = vadd.f32 %v699_v49, %v693_v52 }
 0x200   : > { %v680_v57 = vadd.f32 %v966_v46, %v679_v54  ;;  %v701_v58 = vadd.f32 %v700_v55, %v694_v53 }
 0x202   : > { %v681_v59 = vrot.slane %v680_v57, 4  ;;  %v702_v60 = vadd.f32 %v701_v58, %v695_v56 }
 0x204   : > { %v682_v61 = vadd.f32 %v681_v59, %v680_v57  ;;  %v703_v62 = vrot.slane %v702_v60, 4 }
 0x206   : > { %v683_v63 = vrot.slane %v682_v61, 2  ;;  %v704_v0 = vadd.f32 %v703_v62, %v702_v60 }
 0x208   : > { %v684_v1 = vadd.f32 %v683_v63, %v682_v61  ;;  %v705_v2 = vrot.slane %v704_v0, 2 }
 0x20a   : > { %v685_v3 = vrot.slane %v684_v1, 1  ;;  %v706_v4 = vadd.f32 %v705_v2, %v704_v0 }
 0x20c   : > { %v686_v5 = vadd.f32 %v685_v3, %v684_v1  ;;  %v707_v6 = vrot.slane %v706_v4, 1 }
 0x20e   : > { %687 = vst [vmem:[%s322_s11] sm:$0x1] %v686_v5  ;;  %v708_v7 = vadd.f32 %v707_v6, %v706_v4 }
 0x210   : > { %709 = vst [vmem:[%s322_s11 + $0x1] sm:$0x1] %v708_v7 }
 0x211 PF: > { %s17_s23 = sadd.s32 1, %s1023_s23   ;;  %s1157_s21 = smov %s1019_s22 }
 0x212   : > { %p14_p6 = scmp.ge.s32.totalorder %s17_s23, 4   ;;  %s1158_s22 = smov %s1160_s24 }
 0x214   :  { %16 = sbr.rel (!%p14_p6) target bundleno = 2 (0x2), region = 85 }

// kernel: gcn_r_forward.10
= control target key start
LH: loop header
LB: loop body
LE: loop exit
PB: predicated region body
PF: predicated region fallthrough
CT: control target
= control target key end

     0   :  { %s1225_s21 = smov 0   ;;  %s1227_s22 = smov 0   ;;  %s1417_s0 = inlined_call_operand.vmem [shape: bf16[2,64,64], index: 0, kind: input, shape index: {}]   ;;  %s1418_s1 = inlined_call_operand.vmem [shape: bf16[128,128], index: 1, kind: input, shape index: {}]   ;;  %s1419_s2 = inlined_call_operand.vmem [shape: f32[2,2,128], index: 2, kind: input, shape index: {}]   ;;  %s1420_s3 = inlined_call_operand.vmem [shape: f32[2,128], index: 3, kind: input, shape index: {}]   ;;  %s1421_s4 = inlined_call_operand.vmem [shape: bf16[128,256], index: 4, kind: input, shape index: {}]   ;;  %s1422_s5 = inlined_call_operand.vmem [shape: bf16[128,256], index: 5, kind: output, shape index: {0}]   ;;  %s1423_s6 = inlined_call_operand.vmem [shape: f32[2,2,256], index: 6, kind: output, shape index: {1}]  }
   0x1   :  { %s1229_s23 = smov 0  }
   0x2 LB: > { %s29_s24 = sadd.s32 1, %s1182_s22  ;;  %p993_p0 = scmp.ge.s32.totalorder %s1186_s23, 1  ;;  %s1186_s23 = sphi %s1229_s23, %s17_s23   ;;  %s1182_s22 = sphi %s1227_s22, %s1425_s22   ;;  %s1178_s21 = sphi %s1225_s21, %s1424_s21  }
   0x3   : > { %p31_p1 = scmp.ge.s32.totalorder %s29_s24, 2  ;;  %p249_p2 = scmp.lt.s32.totalorder %s1186_s23, 3 }
   0x5   : > { %s1427_s24 = smov (%p31_p1, %s29_s24), 0  ;;  %p250_p3 = pnand %p993_p0, %p249_p2 }
   0x6   : > { %v338_v0 = vld [vmem:[%s1419_s2] sm:$0x3] (!%p250_p3)  ;;  %p297_p4 = scmp.lt.s32.totalorder (!%p250_p3), %s1178_s21, 1  ;;  %v339_v1 = vld [vmem:[%s1419_s2 + $0x2] sm:$0x3] (!%p250_p3)  ;;  %vm447_vm0 = vcmask (!%p250_p3), 523264   ;;  %v375_v21 = vlaneseq (!%p250_p3) }
   0x7   : > { %253 = sbr.rel (%p250_p3) target bundleno = 538 (0x21a), region = 40  ;;  %v340_v2 = vadd.f32 (!%p250_p3), %v339_v1, %v338_v0  ;;  %v1258_v3 = vld [vmem:[%s1421_s4 + $0x4] ss:$8 sps:$4 sm:$0xff] (!%p250_p3)   ;;  %v1263_v4 = vld [vmem:[%s1421_s4] ss:$8 sps:$4 sm:$0xff] (!%p250_p3)   ;;  %s996_s26 = sshll.u32 (!%p250_p3), %s1178_s21, 3 }
   0x8   : > { %v1268_v5 = vld [vmem:[%s1421_s4 + $0x14] ss:$8 sps:$4 sm:$0xff] (!%p250_p3)   ;;  %1092 = vmatprep.subr.bf16.mxu1 (!%p250_p3), %v1258_v3  ;;  %v1276_v7 = vld [vmem:[%s1421_s4 + $0x10] ss:$8 sps:$4 sm:$0xff] (!%p250_p3)   ;;  %v1282_v9 = vld [vmem:[%s1421_s4 + $0x24] ss:$8 sps:$4 sm:$0xff] (!%p250_p3)  }
   0x9   : > { %v341_v6 = vmul.f32 (!%p250_p3), 0.0078125, %v340_v2  ;;  %1100 = vmatpush1.bf16.msra.mxu1 (!%p250_p3), %v1263_v4  ;;  %v1292_v10 = vld [vmem:[%s1421_s4 + $0x20] ss:$8 sps:$4 sm:$0xff] (!%p250_p3)   ;;  %v1302_v15 = vld [vmem:[%s1421_s4 + $0x34] ss:$8 sps:$4 sm:$0xff] (!%p250_p3)   ;;  %p307_p5 = scmp.lt.s32.totalorder (!%p250_p3), %s996_s26, 15 }
   0xa   : > { %1093 = vmatprep.subr.bf16.mxu1 (!%p250_p3), %v1268_v5  ;;  %v1308_v16 = vld [vmem:[%s1421_s4 + $0x30] ss:$8 sps:$4 sm:$0xff] (!%p250_p3)   ;;  %v1314_v18 = vld [vmem:[%s1421_s4 + $0x44] ss:$8 sps:$4 sm:$0xff] (!%p250_p3)   ;;  %v1322_v19 = vld [vmem:[%s1421_s4 + $0x40] ss:$8 sps:$4 sm:$0xff] (!%p250_p3)  }
   0xb   : > { %v342_v8 = vmul.f32 (!%p250_p3), %v341_v6, %v341_v6  ;;  %v1328_v20 = vld [vmem:[%s1421_s4 + $0x54] ss:$8 sps:$4 sm:$0xff] (!%p250_p3)   ;;  %v1335_v22 = vld [vmem:[%s1421_s4 + $0x50] ss:$8 sps:$4 sm:$0xff] (!%p250_p3)   ;;  %v1341_v23 = vld [vmem:[%s1421_s4 + $0x64] ss:$8 sps:$4 sm:$0xff] (!%p250_p3)  }
   0xc   : > { %v1344_v24 = vshrl.u32 (!%p250_p3), %v375_v21, 7  ;;  %v1353_v25 = vld [vmem:[%s1421_s4 + $0x60] ss:$8 sps:$4 sm:$0xff] (!%p250_p3)   ;;  %vm800_vm9 = vcmp.lt.s32.totalorder (!%p250_p3), %v375_v21, 256 }
   0xd   : > { %v344_v11 = vrot.slane (!%p250_p3), %v342_v8, 7  ;;  %1101 = vmatpush1.bf16.msra.mxu1 (!%p250_p3), %v1276_v7  ;;  %v337_v27 = vld [vmem:[%s1420_s3] sm:$0x3] (!%p250_p3) }
   0xe   : > { %s1253_s29 = scalar_select %p297_p4, %s1178_s21, 1  ;;  %1094 = vmatprep.subr.bf16.mxu1 %v1282_v9  ;;  %v377_v30 = vsub.s32 0, %v1344_v24  ;;  %v389_v46 = vsub.s32 1, %v1344_v24 }
   0xf   : > { %v346_v13 = vsub.f32 %v341_v6, %v344_v11  ;;  %s1429_s26 = smov (!%p307_p5, %s996_s26), 15 }
  0x10   : > { %s1038_s12 = sshll.u32 %s1253_s29, 5  ;;  %s997_s13 = sshll.u32 %s1429_s26, 2 }
  0x11   : > { %s1287_s19 = scalar_lea.vmem %s1417_s0, %s1038_s12  ;;  %v347_v14 = vmax.f32 %v346_v13, 0.0  ;;  %1102 = vmatpush1.bf16.msra.mxu1 %v1292_v10  ;;  %s310_s25 = scalar_lea.vmem %s1418_s1, %s997_s13 }
  0x12   : > { %v1134_v12 = vld [vmem:[%s1287_s19] sm:$0xff]   ;;  %1095 = vmatprep.subr.bf16.mxu1 %v1302_v15  ;;  %v1065_v31 = vld [vmem:[%s310_s25 + $0x8] sm:$0xff]   ;;  %v1066_v33 = vld [vmem:[%s310_s25 + $0x10] sm:$0xff]   ;;  %s1039_s10 = sshll.u32 %s1429_s26, 3  ;;  %s1040_s26 = sshll.u32 %s1253_s29, 2 }
  0x13   : > { %1084 = vmatprep.mubr.msk.bf16.mxu0 %vm447_vm0, %v1134_v12  ;;  %v348_v17 = vadd.f32 1e-05, %v347_v14  ;;  %v1050_v29 = vld [vmem:[%s310_s25] sm:$0xff]   ;;  %v1067_v34 = vld [vmem:[%s310_s25 + $0x18] sm:$0xff]   ;;  %v1055_v39 = vunpack.c.l.bf16 %v1065_v31  ;;  %v1056_v40 = vunpack.c.h.bf16 %v1065_v31  ;;  %v1059_v41 = vunpack.c.l.bf16 %v1066_v33  ;;  %s1392_s13 = scalar_lea.vmem %s1422_s5, %s1039_s10  ;;  %s326_s16 = scalar_lea.vmem %s1423_s6, %s1040_s26 }
  0x14   : > { %v1051_v35 = vunpack.c.l.bf16 %v1050_v29  ;;  %v1052_v36 = vunpack.c.h.bf16 %v1050_v29  ;;  %v1060_v42 = vunpack.c.h.bf16 %v1066_v33  ;;  %v1063_v43 = vunpack.c.l.bf16 %v1067_v34 }
  0x15   : > { %1162 = vrsqrt.f32 %v348_v17  ;;  %1103 = vmatpush1.bf16.msra.mxu1 %v1308_v16  ;;  %v1064_v44 = vunpack.c.h.bf16 %v1067_v34 }
  0x16   : > { %1096 = vmatprep.subr.bf16.mxu1 %v1314_v18 }
  0x19   : > { %1104 = vmatpush1.bf16.msra.mxu1 %v1322_v19 }
  0x1a   : > { %1097 = vmatprep.subr.bf16.mxu1 %v1328_v20 }
  0x1d   : > { %1105 = vmatpush1.bf16.msra.mxu1 %v1335_v22 }
  0x1e   : > { %1098 = vmatprep.subr.bf16.mxu1 %v1341_v23 }
  0x1f   : > { %v1163_v26 = vpop.eup %1162 }
  0x20   : > { %v351_v28 = vrot.slane %v1163_v26, 1 }
  0x21   : > { %1106 = vmatpush1.bf16.msra.mxu1 %v1353_v25 }
  0x22   : > { %v353_v32 = vmul.f32 %v351_v28, %v337_v27 }
  0x24   : > { %v354_v37 = vmul.f32 %v353_v32, %v341_v6  ;;  %v378_v38 = vrot.slane %v353_v32, %v377_v30 }
  0x26   : > { %v356_v45 = vrot.slane %v354_v37, 7  ;;  %v379_v47 = vmul.f32 %v1051_v35, %v378_v38  ;;  %v380_v49 = vmul.f32 %v1052_v36, %v378_v38  ;;  %v381_v50 = vmul.f32 %v1055_v39, %v378_v38  ;;  %v1135_v37 = vld [vmem:[%s1287_s19 + $0x8] sm:$0xff]   ;;  %v1137_v39 = vld [vmem:[%s1287_s19 + $0x18] sm:$0xff]  }
  0x27   : > { %v382_v51 = vmul.f32 %v1056_v40, %v378_v38  ;;  %v383_v52 = vmul.f32 %v1059_v41, %v378_v38  ;;  %v384_v53 = vmul.f32 %v1060_v42, %v378_v38  ;;  %v385_v54 = vmul.f32 %v1063_v43, %v378_v38 }
  0x28   : > { %v358_v48 = vsub.f32 %v337_v27, %v356_v45  ;;  %v386_v55 = vmul.f32 %v1064_v44, %v378_v38  ;;  %v1136_v38 = vld [vmem:[%s1287_s19 + $0x10] sm:$0xff]  }
  0x2a   : > { %v390_v56 = vrot.slane %v358_v48, %v389_v46 }
  0x2c   : > { %v391_v57 = vadd.f32 %v390_v56, %v379_v47  ;;  %v392_v58 = vadd.f32 %v390_v56, %v380_v49  ;;  %v393_v59 = vadd.f32 %v390_v56, %v381_v50  ;;  %v394_v60 = vadd.f32 %v390_v56, %v382_v51 }
  0x2d   : > { %v395_v61 = vadd.f32 %v390_v56, %v383_v52  ;;  %v396_v62 = vadd.f32 %v390_v56, %v384_v53  ;;  %v397_v63 = vadd.f32 %v390_v56, %v385_v54  ;;  %v398_v0 = vadd.f32 %v390_v56, %v386_v55 }
  0x2e   : > { %vm399_vm1 = vcmp.ge.f32.partialorder %v391_v57, 0.0  ;;  %vm400_vm2 = vcmp.ge.f32.partialorder %v392_v58, 0.0  ;;  %v407_v1 = vmul.f32 0.2, %v391_v57  ;;  %v408_v2 = vmul.f32 0.2, %v392_v58 }
  0x2f   : > { %vm401_vm3 = vcmp.ge.f32.partialorder %v393_v59, 0.0  ;;  %vm402_vm4 = vcmp.ge.f32.partialorder %v394_v60, 0.0  ;;  %v409_v6 = vmul.f32 0.2, %v393_v59  ;;  %v410_v8 = vmul.f32 0.2, %v394_v60 }
  0x30   : > { %v415_v11 = vsel %vm399_vm1, %v391_v57, %v407_v1  ;;  %v416_v12 = vsel %vm400_vm2, %v392_v58, %v408_v2  ;;  %vm403_vm5 = vcmp.ge.f32.partialorder %v395_v61, 0.0  ;;  %vm404_vm6 = vcmp.ge.f32.partialorder %v396_v62, 0.0 }
  0x31   : > { %v423_v13 = vpack.c.bf16 %v416_v12, %v415_v11  ;;  %v417_v14 = vsel %vm401_vm3, %v393_v59, %v409_v6  ;;  %v418_v17 = vsel %vm402_vm4, %v394_v60, %v410_v8  ;;  %v411_v26 = vmul.f32 0.2, %v395_v61 }
  0x32   : > { %v424_v27 = vpack.c.bf16 %v418_v17, %v417_v14  ;;  %v412_v28 = vmul.f32 0.2, %v396_v62  ;;  %vm405_vm7 = vcmp.ge.f32.partialorder %v397_v63, 0.0  ;;  %vm406_vm8 = vcmp.ge.f32.partialorder %v398_v0, 0.0 }
  0x33   : > { %1076 = vmatprep.subr.bf16.mxu0 %v423_v13  ;;  %v419_v29 = vsel %vm403_vm5, %v395_v61, %v411_v26  ;;  %v413_v30 = vmul.f32 0.2, %v397_v63  ;;  %v414_v31 = vmul.f32 0.2, %v398_v0 }
  0x34   : > { %1077 = vmatpush3.bf16.msra.mxu0 %v423_v13  ;;  %v420_v32 = vsel %vm404_vm6, %v396_v62, %v412_v28 }
  0x35   : > { %1078 = vmatprep.subr.bf16.mxu0 %v424_v27  ;;  %v425_v33 = vpack.c.bf16 %v420_v32, %v419_v29  ;;  %v421_v34 = vsel %vm405_vm7, %v397_v63, %v413_v30  ;;  %v422_v35 = vsel %vm406_vm8, %v398_v0, %v414_v31 }
  0x36   : > { %v426_v36 = vpack.c.bf16 %v422_v35, %v421_v34 }
  0x38   : > { %1079 = vmatpush3.bf16.msra.mxu0 %v424_v27 }
  0x39   : > { %1080 = vmatprep.subr.bf16.mxu0 %v425_v33 }
  0x3c   : > { %1081 = vmatpush3.bf16.msra.mxu0 %v425_v33 }
  0x3d   : > { %1082 = vmatprep.subr.bf16.mxu0 %v426_v36 }
  0x40   : > { %1083 = vmatpush3.bf16.msra.mxu0 %v426_v36 }
  0x41   : > { %625 = vmatprep.subr.bf16.mxu0 %v1258_v3  ;;  %v1159_v3 = vld [vmem:[%s1421_s4 + $0x74] ss:$8 sps:$4 sm:$0xff]  }
  0x42   : > { %1099 = vmatprep.subr.bf16.mxu1 %v1159_v3 }
  0x43   : > { %1085 = vmatmul.mubr.msk.bf16.vlgmr.msra.gmra.mrb[0].mxu0 %vm447_vm0, %v1135_v37 }
  0x44   : > { %1088 = vmatprep.mubr.msk.bf16.mxu0 %vm447_vm0, %v1136_v38  ;;  %626 = vmatpush1.bf16.msra.mxu0 %v1263_v4  ;;  %v1161_v4 = vld [vmem:[%s1421_s4 + $0x70] ss:$8 sps:$4 sm:$0xff]  }
  0x45   : > { %627 = vmatprep.subr.bf16.mxu0 %v1268_v5  ;;  %1107 = vmatpush1.bf16.msra.mxu1 %v1161_v4  ;;  %v1188_v5 = vmov 0  }
  0x46   : > { %667 = vmatprep.mubr.bf16.mxu1 %v1188_v5 }
  0x48   : > { %628 = vmatpush1.bf16.msra.mxu0 %v1276_v7 }
  0x49   : > { %629 = vmatprep.subr.bf16.mxu0 %v1282_v9 }
  0x4b   : > { %1089 = vmatmul.mubr.msk.bf16.gmra.mrb[4].mxu0 %vm447_vm0, %v1137_v39 }
  0x4c   : > { %630 = vmatpush1.bf16.msra.mxu0 %v1292_v10  ;;  %657 = vmatprep.mubr.bf16.mxu0 %v1188_v5 }
  0x4d   : > { %631 = vmatprep.subr.bf16.mxu0 %v1302_v15 }
  0x50   : > { %632 = vmatpush1.bf16.msra.mxu0 %v1308_v16 }
  0x51   : > { %633 = vmatprep.subr.bf16.mxu0 %v1314_v18 }
  0x54   : > { %634 = vmatpush1.bf16.msra.mxu0 %v1322_v19 }
  0x55   : > { %635 = vmatprep.subr.bf16.mxu0 %v1328_v20 }
  0x58   : > { %636 = vmatpush1.bf16.msra.mxu0 %v1335_v22 }
  0x59   : > { %637 = vmatprep.subr.bf16.mxu0 %v1341_v23 }
  0x5c   : > { %638 = vmatpush1.bf16.msra.mxu0 %v1353_v25 }
  0x5d   : > { %639 = vmatprep.subr.bf16.mxu0 %v1159_v3 }
  0x60   : > { %640 = vmatpush1.bf16.msra.mxu0 %v1161_v4 }
 0x116   : > { %v1086_v7 = vpop.f32.mrb[0].mxu0 }
 0x117   : > { %v494_v9 = vpop.f32.mrb[1].mxu0 }
 0x118   : > { %v1087_v10 = vpop.f32.mrb[2].mxu0 }
 0x119   : > { %v526_v15 = vpack.c.bf16 %v1087_v10, %v1086_v7  ;;  %v497_v16 = vpop.f32.mrb[3].mxu0 }
 0x11a   : > { %v525_v18 = vpack.c.bf16 %v497_v16, %v494_v9 }
 0x11b   : > { %668 = vmatmul.mubr.bf16.vlgmr.msra.gmra.mrb[0].mxu1 %v526_v15 }
 0x11c   : > { %658 = vmatmul.mubr.bf16.vlgmr.msra.gmra.mrb[8].mxu0 %v525_v18  ;;  %677 = vmatprep.mubr.bf16.mxu1 %v1188_v5 }
 0x11e   : > { %v1090_v19 = vpop.f32.mrb[4].mxu0 }
 0x11f   : > { %v510_v20 = vpop.f32.mrb[5].mxu0 }
 0x120   : > { %v1091_v22 = vpop.f32.mrb[6].mxu0 }
 0x121   : > { %v528_v23 = vpack.c.bf16 %v1091_v22, %v1090_v19  ;;  %v513_v25 = vpop.f32.mrb[7].mxu0 }
 0x122   : > { %v527_v40 = vpack.c.bf16 %v513_v25, %v510_v20 }
 0x124   : > { %678 = vmatmul.mubr.bf16.gmra.mrb[4].mxu1 %v527_v40 }
 0x125   : > { %687 = vmatprep.mubr.bf16.mxu1 %v1188_v5 }
 0x12c   : > { %688 = vmatmul.mubr.bf16.gmra.mrb[8].mxu1 %v528_v23 }
 0x1ee   : > { %v669_v41 = vpop.f32.mrb[0].mxu1 }
 0x1ef   : > { %v659_v42 = vpop.f32.mrb[8].mxu0  ;;  %v671_v43 = vpop.f32.mrb[1].mxu1  ;;  %v807_v59 = vmul.f32 %v669_v41, %v669_v41 }
 0x1f0   : > { %v1043_v44 = vpack.c.bf16 %v671_v43, %v669_v41  ;;  %v661_v45 = vpop.f32.mrb[9].mxu0  ;;  %v673_v46 = vpop.f32.mrb[2].mxu1  ;;  %v803_v50 = vmul.f32 %v659_v42, %v659_v42  ;;  %v808_v62 = vmul.f32 %v671_v43, %v671_v43 }
 0x1f1   : > { %v1041_v47 = vpack.c.bf16 %v661_v45, %v659_v42  ;;  %v663_v48 = vpop.f32.mrb[10].mxu0  ;;  %v675_v49 = vpop.f32.mrb[3].mxu1  ;;  %v804_v55 = vmul.f32 %v661_v45, %v661_v45  ;;  %v809_v1 = vmul.f32 %v673_v46, %v673_v46 }
 0x1f2   : > { %748 = vst [vmem:[%s1392_s13 + $0x10] sm:$0xff] %v1043_v44  ;;  %v754_v51 = vadd.f32 %v663_v48, %v659_v42  ;;  %v805_v52 = vmul.f32 %v663_v48, %v663_v48  ;;  %v1044_v53 = vpack.c.bf16 %v675_v49, %v673_v46  ;;  %v665_v54 = vpop.f32.mrb[11].mxu0  ;;  %v810_v8 = vmul.f32 %v675_v49, %v675_v49 }
 0x1f3   : > { %746 = vst [vmem:[%s1392_s13] sm:$0xff] %v1041_v47  ;;  %v1042_v56 = vpack.c.bf16 %v665_v54, %v663_v48  ;;  %v767_v57 = vadd.f32 %v665_v54, %v661_v45  ;;  %v806_v58 = vmul.f32 %v665_v54, %v665_v54 }
 0x1f4   : > { %v755_v60 = vadd.f32 %v754_v51, %v669_v41  ;;  %v819_v61 = vadd.f32 %v805_v52, %v803_v50  ;;  %749 = vst [vmem:[%s1392_s13 + $0x18] sm:$0xff] %v1044_v53  ;;  %v1189_v52 = vmov 1966171168  }
 0x1f5   : > { %747 = vst [vmem:[%s1392_s13 + $0x8] sm:$0xff] %v1042_v56  ;;  %v768_v63 = vadd.f32 %v767_v57, %v671_v43  ;;  %v832_v0 = vadd.f32 %v806_v58, %v804_v55  ;;  %v784_v53 = vunpack.c.l.s4 %v1189_v52 }
 0x1f6   : > { %v820_v2 = vadd.f32 %v819_v61, %v807_v59  ;;  %v756_v6 = vadd.f32 %v755_v60, %v673_v46 }
 0x1f7   : > { %v833_v11 = vadd.f32 %v832_v0, %v808_v62  ;;  %v679_v12 = vpop.f32.mrb[4].mxu1  ;;  %v769_v13 = vadd.f32 %v768_v63, %v675_v49  ;;  %v785_v62 = vunpack.c.0.s8 %v784_v53 }
 0x1f8   : > { %v757_v14 = vadd.f32 %v756_v6, %v679_v12  ;;  %v811_v17 = vmul.f32 %v679_v12, %v679_v12  ;;  %v821_v26 = vadd.f32 %v820_v2, %v809_v1  ;;  %v681_v27 = vpop.f32.mrb[5].mxu1 }
 0x1f9   : > { %v1045_v28 = vpack.c.bf16 %v681_v27, %v679_v12  ;;  %v770_v29 = vadd.f32 %v769_v13, %v681_v27  ;;  %v812_v30 = vmul.f32 %v681_v27, %v681_v27  ;;  %v834_v31 = vadd.f32 %v833_v11, %v810_v8  ;;  %v683_v32 = vpop.f32.mrb[6].mxu1 }
 0x1fa   : > { %v822_v33 = vadd.f32 %v821_v26, %v811_v17  ;;  %v758_v34 = vadd.f32 %v757_v14, %v683_v32  ;;  %v813_v35 = vmul.f32 %v683_v32, %v683_v32  ;;  %v685_v36 = vpop.f32.mrb[7].mxu1  ;;  %v788_v13 = vsub.s32 %v785_v62, %v1344_v24 }
 0x1fb   : > { %750 = vst [vmem:[%s1392_s13 + $0x20] sm:$0xff] %v1045_v28  ;;  %v835_v37 = vadd.f32 %v834_v31, %v812_v30  ;;  %v1046_v38 = vpack.c.bf16 %v685_v36, %v683_v32  ;;  %v771_v39 = vadd.f32 %v770_v29, %v685_v36  ;;  %v814_v3 = vmul.f32 %v685_v36, %v685_v36 }
 0x1fc   : > { %v823_v4 = vadd.f32 %v822_v33, %v813_v35 }
 0x1fd   : > { %751 = vst [vmem:[%s1392_s13 + $0x28] sm:$0xff] %v1046_v38  ;;  %v836_v5 = vadd.f32 %v835_v37, %v814_v3 }
 0x1ff   : > { %v689_v7 = vpop.f32.mrb[8].mxu1 }
 0x200   : > { %v759_v9 = vadd.f32 %v758_v34, %v689_v7  ;;  %v815_v10 = vmul.f32 %v689_v7, %v689_v7  ;;  %v691_v15 = vpop.f32.mrb[9].mxu1 }
 0x201   : > { %v1047_v16 = vpack.c.bf16 %v691_v15, %v689_v7  ;;  %v772_v18 = vadd.f32 %v771_v39, %v691_v15  ;;  %v816_v19 = vmul.f32 %v691_v15, %v691_v15  ;;  %v693_v20 = vpop.f32.mrb[10].mxu1 }
 0x202   : > { %v824_v22 = vadd.f32 %v823_v4, %v815_v10  ;;  %v760_v23 = vadd.f32 %v759_v9, %v693_v20  ;;  %v817_v25 = vmul.f32 %v693_v20, %v693_v20  ;;  %v695_v40 = vpop.f32.mrb[11].mxu1 }
 0x203   : > { %752 = vst [vmem:[%s1392_s13 + $0x30] sm:$0xff] %v1047_v16  ;;  %v837_v41 = vadd.f32 %v836_v5, %v816_v19  ;;  %v1048_v42 = vpack.c.bf16 %v695_v40, %v693_v20  ;;  %v773_v43 = vadd.f32 %v772_v18, %v695_v40  ;;  %v818_v44 = vmul.f32 %v695_v40, %v695_v40 }
 0x204   : > { %v761_v45 = vrot.slane %v760_v23, 4  ;;  %v825_v46 = vadd.f32 %v824_v22, %v817_v25 }
 0x205   : > { %753 = vst [vmem:[%s1392_s13 + $0x38] sm:$0xff] %v1048_v42  ;;  %v774_v47 = vrot.slane %v773_v43, 4  ;;  %v838_v48 = vadd.f32 %v837_v41, %v818_v44 }
 0x206   : > { %v762_v49 = vadd.f32 %v761_v45, %v760_v23  ;;  %v826_v50 = vrot.slane %v825_v46, 4 }
 0x207   : > { %v775_v51 = vadd.f32 %v774_v47, %v773_v43  ;;  %v839_v54 = vrot.slane %v838_v48, 4 }
 0x208   : > { %v763_v55 = vrot.slane %v762_v49, 2  ;;  %v827_v56 = vadd.f32 %v826_v50, %v825_v46 }
 0x209   : > { %v776_v57 = vrot.slane %v775_v51, 2  ;;  %v840_v58 = vadd.f32 %v839_v54, %v838_v48 }
 0x20a   : > { %v764_v59 = vadd.f32 %v763_v55, %v762_v49  ;;  %v828_v60 = vrot.slane %v827_v56, 2 }
 0x20b   : > { %v777_v61 = vadd.f32 %v776_v57, %v775_v51  ;;  %v841_v63 = vrot.slane %v840_v58, 2 }
 0x20c   : > { %v765_v0 = vrot.slane %v764_v59, 1  ;;  %v829_v1 = vadd.f32 %v828_v60, %v827_v56 }
 0x20d   : > { %v778_v2 = vrot.slane %v777_v61, 1  ;;  %v842_v6 = vadd.f32 %v841_v63, %v840_v58 }
 0x20e   : > { %v766_v8 = vadd.f32 %v765_v0, %v764_v59  ;;  %v830_v11 = vrot.slane %v829_v1, 1 }
 0x20f   : > { %v779_v12 = vadd.f32 %v778_v2, %v777_v61  ;;  %v843_v14 = vrot.slane %v842_v6, 1 }
 0x210   : > { %v831_v17 = vadd.f32 %v830_v11, %v829_v1 }
 0x211   : > { %v782_v26 = vcombine.low %v766_v8, %v779_v12  ;;  %v844_v27 = vadd.f32 %v843_v14, %v842_v6 }
 0x213   : > { %v789_v28 = vrot.slane %v782_v26, %v788_v13  ;;  %v847_v29 = vcombine.low %v831_v17, %v844_v27 }
 0x215   : > { %v796_v30 = vrot.slane %v789_v28, %v788_v13  ;;  %v854_v31 = vrot.slane %v847_v29, %v788_v13 }
 0x217   : > { %802 = vst.msk [vmem:[%s326_s16] ss:$2 sm:$0x3] %vm800_vm9, %v796_v30  ;;  %v861_v32 = vrot.slane %v854_v31, %v788_v13 }
 0x219   : > { %1035 = vst.msk [vmem:[%s326_s16 + $0x1] ss:$2 sm:$0x3] %vm800_vm9, %v861_v32 }
 0x21a PF: > { %s17_s23 = sadd.s32 1, %s1186_s23   ;;  %s1424_s21 = smov %s1182_s22 }
 0x21b   : > { %p14_p6 = scmp.ge.s32.totalorder %s17_s23, 4   ;;  %s1425_s22 = smov %s1427_s24 }
 0x21d   :  { %16 = sbr.rel (!%p14_p6) target bundleno = 2 (0x2), region = 86 }

// kernel: gcn_r_forward.12
= control target key start
LH: loop header
LB: loop body
LE: loop exit
PB: predicated region body
PF: predicated region fallthrough
CT: control target
= control target key end

     0   :  { %s1056_s12 = smov 0   ;;  %s2469_s0 = inlined_call_operand.vmem [shape: bf16[128,1024], index: 0, kind: input, shape index: {}]   ;;  %s2470_s1 = inlined_call_operand.vmem [shape: f32[2,2,1024], index: 1, kind: input, shape index: {}]   ;;  %s2471_s2 = inlined_call_operand.vmem [shape: f32[2,1024], index: 2, kind: input, shape index: {}]   ;;  %s2472_s3 = inlined_call_operand.vmem [shape: f32[2,1,1024], index: 3, kind: output, shape index: {}]  }
   0x1 LB: > { %s1062_s13 = sadd.s32 4294967295, %s1033_s12   ;;  %p1004_p0 = scmp.ge.s32.totalorder %s1033_s12, 1  ;;  %s1033_s12 = sphi %s1056_s12, %s13_s12  }
   0x2   : > { %p139_p1 = scmp.lt.s32.totalorder %s1033_s12, 3 }
   0x4   : > { %p140_p2 = pnand %p1004_p0, %p139_p1 }
   0x6   : > { %143 = sbr.rel (%p140_p2) target bundleno = 199 (0xc7), region = 32 }
   0xd   : > { %v174_v0 = vld [vmem:[%s2470_s1] sm:$0xff]  ;;  %v175_v1 = vld [vmem:[%s2470_s1 + $0x8] sm:$0xff]  ;;  %v176_v2 = vld [vmem:[%s2470_s1 + $0x10] sm:$0xff]  ;;  %s1005_s22 = sshll.u32 %s1062_s13, 3  ;;  %v318_v18 = vlaneseq  ;;  %p170_p4 = scmp.lt.s32.totalorder %s1062_s13, 1 }
   0xe   : > { %v177_v3 = vld [vmem:[%s2470_s1 + $0x18] sm:$0xff]  ;;  %v180_v4 = vadd.f32 %v176_v2, %v174_v0  ;;  %p164_p3 = scmp.lt.s32.totalorder %s1005_s22, 15 }
   0xf   : > { %v181_v5 = vadd.f32 %v177_v3, %v175_v1  ;;  %v1094_v19 = vshrl.u32 %v318_v18, 7  ;;  %v1203_v18 = vld [vmem:[%s2471_s2 + $0x8] sm:$0xff]  ;;  %s2790_s13 = smov (!%p170_p4, %s1062_s13), 1 }
  0x10   : > { %v1078_v6 = vmul.f32 0.0078125, %v180_v4  ;;  %s2788_s22 = smov (!%p164_p3, %s1005_s22), 15  ;;  %s1008_s4 = sshll.u32 %s2790_s13, 3 }
  0x11   : > { %v1080_v7 = vmul.f32 0.0078125, %v181_v5  ;;  %s1013_s23 = sshll.u32 %s2788_s22, 5  ;;  %2510 = vst [vmem:[#allocation2_spill] sm:$0xff] %v1094_v19  ;;  %v1106_v23 = vsub.s32 0, %v1094_v19  ;;  %v324_v26 = vsub.s32 2, %v1094_v19  ;;  %v328_v27 = vsub.s32 4, %v1094_v19  ;;  %s173_s7 = scalar_lea.vmem %s2472_s3, %s1008_s4 }
  0x12   : > { %v184_v8 = vmul.f32 %v1078_v6, %v1078_v6  ;;  %s1092_s26 = scalar_lea.vmem %s2469_s0, %s1013_s23  ;;  %v332_v28 = vsub.s32 6, %v1094_v19  ;;  %v1118_v29 = vsub.s32 1, %v1094_v19 }
  0x13   : > { %v185_v9 = vmul.f32 %v1080_v7, %v1080_v7  ;;  %v1097_v20 = vld [vmem:[%s1092_s26] sm:$0xff]  ;;  %v1100_v21 = vld [vmem:[%s1092_s26 + $0x8] sm:$0xff]  ;;  %v1103_v22 = vld [vmem:[%s1092_s26 + $0x10] sm:$0xff] }
  0x14   : > { %v188_v10 = vrot.slane %v184_v8, 7  ;;  %v1109_v24 = vld [vmem:[%s1092_s26 + $0x18] sm:$0xff]  ;;  %v1112_v25 = vld [vmem:[%s1092_s26 + $0x20] sm:$0xff]  ;;  %v1121_v30 = vld [vmem:[%s1092_s26 + $0x28] sm:$0xff]  ;;  %v252_v32 = vunpack.c.l.bf16 %v1097_v20  ;;  %v253_v38 = vunpack.c.h.bf16 %v1097_v20  ;;  %v254_v39 = vunpack.c.l.bf16 %v1100_v21 }
  0x15   : > { %v189_v11 = vrot.slane %v185_v9, 7  ;;  %v1124_v31 = vld [vmem:[%s1092_s26 + $0x30] sm:$0xff]  ;;  %v1131_v36 = vld [vmem:[%s1092_s26 + $0x38] sm:$0xff]  ;;  %v1134_v37 = vld [vmem:[%s1092_s26 + $0x40] sm:$0xff]  ;;  %v255_v40 = vunpack.c.h.bf16 %v1100_v21  ;;  %v256_v41 = vunpack.c.l.bf16 %v1103_v22  ;;  %v257_v44 = vunpack.c.h.bf16 %v1103_v22 }
  0x16   : > { %v192_v12 = vsub.f32 %v1078_v6, %v188_v10  ;;  %v1141_v42 = vld [vmem:[%s1092_s26 + $0x48] sm:$0xff]  ;;  %v1144_v43 = vld [vmem:[%s1092_s26 + $0x50] sm:$0xff]  ;;  %v1151_v49 = vld [vmem:[%s1092_s26 + $0x58] sm:$0xff]  ;;  %v2513_v21 = vunpack.c.h.bf16 %v1109_v24  ;;  %v2515_v22 = vunpack.c.h.bf16 %v1112_v25  ;;  %v2518_v54 = vunpack.c.l.bf16 %v1124_v31 }
  0x17   : > { %v193_v13 = vsub.f32 %v1080_v7, %v189_v11  ;;  %v1154_v50 = vld [vmem:[%s1092_s26 + $0x60] sm:$0xff]  ;;  %v1161_v56 = vld [vmem:[%s1092_s26 + $0x68] sm:$0xff]  ;;  %v1168_v61 = vld [vmem:[%s1092_s26 + $0x70] sm:$0xff]  ;;  %v2524_v52 = vunpack.c.l.bf16 %v1141_v42 }
  0x18   : > { %v194_v14 = vmax.f32 %v192_v12, 0.0  ;;  %v1171_v62 = vld [vmem:[%s1092_s26 + $0x78] sm:$0xff]  ;;  %v1178_v3 = vld [vmem:[%s1092_s26 + $0x80] sm:$0xff]  ;;  %v1181_v4 = vld [vmem:[%s1092_s26 + $0x88] sm:$0xff]  ;;  %v2531_v57 = vunpack.c.l.bf16 %v1154_v50 }
  0x19   : > { %v195_v15 = vmax.f32 %v193_v13, 0.0  ;;  %v1188_v13 = vld [vmem:[%s1092_s26 + $0x90] sm:$0xff]  ;;  %v1223_v5 = vld [vmem:[%s1092_s26 + $0xb8] sm:$0xff]  ;;  %v1226_v35 = vld [vmem:[%s1092_s26 + $0xc0] sm:$0xff] }
  0x1a   : > { %v196_v16 = vadd.f32 1e-05, %v194_v14  ;;  %v1191_v14 = vld [vmem:[%s1092_s26 + $0x98] sm:$0xff]  ;;  %v1235_v0 = vld [vmem:[%s1092_s26 + $0xc8] sm:$0xff]  ;;  %v1238_v8 = vld [vmem:[%s1092_s26 + $0xd0] sm:$0xff] }
  0x1b   : > { %v197_v17 = vadd.f32 1e-05, %v195_v15  ;;  %v1216_v15 = vld [vmem:[%s1092_s26 + $0xb0] sm:$0xff]  ;;  %v1257_v58 = vld [vmem:[%s1092_s26 + $0xd8] sm:$0xff] }
  0x1c   : > { %1023 = vrsqrt.f32 %v196_v16  ;;  %v1213_v16 = vld [vmem:[%s1092_s26 + $0xa8] sm:$0xff]  ;;  %v1285_v47 = vld [vmem:[%s1092_s26 + $0xf0] sm:$0xff]  ;;  %v1288_v46 = vld [vmem:[%s1092_s26 + $0xf8] sm:$0xff] }
  0x1d   : > { %1025 = vrsqrt.f32 %v197_v17  ;;  %v1198_v17 = vld [vmem:[%s2471_s2] sm:$0xff] }
  0x26   : > { %v1024_v48 = vpop.eup %1023 }
  0x27   : > { %v1026_v55 = vpop.eup %1025  ;;  %v1009_v11 = vrot.slane %v1024_v48, 9  ;;  %v1206_v48 = vld [vmem:[%s1092_s26 + $0xa0] sm:$0xff] }
  0x28   : > { %v1010_v12 = vrot.slane %v1026_v55, 9  ;;  %v1264_v55 = vld [vmem:[%s1092_s26 + $0xe8] sm:$0xff] }
  0x29   : > { %v208_v10 = vmul.f32 %v1009_v11, %v1198_v17 }
  0x2a   : > { %v209_v9 = vmul.f32 %v1010_v12, %v1203_v18  ;;  %v1260_v12 = vld [vmem:[%s1092_s26 + $0xe0] sm:$0xff] }
  0x2b   : > { %v210_v1 = vmul.f32 %v208_v10, %v1078_v6  ;;  %v321_v59 = vrot.slane %v208_v10, %v1106_v23  ;;  %v325_v33 = vrot.slane %v208_v10, %v324_v26  ;;  %v329_v6 = vrot.slane %v208_v10, %v328_v27 }
  0x2c   : > { %v211_v11 = vmul.f32 %v209_v9, %v1080_v7  ;;  %v333_v7 = vrot.slane %v208_v10, %v332_v28  ;;  %v337_v2 = vrot.slane %v209_v9, %v1106_v23  ;;  %v341_v60 = vrot.slane %v209_v9, %v324_v26 }
  0x2d   : > { %v345_v63 = vrot.slane %v209_v9, %v328_v27  ;;  %v349_v34 = vrot.slane %v209_v9, %v332_v28  ;;  %v214_v10 = vrot.slane %v210_v1, 7  ;;  %v1035_v27 = vmov 1966171168  }
  0x2e   : > { %v215_v51 = vrot.slane %v211_v11, 7  ;;  %v1291_v45 = vunpack.c.l.s4 %v1035_v27  ;;  %v1294_v28 = vrot.slane %v321_v59, %v1106_v23  ;;  %v1297_v9 = vrot.slane %v325_v33, %v1106_v23 }
  0x2f   : > { %v1300_v53 = vrot.slane %v329_v6, %v1106_v23  ;;  %v1303_v1 = vrot.slane %v333_v7, %v1106_v23  ;;  %v1306_v11 = vrot.slane %v337_v2, %v1106_v23  ;;  %v1309_v26 = vrot.slane %v341_v60, %v1106_v23 }
  0x30   : > { %2511 = vst [vmem:[#allocation3_spill] sm:$0xff] %v1291_v45  ;;  %v1312_v27 = vrot.slane %v345_v63, %v1106_v23  ;;  %v1315_v59 = vrot.slane %v349_v34, %v1106_v23  ;;  %v1322_v2 = vsub.f32 %v1198_v17, %v214_v10  ;;  %v1325_v60 = vsub.f32 %v1203_v18, %v215_v51 }
  0x31   : > { %v1332_v23 = vmul.f32 %v1294_v28, %v252_v32  ;;  %v1337_v34 = vmul.f32 %v1297_v9, %v253_v38  ;;  %v1342_v17 = vmul.f32 %v1300_v53, %v254_v39  ;;  %v1347_v51 = vmul.f32 %v1303_v1, %v255_v40 }
  0x32   : > { %v1352_v32 = vmul.f32 %v1306_v11, %v256_v41  ;;  %v1357_v20 = vmul.f32 %v1309_v26, %v257_v44  ;;  %v2512_v38 = vunpack.c.l.bf16 %v1109_v24  ;;  %v1367_v40 = vmul.f32 %v1315_v59, %v2513_v21 }
  0x33   : > { %v2514_v18 = vunpack.c.l.bf16 %v1112_v25  ;;  %v1377_v44 = vmul.f32 %v1297_v9, %v2515_v22  ;;  %v2516_v10 = vunpack.c.l.bf16 %v1121_v30  ;;  %v2517_v24 = vunpack.c.h.bf16 %v1121_v30 }
  0x34   : > { %v1362_v39 = vmul.f32 %v1312_v27, %v2512_v38  ;;  %v2519_v25 = vunpack.c.h.bf16 %v1124_v31  ;;  %v2520_v63 = vunpack.c.l.bf16 %v1131_v36  ;;  %v2521_v30 = vunpack.c.h.bf16 %v1131_v36 }
  0x35   : > { %v1372_v41 = vmul.f32 %v1294_v28, %v2514_v18  ;;  %v1382_v38 = vmul.f32 %v1300_v53, %v2516_v10  ;;  %v1387_v21 = vmul.f32 %v1303_v1, %v2517_v24  ;;  %v1392_v18 = vmul.f32 %v1306_v11, %v2518_v54 }
  0x36   : > { %v1397_v22 = vmul.f32 %v1309_v26, %v2519_v25  ;;  %v1402_v10 = vmul.f32 %v1312_v27, %v2520_v63  ;;  %v1407_v24 = vmul.f32 %v1315_v59, %v2521_v30  ;;  %v2522_v7 = vunpack.c.l.bf16 %v1134_v37 }
  0x37   : > { %v2523_v31 = vunpack.c.h.bf16 %v1134_v37  ;;  %v1422_v63 = vmul.f32 %v1300_v53, %v2524_v52  ;;  %v2525_v36 = vunpack.c.h.bf16 %v1141_v42  ;;  %v2526_v6 = vunpack.c.l.bf16 %v1144_v43 }
  0x38   : > { %v1412_v54 = vmul.f32 %v1294_v28, %v2522_v7  ;;  %v2527_v37 = vunpack.c.h.bf16 %v1144_v43  ;;  %v2528_v33 = vunpack.c.l.bf16 %v1151_v49  ;;  %v2529_v42 = vunpack.c.h.bf16 %v1151_v49 }
  0x39   : > { %v1417_v25 = vmul.f32 %v1297_v9, %v2523_v31  ;;  %v1427_v30 = vmul.f32 %v1303_v1, %v2525_v36  ;;  %v1432_v7 = vmul.f32 %v1306_v11, %v2526_v6  ;;  %v1452_v6 = vmul.f32 %v1294_v28, %v2531_v57 }
  0x3a   : > { %v1437_v31 = vmul.f32 %v1309_v26, %v2527_v37  ;;  %v1442_v52 = vmul.f32 %v1312_v27, %v2528_v33  ;;  %v1447_v36 = vmul.f32 %v1315_v59, %v2529_v42  ;;  %v2532_v43 = vunpack.c.h.bf16 %v1154_v50 }
  0x3b   : > { %v2534_v45 = vunpack.c.l.bf16 %v1161_v56  ;;  %v2535_v49 = vunpack.c.h.bf16 %v1161_v56  ;;  %v2538_v50 = vunpack.c.h.bf16 %v1168_v61  ;;  %v2541_v56 = vunpack.c.h.bf16 %v1171_v62 }
  0x3c   : > { %2530 = vst [vmem:[#allocation4_spill] sm:$0xff] %v1447_v36  ;;  %v1457_v37 = vmul.f32 %v1297_v9, %v2532_v43  ;;  %v2537_v36 = vunpack.c.l.bf16 %v1168_v61  ;;  %v2544_v61 = vunpack.c.h.bf16 %v1178_v3 }
  0x3d   : > { %v1462_v33 = vmul.f32 %v1300_v53, %v2534_v45  ;;  %v1467_v42 = vmul.f32 %v1303_v1, %v2535_v49  ;;  %v1477_v43 = vmul.f32 %v1309_v26, %v2538_v50  ;;  %v1487_v49 = vmul.f32 %v1315_v59, %v2541_v56 }
  0x3e   : > { %2533 = vst [vmem:[#allocation5_spill] sm:$0xff] %v1457_v37  ;;  %v1472_v57 = vmul.f32 %v1306_v11, %v2537_v36  ;;  %v2540_v37 = vunpack.c.l.bf16 %v1171_v62  ;;  %v1497_v50 = vmul.f32 %v1297_v9, %v2544_v61  ;;  %v2547_v62 = vunpack.c.h.bf16 %v1181_v4 }
  0x3f   : > { %2536 = vst [vmem:[#allocation6_spill] sm:$0xff] %v1467_v42  ;;  %2539 = vst [vmem:[#allocation7_spill] sm:$0xff] %v1477_v43  ;;  %v2543_v42 = vunpack.c.l.bf16 %v1178_v3  ;;  %v2546_v43 = vunpack.c.l.bf16 %v1181_v4  ;;  %v2551_v3 = vunpack.c.h.bf16 %v1188_v13  ;;  %v2555_v4 = vunpack.c.h.bf16 %v1191_v14 }
  0x40   : > { %v1482_v45 = vmul.f32 %v1312_v27, %v2540_v37  ;;  %2542 = vst [vmem:[#allocation8_spill] sm:$0xff] %v1487_v49  ;;  %2545 = vst [vmem:[#allocation9_spill] sm:$0xff] %v1497_v50  ;;  %v1507_v56 = vmul.f32 %v1303_v1, %v2547_v62  ;;  %v2549_v49 = vunpack.c.l.bf16 %v1188_v13  ;;  %v2553_v50 = vunpack.c.l.bf16 %v1191_v14 }
  0x41   : > { %v1492_v36 = vmul.f32 %v1294_v28, %v2543_v42  ;;  %v1502_v37 = vmul.f32 %v1300_v53, %v2546_v43  ;;  %v1517_v61 = vmul.f32 %v1309_v26, %v2551_v3  ;;  %v1527_v62 = vmul.f32 %v1315_v59, %v2555_v4 }
  0x42   : > { %2548 = vst [vmem:[#allocation10_spill] sm:$0xff] %v1507_v56  ;;  %v1512_v42 = vmul.f32 %v1306_v11, %v2549_v49  ;;  %v1522_v43 = vmul.f32 %v1312_v27, %v2553_v50  ;;  %v2557_v56 = vunpack.c.l.bf16 %v1206_v48  ;;  %v2559_v13 = vunpack.c.h.bf16 %v1206_v48 }
  0x43   : > { %2552 = vst [vmem:[#allocation12_spill] sm:$0xff] %v1517_v61  ;;  %2556 = vst [vmem:[#allocation14_spill] sm:$0xff] %v1527_v62  ;;  %v2561_v61 = vunpack.c.l.bf16 %v1213_v16  ;;  %v2563_v14 = vunpack.c.h.bf16 %v1213_v16  ;;  %v2565_v62 = vunpack.c.l.bf16 %v1216_v15  ;;  %v2567_v48 = vunpack.c.h.bf16 %v1216_v15 }
  0x44   : > { %2550 = vst [vmem:[#allocation11_spill] sm:$0xff] %v1512_v42  ;;  %2554 = vst [vmem:[#allocation13_spill] sm:$0xff] %v1522_v43  ;;  %v1532_v49 = vmul.f32 %v1294_v28, %v2557_v56  ;;  %v1537_v3 = vmul.f32 %v1297_v9, %v2559_v13  ;;  %v2571_v16 = vunpack.c.h.bf16 %v1223_v5 }
  0x45   : > { %v1542_v50 = vmul.f32 %v1300_v53, %v2561_v61  ;;  %v1547_v4 = vmul.f32 %v1303_v1, %v2563_v14  ;;  %v1552_v56 = vmul.f32 %v1306_v11, %v2565_v62  ;;  %v1557_v13 = vmul.f32 %v1309_v26, %v2567_v48 }
  0x46   : > { %2558 = vst [vmem:[#allocation15_spill] sm:$0xff] %v1532_v49  ;;  %2560 = vst [vmem:[#allocation16_spill] sm:$0xff] %v1537_v3  ;;  %v2569_v3 = vunpack.c.l.bf16 %v1223_v5  ;;  %v1567_v14 = vmul.f32 %v1315_v59, %v2571_v16  ;;  %v2573_v62 = vsub.s32 3, %v1094_v19  ;;  %v2574_v48 = vsub.s32 5, %v1094_v19 }
  0x47   : > { %2562 = vst [vmem:[#allocation17_spill] sm:$0xff] %v1542_v50  ;;  %2564 = vst [vmem:[#allocation18_spill] sm:$0xff] %v1547_v4  ;;  %v459_v4 = vrot.slane %v1322_v2, %v1118_v29  ;;  %v475_v5 = vrot.slane %v1325_v60, %v1118_v29 }
  0x48   : > { %2566 = vst [vmem:[#allocation19_spill] sm:$0xff] %v1552_v56  ;;  %2568 = vst [vmem:[#allocation20_spill] sm:$0xff] %v1557_v13  ;;  %v1562_v61 = vmul.f32 %v1312_v27, %v2569_v3  ;;  %v463_v15 = vrot.slane %v1322_v2, %v2573_v62  ;;  %v467_v13 = vrot.slane %v1322_v2, %v2574_v48  ;;  %v2575_v56 = vsub.s32 7, %v1094_v19 }
  0x49   : > { %2572 = vst [vmem:[#allocation22_spill] sm:$0xff] %v1567_v14  ;;  %v2576_v16 = vmov %v2573_v62 }
  0x4a   : > { %2570 = vst [vmem:[#allocation21_spill] sm:$0xff] %v1562_v61  ;;  %v471_v3 = vrot.slane %v1322_v2, %v2575_v56  ;;  %v479_v14 = vrot.slane %v1325_v60, %v2576_v16  ;;  %v2577_v61 = vmov %v2574_v48  ;;  %v2578_v62 = vmov %v2575_v56 }
  0x4b   : > { %v483_v50 = vrot.slane %v1325_v60, %v2577_v61  ;;  %v487_v49 = vrot.slane %v1325_v60, %v2578_v62  ;;  %v2579_v48 = vunpack.c.l.bf16 %v1226_v35  ;;  %v2580_v2 = vunpack.c.h.bf16 %v1226_v35 }
  0x4c   : > { %v2581_v16 = vunpack.c.l.bf16 %v1235_v0  ;;  %v2582_v61 = vunpack.c.h.bf16 %v1235_v0  ;;  %v2584_v60 = vunpack.c.l.bf16 %v1238_v8  ;;  %v2585_v35 = vunpack.c.h.bf16 %v1238_v8 }
  0x4d   : > { %v1594_v43 = vmul.f32 %v1294_v28, %v2579_v48  ;;  %v1599_v56 = vmul.f32 %v1297_v9, %v2580_v2  ;;  %v2586_v2 = vunpack.c.l.bf16 %v1257_v58  ;;  %v2587_v0 = vunpack.c.h.bf16 %v1257_v58 }
  0x4e   : > { %v1604_v42 = vmul.f32 %v1300_v53, %v2581_v16  ;;  %v1609_v19 = vmul.f32 %v1303_v1, %v2582_v61  ;;  %v1614_v62 = vmul.f32 %v1306_v11, %v2584_v60  ;;  %v1619_v48 = vmul.f32 %v1309_v26, %v2585_v35 }
  0x4f   : > { %v1624_v16 = vmul.f32 %v1312_v27, %v2586_v2  ;;  %v1629_v61 = vmul.f32 %v1315_v59, %v2587_v0  ;;  %v1635_v60 = vrot.slane %v463_v15, %v1118_v29  ;;  %v1638_v8 = vrot.slane %v467_v13, %v1118_v29 }
  0x50   : > { %2583 = vst [vmem:[#allocation23_spill] sm:$0xff] %v1609_v19  ;;  %v1632_v19 = vrot.slane %v459_v4, %v1118_v29  ;;  %v1641_v35 = vrot.slane %v471_v3, %v1118_v29  ;;  %v1644_v2 = vrot.slane %v475_v5, %v1118_v29  ;;  %v1647_v58 = vrot.slane %v479_v14, %v1118_v29 }
  0x51   : > { %2588 = vst [vmem:[#allocation24_spill] sm:$0xff] %v1629_v61  ;;  %v1650_v0 = vrot.slane %v483_v50, %v1118_v29  ;;  %v1653_v4 = vrot.slane %v487_v49, %v1118_v29  ;;  %v2589_v15 = vunpack.c.l.bf16 %v1260_v12  ;;  %v2590_v3 = vunpack.c.h.bf16 %v1260_v12 }
  0x52   : > { %v2591_v5 = vunpack.c.l.bf16 %v1264_v55  ;;  %v2592_v50 = vunpack.c.h.bf16 %v1264_v55  ;;  %v2593_v49 = vunpack.c.l.bf16 %v1285_v47  ;;  %v2594_v12 = vunpack.c.h.bf16 %v1285_v47 }
  0x53   : > { %v1658_v13 = vmul.f32 %v1294_v28, %v2589_v15  ;;  %v1663_v61 = vmul.f32 %v1297_v9, %v2590_v3  ;;  %v2595_v15 = vunpack.c.l.bf16 %v1288_v46  ;;  %v2596_v55 = vunpack.c.h.bf16 %v1288_v46 }
  0x54   : > { %v1668_v14 = vmul.f32 %v1300_v53, %v2591_v5  ;;  %v1673_v29 = vmul.f32 %v1303_v1, %v2592_v50  ;;  %v1678_v28 = vmul.f32 %v1306_v11, %v2593_v49  ;;  %v1683_v9 = vmul.f32 %v1309_v26, %v2594_v12  ;;  %v2599_v5 = vld [vmem:[#allocation6_spill] sm:$0xff]  ;;  %v2601_v49 = vld [vmem:[#allocation7_spill] sm:$0xff] }
  0x55   : > { %v1688_v53 = vmul.f32 %v1312_v27, %v2595_v15  ;;  %v1693_v1 = vmul.f32 %v1315_v59, %v2596_v55  ;;  %v1697_v3 = vadd.f32 %v1632_v19, %v1332_v23  ;;  %v1701_v47 = vadd.f32 %v1635_v60, %v1337_v34  ;;  %v2602_v15 = vld [vmem:[#allocation8_spill] sm:$0xff] }
  0x56   : > { %v1705_v26 = vadd.f32 %v1638_v8, %v1342_v17  ;;  %v1709_v11 = vadd.f32 %v1641_v35, %v1347_v51  ;;  %v1713_v46 = vadd.f32 %v1644_v2, %v1352_v32  ;;  %v1717_v27 = vadd.f32 %v1647_v58, %v1357_v20 }
  0x57   : > { %v1721_v59 = vadd.f32 %v1650_v0, %v1362_v39  ;;  %v1725_v23 = vadd.f32 %v1653_v4, %v1367_v40  ;;  %v1729_v34 = vadd.f32 %v1632_v19, %v1372_v41  ;;  %v1733_v17 = vadd.f32 %v1635_v60, %v1377_v44 }
  0x58   : > { %v1737_v51 = vadd.f32 %v1638_v8, %v1382_v38  ;;  %v1741_v32 = vadd.f32 %v1641_v35, %v1387_v21  ;;  %v1745_v20 = vadd.f32 %v1644_v2, %v1392_v18  ;;  %v1749_v39 = vadd.f32 %v1647_v58, %v1397_v22 }
  0x59   : > { %v1753_v40 = vadd.f32 %v1650_v0, %v1402_v10  ;;  %v1757_v41 = vadd.f32 %v1653_v4, %v1407_v24  ;;  %v1761_v44 = vadd.f32 %v1632_v19, %v1412_v54  ;;  %v1765_v38 = vadd.f32 %v1635_v60, %v1417_v25  ;;  %v2597_v54 = vld [vmem:[#allocation4_spill] sm:$0xff] }
  0x5a   : > { %v1769_v21 = vadd.f32 %v1638_v8, %v1422_v63  ;;  %v1773_v18 = vadd.f32 %v1641_v35, %v1427_v30  ;;  %v1777_v22 = vadd.f32 %v1644_v2, %v1432_v7  ;;  %v1781_v10 = vadd.f32 %v1647_v58, %v1437_v31  ;;  %v2598_v30 = vld [vmem:[#allocation5_spill] sm:$0xff] }
  0x5b   : > { %v1785_v24 = vadd.f32 %v1650_v0, %v1442_v52  ;;  %v1789_v25 = vadd.f32 %v1653_v4, %v2597_v54  ;;  %v1793_v63 = vadd.f32 %v1632_v19, %v1452_v6  ;;  %v1797_v7 = vadd.f32 %v1635_v60, %v2598_v30  ;;  %v2605_v54 = vld [vmem:[#allocation9_spill] sm:$0xff] }
  0x5c   : > { %v1801_v31 = vadd.f32 %v1638_v8, %v1462_v33  ;;  %v1805_v52 = vadd.f32 %v1641_v35, %v2599_v5  ;;  %v1809_v50 = vadd.f32 %v1644_v2, %v1472_v57  ;;  %v1813_v6 = vadd.f32 %v1647_v58, %v2601_v49  ;;  %v2608_v5 = vld [vmem:[#allocation10_spill] sm:$0xff]  ;;  %v2610_v49 = vld [vmem:[#allocation11_spill] sm:$0xff] }
  0x5d   : > { %v1817_v12 = vadd.f32 %v1650_v0, %v1482_v45  ;;  %v1821_v33 = vadd.f32 %v1653_v4, %v2602_v15  ;;  %v1825_v55 = vadd.f32 %v1632_v19, %v1492_v36  ;;  %v1829_v57 = vadd.f32 %v1635_v60, %v2605_v54 }
  0x5e   : > { %2600 = vst [vmem:[#allocation4_spill] sm:$0xff] %v1809_v50  ;;  %v1833_v30 = vadd.f32 %v1638_v8, %v1502_v37  ;;  %v1837_v45 = vadd.f32 %v1641_v35, %v2608_v5  ;;  %v1841_v15 = vadd.f32 %v1644_v2, %v2610_v49  ;;  %vm592_vm0 = vcmp.ge.f32.partialorder %v1697_v3, 0.0 }
  0x5f   : > { %2603 = vst [vmem:[#allocation5_spill] sm:$0xff] %v1821_v33  ;;  %2604 = vst [vmem:[#allocation6_spill] sm:$0xff] %v1825_v55  ;;  %v2612_v33 = vld [vmem:[#allocation12_spill] sm:$0xff]  ;;  %v2614_v55 = vld [vmem:[#allocation13_spill] sm:$0xff]  ;;  %vm593_vm1 = vcmp.ge.f32.partialorder %v1701_v47, 0.0  ;;  %vm594_vm2 = vcmp.ge.f32.partialorder %v1705_v26, 0.0 }
  0x60   : > { %2606 = vst [vmem:[#allocation7_spill] sm:$0xff] %v1829_v57  ;;  %2607 = vst [vmem:[#allocation8_spill] sm:$0xff] %v1833_v30  ;;  %v1845_v36 = vadd.f32 %v1647_v58, %v2612_v33  ;;  %v1849_v54 = vadd.f32 %v1650_v0, %v2614_v55  ;;  %v2616_v57 = vld [vmem:[#allocation14_spill] sm:$0xff]  ;;  %v2618_v30 = vld [vmem:[#allocation15_spill] sm:$0xff]  ;;  %vm595_vm3 = vcmp.ge.f32.partialorder %v1709_v11, 0.0  ;;  %vm596_vm4 = vcmp.ge.f32.partialorder %v1713_v46, 0.0 }
  0x61   : > { %2609 = vst [vmem:[#allocation9_spill] sm:$0xff] %v1837_v45  ;;  %2611 = vst [vmem:[#allocation10_spill] sm:$0xff] %v1841_v15  ;;  %v1853_v37 = vadd.f32 %v1653_v4, %v2616_v57  ;;  %v1857_v5 = vadd.f32 %v1632_v19, %v2618_v30  ;;  %v2620_v45 = vld [vmem:[#allocation16_spill] sm:$0xff]  ;;  %v2622_v15 = vld [vmem:[#allocation17_spill] sm:$0xff]  ;;  %vm597_vm5 = vcmp.ge.f32.partialorder %v1717_v27, 0.0  ;;  %vm598_vm6 = vcmp.ge.f32.partialorder %v1721_v59, 0.0 }
  0x62   : > { %2613 = vst [vmem:[#allocation11_spill] sm:$0xff] %v1845_v36  ;;  %2615 = vst [vmem:[#allocation12_spill] sm:$0xff] %v1849_v54  ;;  %v1861_v49 = vadd.f32 %v1635_v60, %v2620_v45  ;;  %v1865_v33 = vadd.f32 %v1638_v8, %v2622_v15  ;;  %v2623_v36 = vld [vmem:[#allocation18_spill] sm:$0xff]  ;;  %v2624_v54 = vld [vmem:[#allocation19_spill] sm:$0xff]  ;;  %vm599_vm7 = vcmp.ge.f32.partialorder %v1725_v23, 0.0  ;;  %vm600_vm8 = vcmp.ge.f32.partialorder %v1729_v34, 0.0 }
  0x63   : > { %2617 = vst [vmem:[#allocation13_spill] sm:$0xff] %v1853_v37  ;;  %2619 = vst [vmem:[#allocation14_spill] sm:$0xff] %v1857_v5  ;;  %v1869_v55 = vadd.f32 %v1641_v35, %v2623_v36  ;;  %v1873_v57 = vadd.f32 %v1644_v2, %v2624_v54  ;;  %v2625_v37 = vld [vmem:[#allocation20_spill] sm:$0xff]  ;;  %v2627_v5 = vld [vmem:[#allocation21_spill] sm:$0xff]  ;;  %v1889_v36 = vadd.f32 %v1632_v19, %v1594_v43  ;;  %vm601_vm9 = vcmp.ge.f32.partialorder %v1733_v17, 0.0 }
  0x64   : > { %2621 = vst [vmem:[#allocation15_spill] sm:$0xff] %v1861_v49  ;;  %v1877_v30 = vadd.f32 %v1647_v58, %v2625_v37  ;;  %v1881_v45 = vadd.f32 %v1650_v0, %v2627_v5  ;;  %v2628_v49 = vld [vmem:[#allocation22_spill] sm:$0xff]  ;;  %v1893_v54 = vadd.f32 %v1635_v60, %v1599_v56  ;;  %v1897_v37 = vadd.f32 %v1638_v8, %v1604_v42 }
  0x65   : > { %v1885_v15 = vadd.f32 %v1653_v4, %v2628_v49  ;;  %v1905_v49 = vadd.f32 %v1644_v2, %v1614_v62  ;;  %v1909_v43 = vadd.f32 %v1647_v58, %v1619_v48  ;;  %v1913_v56 = vadd.f32 %v1650_v0, %v1624_v16 }
  0x66   : > { %2626 = vst [vmem:[#allocation16_spill] sm:$0xff] %v1877_v30  ;;  %2629 = vst [vmem:[#allocation17_spill] sm:$0xff] %v1893_v54  ;;  %v2630_v30 = vld [vmem:[#allocation23_spill] sm:$0xff]  ;;  %v2632_v54 = vld [vmem:[#allocation24_spill] sm:$0xff]  ;;  %v1925_v62 = vadd.f32 %v1635_v60, %v1663_v61  ;;  %v1929_v48 = vadd.f32 %v1638_v8, %v1668_v14  ;;  %v1933_v16 = vadd.f32 %v1641_v35, %v1673_v29  ;;  %v656_v8 = vmul.f32 0.2, %v1697_v3 }
  0x67   : > { %v1901_v5 = vadd.f32 %v1641_v35, %v2630_v30  ;;  %2631 = vst [vmem:[#allocation18_spill] sm:$0xff] %v1905_v49  ;;  %v1917_v42 = vadd.f32 %v1653_v4, %v2632_v54  ;;  %v1921_v30 = vadd.f32 %v1632_v19, %v1658_v13  ;;  %v1937_v54 = vadd.f32 %v1644_v2, %v1678_v28  ;;  %v2643_v13 = vld [vmem:[#allocation3_spill] sm:$0xff] }
  0x68   : > { %2635 = vst [vmem:[#allocation21_spill] sm:$0xff] %v1925_v62  ;;  %2636 = vst [vmem:[#allocation22_spill] sm:$0xff] %v1929_v48  ;;  %v1941_v19 = vadd.f32 %v1647_v58, %v1683_v9  ;;  %v1945_v61 = vadd.f32 %v1650_v0, %v1688_v53  ;;  %v1949_v60 = vadd.f32 %v1653_v4, %v1693_v1  ;;  %v657_v35 = vmul.f32 0.2, %v1701_v47  ;;  %v2642_v4 = vld [vmem:[#allocation2_spill] sm:$0xff] }
  0x69   : > { %2633 = vst [vmem:[#allocation19_spill] sm:$0xff] %v1917_v42  ;;  %2634 = vst [vmem:[#allocation20_spill] sm:$0xff] %v1921_v30  ;;  %vm602_vm10 = vcmp.ge.f32.partialorder %v1737_v51, 0.0  ;;  %v658_v2 = vmul.f32 0.2, %v1705_v26  ;;  %v2644_v14 = vunpack.c.0.s8 %v2643_v13  ;;  %vm603_vm11 = vcmp.ge.f32.partialorder %v1741_v32, 0.0 }
  0x6a   : > { %2637 = vst [vmem:[#allocation23_spill] sm:$0xff] %v1933_v16  ;;  %2638 = vst [vmem:[#allocation24_spill] sm:$0xff] %v1937_v54  ;;  %v659_v58 = vmul.f32 0.2, %v1709_v11  ;;  %v660_v0 = vmul.f32 0.2, %v1713_v46  ;;  %v1979_v1 = vsel %vm592_vm0, %v1697_v3, %v656_v8 }
  0x6b   : > { %2639 = vst [vmem:[#allocation25_spill] sm:$0xff] %v1941_v19  ;;  %2640 = vst [vmem:[#allocation26_spill] sm:$0xff] %v1945_v61  ;;  %v1970_v29 = vsub.s32 %v2644_v14, %v2642_v4  ;;  %v661_v28 = vmul.f32 0.2, %v1717_v27  ;;  %v662_v9 = vmul.f32 0.2, %v1721_v59  ;;  %v1988_v14 = vsel %vm593_vm1, %v1701_v47, %v657_v35 }
  0x6c   : > { %2641 = vst [vmem:[#allocation27_spill] sm:$0xff] %v1949_v60  ;;  %v663_v53 = vmul.f32 0.2, %v1725_v23  ;;  %2646 = vst [vmem:[#allocation3_spill] sm:$0xff] %v1979_v1  ;;  %vm604_vm12 = vcmp.ge.f32.partialorder %v1745_v20, 0.0  ;;  %vm605_vm13 = vcmp.ge.f32.partialorder %v1749_v39, 0.0  ;;  %v2001_v1 = vsel %vm594_vm2, %v1705_v26, %v658_v2 }
  0x6d   : > { %2645 = vst [vmem:[#allocation2_spill] sm:$0xff] %v1970_v29  ;;  %v664_v60 = vmul.f32 0.2, %v1729_v34  ;;  %v665_v4 = vmul.f32 0.2, %v1733_v17  ;;  %2647 = vst [vmem:[#allocation28_spill] sm:$0xff] %v1988_v14  ;;  %v2016_v61 = vsel %vm595_vm3, %v1709_v11, %v659_v58  ;;  %v2031_v19 = vsel %vm596_vm4, %v1713_v46, %v660_v0 }
  0x6e   : > { %v666_v13 = vmul.f32 0.2, %v1737_v51  ;;  %v667_v29 = vmul.f32 0.2, %v1741_v32  ;;  %v1993_v3 = vmul.f32 0.2, %v1745_v20 }
  0x6f   : > { %v1996_v8 = vmul.f32 0.2, %v1749_v39  ;;  %2648 = vst [vmem:[#allocation29_spill] sm:$0xff] %v2001_v1  ;;  %vm606_vm14 = vcmp.ge.f32.partialorder %v1753_v40, 0.0  ;;  %v2005_v47 = vmul.f32 0.2, %v1753_v40 }
  0x70   : > { %v2008_v35 = vmul.f32 0.2, %v1757_v41  ;;  %v2011_v14 = vmul.f32 0.2, %v1761_v44  ;;  %2649 = vst [vmem:[#allocation30_spill] sm:$0xff] %v2016_v61  ;;  %vm607_vm15 = vcmp.ge.f32.partialorder %v1757_v41, 0.0 }
  0x71   : > { %v2020_v26 = vmul.f32 0.2, %v1765_v38  ;;  %v2023_v2 = vmul.f32 0.2, %v1769_v21  ;;  %v2026_v1 = vmul.f32 0.2, %v1773_v18 }
  0x72   : > { %2651 = vst [vmem:[#allocation32_spill] sm:$0xff] %v2031_v19  ;;  %vm608_vm0 = vcmp.ge.f32.partialorder %v1761_v44, 0.0  ;;  %v2035_v11 = vmul.f32 0.2, %v1777_v22  ;;  %v2038_v58 = vmul.f32 0.2, %v1781_v10 }
  0x73   : > { %2650 = vst [vmem:[#allocation31_spill] sm:$0xff] %v2026_v1  ;;  %v2041_v61 = vmul.f32 0.2, %v1785_v24  ;;  %v2046_v1 = vsel %vm597_vm5, %v1717_v27, %v661_v28  ;;  %vm609_vm1 = vcmp.ge.f32.partialorder %v1765_v38, 0.0  ;;  %v2050_v46 = vmul.f32 0.2, %v1789_v25 }
  0x74   : > { %2653 = vst [vmem:[#allocation34_spill] sm:$0xff] %v2046_v1  ;;  %v2053_v0 = vmul.f32 0.2, %v1793_v63  ;;  %v2056_v19 = vmul.f32 0.2, %v1797_v7  ;;  %vm610_vm2 = vcmp.ge.f32.partialorder %v1769_v21, 0.0 }
  0x75   : > { %2652 = vst [vmem:[#allocation33_spill] sm:$0xff] %v2041_v61  ;;  %v2061_v61 = vsel %vm598_vm6, %v1721_v59, %v662_v9  ;;  %v2065_v27 = vmul.f32 0.2, %v1801_v31  ;;  %v2068_v28 = vmul.f32 0.2, %v1805_v52  ;;  %vm611_vm3 = vcmp.ge.f32.partialorder %v1773_v18, 0.0 }
  0x76   : > { %2654 = vst [vmem:[#allocation35_spill] sm:$0xff] %v2056_v19  ;;  %2655 = vst [vmem:[#allocation36_spill] sm:$0xff] %v2061_v61  ;;  %v2071_v1 = vmul.f32 0.2, %v1809_v50  ;;  %v2076_v19 = vsel %vm599_vm7, %v1725_v23, %v663_v53  ;;  %v2081_v59 = vmul.f32 0.2, %v1813_v6 }
  0x77   : > { %2656 = vst [vmem:[#allocation37_spill] sm:$0xff] %v2065_v27  ;;  %2657 = vst [vmem:[#allocation38_spill] sm:$0xff] %v2068_v28  ;;  %v2084_v9 = vmul.f32 0.2, %v1817_v12  ;;  %v2662_v61 = vld [vmem:[#allocation5_spill] sm:$0xff]  ;;  %vm613_vm5 = vcmp.ge.f32.partialorder %v1781_v10, 0.0 }
  0x78   : > { %2658 = vst [vmem:[#allocation39_spill] sm:$0xff] %v2071_v1  ;;  %2659 = vst [vmem:[#allocation40_spill] sm:$0xff] %v2076_v19  ;;  %v2087_v28 = vmul.f32 0.2, %v2662_v61  ;;  %v2092_v1 = vsel %vm600_vm8, %v1729_v34, %v664_v60  ;;  %v2665_v23 = vld [vmem:[#allocation6_spill] sm:$0xff]  ;;  %v2667_v19 = vld [vmem:[#allocation7_spill] sm:$0xff]  ;;  %v2110_v34 = vsel %vm601_vm9, %v1733_v17, %v665_v4  ;;  %v2128_v17 = vsel %vm602_vm10, %v1737_v51, %v666_v13 }
  0x79   : > { %2660 = vst [vmem:[#allocation41_spill] sm:$0xff] %v2081_v59  ;;  %2661 = vst [vmem:[#allocation42_spill] sm:$0xff] %v2084_v9  ;;  %v2099_v53 = vmul.f32 0.2, %v2665_v23  ;;  %v2102_v9 = vmul.f32 0.2, %v2667_v19  ;;  %v2146_v51 = vsel %vm603_vm11, %v1741_v32, %v667_v29  ;;  %v2165_v32 = vsel %vm604_vm12, %v1745_v20, %v1993_v3 }
  0x7a   : > { %2663 = vst [vmem:[#allocation5_spill] sm:$0xff] %v2087_v28  ;;  %2664 = vst [vmem:[#allocation43_spill] sm:$0xff] %v2092_v1  ;;  %v2669_v28 = vld [vmem:[#allocation8_spill] sm:$0xff]  ;;  %vm617_vm8 = vcmp.ge.f32.partialorder %v1797_v7, 0.0  ;;  %v2672_v60 = vld [vmem:[#allocation9_spill] sm:$0xff]  ;;  %vm621_vm9 = vcmp.ge.f32.partialorder %v1813_v6, 0.0  ;;  %v2184_v20 = vsel %vm605_vm13, %v1749_v39, %v1996_v8  ;;  %v2203_v39 = vsel %vm606_vm14, %v1753_v40, %v2005_v47 }
  0x7b   : > { %2666 = vst [vmem:[#allocation6_spill] sm:$0xff] %v2099_v53  ;;  %2668 = vst [vmem:[#allocation7_spill] sm:$0xff] %v2102_v9  ;;  %v2105_v59 = vmul.f32 0.2, %v2669_v28  ;;  %v2117_v1 = vmul.f32 0.2, %v2672_v60  ;;  %v2222_v40 = vsel %vm607_vm15, %v1757_v41, %v2008_v35  ;;  %v2235_v41 = vsel %vm608_vm0, %v1761_v44, %v2011_v14 }
  0x7c   : > { %2671 = vst [vmem:[#allocation44_spill] sm:$0xff] %v2110_v34  ;;  %v2674_v9 = vld [vmem:[#allocation10_spill] sm:$0xff]  ;;  %2678 = vst [vmem:[#allocation45_spill] sm:$0xff] %v2128_v17  ;;  %v2679_v4 = vld [vmem:[#allocation12_spill] sm:$0xff]  ;;  %vm625_vm10 = vcmp.ge.f32.partialorder %v2667_v19, 0.0  ;;  %vm645_vm15 = vcmp.ge.f32.partialorder %v1909_v43, 0.0  ;;  %v2248_v44 = vsel %vm609_vm1, %v1765_v38, %v2020_v26  ;;  %v738_v38 = vsel %vm610_vm2, %v1769_v21, %v2023_v2 }
  0x7d   : > { %2670 = vst [vmem:[#allocation8_spill] sm:$0xff] %v2105_v59  ;;  %2673 = vst [vmem:[#allocation9_spill] sm:$0xff] %v2117_v1  ;;  %v2120_v53 = vmul.f32 0.2, %v2674_v9  ;;  %v2676_v59 = vld [vmem:[#allocation11_spill] sm:$0xff]  ;;  %vm651_vm4 = vcmp.ge.f32.partialorder %v1933_v16, 0.0  ;;  %v741_v2 = vsel %vm613_vm5, %v1781_v10, %v2038_v58 }
  0x7e   : > { %v2123_v27 = vmul.f32 0.2, %v2676_v59  ;;  %v2135_v34 = vmul.f32 0.2, %v2679_v4  ;;  %v2685_v13 = vld [vmem:[#allocation15_spill] sm:$0xff]  ;;  %2688 = vst [vmem:[#allocation47_spill] sm:$0xff] %v2165_v32 }
  0x7f   : > { %2675 = vst [vmem:[#allocation10_spill] sm:$0xff] %v2120_v53  ;;  %v2680_v53 = vld [vmem:[#allocation13_spill] sm:$0xff]  ;;  %v2153_v17 = vmul.f32 0.2, %v2685_v13  ;;  %vm629_vm11 = vcmp.ge.f32.partialorder %v2676_v59, 0.0  ;;  %2692 = vst [vmem:[#allocation49_spill] sm:$0xff] %v2184_v20 }
  0x80   : > { %2677 = vst [vmem:[#allocation11_spill] sm:$0xff] %v2123_v27  ;;  %v2138_v1 = vmul.f32 0.2, %v2680_v53  ;;  %v2682_v27 = vld [vmem:[#allocation14_spill] sm:$0xff]  ;;  %v2172_v29 = vmul.f32 0.2, %v1873_v57 }
  0x81   : > { %v2141_v50 = vmul.f32 0.2, %v2682_v27  ;;  %2684 = vst [vmem:[#allocation14_spill] sm:$0xff] %v2146_v51  ;;  %v2689_v51 = vld [vmem:[#allocation16_spill] sm:$0xff]  ;;  %vm633_vm12 = vcmp.ge.f32.partialorder %v2685_v13, 0.0  ;;  %2695 = vst [vmem:[#allocation50_spill] sm:$0xff] %v2203_v39 }
  0x82   : > { %2681 = vst [vmem:[#allocation12_spill] sm:$0xff] %v2138_v1  ;;  %v2156_v1 = vmul.f32 0.2, %v1865_v33  ;;  %v2191_v3 = vmul.f32 0.2, %v1885_v15  ;;  %vm637_vm13 = vcmp.ge.f32.partialorder %v2689_v51, 0.0 }
  0x83   : > { %2683 = vst [vmem:[#allocation13_spill] sm:$0xff] %v2141_v50  ;;  %v2159_v50 = vmul.f32 0.2, %v1869_v55  ;;  %v2194_v32 = vmul.f32 0.2, %v1889_v36  ;;  %2697 = vst [vmem:[#allocation52_spill] sm:$0xff] %v2222_v40 }
  0x84   : > { %2686 = vst [vmem:[#allocation15_spill] sm:$0xff] %v2156_v1  ;;  %v2175_v1 = vmul.f32 0.2, %v2689_v51  ;;  %v2210_v8 = vmul.f32 0.2, %v1897_v37  ;;  %2698 = vst [vmem:[#allocation53_spill] sm:$0xff] %v2235_v41 }
  0x85   : > { %2687 = vst [vmem:[#allocation46_spill] sm:$0xff] %v2159_v50  ;;  %v2178_v50 = vmul.f32 0.2, %v1881_v45  ;;  %v2213_v20 = vmul.f32 0.2, %v1901_v5  ;;  %2699 = vst [vmem:[#allocation54_spill] sm:$0xff] %v2248_v44 }
  0x86   : > { %2690 = vst [vmem:[#allocation16_spill] sm:$0xff] %v2175_v1  ;;  %v709_v47 = vmul.f32 0.2, %v1909_v43  ;;  %v710_v39 = vmul.f32 0.2, %v1913_v56  ;;  %v2701_v26 = vld [vmem:[#allocation26_spill] sm:$0xff] }
  0x87   : > { %2691 = vst [vmem:[#allocation48_spill] sm:$0xff] %v2178_v50  ;;  %v2693_v50 = vld [vmem:[#allocation17_spill] sm:$0xff]  ;;  %v712_v35 = vmul.f32 0.2, %v1921_v30  ;;  %v713_v40 = vmul.f32 0.2, %v1925_v62 }
  0x88   : > { %v2197_v1 = vmul.f32 0.2, %v2693_v50  ;;  %vm641_vm14 = vcmp.ge.f32.partialorder %v2693_v50, 0.0  ;;  %v715_v14 = vmul.f32 0.2, %v1933_v16  ;;  %v2700_v30 = vld [vmem:[#allocation25_spill] sm:$0xff] }
  0x89   : > { %v716_v41 = vmul.f32 0.2, %v1937_v54  ;;  %vm653_vm1 = vcmp.ge.f32.partialorder %v2700_v30, 0.0  ;;  %vm654_vm0 = vcmp.ge.f32.partialorder %v2701_v26, 0.0  ;;  %v2702_v44 = vld [vmem:[#allocation27_spill] sm:$0xff]  ;;  %vm2704_vm6 = vcmp.ge.f32.partialorder %v1777_v22, 0.0 }
  0x8a   : > { %2694 = vst [vmem:[#allocation17_spill] sm:$0xff] %v2197_v1  ;;  %v2216_v1 = vmul.f32 0.2, %v1905_v49  ;;  %v714_v49 = vmul.f32 0.2, %v1929_v48  ;;  %v2703_v16 = vld [vmem:[#allocation31_spill] sm:$0xff]  ;;  %v740_v21 = vsel %vm2704_vm6, %v1777_v22, %v2035_v11 }
  0x8b   : > { %v718_v48 = vmul.f32 0.2, %v2701_v26  ;;  %v719_v62 = vmul.f32 0.2, %v2702_v44  ;;  %v739_v54 = vsel %vm611_vm3, %v1773_v18, %v2703_v16  ;;  %vm2706_vm2 = vcmp.ge.f32.partialorder %v1785_v24, 0.0  ;;  %v2709_v16 = vld [vmem:[#allocation35_spill] sm:$0xff] }
  0x8c   : > { %2696 = vst [vmem:[#allocation51_spill] sm:$0xff] %v2216_v1  ;;  %v711_v1 = vmul.f32 0.2, %v1917_v42  ;;  %v717_v42 = vmul.f32 0.2, %v2700_v30  ;;  %v2705_v30 = vld [vmem:[#allocation33_spill] sm:$0xff]  ;;  %v745_v10 = vsel %vm617_vm8, %v1797_v7, %v2709_v16 }
  0x8d   : > { %v742_v44 = vsel %vm2706_vm2, %v1785_v24, %v2705_v30  ;;  %vm2707_vm7 = vcmp.ge.f32.partialorder %v1789_v25, 0.0  ;;  %vm2708_vm3 = vcmp.ge.f32.partialorder %v1793_v63, 0.0  ;;  %v2710_v11 = vld [vmem:[#allocation37_spill] sm:$0xff]  ;;  %vm2711_vm5 = vcmp.ge.f32.partialorder %v1801_v31, 0.0  ;;  %v2712_v30 = vld [vmem:[#allocation38_spill] sm:$0xff]  ;;  %v2714_v58 = vld [vmem:[#allocation39_spill] sm:$0xff] }
  0x8e   : > { %v743_v18 = vsel %vm2707_vm7, %v1789_v25, %v2050_v46  ;;  %v744_v22 = vsel %vm2708_vm3, %v1793_v63, %v2053_v0  ;;  %v746_v24 = vsel %vm2711_vm5, %v1801_v31, %v2710_v11  ;;  %vm2713_vm6 = vcmp.ge.f32.partialorder %v1805_v52, 0.0  ;;  %v2715_v46 = vld [vmem:[#allocation4_spill] sm:$0xff]  ;;  %v2717_v0 = vld [vmem:[#allocation41_spill] sm:$0xff]  ;;  %v2718_v16 = vld [vmem:[#allocation42_spill] sm:$0xff] }
  0x8f   : > { %v747_v25 = vsel %vm2713_vm6, %v1805_v52, %v2712_v30  ;;  %vm2716_vm7 = vcmp.ge.f32.partialorder %v2715_v46, 0.0  ;;  %v749_v7 = vsel %vm621_vm9, %v1813_v6, %v2717_v0  ;;  %vm2719_vm8 = vcmp.ge.f32.partialorder %v1817_v12, 0.0  ;;  %v2720_v11 = vld [vmem:[#allocation5_spill] sm:$0xff]  ;;  %v2722_v30 = vld [vmem:[#allocation6_spill] sm:$0xff]  ;;  %v2725_v0 = vld [vmem:[#allocation8_spill] sm:$0xff] }
  0x90   : > { %v748_v63 = vsel %vm2716_vm7, %v2715_v46, %v2714_v58  ;;  %v750_v31 = vsel %vm2719_vm8, %v1817_v12, %v2718_v16  ;;  %vm2721_vm2 = vcmp.ge.f32.partialorder %v2662_v61, 0.0  ;;  %vm2723_vm3 = vcmp.ge.f32.partialorder %v2665_v23, 0.0  ;;  %v2724_v46 = vld [vmem:[#allocation7_spill] sm:$0xff]  ;;  %v2727_v16 = vld [vmem:[#allocation9_spill] sm:$0xff] }
  0x91   : > { %v751_v52 = vsel %vm2721_vm2, %v2662_v61, %v2720_v11  ;;  %v752_v58 = vsel %vm2723_vm3, %v2665_v23, %v2722_v30  ;;  %v753_v6 = vsel %vm625_vm10, %v2667_v19, %v2724_v46  ;;  %vm2726_vm9 = vcmp.ge.f32.partialorder %v2669_v28, 0.0  ;;  %v2729_v11 = vld [vmem:[#allocation10_spill] sm:$0xff]  ;;  %v2731_v30 = vld [vmem:[#allocation11_spill] sm:$0xff]  ;;  %v2733_v46 = vld [vmem:[#allocation12_spill] sm:$0xff] }
  0x92   : > { %v754_v12 = vsel %vm2726_vm9, %v2669_v28, %v2725_v0  ;;  %vm2728_vm5 = vcmp.ge.f32.partialorder %v2672_v60, 0.0  ;;  %vm2730_vm6 = vcmp.ge.f32.partialorder %v2674_v9, 0.0  ;;  %v757_v19 = vsel %vm629_vm11, %v2676_v59, %v2731_v30  ;;  %v2735_v0 = vld [vmem:[#allocation13_spill] sm:$0xff]  ;;  %v2751_v30 = vld [vmem:[#allocation18_spill] sm:$0xff] }
  0x93   : > { %v755_v61 = vsel %vm2728_vm5, %v2672_v60, %v2727_v16  ;;  %v756_v23 = vsel %vm2730_vm6, %v2674_v9, %v2729_v11  ;;  %vm2732_vm10 = vcmp.ge.f32.partialorder %v2679_v4, 0.0  ;;  %vm2734_vm7 = vcmp.ge.f32.partialorder %v2680_v53, 0.0  ;;  %v2737_v16 = vld [vmem:[#allocation15_spill] sm:$0xff]  ;;  %v2742_v11 = vld [vmem:[#allocation16_spill] sm:$0xff] }
  0x94   : > { %v758_v28 = vsel %vm2732_vm10, %v2679_v4, %v2135_v34  ;;  %v759_v60 = vsel %vm2734_vm7, %v2680_v53, %v2733_v46  ;;  %vm2736_vm8 = vcmp.ge.f32.partialorder %v2682_v27, 0.0  ;;  %v761_v59 = vsel %vm633_vm12, %v2685_v13, %v2153_v17  ;;  %v2739_v4 = vld [vmem:[#allocation46_spill] sm:$0xff]  ;;  %v2743_v13 = vld [vmem:[#allocation48_spill] sm:$0xff]  ;;  %v2754_v46 = vld [vmem:[#allocation19_spill] sm:$0xff] }
  0x95   : > { %v760_v9 = vsel %vm2736_vm8, %v2682_v27, %v2735_v0  ;;  %vm2738_vm11 = vcmp.ge.f32.partialorder %v1865_v33, 0.0  ;;  %vm2740_vm2 = vcmp.ge.f32.partialorder %v1869_v55, 0.0  ;;  %vm2741_vm3 = vcmp.ge.f32.partialorder %v1873_v57, 0.0 }
  0x96   : > { %v762_v34 = vsel %vm2738_vm11, %v1865_v33, %v2737_v16  ;;  %v763_v53 = vsel %vm2740_vm2, %v1869_v55, %v2739_v4  ;;  %v764_v27 = vsel %vm2741_vm3, %v1873_v57, %v2172_v29  ;;  %v765_v17 = vsel %vm637_vm13, %v2689_v51, %v2742_v11  ;;  %v2747_v29 = vld [vmem:[#allocation17_spill] sm:$0xff]  ;;  %v2760_v16 = vld [vmem:[#allocation22_spill] sm:$0xff]  ;;  %v2766_v11 = vld [vmem:[#allocation27_spill] sm:$0xff] }
  0x97   : > { %vm2744_vm12 = vcmp.ge.f32.partialorder %v1881_v45, 0.0  ;;  %vm2745_vm9 = vcmp.ge.f32.partialorder %v1885_v15, 0.0  ;;  %vm2746_vm5 = vcmp.ge.f32.partialorder %v1889_v36, 0.0  ;;  %v769_v51 = vsel %vm641_vm14, %v2693_v50, %v2747_v29  ;;  %v2765_v4 = vld [vmem:[#allocation25_spill] sm:$0xff]  ;;  %v2769_v29 = vld [vmem:[#allocation43_spill] sm:$0xff] }
  0x98   : > { %v766_v33 = vsel %vm2744_vm12, %v1881_v45, %v2743_v13  ;;  %v767_v55 = vsel %vm2745_vm9, %v1885_v15, %v2191_v3  ;;  %v768_v57 = vsel %vm2746_vm5, %v1889_v36, %v2194_v32  ;;  %vm2748_vm13 = vcmp.ge.f32.partialorder %v1897_v37, 0.0  ;;  %v2750_v3 = vld [vmem:[#allocation51_spill] sm:$0xff] }
  0x99   : > { %v770_v45 = vsel %vm2748_vm13, %v1897_v37, %v2210_v8  ;;  %vm2749_vm6 = vcmp.ge.f32.partialorder %v1901_v5, 0.0  ;;  %vm2752_vm10 = vcmp.ge.f32.partialorder %v2751_v30, 0.0  ;;  %v773_v32 = vsel %vm645_vm15, %v1909_v43, %v709_v47  ;;  %v2756_v8 = vld [vmem:[#allocation20_spill] sm:$0xff]  ;;  %v2762_v47 = vld [vmem:[#allocation23_spill] sm:$0xff] }
  0x9a   : > { %v771_v15 = vsel %vm2749_vm6, %v1901_v5, %v2213_v20  ;;  %v772_v36 = vsel %vm2752_vm10, %v2751_v30, %v2750_v3  ;;  %vm2753_vm14 = vcmp.ge.f32.partialorder %v1913_v56, 0.0  ;;  %vm2755_vm7 = vcmp.ge.f32.partialorder %v2754_v46, 0.0  ;;  %v2758_v20 = vld [vmem:[#allocation21_spill] sm:$0xff]  ;;  %v2768_v13 = vld [vmem:[#allocation3_spill] sm:$0xff]  ;;  %v2771_v30 = vld [vmem:[#allocation44_spill] sm:$0xff] }
  0x9b   : > { %v774_v50 = vsel %vm2753_vm14, %v1913_v56, %v710_v39  ;;  %v775_v37 = vsel %vm2755_vm7, %v2754_v46, %v711_v1  ;;  %vm2757_vm8 = vcmp.ge.f32.partialorder %v2756_v8, 0.0  ;;  %vm2759_vm11 = vcmp.ge.f32.partialorder %v2758_v20, 0.0  ;;  %v2763_v39 = vld [vmem:[#allocation24_spill] sm:$0xff] }
  0x9c   : > { %v776_v5 = vsel %vm2757_vm8, %v2756_v8, %v712_v35  ;;  %v777_v0 = vsel %vm2759_vm11, %v2758_v20, %v713_v40  ;;  %vm2761_vm2 = vcmp.ge.f32.partialorder %v2760_v16, 0.0  ;;  %v779_v56 = vsel %vm651_vm4, %v2762_v47, %v715_v14  ;;  %v2770_v14 = vld [vmem:[#allocation28_spill] sm:$0xff]  ;;  %v2772_v8 = vld [vmem:[#allocation29_spill] sm:$0xff]  ;;  %v2775_v47 = vld [vmem:[#allocation14_spill] sm:$0xff] }
  0x9d   : > { %v778_v43 = vsel %vm2761_vm2, %v2760_v16, %v714_v49  ;;  %vm2764_vm15 = vcmp.ge.f32.partialorder %v2763_v39, 0.0  ;;  %v781_v35 = vsel %vm653_vm1, %v2765_v4, %v717_v42  ;;  %v782_v40 = vsel %vm654_vm0, %v2701_v26, %v718_v48  ;;  %v2774_v16 = vld [vmem:[#allocation30_spill] sm:$0xff]  ;;  %v2777_v4 = vld [vmem:[#allocation47_spill] sm:$0xff]  ;;  %v2778_v48 = vld [vmem:[#allocation53_spill] sm:$0xff] }
  0x9e   : > { %v780_v1 = vsel %vm2764_vm15, %v2763_v39, %v716_v41  ;;  %vm2767_vm3 = vcmp.ge.f32.partialorder %v2766_v11, 0.0  ;;  %v784_v3 = vadd.f32 %v2769_v29, %v2768_v13  ;;  %v797_v46 = vadd.f32 %v2771_v30, %v2770_v14  ;;  %v2773_v41 = vld [vmem:[#allocation45_spill] sm:$0xff]  ;;  %v2776_v39 = vld [vmem:[#allocation32_spill] sm:$0xff]  ;;  %v2782_v30 = vld [vmem:[#allocation50_spill] sm:$0xff] }
  0x9f   : > { %v783_v49 = vsel %vm2767_vm3, %v2766_v11, %v719_v62  ;;  %v810_v20 = vadd.f32 %v2773_v41, %v2772_v8  ;;  %v823_v42 = vadd.f32 %v2775_v47, %v2774_v16  ;;  %v836_v26 = vadd.f32 %v2777_v4, %v2776_v39  ;;  %v2779_v62 = vld [vmem:[#allocation34_spill] sm:$0xff]  ;;  %v2780_v13 = vld [vmem:[#allocation49_spill] sm:$0xff]  ;;  %v2781_v14 = vld [vmem:[#allocation36_spill] sm:$0xff] }
  0xa0   : > { %v785_v11 = vadd.f32 %v784_v3, %v2778_v48  ;;  %v849_v29 = vadd.f32 %v2780_v13, %v2779_v62  ;;  %v862_v8 = vadd.f32 %v2782_v30, %v2781_v14  ;;  %v2783_v41 = vld [vmem:[#allocation40_spill] sm:$0xff]  ;;  %v2785_v4 = vld [vmem:[#allocation54_spill] sm:$0xff] }
  0xa1   : > { %v2784_v16 = vld [vmem:[#allocation52_spill] sm:$0xff]  ;;  %v798_v39 = vadd.f32 %v797_v46, %v2785_v4  ;;  %v811_v3 = vadd.f32 %v810_v20, %v738_v38  ;;  %v824_v48 = vadd.f32 %v823_v42, %v739_v54  ;;  %v837_v13 = vadd.f32 %v836_v26, %v740_v21 }
  0xa2   : > { %v875_v47 = vadd.f32 %v2784_v16, %v2783_v41  ;;  %v786_v62 = vadd.f32 %v785_v11, %v744_v22  ;;  %v850_v14 = vadd.f32 %v849_v29, %v741_v2  ;;  %v863_v30 = vadd.f32 %v862_v8, %v742_v44 }
  0xa3   : > { %v799_v41 = vadd.f32 %v798_v39, %v745_v10  ;;  %v812_v4 = vadd.f32 %v811_v3, %v746_v24  ;;  %v825_v46 = vadd.f32 %v824_v48, %v747_v25  ;;  %v838_v20 = vadd.f32 %v837_v13, %v748_v63 }
  0xa4   : > { %v876_v16 = vadd.f32 %v875_v47, %v743_v18  ;;  %v787_v38 = vadd.f32 %v786_v62, %v752_v58  ;;  %v851_v42 = vadd.f32 %v850_v14, %v749_v7  ;;  %v864_v54 = vadd.f32 %v863_v30, %v750_v31 }
  0xa5   : > { %v800_v26 = vadd.f32 %v799_v41, %v753_v6  ;;  %v813_v11 = vadd.f32 %v812_v4, %v754_v12  ;;  %v826_v22 = vadd.f32 %v825_v46, %v755_v61  ;;  %v839_v2 = vadd.f32 %v838_v20, %v756_v23 }
  0xa6   : > { %v877_v21 = vadd.f32 %v876_v16, %v751_v52  ;;  %v788_v29 = vadd.f32 %v787_v38, %v760_v9  ;;  %v852_v8 = vadd.f32 %v851_v42, %v757_v19  ;;  %v865_v44 = vadd.f32 %v864_v54, %v758_v28 }
  0xa7   : > { %v801_v47 = vadd.f32 %v800_v26, %v761_v59  ;;  %v814_v10 = vadd.f32 %v813_v11, %v762_v34  ;;  %v827_v39 = vadd.f32 %v826_v22, %v763_v53  ;;  %v840_v3 = vadd.f32 %v839_v2, %v764_v27 }
  0xa8   : > { %v878_v18 = vadd.f32 %v877_v21, %v759_v60  ;;  %v789_v24 = vadd.f32 %v788_v29, %v768_v57  ;;  %v853_v25 = vadd.f32 %v852_v8, %v765_v17  ;;  %v866_v48 = vadd.f32 %v865_v44, %v766_v33 }
  0xa9   : > { %v802_v58 = vadd.f32 %v801_v47, %v769_v51  ;;  %v815_v7 = vadd.f32 %v814_v10, %v770_v45  ;;  %v828_v31 = vadd.f32 %v827_v39, %v771_v15  ;;  %v841_v52 = vadd.f32 %v840_v3, %v772_v36 }
  0xaa   : > { %v879_v63 = vadd.f32 %v878_v18, %v767_v55  ;;  %v790_v6 = vadd.f32 %v789_v24, %v776_v5  ;;  %v854_v12 = vadd.f32 %v853_v25, %v773_v32  ;;  %v867_v61 = vadd.f32 %v866_v48, %v774_v50 }
  0xab   : > { %v803_v9 = vadd.f32 %v802_v58, %v777_v0  ;;  %v816_v19 = vadd.f32 %v815_v7, %v778_v43  ;;  %v829_v28 = vadd.f32 %v828_v31, %v779_v56  ;;  %v842_v60 = vadd.f32 %v841_v52, %v780_v1  ;;  %v2786_v52 = vld [vmem:[#allocation2_spill] sm:$0xff] }
  0xac   : > { %v880_v23 = vadd.f32 %v879_v63, %v775_v37  ;;  %v791_v59 = vrot.slane %v790_v6, 4  ;;  %v855_v34 = vadd.f32 %v854_v12, %v781_v35  ;;  %v868_v53 = vadd.f32 %v867_v61, %v782_v40 }
  0xad   : > { %v804_v57 = vrot.slane %v803_v9, 4  ;;  %v817_v17 = vrot.slane %v816_v19, 4  ;;  %v830_v33 = vrot.slane %v829_v28, 4  ;;  %v843_v55 = vrot.slane %v842_v60, 4 }
  0xae   : > { %v881_v27 = vadd.f32 %v880_v23, %v783_v49  ;;  %v792_v51 = vadd.f32 %v791_v59, %v790_v6  ;;  %v856_v45 = vrot.slane %v855_v34, 4  ;;  %v869_v15 = vrot.slane %v868_v53, 4 }
  0xaf   : > { %v805_v5 = vadd.f32 %v804_v57, %v803_v9  ;;  %v818_v32 = vadd.f32 %v817_v17, %v816_v19  ;;  %v831_v50 = vadd.f32 %v830_v33, %v829_v28  ;;  %v844_v37 = vadd.f32 %v843_v55, %v842_v60 }
  0xb0   : > { %v882_v36 = vrot.slane %v881_v27, 4  ;;  %v793_v0 = vrot.slane %v792_v51, 2  ;;  %v857_v43 = vadd.f32 %v856_v45, %v855_v34  ;;  %v870_v56 = vadd.f32 %v869_v15, %v868_v53 }
  0xb1   : > { %v806_v13 = vrot.slane %v805_v5, 2  ;;  %v819_v35 = vrot.slane %v818_v32, 2  ;;  %v832_v40 = vrot.slane %v831_v50, 2  ;;  %v845_v49 = vrot.slane %v844_v37, 2 }
  0xb2   : > { %v883_v1 = vadd.f32 %v882_v36, %v881_v27  ;;  %v794_v62 = vadd.f32 %v793_v0, %v792_v51  ;;  %v858_v14 = vrot.slane %v857_v43, 2  ;;  %v871_v30 = vrot.slane %v870_v56, 2 }
  0xb3   : > { %v807_v41 = vadd.f32 %v806_v13, %v805_v5  ;;  %v820_v4 = vadd.f32 %v819_v35, %v818_v32  ;;  %v833_v46 = vadd.f32 %v832_v40, %v831_v50  ;;  %v846_v20 = vadd.f32 %v845_v49, %v844_v37 }
  0xb4   : > { %v884_v16 = vrot.slane %v883_v1, 2  ;;  %v795_v38 = vrot.slane %v794_v62, 1  ;;  %v859_v42 = vadd.f32 %v858_v14, %v857_v43  ;;  %v872_v54 = vadd.f32 %v871_v30, %v870_v56 }
  0xb5   : > { %v808_v26 = vrot.slane %v807_v41, 1  ;;  %v821_v11 = vrot.slane %v820_v4, 1  ;;  %v834_v22 = vrot.slane %v833_v46, 1  ;;  %v847_v2 = vrot.slane %v846_v20, 1 }
  0xb6   : > { %v885_v21 = vadd.f32 %v884_v16, %v883_v1  ;;  %v796_v29 = vadd.f32 %v795_v38, %v794_v62  ;;  %v860_v8 = vrot.slane %v859_v42, 1  ;;  %v873_v44 = vrot.slane %v872_v54, 1 }
  0xb7   : > { %v809_v47 = vadd.f32 %v808_v26, %v807_v41  ;;  %v822_v10 = vadd.f32 %v821_v11, %v820_v4  ;;  %v835_v39 = vadd.f32 %v834_v22, %v833_v46  ;;  %v848_v3 = vadd.f32 %v847_v2, %v846_v20 }
  0xb8   : > { %v886_v18 = vrot.slane %v885_v21, 1  ;;  %v861_v24 = vadd.f32 %v860_v8, %v859_v42  ;;  %v874_v25 = vadd.f32 %v873_v44, %v872_v54 }
  0xb9   : > { %v896_v63 = vcombine.low %v796_v29, %v809_v47  ;;  %v897_v58 = vcombine.low %v822_v10, %v835_v39 }
  0xba   : > { %v887_v48 = vadd.f32 %v886_v18, %v885_v21  ;;  %v898_v7 = vcombine.low %v848_v3, %v861_v24 }
  0xbb   : > { %v906_v6 = vrot.slane %v896_v63, %v2786_v52  ;;  %v913_v12 = vrot.slane %v897_v58, %v2786_v52 }
  0xbc   : > { %v899_v31 = vcombine.low %v874_v25, %v887_v48  ;;  %v920_v61 = vrot.slane %v898_v7, %v2786_v52 }
  0xbd   : > { %v928_v9 = vcombine.low %v906_v6, %v913_v12 }
  0xbe   : > { %v927_v23 = vrot.slane %v899_v31, %v2786_v52 }
  0xbf   : > { %v936_v28 = vrot.slane %v928_v9, %v2786_v52 }
  0xc0   : > { %v929_v19 = vcombine.low %v920_v61, %v927_v23 }
  0xc2   : > { %v943_v60 = vrot.slane %v929_v19, %v2786_v52 }
  0xc4   : > { %v944_v59 = vcombine.low %v936_v28, %v943_v60 }
  0xc6   : > { %946 = vst [vmem:[%s173_s7] sm:$0xff] %v944_v59 }
  0xc7 PF: > { %s13_s12 = sadd.s32 1, %s1033_s12  }
  0xc8   : > { %p10_p5 = scmp.ge.s32.totalorder %s13_s12, 4  }
  0xca   :  { %12 = sbr.rel (!%p10_p5) target bundleno = 1 (0x1), region = 62 }

// kernel: gcn_r_forward.11
= control target key start
LH: loop header
LB: loop body
LE: loop exit
PB: predicated region body
PF: predicated region fallthrough
CT: control target
= control target key end

     0   :  { %s4814_s21 = smov 0   ;;  %s4816_s22 = smov 0   ;;  %s6071_s0 = inlined_call_operand.vmem [shape: bf16[2,64,64], index: 0, kind: input, shape index: {}]   ;;  %s6072_s1 = inlined_call_operand.vmem [shape: bf16[128,64], index: 1, kind: input, shape index: {}]   ;;  %s6073_s2 = inlined_call_operand.vmem [shape: bf16[128,64], index: 2, kind: input, shape index: {}]   ;;  %s6074_s3 = inlined_call_operand.vmem [shape: bf16[128,128], index: 3, kind: input, shape index: {}]   ;;  %s6075_s4 = inlined_call_operand.vmem [shape: bf16[128,256], index: 4, kind: input, shape index: {}]   ;;  %s6076_s5 = inlined_call_operand.vmem [shape: f32[2,2,64], index: 5, kind: input, shape index: {}]   ;;  %s6077_s6 = inlined_call_operand.vmem [shape: f32[2,2,64], index: 6, kind: input, shape index: {}]   ;;  %s6078_s7 = inlined_call_operand.vmem [shape: f32[2,2,128], index: 7, kind: input, shape index: {}]   ;;  %s6079_s8 = inlined_call_operand.vmem [shape: f32[2,2,256], index: 8, kind: input, shape index: {}]   ;;  %s6080_s9 = inlined_call_operand.vmem [shape: f32[2,512], index: 9, kind: input, shape index: {}]   ;;  %s6081_s10 = inlined_call_operand.vmem [shape: bf16[512,1024], index: 10, kind: input, shape index: {}]   ;;  %s6082_s11 = inlined_call_operand.vmem [shape: bf16[128,1024], index: 11, kind: output, shape index: {0}]   ;;  %s6083_s12 = inlined_call_operand.vmem [shape: f32[2,2,1024], index: 12, kind: output, shape index: {1}]  }
   0x1   :  { %s4818_s23 = smov 0  }
   0x2 LB: > { %s35_s24 = sadd.s32 1, %s4739_s22  ;;  %p4200_p0 = scmp.ge.s32.totalorder %s4743_s23, 1  ;;  %s4743_s23 = sphi %s4818_s23, %s23_s23   ;;  %s4739_s22 = sphi %s4816_s22, %s6085_s22   ;;  %s4735_s21 = sphi %s4814_s21, %s6084_s21  }
   0x3   : > { %p37_p1 = scmp.ge.s32.totalorder %s35_s24, 2  ;;  %p433_p2 = scmp.lt.s32.totalorder %s4743_s23, 3 }
   0x5   : > { %s6087_s24 = smov (%p37_p1, %s35_s24), 0  ;;  %p434_p3 = pnand %p4200_p0, %p433_p2 }
   0x6   : > { %v673_v0 = vld [vmem:[%s6077_s6] sm:$0x3] (!%p434_p3)  ;;  %v674_v1 = vld [vmem:[%s6077_s6 + $0x2] sm:$0x3] (!%p434_p3)  ;;  %v4745_v9 = vmov (!%p434_p3), 1983009808   ;;  %v585_v11 = vlaneseq (!%p434_p3) }
   0x7   : > { %437 = sbr.rel (%p434_p3) target bundleno = 1331 (0x533), region = 64  ;;  %v675_v2 = vadd.f32 (!%p434_p3), %v674_v1, %v673_v0  ;;  %v583_v10 = vunpack.c.l.s4 (!%p434_p3), %v4745_v9  ;;  %s4746_s29 = smov (!%p434_p3), 64   ;;  %v4850_v18 = vld [vmem:[%s6080_s9] sm:$0xff] (!%p434_p3) }
   0x8   : > { %v4840_v13 = vshrl.u32 (!%p434_p3), %v585_v11, 7  ;;  %v797_v31 = vld [vmem:[%s6078_s7] sm:$0x3] (!%p434_p3)  ;;  %v798_v32 = vld [vmem:[%s6078_s7 + $0x2] sm:$0x3] (!%p434_p3)  ;;  %v810_v48 = vrot.slane (!%p434_p3), %v4850_v18, 2 }
   0x9   : > { %v676_v3 = vmul.f32 (!%p434_p3), 0.0078125, %v675_v2  ;;  %v584_v12 = vunpack.c.0.s8 (!%p434_p3), %v583_v10  ;;  %v799_v33 = vadd.f32 (!%p434_p3), %v798_v32, %v797_v31  ;;  %v904_v40 = vld [vmem:[%s6079_s8] sm:$0xf] (!%p434_p3)  ;;  %v905_v41 = vld [vmem:[%s6079_s8 + $0x4] sm:$0xf] (!%p434_p3)  ;;  %s4203_s26 = sshll.u32 (!%p434_p3), %s4735_s21, 3 }
   0xa   : > { %v4853_v19 = vsub.s32 (!%p434_p3), 0, %v4840_v13  ;;  %v4862_v27 = vsub.s32 (!%p434_p3), 1, %v4840_v13  ;;  %v906_v42 = vadd.f32 (!%p434_p3), %v905_v41, %v904_v40  ;;  %p519_p4 = scmp.lt.s32.totalorder (!%p434_p3), %s4203_s26, 15  ;;  %p509_p5 = scmp.lt.s32.totalorder (!%p434_p3), %s4735_s21, 1 }
   0xb   : > { %v677_v4 = vmul.f32 (!%p434_p3), %v676_v3, %v676_v3  ;;  %v4843_v14 = vsub.s32 (!%p434_p3), %v584_v12, %v4840_v13  ;;  %v800_v34 = vmul.f32 (!%p434_p3), 0.0078125, %v799_v33 }
   0xc   : > { %v4879_v44 = vmul.f32 (!%p434_p3), 0.0078125, %v906_v42 }
   0xd   : > { %v679_v5 = vrot.slane (!%p434_p3), %v677_v4, 7  ;;  %v801_v35 = vmul.f32 (!%p434_p3), %v800_v34, %v800_v34 }
   0xe   : > { %v908_v46 = vmul.f32 %v4879_v44, %v4879_v44  ;;  %s6089_s26 = smov (!%p519_p4, %s4203_s26), 15  ;;  %s6091_s21 = smov (!%p509_p5, %s4735_s21), 1 }
   0xf   : > { %v681_v6 = vsub.f32 %v676_v3, %v679_v5  ;;  %v803_v36 = vrot.slane %v801_v35, 7  ;;  %s4891_s27 = sshll.u32 %s6089_s26, 2  ;;  %s4524_s25 = sshll.u32 %s6091_s21, 5 }
  0x10   : > { %v910_v49 = vrot.slane %v908_v46, 7  ;;  %s528_s13 = scalar_lea.vmem %s6073_s2, %s4891_s27  ;;  %s4904_s16 = scalar_lea.vmem %s6074_s3, %s4891_s27 }
  0x11   : > { %v682_v7 = vmax.f32 %v681_v6, 0.0  ;;  %v805_v37 = vsub.f32 %v800_v34, %v803_v36  ;;  %v4593_v59 = vld [vmem:[%s4904_s16] sm:$0xff]   ;;  %v4611_v61 = vld [vmem:[%s528_s13 + $0x8] sm:$0xff]   ;;  %v4613_v1 = vld [vmem:[%s528_s13 + $0x18] sm:$0xff]   ;;  %s5147_s14 = scalar_lea.vmem %s6072_s1, %s4891_s27  ;;  %s4526_s19 = sshll.u32 %s6089_s26, 5 }
  0x12   : > { %v912_v51 = vsub.f32 %v4879_v44, %v910_v49  ;;  %v4594_v62 = vunpack.c.l.bf16 %v4593_v59  ;;  %v4595_v63 = vunpack.c.h.bf16 %v4593_v59  ;;  %v4577_v0 = vld [vmem:[%s528_s13] sm:$0xff]   ;;  %v4582_v4 = vunpack.c.l.bf16 %v4611_v61  ;;  %v4614_v6 = vld [vmem:[%s4904_s16 + $0x8] sm:$0xff]   ;;  %v4612_v10 = vld [vmem:[%s528_s13 + $0x10] sm:$0xff]   ;;  %s4959_s13 = scalar_lea.vmem %s6071_s0, %s4524_s25 }
  0x13   : > { %v683_v8 = vadd.f32 1e-05, %v682_v7  ;;  %v806_v38 = vmax.f32 %v805_v37, 0.0  ;;  %v4583_v5 = vunpack.c.h.bf16 %v4611_v61  ;;  %v4579_v9 = vunpack.c.h.bf16 %v4577_v0  ;;  %v4921_v33 = vld [vmem:[%s4904_s16 + $0x10] sm:$0xff]  }
  0x14   : > { %v913_v53 = vmax.f32 %v912_v51, 0.0 }
  0x15   : > { %4713 = vrsqrt.f32 %v683_v8  ;;  %v807_v39 = vadd.f32 1e-05, %v806_v38  ;;  %v4578_v8 = vunpack.c.l.bf16 %v4577_v0 }
  0x16   : > { %v914_v55 = vadd.f32 1e-05, %v913_v53 }
  0x17   : > { %4715 = vrsqrt.f32 %v807_v39 }
  0x18   : > { %4717 = vrsqrt.f32 %v914_v55 }
  0x1f   : > { %v4714_v15 = vpop.eup %4713 }
  0x20   : > { %v692_v16 = vrot.slane %v4714_v15, %v4843_v14 }
  0x21   : > { %v4716_v43 = vpop.eup %4715 }
  0x22   : > { %v4218_v17 = vrot.slane %v692_v16, 9  ;;  %v819_v45 = vrot.slane %v4716_v43, %v4843_v14  ;;  %v4913_v7 = vpop.eup %4717  ;;  %v4590_v16 = vunpack.c.l.bf16 %v4613_v1 }
  0x24   : > { %695 = vrot.lane.b32.xlu0 %v4218_v17, %s4746_s29  ;;  %v4219_v47 = vrot.slane %v819_v45, 9  ;;  %v4591_v17 = vunpack.c.h.bf16 %v4613_v1 }
  0x26   : > { %v823_v50 = vmul.f32 %v4219_v47, %v810_v48  ;;  %v4602_v47 = vunpack.c.l.bf16 %v4921_v33 }
  0x28   : > { %v824_v52 = vmul.f32 %v823_v50, %v800_v34  ;;  %v4898_v58 = vrot.slane %v823_v50, %v4853_v19 }
  0x2a   : > { %v832_v54 = vrot.slane %v824_v52, %v4843_v14  ;;  %v856_v2 = vmul.f32 %v4594_v62, %v4898_v58 }
  0x2c   : > { %v833_v56 = vrot.slane %v832_v54, 7 }
  0x2e   : > { %v835_v57 = vsub.f32 %v810_v48, %v833_v56 }
  0x30   : > { %v4908_v60 = vrot.slane %v835_v57, %v4862_v27 }
  0x32   : > { %v868_v11 = vadd.f32 %v4908_v60, %v856_v2 }
  0x34   : > { %vm876_vm0 = vcmp.ge.f32.partialorder %v868_v11, 0.0 }
  0x96   : > { %v696_v20 = vpop.permute.xlu0 %695 }
  0x97   : > { %v698_v21 = vmul.f32 %v696_v20, %v4850_v18  ;;  %v4598_v20 = vunpack.c.l.bf16 %v4614_v6 }
  0x99   : > { %v703_v22 = vrot.slane %v698_v21, %v4853_v19  ;;  %v4599_v21 = vunpack.c.h.bf16 %v4614_v6  ;;  %v858_v32 = vmul.f32 %v4598_v20, %v4898_v58 }
  0x9b   : > { %704 = vrot.lane.b32.xlu0 %v703_v22, %s4746_s29  ;;  %v859_v37 = vmul.f32 %v4599_v21, %v4898_v58  ;;  %v870_v41 = vadd.f32 %v4908_v60, %v858_v32 }
  0x9d   : > { %v871_v46 = vadd.f32 %v4908_v60, %v859_v37  ;;  %vm878_vm10 = vcmp.ge.f32.partialorder %v870_v41, 0.0 }
  0x9f   : > { %vm879_vm11 = vcmp.ge.f32.partialorder %v871_v46, 0.0 }
 0x10d   : > { %v705_v23 = vpop.permute.xlu0 %704 }
 0x10e   : > { %v707_v24 = vmul.f32 %v705_v23, %v676_v3  ;;  %v857_v3 = vmul.f32 %v4595_v63, %v4898_v58 }
 0x110   : > { %v715_v25 = vrot.slane %v707_v24, %v4843_v14  ;;  %v869_v12 = vadd.f32 %v4908_v60, %v857_v3  ;;  %v4220_v24 = vrot.slane %v4913_v7, 9  ;;  %v4603_v7 = vunpack.c.h.bf16 %v4921_v33 }
 0x112   : > { %v716_v26 = vrot.slane %v715_v25, 7  ;;  %vm877_vm1 = vcmp.ge.f32.partialorder %v869_v12, 0.0  ;;  %v885_v23 = vmul.f32 0.2, %v869_v12  ;;  %v916_v25 = vrot.slane %v4850_v18, 4 }
 0x114   : > { %717 = vrot.lane.b32.xlu1 %v716_v26, %s4746_s29  ;;  %v4586_v26 = vunpack.c.l.bf16 %v4612_v10  ;;  %v893_v31 = vsel %vm877_vm1, %v869_v12, %v885_v23  ;;  %v4616_v23 = vld [vmem:[%s4904_s16 + $0x18] sm:$0xff]  }
 0x115   : > { %v4606_v32 = vunpack.c.l.bf16 %v4616_v23 }
 0x117   : > { %v862_v33 = vmul.f32 %v4606_v32, %v4898_v58 }
 0x118   : > { %742 = vrot.lane.b32.xlu1 %v703_v22, %s4746_s29  ;;  %v884_v22 = vmul.f32 0.2, %v868_v11 }
 0x186   : > { %v718_v28 = vpop.permute.xlu1 %717 }
 0x187   : > { %v720_v29 = vsub.f32 %v4850_v18, %v718_v28  ;;  %v4587_v28 = vunpack.c.h.bf16 %v4612_v10 }
 0x189   : > { %v756_v30 = vrot.slane %v720_v29, %v4862_v27 }
 0x18a   : > { %v743_v15 = vpop.permute.xlu1 %742 }
 0x18b   : > { %758 = vrot.lane.b32.xlu0 %v756_v30, %s4746_s29  ;;  %v747_v29 = vmul.f32 %v4582_v4, %v743_v15  ;;  %v892_v30 = vsel %vm876_vm0, %v868_v11, %v884_v22  ;;  %v748_v34 = vmul.f32 %v4583_v5, %v743_v15  ;;  %v745_v35 = vmul.f32 %v4578_v8, %v743_v15  ;;  %v569_v4 = vld [vmem:[%s6076_s5] sm:$0x3]  ;;  %v570_v5 = vld [vmem:[%s6076_s5 + $0x2] sm:$0x3] }
 0x18c   : > { %v900_v36 = vpack.c.bf16 %v893_v31, %v892_v30  ;;  %v746_v38 = vmul.f32 %v4579_v9, %v743_v15  ;;  %v751_v39 = vmul.f32 %v4590_v16, %v743_v15  ;;  %v752_v40 = vmul.f32 %v4591_v17, %v743_v15 }
 0x18d   : > { %v749_v43 = vmul.f32 %v4586_v26, %v743_v15  ;;  %v750_v45 = vmul.f32 %v4587_v28, %v743_v15  ;;  %v886_v15 = vmul.f32 0.2, %v870_v41  ;;  %v887_v16 = vmul.f32 0.2, %v871_v46 }
 0x18e   : > { %1139 = vmatprep.subr.bf16.mxu0 %v900_v36  ;;  %v922_v17 = vmul.f32 %v4220_v24, %v916_v25  ;;  %v571_v30 = vadd.f32 %v570_v5, %v569_v4  ;;  %v860_v24 = vmul.f32 %v4602_v47, %v4898_v58  ;;  %v861_v36 = vmul.f32 %v4603_v7, %v4898_v58 }
 0x18f   : > { %v4945_v28 = vsel %vm878_vm10, %v870_v41, %v886_v15 }
 0x190   : > { %v872_v37 = vadd.f32 %v4908_v60, %v860_v24 }
 0x192   : > { %vm880_vm12 = vcmp.ge.f32.partialorder %v872_v37, 0.0  ;;  %v888_v41 = vmul.f32 0.2, %v872_v37 }
 0x1fd   : > { %v759_v42 = vpop.permute.xlu0 %758 }
 0x1fe   : > { %v763_v48 = vadd.f32 %v759_v42, %v747_v29  ;;  %v764_v49 = vadd.f32 %v759_v42, %v748_v34  ;;  %v761_v50 = vadd.f32 %v759_v42, %v745_v35  ;;  %v762_v51 = vadd.f32 %v759_v42, %v746_v38 }
 0x1ff   : > { %v767_v52 = vadd.f32 %v759_v42, %v751_v39  ;;  %v768_v53 = vadd.f32 %v759_v42, %v752_v40  ;;  %v765_v54 = vadd.f32 %v759_v42, %v749_v43  ;;  %v766_v55 = vadd.f32 %v759_v42, %v750_v45 }
 0x200   : > { %vm771_vm2 = vcmp.ge.f32.partialorder %v763_v48, 0.0  ;;  %vm772_vm3 = vcmp.ge.f32.partialorder %v764_v49, 0.0  ;;  %v779_v56 = vmul.f32 0.2, %v763_v48  ;;  %v780_v57 = vmul.f32 0.2, %v764_v49 }
 0x201   : > { %vm769_vm4 = vcmp.ge.f32.partialorder %v761_v50, 0.0  ;;  %vm770_vm5 = vcmp.ge.f32.partialorder %v762_v51, 0.0  ;;  %v777_v59 = vmul.f32 0.2, %v761_v50  ;;  %v778_v61 = vmul.f32 0.2, %v762_v51 }
 0x202   : > { %v787_v62 = vsel %vm771_vm2, %v763_v48, %v779_v56  ;;  %v788_v63 = vsel %vm772_vm3, %v764_v49, %v780_v57  ;;  %vm775_vm6 = vcmp.ge.f32.partialorder %v767_v52, 0.0  ;;  %vm776_vm7 = vcmp.ge.f32.partialorder %v768_v53, 0.0 }
 0x203   : > { %v794_v0 = vpack.c.bf16 %v788_v63, %v787_v62  ;;  %v785_v1 = vsel %vm769_vm4, %v761_v50, %v777_v59  ;;  %v786_v2 = vsel %vm770_vm5, %v762_v51, %v778_v61  ;;  %v783_v3 = vmul.f32 0.2, %v767_v52 }
 0x204   : > { %v793_v6 = vpack.c.bf16 %v786_v2, %v785_v1  ;;  %v784_v8 = vmul.f32 0.2, %v768_v53  ;;  %vm773_vm8 = vcmp.ge.f32.partialorder %v765_v54, 0.0  ;;  %vm774_vm9 = vcmp.ge.f32.partialorder %v766_v55, 0.0 }
 0x205   : > { %1084 = vrot.lane.b32.xlu0 %v794_v0, %s4746_s29  ;;  %v791_v9 = vsel %vm775_vm6, %v767_v52, %v783_v3  ;;  %v781_v10 = vmul.f32 0.2, %v765_v54  ;;  %v782_v11 = vmul.f32 0.2, %v766_v55  ;;  %v4947_v29 = vsel %vm879_vm11, %v871_v46, %v887_v16 }
 0x206   : > { %1082 = vrot.lane.b32.xlu1 %v793_v6, %s4746_s29  ;;  %v792_v12 = vsel %vm776_vm7, %v768_v53, %v784_v8  ;;  %v901_v31 = vpack.c.bf16 %v4947_v29, %v4945_v28  ;;  %v4607_v34 = vunpack.c.h.bf16 %v4616_v23  ;;  %v923_v35 = vmul.f32 %v922_v17, %v4879_v44  ;;  %v1305_v28 = vld [vmem:[%s6081_s10 + $0x20] sm:$0xff] }
 0x207   : > { %v796_v20 = vpack.c.bf16 %v792_v12, %v791_v9  ;;  %v789_v21 = vsel %vm773_vm8, %v765_v54, %v781_v10  ;;  %v790_v22 = vsel %vm774_vm9, %v766_v55, %v782_v11  ;;  %v4966_v39 = vmul.f32 0.0078125, %v571_v30 }
 0x208   : > { %v795_v26 = vpack.c.bf16 %v790_v22, %v789_v21  ;;  %v863_v38 = vmul.f32 %v4607_v34, %v4898_v58  ;;  %v873_v40 = vadd.f32 %v4908_v60, %v861_v36  ;;  %v874_v42 = vadd.f32 %v4908_v60, %v862_v33 }
 0x209   : > { %1088 = vrot.lane.b32.xlu0 %v796_v20, %s4746_s29  ;;  %v925_v45 = vrot.slane %v923_v35, 7  ;;  %v4971_v46 = vsel %vm880_vm12, %v872_v37, %v888_v41  ;;  %v959_v48 = vsub.s32 2, %v4840_v13  ;;  %v994_v51 = vsub.s32 3, %v4840_v13 }
 0x20a   : > { %1086 = vrot.lane.b32.xlu1 %v795_v26, %s4746_s29  ;;  %v875_v43 = vadd.f32 %v4908_v60, %v863_v38  ;;  %vm881_vm13 = vcmp.ge.f32.partialorder %v873_v40, 0.0  ;;  %v889_v44 = vmul.f32 0.2, %v873_v40  ;;  %vm882_vm14 = vcmp.ge.f32.partialorder %v874_v42, 0.0  ;;  %s4525_s29 = sshll.u32 %s6089_s26, 3  ;;  %s4527_s26 = sshll.u32 %s6091_s21, 4 }
 0x20b   : > { %v890_v58 = vmul.f32 0.2, %v874_v42  ;;  %v573_v60 = vmul.f32 %v4966_v39, %v4966_v39  ;;  %v927_v52 = vsub.f32 %v916_v25, %v925_v45  ;;  %v4747_v56 = vmov 0   ;;  %s5003_s16 = scalar_lea.vmem %s6075_s4, %s4525_s29  ;;  %s557_s30 = scalar_lea.vmem %s6083_s12, %s4527_s26 }
 0x20c   : > { %v4973_v47 = vsel %vm881_vm13, %v873_v40, %v889_v44  ;;  %vm883_vm15 = vcmp.ge.f32.partialorder %v875_v43, 0.0  ;;  %v891_v50 = vmul.f32 0.2, %v875_v43  ;;  %1171 = vmatprep.mubr.bf16.mxu0 %v4747_v56  ;;  %1244 = vmatprep.mubr.bf16.mxu1 %v4747_v56  ;;  %v956_v57 = vrot.slane %v922_v17, %v4853_v19  ;;  %v928_v4 = vld [vmem:[%s5003_s16] sm:$0xff]  ;;  %v929_v5 = vld [vmem:[%s5003_s16 + $0x8] sm:$0xff]  ;;  %v930_v6 = vld [vmem:[%s5003_s16 + $0x10] sm:$0xff] }
 0x20d   : > { %v902_v49 = vpack.c.bf16 %v4973_v47, %v4971_v46  ;;  %v4983_v53 = vsel %vm882_vm14, %v874_v42, %v890_v58  ;;  %v960_v59 = vrot.slane %v922_v17, %v959_v48  ;;  %v575_v61 = vrot.slane %v573_v60, 7  ;;  %v931_v12 = vld [vmem:[%s5003_s16 + $0x18] sm:$0xff]  ;;  %v1309_v46 = vld [vmem:[%s6081_s10 + $0x40] sm:$0xff] }
 0x20e   : > { %v4985_v54 = vsel %vm883_vm15, %v875_v43, %v891_v50  ;;  %v991_v62 = vrot.slane %v927_v52, %v4862_v27  ;;  %v995_v63 = vrot.slane %v927_v52, %v994_v51  ;;  %v4995_v25 = vrot.slane %v956_v57, %v4853_v19  ;;  %v932_v50 = vld [vmem:[%s5003_s16 + $0x20] sm:$0xff] }
 0x20f   : > { %v903_v55 = vpack.c.bf16 %v4985_v54, %v4983_v53  ;;  %v4998_v0 = vrot.slane %v960_v59, %v4853_v19  ;;  %v5006_v1 = vsub.f32 %v4966_v39, %v575_v61  ;;  %v937_v8 = vunpack.c.h.bf16 %v928_v4  ;;  %v933_v59 = vld [vmem:[%s5003_s16 + $0x28] sm:$0xff]  ;;  %v1313_v47 = vld [vmem:[%s6081_s10 + $0x60] sm:$0xff] }
 0x210   : > { %v5009_v2 = vrot.slane %v991_v62, %v4862_v27  ;;  %v5012_v3 = vrot.slane %v995_v63, %v4862_v27  ;;  %v939_v9 = vunpack.c.h.bf16 %v929_v5  ;;  %v936_v10 = vunpack.c.l.bf16 %v928_v4  ;;  %v1317_v53 = vld [vmem:[%s6081_s10 + $0x80] sm:$0xff] }
 0x211   : > { %v938_v11 = vunpack.c.l.bf16 %v929_v5  ;;  %v941_v15 = vunpack.c.h.bf16 %v930_v6  ;;  %v943_v16 = vunpack.c.h.bf16 %v931_v12  ;;  %v940_v17 = vunpack.c.l.bf16 %v930_v6  ;;  %v1321_v54 = vld [vmem:[%s6081_s10 + $0xa0] sm:$0xff] }
 0x212   : > { %v942_v20 = vunpack.c.l.bf16 %v931_v12  ;;  %v972_v21 = vmul.f32 %v4998_v0, %v937_v8  ;;  %v974_v22 = vmul.f32 %v4998_v0, %v939_v9  ;;  %v971_v23 = vmul.f32 %v4995_v25, %v936_v10  ;;  %v934_v12 = vld [vmem:[%s5003_s16 + $0x30] sm:$0xff] }
 0x213   : > { %v973_v26 = vmul.f32 %v4995_v25, %v938_v11  ;;  %v976_v30 = vmul.f32 %v4998_v0, %v941_v15  ;;  %v978_v7 = vmul.f32 %v4998_v0, %v943_v16  ;;  %v975_v24 = vmul.f32 %v4995_v25, %v940_v17  ;;  %v935_v15 = vld [vmem:[%s5003_s16 + $0x38] sm:$0xff] }
 0x214   : > { %v977_v32 = vmul.f32 %v4995_v25, %v942_v20  ;;  %v1007_v34 = vadd.f32 %v5012_v3, %v972_v21  ;;  %v1009_v35 = vadd.f32 %v5012_v3, %v974_v22  ;;  %v1006_v36 = vadd.f32 %v5009_v2, %v971_v23 }
 0x215   : > { %v1008_v37 = vadd.f32 %v5009_v2, %v973_v26  ;;  %v1011_v33 = vadd.f32 %v5012_v3, %v976_v30  ;;  %v1013_v38 = vadd.f32 %v5012_v3, %v978_v7  ;;  %v1010_v40 = vadd.f32 %v5009_v2, %v975_v24 }
 0x216   : > { %v1012_v41 = vadd.f32 %v5009_v2, %v977_v32  ;;  %vm1023_vm0 = vcmp.ge.f32.partialorder %v1007_v34, 0.0  ;;  %vm1025_vm1 = vcmp.ge.f32.partialorder %v1009_v35, 0.0  ;;  %v1039_v42 = vmul.f32 0.2, %v1007_v34 }
 0x217   : > { %v1041_v43 = vmul.f32 0.2, %v1009_v35  ;;  %vm1022_vm2 = vcmp.ge.f32.partialorder %v1006_v36, 0.0  ;;  %vm1024_vm3 = vcmp.ge.f32.partialorder %v1008_v37, 0.0  ;;  %v1038_v45 = vmul.f32 0.2, %v1006_v36 }
 0x218   : > { %v1040_v44 = vmul.f32 0.2, %v1008_v37  ;;  %v1055_v58 = vsel %vm1023_vm0, %v1007_v34, %v1039_v42  ;;  %vm1027_vm4 = vcmp.ge.f32.partialorder %v1011_v33, 0.0  ;;  %vm1029_vm5 = vcmp.ge.f32.partialorder %v1013_v38, 0.0 }
 0x219   : > { %v1057_v48 = vsel %vm1025_vm1, %v1009_v35, %v1041_v43  ;;  %v1054_v60 = vsel %vm1022_vm2, %v1006_v36, %v1038_v45  ;;  %v1043_v57 = vmul.f32 0.2, %v1011_v33  ;;  %v1045_v62 = vmul.f32 0.2, %v1013_v38 }
 0x21a   : > { %v1071_v51 = vpack.c.bf16 %v1057_v48, %v1055_v58  ;;  %v1056_v52 = vsel %vm1024_vm3, %v1008_v37, %v1040_v44  ;;  %vm1026_vm6 = vcmp.ge.f32.partialorder %v1010_v40, 0.0  ;;  %vm1028_vm7 = vcmp.ge.f32.partialorder %v1012_v41, 0.0 }
 0x21b   : > { %v1070_v61 = vpack.c.bf16 %v1056_v52, %v1054_v60  ;;  %v1059_v63 = vsel %vm1027_vm4, %v1011_v33, %v1043_v57  ;;  %v1042_v4 = vmul.f32 0.2, %v1010_v40  ;;  %v1044_v5 = vmul.f32 0.2, %v1012_v41 }
 0x21c   : > { %1212 = vmatprep.subr.bf16.mxu1 %v1071_v51  ;;  %v945_v6 = vunpack.c.h.bf16 %v932_v50  ;;  %v1061_v8 = vsel %vm1029_vm5, %v1013_v38, %v1045_v62  ;;  %v947_v9 = vunpack.c.h.bf16 %v933_v59  ;;  %v944_v10 = vunpack.c.l.bf16 %v932_v50 }
 0x21d   : > { %1213 = vmatpush1.bf16.msra.mxu1 %v1070_v61  ;;  %v946_v11 = vunpack.c.l.bf16 %v933_v59  ;;  %v1073_v16 = vpack.c.bf16 %v1061_v8, %v1059_v63  ;;  %v1058_v17 = vsel %vm1026_vm6, %v1010_v40, %v1042_v4  ;;  %v1060_v20 = vsel %vm1028_vm7, %v1012_v41, %v1044_v5 }
 0x21e   : > { %v980_v21 = vmul.f32 %v4998_v0, %v945_v6  ;;  %v1072_v22 = vpack.c.bf16 %v1060_v20, %v1058_v17  ;;  %v982_v23 = vmul.f32 %v4998_v0, %v947_v9  ;;  %v979_v26 = vmul.f32 %v4995_v25, %v944_v10  ;;  %v1302_v9 = vld [vmem:[%s6081_s10 + $0x8] sm:$0xff] }
 0x21f   : > { %v981_v30 = vmul.f32 %v4995_v25, %v946_v11  ;;  %1214 = vmatprep.subr.bf16.mxu1 %v1073_v16  ;;  %v949_v24 = vunpack.c.h.bf16 %v934_v12  ;;  %v951_v32 = vunpack.c.h.bf16 %v935_v15  ;;  %v948_v34 = vunpack.c.l.bf16 %v934_v12  ;;  %v1310_v17 = vld [vmem:[%s6081_s10 + $0x48] sm:$0xff] }
 0x220   : > { %v1015_v7 = vadd.f32 %v5012_v3, %v980_v21  ;;  %v1017_v35 = vadd.f32 %v5012_v3, %v982_v23  ;;  %v1014_v36 = vadd.f32 %v5009_v2, %v979_v26  ;;  %v950_v33 = vunpack.c.l.bf16 %v935_v15  ;;  %v1314_v20 = vld [vmem:[%s6081_s10 + $0x68] sm:$0xff] }
 0x221   : > { %1215 = vmatpush1.bf16.msra.mxu1 %v1072_v22  ;;  %v1016_v37 = vadd.f32 %v5009_v2, %v981_v30  ;;  %v984_v40 = vmul.f32 %v4998_v0, %v949_v24  ;;  %v986_v41 = vmul.f32 %v4998_v0, %v951_v32  ;;  %v983_v51 = vmul.f32 %v4995_v25, %v948_v34  ;;  %v5069_v22 = vld [vmem:[%s4959_s13] sm:$0xff]   ;;  %v1318_v26 = vld [vmem:[%s6081_s10 + $0x88] sm:$0xff] }
 0x222   : > { %vm1031_vm8 = vcmp.ge.f32.partialorder %v1015_v7, 0.0  ;;  %v1047_v38 = vmul.f32 0.2, %v1015_v7  ;;  %vm1033_vm9 = vcmp.ge.f32.partialorder %v1017_v35, 0.0  ;;  %v1049_v42 = vmul.f32 0.2, %v1017_v35 }
 0x223   : > { %vm1030_vm10 = vcmp.ge.f32.partialorder %v1014_v36, 0.0  ;;  %vm1032_vm11 = vcmp.ge.f32.partialorder %v1016_v37, 0.0  ;;  %v1046_v45 = vmul.f32 0.2, %v1014_v36  ;;  %v1048_v44 = vmul.f32 0.2, %v1016_v37 }
 0x224   : > { %v1063_v43 = vsel %vm1031_vm8, %v1015_v7, %v1047_v38  ;;  %v1019_v58 = vadd.f32 %v5012_v3, %v984_v40  ;;  %v1065_v48 = vsel %vm1033_vm9, %v1017_v35, %v1049_v42  ;;  %v1021_v50 = vadd.f32 %v5012_v3, %v986_v41  ;;  %v1322_v30 = vld [vmem:[%s6081_s10 + $0xa8] sm:$0xff] }
 0x225   : > { %v985_v60 = vmul.f32 %v4995_v25, %v950_v33  ;;  %v1075_v52 = vpack.c.bf16 %v1065_v48, %v1063_v43  ;;  %v1062_v57 = vsel %vm1030_vm10, %v1014_v36, %v1046_v45  ;;  %v1064_v59 = vsel %vm1032_vm11, %v1016_v37, %v1048_v44  ;;  %v1326_v32 = vld [vmem:[%s6081_s10 + $0xc8] sm:$0xff] }
 0x226   : > { %vm1035_vm12 = vcmp.ge.f32.partialorder %v1019_v58, 0.0  ;;  %v1074_v0 = vpack.c.bf16 %v1064_v59, %v1062_v57  ;;  %vm1037_vm13 = vcmp.ge.f32.partialorder %v1021_v50, 0.0  ;;  %v1051_v61 = vmul.f32 0.2, %v1019_v58  ;;  %v1330_v34 = vld [vmem:[%s6081_s10 + $0xe8] sm:$0xff] }
 0x227   : > { %v1053_v62 = vmul.f32 0.2, %v1021_v50  ;;  %v578_v63 = vmax.f32 %v5006_v1, 0.0  ;;  %1216 = vmatprep.subr.bf16.mxu1 %v1075_v52  ;;  %v1018_v4 = vadd.f32 %v5009_v2, %v983_v51  ;;  %v1020_v5 = vadd.f32 %v5009_v2, %v985_v60  ;;  %v1306_v1 = vld [vmem:[%s6081_s10 + $0x28] sm:$0xff] }
 0x228   : > { %1217 = vmatpush1.bf16.msra.mxu1 %v1074_v0  ;;  %v1067_v3 = vsel %vm1035_vm12, %v1019_v58, %v1051_v61  ;;  %v4236_v15 = vcombine.high %v1302_v9, %v1306_v1  ;;  %v4235_v21 = vcombine.low %v1302_v9, %v1306_v1  ;;  %v4244_v23 = vcombine.high %v1310_v17, %v1314_v20  ;;  %v5087_v36 = vld [vmem:[%s4959_s13 + $0x8] sm:$0xff]  }
 0x229   : > { %v1069_v6 = vsel %vm1037_vm13, %v1021_v50, %v1053_v62  ;;  %vm1034_vm14 = vcmp.ge.f32.partialorder %v1018_v4, 0.0  ;;  %vm1036_vm15 = vcmp.ge.f32.partialorder %v1020_v5, 0.0  ;;  %v1050_v25 = vmul.f32 0.2, %v1018_v4  ;;  %v1334_v38 = vld [vmem:[%s6081_s10 + $0x108] sm:$0xff]  ;;  %v5106_v50 = vld [vmem:[%s4959_s13 + $0x10] sm:$0xff]  }
 0x22a   : > { %v1077_v8 = vpack.c.bf16 %v1069_v6, %v1067_v3  ;;  %v1052_v10 = vmul.f32 0.2, %v1020_v5  ;;  %v579_v11 = vadd.f32 1e-05, %v578_v63  ;;  %vm1090_vm0 = vcmask 523264   ;;  %v1338_v40 = vld [vmem:[%s6081_s10 + $0x128] sm:$0xff] }
 0x22b   : > { %v1066_v2 = vsel %vm1034_vm14, %v1018_v4, %v1050_v25  ;;  %v4243_v7 = vcombine.low %v1310_v17, %v1314_v20  ;;  %v4252_v24 = vcombine.high %v1318_v26, %v1322_v30  ;;  %v4251_v35 = vcombine.low %v1318_v26, %v1322_v30  ;;  %v1342_v45 = vld [vmem:[%s6081_s10 + $0x148] sm:$0xff] }
 0x22c   : > { %1218 = vmatprep.subr.bf16.mxu1 %v1077_v8  ;;  %v1068_v12 = vsel %vm1036_vm15, %v1020_v5, %v1052_v10  ;;  %4719 = vrsqrt.f32 %v579_v11  ;;  %v4260_v37 = vcombine.high %v1326_v32, %v1330_v34  ;;  %v4259_v41 = vcombine.low %v1326_v32, %v1330_v34  ;;  %v1346_v44 = vld [vmem:[%s6081_s10 + $0x168] sm:$0xff]  ;;  %v5126_v5 = vld [vmem:[%s4959_s13 + $0x18] sm:$0xff]  }
 0x22d   : > { %v1076_v16 = vpack.c.bf16 %v1068_v12, %v1066_v2  ;;  %v4268_v43 = vcombine.high %v1334_v38, %v1338_v40  ;;  %v4267_v58 = vcombine.low %v1334_v38, %v1338_v40  ;;  %v4276_v51 = vcombine.high %v1342_v45, %v1346_v44  ;;  %v1350_v60 = vld [vmem:[%s6081_s10 + $0x188] sm:$0xff]  ;;  %v4561_v12 = vld [vmem:[%s5147_s14] sm:$0xff]  }
 0x22e   : > { %v1354_v52 = vld [vmem:[%s6081_s10 + $0x1a8] sm:$0xff]  ;;  %v4275_v57 = vcombine.low %v1342_v45, %v1346_v44  ;;  %v4563_v26 = vunpack.c.h.bf16 %v4561_v12 }
 0x22f   : > { %1219 = vmatpush1.bf16.msra.mxu1 %v1076_v16  ;;  %v4284_v0 = vcombine.high %v1350_v60, %v1354_v52  ;;  %v1358_v61 = vld [vmem:[%s6081_s10 + $0x1c8] sm:$0xff]  ;;  %v4283_v63 = vcombine.low %v1350_v60, %v1354_v52 }
 0x230   : > { %2983 = vmatprep.subr.bf16.mxu1 %v4236_v15  ;;  %v1362_v62 = vld [vmem:[%s6081_s10 + $0x1e8] sm:$0xff] }
 0x231   : > { %v4292_v3 = vcombine.high %v1358_v61, %v1362_v62  ;;  %v1366_v6 = vld [vmem:[%s6081_s10 + $0x208] sm:$0xff]  ;;  %v4291_v25 = vcombine.low %v1358_v61, %v1362_v62 }
 0x232   : > { %4229 = vmatmul.mubr.msk.bf16.vlgmr.msra.gmra.mrb[0].mxu1 %vm1090_vm0, %v5069_v22  ;;  %v1370_v8 = vld [vmem:[%s6081_s10 + $0x228] sm:$0xff] }
 0x233   : > { %1254 = vmatprep.mubr.bf16.mxu1 %v4747_v56  ;;  %2984 = vmatpush1.bf16.msra.mxu1 %v4235_v21  ;;  %v1374_v1 = vld [vmem:[%s6081_s10 + $0x248] sm:$0xff]  ;;  %v4299_v11 = vcombine.low %v1366_v6, %v1370_v8 }
 0x234   : > { %2985 = vmatprep.subr.bf16.mxu1 %v4244_v23  ;;  %v1378_v10 = vld [vmem:[%s6081_s10 + $0x268] sm:$0xff]  ;;  %v4562_v23 = vunpack.c.l.bf16 %v4561_v12 }
 0x235   : > { %v1382_v15 = vld [vmem:[%s6081_s10 + $0x288] sm:$0xff]  ;;  %v4307_v20 = vcombine.low %v1374_v1, %v1378_v10 }
 0x236   : > { %v4720_v33 = vpop.eup %4719  ;;  %v1386_v16 = vld [vmem:[%s6081_s10 + $0x2a8] sm:$0xff] }
 0x237   : > { %2986 = vmatpush1.bf16.msra.mxu1 %v4243_v7  ;;  %v588_v42 = vrot.slane %v4720_v33, %v4843_v14  ;;  %v4316_v30 = vcombine.high %v1382_v15, %v1386_v16  ;;  %v1390_v7 = vld [vmem:[%s6081_s10 + $0x2c8] sm:$0xff] }
 0x238   : > { %2987 = vmatprep.subr.bf16.mxu1 %v4252_v24  ;;  %v1394_v24 = vld [vmem:[%s6081_s10 + $0x2e8] sm:$0xff] }
 0x239   : > { %v4217_v48 = vrot.slane %v588_v42, 9  ;;  %v4608_v32 = vld [vmem:[%s5147_s14 + $0x8] sm:$0xff]   ;;  %v4609_v42 = vld [vmem:[%s5147_s14 + $0x10] sm:$0xff]  }
 0x23a   : > { %4230 = vmatmul.mubr.msk.bf16.gmra.mrb[4].mxu1 %vm1090_vm0, %v5087_v36  ;;  %v4566_v33 = vunpack.c.l.bf16 %v4608_v32  ;;  %v4567_v38 = vunpack.c.h.bf16 %v4608_v32  ;;  %v1398_v40 = vld [vmem:[%s6081_s10 + $0x308] sm:$0xff]  ;;  %v4570_v52 = vunpack.c.l.bf16 %v4609_v42 }
 0x23b   : > { %1264 = vmatprep.mubr.bf16.mxu1 %v4747_v56  ;;  %2988 = vmatpush1.bf16.msra.mxu1 %v4251_v35  ;;  %v592_v59 = vmul.f32 %v4217_v48, %v4850_v18  ;;  %v1410_v60 = vld [vmem:[%s6081_s10 + $0x368] sm:$0xff] }
 0x23c   : > { %2989 = vmatprep.subr.bf16.mxu1 %v4260_v37  ;;  %v4324_v37 = vcombine.high %v1390_v7, %v1394_v24 }
 0x23d   : > { %v593_v4 = vmul.f32 %v592_v59, %v4966_v39  ;;  %v4300_v39 = vcombine.high %v1366_v6, %v1370_v8  ;;  %v5157_v17 = vrot.slane %v592_v59, %v4853_v19  ;;  %v4315_v19 = vcombine.low %v1382_v15, %v1386_v16  ;;  %v4610_v59 = vld [vmem:[%s5147_s14 + $0x18] sm:$0xff]   ;;  %v1414_v6 = vld [vmem:[%s6081_s10 + $0x388] sm:$0xff]  ;;  %s5998_s14 = scalar_lea.vmem %s6082_s11, %s4526_s19 }
 0x23e   : > { %v1418_v8 = vld [vmem:[%s6081_s10 + $0x3a8] sm:$0xff] }
 0x23f   : > { %2990 = vmatpush1.bf16.msra.mxu1 %v4259_v41  ;;  %v601_v9 = vrot.slane %v593_v4, %v4843_v14  ;;  %v4308_v14 = vcombine.high %v1374_v1, %v1378_v10  ;;  %v626_v35 = vmul.f32 %v4563_v26, %v5157_v17  ;;  %v1402_v41 = vld [vmem:[%s6081_s10 + $0x328] sm:$0xff]  ;;  %v628_v48 = vmul.f32 %v4567_v38, %v5157_v17 }
 0x240   : > { %2991 = vmatprep.subr.bf16.mxu1 %v4268_v43  ;;  %v4332_v44 = vcombine.high %v1398_v40, %v1402_v41  ;;  %v4575_v1 = vunpack.c.h.bf16 %v4610_v59  ;;  %v4347_v26 = vcombine.low %v1414_v6, %v1418_v8 }
 0x241   : > { %v602_v2 = vrot.slane %v601_v9, 7 }
 0x242   : > { %4231 = vmatmul.mubr.msk.bf16.gmra.mrb[8].mxu1 %vm1090_vm0, %v5106_v50 }
 0x243   : > { %1274 = vmatprep.mubr.bf16.mxu1 %v4747_v56  ;;  %2992 = vmatpush1.bf16.msra.mxu1 %v4267_v58  ;;  %v604_v21 = vsub.f32 %v4850_v18, %v602_v2  ;;  %v625_v18 = vmul.f32 %v4562_v23, %v5157_v17  ;;  %v627_v58 = vmul.f32 %v4566_v33, %v5157_v17 }
 0x244   : > { %2993 = vmatprep.subr.bf16.mxu1 %v4276_v51  ;;  %v1406_v51 = vld [vmem:[%s6081_s10 + $0x348] sm:$0xff]  ;;  %v632_v23 = vmul.f32 %v4575_v1, %v5157_v17  ;;  %v1353_v1 = vld [vmem:[%s6081_s10 + $0x1a0] sm:$0xff] }
 0x245   : > { %v636_v34 = vrot.slane %v604_v21, %v4862_v27  ;;  %v4323_v27 = vcombine.low %v1390_v7, %v1394_v24  ;;  %v4339_v10 = vcombine.low %v1406_v51, %v1410_v60 }
 0x247   : > { %2994 = vmatpush1.bf16.msra.mxu1 %v4275_v57  ;;  %v637_v43 = vadd.f32 %v636_v34, %v625_v18  ;;  %v638_v45 = vadd.f32 %v636_v34, %v626_v35  ;;  %v4571_v57 = vunpack.c.h.bf16 %v4609_v42  ;;  %v639_v4 = vadd.f32 %v636_v34, %v627_v58 }
 0x248   : > { %2995 = vmatprep.subr.bf16.mxu1 %v4284_v0  ;;  %v4331_v0 = vcombine.low %v1398_v40, %v1402_v41  ;;  %v644_v35 = vadd.f32 %v636_v34, %v632_v23  ;;  %v1377_v23 = vld [vmem:[%s6081_s10 + $0x260] sm:$0xff] }
 0x249   : > { %v653_v61 = vmul.f32 0.2, %v637_v43  ;;  %v654_v62 = vmul.f32 0.2, %v638_v45  ;;  %vm645_vm1 = vcmp.ge.f32.partialorder %v637_v43, 0.0  ;;  %vm646_vm2 = vcmp.ge.f32.partialorder %v638_v45, 0.0 }
 0x24a   : > { %4232 = vmatmul.mubr.msk.bf16.gmra.mrb[12].mxu1 %vm1090_vm0, %v5126_v5  ;;  %v630_v9 = vmul.f32 %v4571_v57, %v5157_v17  ;;  %vm647_vm3 = vcmp.ge.f32.partialorder %v639_v4, 0.0  ;;  %v655_v12 = vmul.f32 0.2, %v639_v4  ;;  %vm652_vm8 = vcmp.ge.f32.partialorder %v644_v35, 0.0 }
 0x24b   : > { %2996 = vmatpush1.bf16.msra.mxu1 %v4283_v63  ;;  %v4340_v63 = vcombine.high %v1406_v51, %v1410_v60  ;;  %v662_v2 = vsel %vm646_vm2, %v638_v45, %v654_v62  ;;  %v4242_v57 = vcombine.high %v1309_v46, %v1313_v47  ;;  %v4249_v62 = vcombine.low %v1317_v53, %v1321_v54 }
 0x24c   : > { %2997 = vmatprep.subr.bf16.mxu1 %v4292_v3  ;;  %v640_v3 = vadd.f32 %v636_v34, %v628_v48  ;;  %v663_v7 = vsel %vm647_vm3, %v639_v4, %v655_v12  ;;  %v1301_v48 = vld [vmem:[%s6081_s10] sm:$0xff] }
 0x24d   : > { %v4234_v60 = vcombine.high %v1301_v48, %v1305_v28  ;;  %v1337_v4 = vld [vmem:[%s6081_s10 + $0x120] sm:$0xff] }
 0x24e   : > { %vm648_vm4 = vcmp.ge.f32.partialorder %v640_v3, 0.0  ;;  %v656_v15 = vmul.f32 0.2, %v640_v3 }
 0x24f   : > { %2998 = vmatpush1.bf16.msra.mxu1 %v4291_v25  ;;  %v629_v25 = vmul.f32 %v4570_v52, %v5157_v17  ;;  %v4233_v52 = vcombine.low %v1301_v48, %v1305_v28  ;;  %v1421_v28 = vld [vmem:[%s6081_s10 + $0x3c0] sm:$0xff] }
 0x250   : > { %2999 = vmatprep.subr.bf16.mxu1 %v4300_v39  ;;  %v4574_v39 = vunpack.c.l.bf16 %v4610_v59  ;;  %v664_v24 = vsel %vm648_vm4, %v640_v3, %v656_v15  ;;  %v4250_v59 = vcombine.high %v1317_v53, %v1321_v54  ;;  %v1430_v53 = vld [vmem:[%s6081_s10 + $0x408] sm:$0xff] }
 0x251   : > { %v641_v16 = vadd.f32 %v636_v34, %v629_v25  ;;  %v670_v38 = vpack.c.bf16 %v664_v24, %v663_v7  ;;  %v1345_v25 = vld [vmem:[%s6081_s10 + $0x160] sm:$0xff] }
 0x252   : > { %v631_v21 = vmul.f32 %v4574_v39, %v5157_v17  ;;  %v1385_v7 = vld [vmem:[%s6081_s10 + $0x2a0] sm:$0xff] }
 0x253   : > { %3000 = vmatpush1.bf16.msra.mxu1 %v4299_v11  ;;  %v661_v11 = vsel %vm645_vm1, %v637_v43, %v653_v61  ;;  %v657_v32 = vmul.f32 0.2, %v641_v16  ;;  %vm649_vm5 = vcmp.ge.f32.partialorder %v641_v16, 0.0  ;;  %v1329_v61 = vld [vmem:[%s6081_s10 + $0xe0] sm:$0xff] }
 0x254   : > { %3001 = vmatprep.subr.bf16.mxu1 %v4308_v14  ;;  %v4348_v14 = vcombine.high %v1414_v6, %v1418_v8  ;;  %v643_v18 = vadd.f32 %v636_v34, %v631_v21  ;;  %v1341_v8 = vld [vmem:[%s6081_s10 + $0x140] sm:$0xff] }
 0x255   : > { %v665_v17 = vsel %vm649_vm5, %v641_v16, %v657_v32  ;;  %v4274_v39 = vcombine.high %v1341_v8, %v1345_v25  ;;  %v1373_v21 = vld [vmem:[%s6081_s10 + $0x240] sm:$0xff] }
 0x256   : > { %v659_v42 = vmul.f32 0.2, %v643_v18  ;;  %vm651_vm7 = vcmp.ge.f32.partialorder %v643_v18, 0.0  ;;  %v4305_v24 = vcombine.low %v1373_v21, %v1377_v23 }
 0x257   : > { %3002 = vmatpush1.bf16.msra.mxu1 %v4307_v20  ;;  %v642_v20 = vadd.f32 %v636_v34, %v630_v9 }
 0x258   : > { %3003 = vmatprep.subr.bf16.mxu1 %v4316_v30  ;;  %v669_v30 = vpack.c.bf16 %v662_v2, %v661_v11  ;;  %v1357_v2 = vld [vmem:[%s6081_s10 + $0x1c0] sm:$0xff] }
 0x259   : > { %vm650_vm6 = vcmp.ge.f32.partialorder %v642_v20, 0.0 }
 0x25b   : > { %3004 = vmatpush1.bf16.msra.mxu1 %v4315_v19  ;;  %v658_v19 = vmul.f32 0.2, %v642_v20 }
 0x25c   : > { %3005 = vmatprep.subr.bf16.mxu1 %v4324_v37 }
 0x25d   : > { %v666_v41 = vsel %vm650_vm6, %v642_v20, %v658_v19  ;;  %v1389_v19 = vld [vmem:[%s6081_s10 + $0x2c0] sm:$0xff] }
 0x25e   : > { %v671_v43 = vpack.c.bf16 %v666_v41, %v665_v17  ;;  %v1405_v41 = vld [vmem:[%s6081_s10 + $0x340] sm:$0xff] }
 0x25f   : > { %3006 = vmatpush1.bf16.msra.mxu1 %v4323_v27  ;;  %v660_v27 = vmul.f32 0.2, %v644_v35 }
 0x260   : > { %3007 = vmatprep.subr.bf16.mxu1 %v4332_v44  ;;  %v667_v44 = vsel %vm651_vm7, %v643_v18, %v659_v42  ;;  %v1393_v18 = vld [vmem:[%s6081_s10 + $0x2e0] sm:$0xff] }
 0x261   : > { %v668_v58 = vsel %vm652_vm8, %v644_v35, %v660_v27  ;;  %v1409_v42 = vld [vmem:[%s6081_s10 + $0x360] sm:$0xff] }
 0x263   : > { %3008 = vmatpush1.bf16.msra.mxu1 %v4331_v0  ;;  %v1325_v0 = vld [vmem:[%s6081_s10 + $0xc0] sm:$0xff] }
 0x264   : > { %3009 = vmatprep.subr.bf16.mxu1 %v4340_v63  ;;  %v4258_v63 = vcombine.high %v1325_v0, %v1329_v61  ;;  %v4257_v3 = vcombine.low %v1325_v0, %v1329_v61 }
 0x267   : > { %3010 = vmatpush1.bf16.msra.mxu1 %v4339_v10  ;;  %v4273_v10 = vcombine.low %v1341_v8, %v1345_v25 }
 0x268   : > { %3011 = vmatprep.subr.bf16.mxu1 %v4348_v14  ;;  %v1361_v14 = vld [vmem:[%s6081_s10 + $0x1e0] sm:$0xff] }
 0x269   : > { %v4290_v15 = vcombine.high %v1357_v2, %v1361_v14  ;;  %v4289_v16 = vcombine.low %v1357_v2, %v1361_v14 }
 0x26b   : > { %3012 = vmatpush1.bf16.msra.mxu1 %v4347_v26 }
 0x277   : > { %v1085_v40 = vpop.permute.xlu0 %1084 }
 0x278   : > { %v1083_v37 = vpop.permute.xlu1 %1082  ;;  %v1097_v34 = vsel %vm1090_vm0, %v670_v38, %v1085_v40  ;;  %v1401_v38 = vld [vmem:[%s6081_s10 + $0x320] sm:$0xff]  ;;  %v4321_v40 = vcombine.low %v1389_v19, %v1393_v18 }
 0x279   : > { %v1093_v33 = vsel %vm1090_vm0, %v669_v30, %v1083_v37  ;;  %v4306_v30 = vcombine.high %v1373_v21, %v1377_v23  ;;  %v4322_v37 = vcombine.high %v1389_v19, %v1393_v18  ;;  %v1442_v19 = vld [vmem:[%s6081_s10 + $0x468] sm:$0xff] }
 0x27a   : > { %1140 = vmatpush1.bf16.msra.mxu0 %v1093_v33  ;;  %v1397_v33 = vld [vmem:[%s6081_s10 + $0x300] sm:$0xff] }
 0x27b   : > { %1141 = vmatprep.subr.bf16.mxu0 %v901_v31  ;;  %v672_v31 = vpack.c.bf16 %v668_v58, %v667_v44  ;;  %v1089_v51 = vpop.permute.xlu0 %1088  ;;  %v4330_v17 = vcombine.high %v1397_v33, %v1401_v38  ;;  %v4329_v27 = vcombine.low %v1397_v33, %v1401_v38  ;;  %v4337_v44 = vcombine.low %v1405_v41, %v1409_v42 }
 0x27c   : > { %v1087_v45 = vpop.permute.xlu1 %1086 }
 0x27d   : > { %v1101_v29 = vsel %vm1090_vm0, %v671_v43, %v1087_v45  ;;  %v1413_v43 = vld [vmem:[%s6081_s10 + $0x380] sm:$0xff] }
 0x27e   : > { %1142 = vmatpush1.bf16.msra.mxu0 %v1097_v34  ;;  %v4338_v34 = vcombine.high %v1405_v41, %v1409_v42  ;;  %v1417_v45 = vld [vmem:[%s6081_s10 + $0x3a0] sm:$0xff]  ;;  %v1446_v41 = vld [vmem:[%s6081_s10 + $0x488] sm:$0xff] }
 0x27f   : > { %1143 = vmatprep.subr.bf16.mxu0 %v902_v49  ;;  %v1105_v49 = vsel %vm1090_vm0, %v672_v31, %v1089_v51  ;;  %v4346_v58 = vcombine.high %v1413_v43, %v1417_v45  ;;  %v4345_v48 = vcombine.low %v1413_v43, %v1417_v45  ;;  %v1422_v31 = vld [vmem:[%s6081_s10 + $0x3c8] sm:$0xff] }
 0x280   : > { %v1450_v42 = vld [vmem:[%s6081_s10 + $0x4a8] sm:$0xff] }
 0x282   : > { %1144 = vmatpush1.bf16.msra.mxu0 %v1101_v29  ;;  %v1425_v29 = vld [vmem:[%s6081_s10 + $0x3e0] sm:$0xff] }
 0x283   : > { %1145 = vmatprep.subr.bf16.mxu0 %v903_v55  ;;  %v4241_v55 = vcombine.low %v1309_v46, %v1313_v47  ;;  %v4353_v51 = vcombine.low %v1421_v28, %v1425_v29  ;;  %v1426_v46 = vld [vmem:[%s6081_s10 + $0x3e8] sm:$0xff] }
 0x284   : > { %v4355_v47 = vcombine.low %v1422_v31, %v1426_v46 }
 0x286   : > { %1146 = vmatpush1.bf16.msra.mxu0 %v1105_v49  ;;  %v4356_v49 = vcombine.high %v1422_v31, %v1426_v46  ;;  %v1458_v31 = vld [vmem:[%s6081_s10 + $0x4e8] sm:$0xff] }
 0x287   : > { %2837 = vmatprep.subr.bf16.mxu0 %v4234_v60  ;;  %v4354_v60 = vcombine.high %v1421_v28, %v1425_v29  ;;  %v1457_v28 = vld [vmem:[%s6081_s10 + $0x4e0] sm:$0xff]  ;;  %v1454_v29 = vld [vmem:[%s6081_s10 + $0x4c8] sm:$0xff] }
 0x288   : > { %3013 = vmatprep.subr.bf16.mxu1 %v4356_v49  ;;  %v4379_v49 = vcombine.low %v1446_v41, %v1450_v42 }
 0x289   : > { %4225 = vmatmul.mubr.msk.bf16.vlgmr.msra.gmra.mrb[0].mxu0 %vm1090_vm0, %v5069_v22  ;;  %v1333_v22 = vld [vmem:[%s6081_s10 + $0x100] sm:$0xff]  ;;  %3014 = vmatpush1.bf16.msra.mxu1 %v4355_v47 }
 0x28a   : > { %1181 = vmatprep.mubr.bf16.mxu0 %v4747_v56  ;;  %2838 = vmatpush1.bf16.msra.mxu0 %v4233_v52  ;;  %v4266_v6 = vcombine.high %v1333_v22, %v1337_v4  ;;  %v4265_v9 = vcombine.low %v1333_v22, %v1337_v4  ;;  %v1429_v52 = vld [vmem:[%s6081_s10 + $0x400] sm:$0xff] }
 0x28b   : > { %2839 = vmatprep.subr.bf16.mxu0 %v4242_v57  ;;  %v1433_v57 = vld [vmem:[%s6081_s10 + $0x420] sm:$0xff] }
 0x28c   : > { %v4361_v54 = vcombine.low %v1429_v52, %v1433_v57 }
 0x28e   : > { %2840 = vmatpush1.bf16.msra.mxu0 %v4241_v55  ;;  %v4362_v55 = vcombine.high %v1429_v52, %v1433_v57 }
 0x28f   : > { %2841 = vmatprep.subr.bf16.mxu0 %v4250_v59  ;;  %v1434_v59 = vld [vmem:[%s6081_s10 + $0x428] sm:$0xff] }
 0x290   : > { %v4363_v0 = vcombine.low %v1430_v53, %v1434_v59  ;;  %v4364_v61 = vcombine.high %v1430_v53, %v1434_v59  ;;  %v4388_v53 = vcombine.high %v1454_v29, %v1458_v31  ;;  %v1462_v59 = vld [vmem:[%s6081_s10 + $0x508] sm:$0xff] }
 0x291   : > { %4226 = vmatmul.mubr.msk.bf16.gmra.mrb[4].mxu0 %vm1090_vm0, %v5087_v36  ;;  %v1349_v36 = vld [vmem:[%s6081_s10 + $0x180] sm:$0xff] }
 0x292   : > { %1191 = vmatprep.mubr.bf16.mxu0 %v4747_v56  ;;  %2842 = vmatpush1.bf16.msra.mxu0 %v4249_v62  ;;  %v4282_v11 = vcombine.high %v1349_v36, %v1353_v1  ;;  %v4281_v12 = vcombine.low %v1349_v36, %v1353_v1 }
 0x293   : > { %2843 = vmatprep.subr.bf16.mxu0 %v4258_v63  ;;  %3056 = vmatprep.subr.bf16.mxu1 %v4364_v61 }
 0x296   : > { %2844 = vmatpush1.bf16.msra.mxu0 %v4257_v3 }
 0x297   : > { %2845 = vmatprep.subr.bf16.mxu0 %v4266_v6 }
 0x299   : > { %4227 = vmatmul.mubr.msk.bf16.gmra.mrb[8].mxu0 %vm1090_vm0, %v5106_v50  ;;  %v1369_v50 = vld [vmem:[%s6081_s10 + $0x220] sm:$0xff] }
 0x29a   : > { %1201 = vmatprep.mubr.bf16.mxu0 %v4747_v56  ;;  %2846 = vmatpush1.bf16.msra.mxu0 %v4265_v9  ;;  %v1365_v56 = vld [vmem:[%s6081_s10 + $0x200] sm:$0xff] }
 0x29b   : > { %2847 = vmatprep.subr.bf16.mxu0 %v4274_v39  ;;  %v4298_v20 = vcombine.high %v1365_v56, %v1369_v50  ;;  %v4297_v26 = vcombine.low %v1365_v56, %v1369_v50 }
 0x29e   : > { %2848 = vmatpush1.bf16.msra.mxu0 %v4273_v10 }
 0x29f   : > { %2849 = vmatprep.subr.bf16.mxu0 %v4282_v11 }
 0x2a1   : > { %4228 = vmatmul.mubr.msk.bf16.gmra.mrb[12].mxu0 %vm1090_vm0, %v5126_v5  ;;  %v1381_v5 = vld [vmem:[%s6081_s10 + $0x280] sm:$0xff] }
 0x2a2   : > { %2850 = vmatpush1.bf16.msra.mxu0 %v4281_v12  ;;  %v4314_v32 = vcombine.high %v1381_v5, %v1385_v7  ;;  %v4313_v35 = vcombine.low %v1381_v5, %v1385_v7  ;;  %v1437_v5 = vld [vmem:[%s6081_s10 + $0x440] sm:$0xff] }
 0x2a3   : > { %2851 = vmatprep.subr.bf16.mxu0 %v4290_v15 }
 0x2a6   : > { %2852 = vmatpush1.bf16.msra.mxu0 %v4289_v16 }
 0x2a7   : > { %2853 = vmatprep.subr.bf16.mxu0 %v4298_v20 }
 0x2aa   : > { %2854 = vmatpush1.bf16.msra.mxu0 %v4297_v26 }
 0x2ab   : > { %2855 = vmatprep.subr.bf16.mxu0 %v4306_v30 }
 0x2ae   : > { %2856 = vmatpush1.bf16.msra.mxu0 %v4305_v24  ;;  %v1441_v24 = vld [vmem:[%s6081_s10 + $0x460] sm:$0xff] }
 0x2af   : > { %2857 = vmatprep.subr.bf16.mxu0 %v4314_v32  ;;  %v1438_v32 = vld [vmem:[%s6081_s10 + $0x448] sm:$0xff]  ;;  %v4370_v33 = vcombine.high %v1437_v5, %v1441_v24 }
 0x2b0   : > { %v4372_v38 = vcombine.high %v1438_v32, %v1442_v19 }
 0x2b2   : > { %2858 = vmatpush1.bf16.msra.mxu0 %v4313_v35 }
 0x2b3   : > { %2859 = vmatprep.subr.bf16.mxu0 %v4322_v37 }
 0x2b6   : > { %2860 = vmatpush1.bf16.msra.mxu0 %v4321_v40  ;;  %v1445_v40 = vld [vmem:[%s6081_s10 + $0x480] sm:$0xff] }
 0x2b7   : > { %2861 = vmatprep.subr.bf16.mxu0 %v4330_v17  ;;  %v1449_v17 = vld [vmem:[%s6081_s10 + $0x4a0] sm:$0xff] }
 0x2b8   : > { %v4378_v45 = vcombine.high %v1445_v40, %v1449_v17  ;;  %v4377_v47 = vcombine.low %v1445_v40, %v1449_v17  ;;  %v1485_v40 = vld [vmem:[%s6081_s10 + $0x5c0] sm:$0xff] }
 0x2ba   : > { %2862 = vmatpush1.bf16.msra.mxu0 %v4329_v27  ;;  %v4369_v27 = vcombine.low %v1437_v5, %v1441_v24  ;;  %v1481_v5 = vld [vmem:[%s6081_s10 + $0x5a0] sm:$0xff]  ;;  %v1482_v24 = vld [vmem:[%s6081_s10 + $0x5a8] sm:$0xff] }
 0x2bb   : > { %2863 = vmatprep.subr.bf16.mxu0 %v4338_v34  ;;  %v4371_v34 = vcombine.low %v1438_v32, %v1442_v19 }
 0x2be   : > { %2864 = vmatpush1.bf16.msra.mxu0 %v4337_v44  ;;  %v4380_v44 = vcombine.high %v1446_v41, %v1450_v42  ;;  %v1489_v41 = vld [vmem:[%s6081_s10 + $0x5e0] sm:$0xff]  ;;  %v1486_v42 = vld [vmem:[%s6081_s10 + $0x5c8] sm:$0xff] }
 0x2bf   : > { %2865 = vmatprep.subr.bf16.mxu0 %v4346_v58  ;;  %v1453_v58 = vld [vmem:[%s6081_s10 + $0x4c0] sm:$0xff] }
 0x2c0   : > { %v4386_v57 = vcombine.high %v1453_v58, %v1457_v28  ;;  %v4385_v61 = vcombine.low %v1453_v58, %v1457_v28  ;;  %v4418_v28 = vcombine.high %v1485_v40, %v1489_v41 }
 0x2c2   : > { %2866 = vmatpush1.bf16.msra.mxu0 %v4345_v48 }
 0x2c3   : > { %2867 = vmatprep.subr.bf16.mxu0 %v4354_v60 }
 0x2c6   : > { %2868 = vmatpush1.bf16.msra.mxu0 %v4353_v51 }
 0x2c7   : > { %2910 = vmatprep.subr.bf16.mxu0 %v4362_v55  ;;  %v1465_v55 = vld [vmem:[%s6081_s10 + $0x520] sm:$0xff] }
 0x305   : > { %v1246_v62 = vpop.f32.mrb[0].mxu1 }
 0x306   : > { %v1248_v63 = vpop.f32.mrb[1].mxu1 }
 0x307   : > { %v1250_v22 = vpop.f32.mrb[2].mxu1 }
 0x308   : > { %v5334_v4 = vpack.c.bf16 %v1250_v22, %v1246_v62  ;;  %v1252_v3 = vpop.f32.mrb[3].mxu1  ;;  %v4387_v62 = vcombine.low %v1454_v29, %v1458_v31  ;;  %v1493_v31 = vld [vmem:[%s6081_s10 + $0x600] sm:$0xff] }
 0x309   : > { %v5336_v6 = vpack.c.bf16 %v1252_v3, %v1248_v63 }
 0x30d   : > { %v1256_v8 = vpop.f32.mrb[4].mxu1 }
 0x30e   : > { %v1258_v25 = vpop.f32.mrb[5].mxu1 }
 0x30f   : > { %v1260_v9 = vpop.f32.mrb[6].mxu1 }
 0x310   : > { %v5338_v39 = vpack.c.bf16 %v1260_v9, %v1256_v8  ;;  %v1262_v36 = vpop.f32.mrb[7].mxu1  ;;  %v1469_v8 = vld [vmem:[%s6081_s10 + $0x540] sm:$0xff] }
 0x311   : > { %v5340_v1 = vpack.c.bf16 %v1262_v36, %v1258_v25  ;;  %v1473_v9 = vld [vmem:[%s6081_s10 + $0x560] sm:$0xff]  ;;  %v1470_v36 = vld [vmem:[%s6081_s10 + $0x548] sm:$0xff] }
 0x312   : > { %v4401_v32 = vcombine.low %v1469_v8, %v1473_v9 }
 0x315   : > { %v1266_v10 = vpop.f32.mrb[8].mxu1 }
 0x316   : > { %v1268_v11 = vpop.f32.mrb[9].mxu1 }
 0x317   : > { %v1270_v2 = vpop.f32.mrb[10].mxu1 }
 0x318   : > { %v5342_v14 = vpack.c.bf16 %v1270_v2, %v1266_v10  ;;  %v1272_v12 = vpop.f32.mrb[11].mxu1  ;;  %v1474_v10 = vld [vmem:[%s6081_s10 + $0x568] sm:$0xff] }
 0x319   : > { %v5344_v15 = vpack.c.bf16 %v1272_v12, %v1268_v11  ;;  %v4403_v19 = vcombine.low %v1470_v36, %v1474_v10 }
 0x31d   : > { %v1276_v56 = vpop.f32.mrb[12].mxu1 }
 0x31e   : > { %v1278_v50 = vpop.f32.mrb[13].mxu1 }
 0x31f   : > { %v1280_v16 = vpop.f32.mrb[14].mxu1 }
 0x320   : > { %v5346_v20 = vpack.c.bf16 %v1280_v16, %v1276_v56  ;;  %v1282_v21 = vpop.f32.mrb[15].mxu1 }
 0x321   : > { %v5348_v23 = vpack.c.bf16 %v1282_v21, %v1278_v50  ;;  %v4402_v21 = vcombine.high %v1469_v8, %v1473_v9  ;;  %v1509_v8 = vld [vmem:[%s6081_s10 + $0x680] sm:$0xff]  ;;  %v1510_v9 = vld [vmem:[%s6081_s10 + $0x688] sm:$0xff] }
 0x35c   : > { %v1173_v26 = vpop.f32.mrb[0].mxu0 }
 0x35d   : > { %v1175_v30 = vpop.f32.mrb[1].mxu0 }
 0x35e   : > { %v1177_v7 = vpop.f32.mrb[2].mxu0 }
 0x35f   : > { %v5362_v18 = vpack.c.bf16 %v1177_v7, %v1173_v26  ;;  %v1179_v35 = vpop.f32.mrb[3].mxu0  ;;  %v4404_v26 = vcombine.high %v1470_v36, %v1474_v10  ;;  %v1478_v7 = vld [vmem:[%s6081_s10 + $0x588] sm:$0xff] }
 0x360   : > { %v5364_v37 = vpack.c.bf16 %v1179_v35, %v1175_v30  ;;  %v1477_v30 = vld [vmem:[%s6081_s10 + $0x580] sm:$0xff]  ;;  %v4411_v58 = vcombine.low %v1478_v7, %v1482_v24  ;;  %v1514_v36 = vld [vmem:[%s6081_s10 + $0x6a8] sm:$0xff] }
 0x362   : > { %2869 = vmatprep.mubr.bf16.mxu0 %v5364_v37  ;;  %3015 = vmatprep.mubr.bf16.mxu1 %v5364_v37 }
 0x363   : > { %2870 = vmatmul.mubr.bf16.vlgmr.msra.gmra.mrb[16].mxu0 %v5362_v18  ;;  %3016 = vmatmul.mubr.bf16.vlgmr.msra.gmra.mrb[16].mxu1 %v5362_v18 }
 0x364   : > { %2911 = vmatpush1.bf16.msra.mxu0 %v4361_v54  ;;  %3057 = vmatpush1.bf16.msra.mxu1 %v4363_v0  ;;  %v1183_v43 = vpop.f32.mrb[4].mxu0  ;;  %v1461_v54 = vld [vmem:[%s6081_s10 + $0x500] sm:$0xff]  ;;  %v1466_v0 = vld [vmem:[%s6081_s10 + $0x528] sm:$0xff] }
 0x365   : > { %2912 = vmatprep.subr.bf16.mxu0 %v4370_v33  ;;  %3058 = vmatprep.subr.bf16.mxu1 %v4372_v38  ;;  %v1185_v48 = vpop.f32.mrb[5].mxu0  ;;  %v4394_v22 = vcombine.high %v1461_v54, %v1465_v55  ;;  %v4396_v3 = vcombine.high %v1462_v59, %v1466_v0  ;;  %v4393_v56 = vcombine.low %v1461_v54, %v1465_v55  ;;  %v1501_v55 = vld [vmem:[%s6081_s10 + $0x640] sm:$0xff] }
 0x366   : > { %v1187_v51 = vpop.f32.mrb[6].mxu0  ;;  %v4395_v50 = vcombine.low %v1462_v59, %v1466_v0  ;;  %v4410_v33 = vcombine.high %v1477_v30, %v1481_v5  ;;  %v4412_v38 = vcombine.high %v1478_v7, %v1482_v24  ;;  %v1505_v59 = vld [vmem:[%s6081_s10 + $0x660] sm:$0xff]  ;;  %v1502_v0 = vld [vmem:[%s6081_s10 + $0x648] sm:$0xff]  ;;  %v4443_v7 = vcombine.low %v1510_v9, %v1514_v36 }
 0x367   : > { %v5394_v60 = vpack.c.bf16 %v1187_v51, %v1183_v43  ;;  %v1189_v46 = vpop.f32.mrb[7].mxu0  ;;  %v1497_v51 = vld [vmem:[%s6081_s10 + $0x620] sm:$0xff]  ;;  %v4433_v10 = vcombine.low %v1501_v55, %v1505_v59 }
 0x368   : > { %2913 = vmatpush1.bf16.msra.mxu0 %v4369_v27  ;;  %3059 = vmatpush1.bf16.msra.mxu1 %v4371_v34  ;;  %v5396_v52 = vpack.c.bf16 %v1189_v46, %v1185_v48  ;;  %v1490_v27 = vld [vmem:[%s6081_s10 + $0x5e8] sm:$0xff] }
 0x369   : > { %2914 = vmatprep.subr.bf16.mxu0 %v4378_v45  ;;  %3060 = vmatprep.subr.bf16.mxu1 %v4380_v44  ;;  %v4409_v44 = vcombine.low %v1477_v30, %v1481_v5  ;;  %v4420_v29 = vcombine.high %v1486_v42, %v1490_v27  ;;  %v1494_v46 = vld [vmem:[%s6081_s10 + $0x608] sm:$0xff] }
 0x36a   : > { %2879 = vmatprep.mubr.bf16.mxu0 %v5396_v52  ;;  %3025 = vmatprep.mubr.bf16.mxu1 %v5396_v52  ;;  %v1522_v30 = vld [vmem:[%s6081_s10 + $0x6e8] sm:$0xff] }
 0x36b   : > { %2880 = vmatmul.mubr.bf16.gmra.mrb[20].mxu0 %v5394_v60  ;;  %3026 = vmatmul.mubr.bf16.gmra.mrb[20].mxu1 %v5394_v60 }
 0x36c   : > { %2915 = vmatpush1.bf16.msra.mxu0 %v4377_v47  ;;  %3061 = vmatpush1.bf16.msra.mxu1 %v4379_v49  ;;  %v1193_v63 = vpop.f32.mrb[8].mxu0  ;;  %v1498_v47 = vld [vmem:[%s6081_s10 + $0x628] sm:$0xff]  ;;  %v4417_v49 = vcombine.low %v1485_v40, %v1489_v41 }
 0x36d   : > { %2916 = vmatprep.subr.bf16.mxu0 %v4386_v57  ;;  %3062 = vmatprep.subr.bf16.mxu1 %v4388_v53  ;;  %v1195_v25 = vpop.f32.mrb[9].mxu0  ;;  %v4419_v57 = vcombine.low %v1486_v42, %v1490_v27  ;;  %v4426_v53 = vcombine.high %v1493_v31, %v1497_v51  ;;  %v4428_v54 = vcombine.high %v1494_v46, %v1498_v47  ;;  %v1533_v27 = vld [vmem:[%s6081_s10 + $0x740] sm:$0xff] }
 0x36e   : > { %v1197_v11 = vpop.f32.mrb[10].mxu0 }
 0x36f   : > { %v5426_v2 = vpack.c.bf16 %v1197_v11, %v1193_v63  ;;  %v1199_v12 = vpop.f32.mrb[11].mxu0  ;;  %v4427_v63 = vcombine.low %v1494_v46, %v1498_v47  ;;  %v1545_v46 = vld [vmem:[%s6081_s10 + $0x7a0] sm:$0xff]  ;;  %v1542_v47 = vld [vmem:[%s6081_s10 + $0x788] sm:$0xff] }
 0x370   : > { %2917 = vmatpush1.bf16.msra.mxu0 %v4385_v61  ;;  %3063 = vmatpush1.bf16.msra.mxu1 %v4387_v62  ;;  %v5428_v16 = vpack.c.bf16 %v1199_v12, %v1195_v25  ;;  %v1506_v61 = vld [vmem:[%s6081_s10 + $0x668] sm:$0xff]  ;;  %v4425_v62 = vcombine.low %v1493_v31, %v1497_v51  ;;  %v1513_v25 = vld [vmem:[%s6081_s10 + $0x6a0] sm:$0xff] }
 0x371   : > { %2918 = vmatprep.subr.bf16.mxu0 %v4394_v22  ;;  %3064 = vmatprep.subr.bf16.mxu1 %v4396_v3  ;;  %v4434_v22 = vcombine.high %v1501_v55, %v1505_v59  ;;  %v4436_v3 = vcombine.high %v1502_v0, %v1506_v61  ;;  %v4435_v11 = vcombine.low %v1502_v0, %v1506_v61  ;;  %v1541_v51 = vld [vmem:[%s6081_s10 + $0x780] sm:$0xff]  ;;  %v1550_v61 = vld [vmem:[%s6081_s10 + $0x7c8] sm:$0xff] }
 0x372   : > { %2889 = vmatprep.mubr.bf16.mxu0 %v5428_v16  ;;  %3035 = vmatprep.mubr.bf16.mxu1 %v5428_v16  ;;  %v4442_v12 = vcombine.high %v1509_v8, %v1513_v25  ;;  %v4441_v5 = vcombine.low %v1509_v8, %v1513_v25  ;;  %v1549_v59 = vld [vmem:[%s6081_s10 + $0x7c0] sm:$0xff]  ;;  %v1303_v25 = vld [vmem:[%s6081_s10 + $0x10] sm:$0xff] }
 0x373   : > { %2890 = vmatmul.mubr.bf16.gmra.mrb[24].mxu0 %v5426_v2  ;;  %3036 = vmatmul.mubr.bf16.gmra.mrb[24].mxu1 %v5426_v2  ;;  %v1553_v0 = vld [vmem:[%s6081_s10 + $0x7e0] sm:$0xff] }
 0x374   : > { %2919 = vmatpush1.bf16.msra.mxu0 %v4393_v56  ;;  %3065 = vmatpush1.bf16.msra.mxu1 %v4395_v50  ;;  %v1203_v35 = vpop.f32.mrb[12].mxu0  ;;  %v4444_v56 = vcombine.high %v1510_v9, %v1514_v36  ;;  %v1517_v50 = vld [vmem:[%s6081_s10 + $0x6c0] sm:$0xff]  ;;  %v1307_v9 = vld [vmem:[%s6081_s10 + $0x30] sm:$0xff]  ;;  %v1304_v36 = vld [vmem:[%s6081_s10 + $0x18] sm:$0xff] }
 0x375   : > { %2920 = vmatprep.subr.bf16.mxu0 %v4402_v21  ;;  %3066 = vmatprep.subr.bf16.mxu1 %v4404_v26  ;;  %v1205_v17 = vpop.f32.mrb[13].mxu0  ;;  %v1521_v21 = vld [vmem:[%s6081_s10 + $0x6e0] sm:$0xff]  ;;  %v1518_v26 = vld [vmem:[%s6081_s10 + $0x6c8] sm:$0xff] }
 0x376   : > { %v1207_v34 = vpop.f32.mrb[14].mxu0  ;;  %v4450_v24 = vcombine.high %v1517_v50, %v1521_v21  ;;  %v4449_v40 = vcombine.low %v1517_v50, %v1521_v21  ;;  %v1311_v21 = vld [vmem:[%s6081_s10 + $0x50] sm:$0xff] }
 0x377   : > { %v5458_v43 = vpack.c.bf16 %v1207_v34, %v1203_v35  ;;  %v1209_v45 = vpop.f32.mrb[15].mxu0  ;;  %v1529_v35 = vld [vmem:[%s6081_s10 + $0x720] sm:$0xff] }
 0x378   : > { %2921 = vmatpush1.bf16.msra.mxu0 %v4401_v32  ;;  %3067 = vmatpush1.bf16.msra.mxu1 %v4403_v19  ;;  %v5460_v48 = vpack.c.bf16 %v1209_v45, %v1205_v17  ;;  %v4452_v32 = vcombine.high %v1518_v26, %v1522_v30  ;;  %v1525_v19 = vld [vmem:[%s6081_s10 + $0x700] sm:$0xff]  ;;  %v4451_v17 = vcombine.low %v1518_v26, %v1522_v30  ;;  %v1534_v45 = vld [vmem:[%s6081_s10 + $0x748] sm:$0xff]  ;;  %v1315_v26 = vld [vmem:[%s6081_s10 + $0x70] sm:$0xff] }
 0x379   : > { %2922 = vmatprep.subr.bf16.mxu0 %v4410_v33  ;;  %3068 = vmatprep.subr.bf16.mxu1 %v4412_v38  ;;  %v1526_v33 = vld [vmem:[%s6081_s10 + $0x708] sm:$0xff]  ;;  %v4458_v41 = vcombine.high %v1525_v19, %v1529_v35  ;;  %v1537_v34 = vld [vmem:[%s6081_s10 + $0x760] sm:$0xff]  ;;  %v1312_v30 = vld [vmem:[%s6081_s10 + $0x58] sm:$0xff] }
 0x37a   : > { %2899 = vmatprep.mubr.bf16.mxu0 %v5460_v48  ;;  %3045 = vmatprep.mubr.bf16.mxu1 %v5460_v48  ;;  %v1530_v38 = vld [vmem:[%s6081_s10 + $0x728] sm:$0xff] }
 0x37b   : > { %2900 = vmatmul.mubr.bf16.gmra.mrb[28].mxu0 %v5458_v43  ;;  %3046 = vmatmul.mubr.bf16.gmra.mrb[28].mxu1 %v5458_v43  ;;  %v4460_v42 = vcombine.high %v1526_v33, %v1530_v38 }
 0x37c   : > { %2923 = vmatpush1.bf16.msra.mxu0 %v4409_v44  ;;  %3069 = vmatpush1.bf16.msra.mxu1 %v4411_v58  ;;  %v1538_v44 = vld [vmem:[%s6081_s10 + $0x768] sm:$0xff]  ;;  %v4457_v58 = vcombine.low %v1525_v19, %v1529_v35  ;;  %v1319_v35 = vld [vmem:[%s6081_s10 + $0x90] sm:$0xff] }
 0x37d   : > { %2924 = vmatprep.subr.bf16.mxu0 %v4418_v28  ;;  %3070 = vmatprep.subr.bf16.mxu1 %v4420_v29  ;;  %v4459_v28 = vcombine.low %v1526_v33, %v1530_v38  ;;  %v4466_v29 = vcombine.high %v1533_v27, %v1537_v34  ;;  %v4468_v31 = vcombine.high %v1534_v45, %v1538_v44  ;;  %v1323_v33 = vld [vmem:[%s6081_s10 + $0xb0] sm:$0xff]  ;;  %v1320_v38 = vld [vmem:[%s6081_s10 + $0x98] sm:$0xff] }
 0x37e   : > { %2942 = vmatprep.mubr.bf16.mxu0 %v5336_v6  ;;  %3088 = vmatprep.mubr.bf16.mxu1 %v5336_v6 }
 0x380   : > { %2925 = vmatpush1.bf16.msra.mxu0 %v4417_v49  ;;  %3071 = vmatpush1.bf16.msra.mxu1 %v4419_v57  ;;  %v1546_v49 = vld [vmem:[%s6081_s10 + $0x7a8] sm:$0xff]  ;;  %v4465_v57 = vcombine.low %v1533_v27, %v1537_v34  ;;  %v1327_v34 = vld [vmem:[%s6081_s10 + $0xd0] sm:$0xff] }
 0x381   : > { %2926 = vmatprep.subr.bf16.mxu0 %v4426_v53  ;;  %3072 = vmatprep.subr.bf16.mxu1 %v4428_v54  ;;  %v4467_v53 = vcombine.low %v1534_v45, %v1538_v44  ;;  %v4474_v54 = vcombine.high %v1541_v51, %v1545_v46  ;;  %v4476_v55 = vcombine.high %v1542_v47, %v1546_v49  ;;  %v1331_v45 = vld [vmem:[%s6081_s10 + $0xf0] sm:$0xff]  ;;  %v1328_v44 = vld [vmem:[%s6081_s10 + $0xd8] sm:$0xff] }
 0x384   : > { %2927 = vmatpush1.bf16.msra.mxu0 %v4425_v62  ;;  %3073 = vmatpush1.bf16.msra.mxu1 %v4427_v63  ;;  %v1554_v62 = vld [vmem:[%s6081_s10 + $0x7e8] sm:$0xff]  ;;  %v4473_v63 = vcombine.low %v1541_v51, %v1545_v46  ;;  %v1335_v46 = vld [vmem:[%s6081_s10 + $0x110] sm:$0xff] }
 0x385   : > { %2928 = vmatprep.subr.bf16.mxu0 %v4434_v22  ;;  %3074 = vmatprep.subr.bf16.mxu1 %v4436_v3  ;;  %v4475_v22 = vcombine.low %v1542_v47, %v1546_v49  ;;  %v4482_v3 = vcombine.high %v1549_v59, %v1553_v0  ;;  %v4484_v8 = vcombine.high %v1550_v61, %v1554_v62  ;;  %v1339_v47 = vld [vmem:[%s6081_s10 + $0x130] sm:$0xff]  ;;  %v1336_v49 = vld [vmem:[%s6081_s10 + $0x118] sm:$0xff] }
 0x388   : > { %2929 = vmatpush1.bf16.msra.mxu0 %v4433_v10  ;;  %3075 = vmatpush1.bf16.msra.mxu1 %v4435_v11  ;;  %v1308_v10 = vld [vmem:[%s6081_s10 + $0x38] sm:$0xff]  ;;  %v4481_v11 = vcombine.low %v1549_v59, %v1553_v0  ;;  %v1343_v0 = vld [vmem:[%s6081_s10 + $0x150] sm:$0xff] }
 0x389   : > { %2930 = vmatprep.subr.bf16.mxu0 %v4442_v12  ;;  %3076 = vmatprep.subr.bf16.mxu1 %v4444_v56  ;;  %v4483_v12 = vcombine.low %v1550_v61, %v1554_v62  ;;  %v4238_v56 = vcombine.high %v1303_v25, %v1307_v9  ;;  %v4240_v50 = vcombine.high %v1304_v36, %v1308_v10  ;;  %v1347_v61 = vld [vmem:[%s6081_s10 + $0x170] sm:$0xff]  ;;  %v1344_v62 = vld [vmem:[%s6081_s10 + $0x158] sm:$0xff] }
 0x38c   : > { %2931 = vmatpush1.bf16.msra.mxu0 %v4441_v5  ;;  %3077 = vmatpush1.bf16.msra.mxu1 %v4443_v7  ;;  %v1316_v5 = vld [vmem:[%s6081_s10 + $0x78] sm:$0xff]  ;;  %v4237_v7 = vcombine.low %v1303_v25, %v1307_v9  ;;  %v1351_v9 = vld [vmem:[%s6081_s10 + $0x190] sm:$0xff] }
 0x38d   : > { %2932 = vmatprep.subr.bf16.mxu0 %v4450_v24  ;;  %3078 = vmatprep.subr.bf16.mxu1 %v4452_v32  ;;  %v4239_v24 = vcombine.low %v1304_v36, %v1308_v10  ;;  %v4246_v32 = vcombine.high %v1311_v21, %v1315_v26  ;;  %v4248_v19 = vcombine.high %v1312_v30, %v1316_v5  ;;  %v1355_v36 = vld [vmem:[%s6081_s10 + $0x1b0] sm:$0xff]  ;;  %v1352_v10 = vld [vmem:[%s6081_s10 + $0x198] sm:$0xff] }
 0x390   : > { %2933 = vmatpush1.bf16.msra.mxu0 %v4449_v40  ;;  %3079 = vmatpush1.bf16.msra.mxu1 %v4451_v17  ;;  %v1324_v40 = vld [vmem:[%s6081_s10 + $0xb8] sm:$0xff]  ;;  %v4245_v17 = vcombine.low %v1311_v21, %v1315_v26  ;;  %v1359_v26 = vld [vmem:[%s6081_s10 + $0x1d0] sm:$0xff] }
 0x391   : > { %2934 = vmatprep.subr.bf16.mxu0 %v4458_v41  ;;  %3080 = vmatprep.subr.bf16.mxu1 %v4460_v42  ;;  %v4247_v41 = vcombine.low %v1312_v30, %v1316_v5  ;;  %v4254_v42 = vcombine.high %v1319_v35, %v1323_v33  ;;  %v4256_v27 = vcombine.high %v1320_v38, %v1324_v40  ;;  %v1363_v30 = vld [vmem:[%s6081_s10 + $0x1f0] sm:$0xff]  ;;  %v1360_v5 = vld [vmem:[%s6081_s10 + $0x1d8] sm:$0xff] }
 0x394   : > { %2935 = vmatpush1.bf16.msra.mxu0 %v4457_v58  ;;  %3081 = vmatpush1.bf16.msra.mxu1 %v4459_v28  ;;  %v1332_v58 = vld [vmem:[%s6081_s10 + $0xf8] sm:$0xff]  ;;  %v4253_v28 = vcombine.low %v1319_v35, %v1323_v33  ;;  %v1367_v33 = vld [vmem:[%s6081_s10 + $0x210] sm:$0xff] }
 0x395   : > { %2936 = vmatprep.subr.bf16.mxu0 %v4466_v29  ;;  %3082 = vmatprep.subr.bf16.mxu1 %v4468_v31  ;;  %v4255_v29 = vcombine.low %v1320_v38, %v1324_v40  ;;  %v4262_v31 = vcombine.high %v1327_v34, %v1331_v45  ;;  %v4264_v51 = vcombine.high %v1328_v44, %v1332_v58  ;;  %v1371_v38 = vld [vmem:[%s6081_s10 + $0x230] sm:$0xff]  ;;  %v1368_v40 = vld [vmem:[%s6081_s10 + $0x218] sm:$0xff] }
 0x398   : > { %2937 = vmatpush1.bf16.msra.mxu0 %v4465_v57  ;;  %3083 = vmatpush1.bf16.msra.mxu1 %v4467_v53  ;;  %v1340_v57 = vld [vmem:[%s6081_s10 + $0x138] sm:$0xff]  ;;  %v4261_v53 = vcombine.low %v1327_v34, %v1331_v45  ;;  %v1375_v45 = vld [vmem:[%s6081_s10 + $0x250] sm:$0xff] }
 0x399   : > { %2938 = vmatprep.subr.bf16.mxu0 %v4474_v54  ;;  %3084 = vmatprep.subr.bf16.mxu1 %v4476_v55  ;;  %v4263_v54 = vcombine.low %v1328_v44, %v1332_v58  ;;  %v4270_v55 = vcombine.high %v1335_v46, %v1339_v47  ;;  %v4272_v59 = vcombine.high %v1336_v49, %v1340_v57  ;;  %v1379_v44 = vld [vmem:[%s6081_s10 + $0x270] sm:$0xff]  ;;  %v1376_v58 = vld [vmem:[%s6081_s10 + $0x258] sm:$0xff] }
 0x39c   : > { %2939 = vmatpush1.bf16.msra.mxu0 %v4473_v63  ;;  %3085 = vmatpush1.bf16.msra.mxu1 %v4475_v22  ;;  %v1348_v63 = vld [vmem:[%s6081_s10 + $0x178] sm:$0xff]  ;;  %v4269_v22 = vcombine.low %v1335_v46, %v1339_v47  ;;  %v1383_v46 = vld [vmem:[%s6081_s10 + $0x290] sm:$0xff] }
 0x39d   : > { %2940 = vmatprep.subr.bf16.mxu0 %v4482_v3  ;;  %3086 = vmatprep.subr.bf16.mxu1 %v4484_v8  ;;  %v4271_v3 = vcombine.low %v1336_v49, %v1340_v57  ;;  %v4278_v8 = vcombine.high %v1343_v0, %v1347_v61  ;;  %v4280_v25 = vcombine.high %v1344_v62, %v1348_v63  ;;  %v1387_v47 = vld [vmem:[%s6081_s10 + $0x2b0] sm:$0xff]  ;;  %v1384_v49 = vld [vmem:[%s6081_s10 + $0x298] sm:$0xff] }
 0x39e   : > { %v1388_v57 = vld [vmem:[%s6081_s10 + $0x2b8] sm:$0xff] }
 0x3a0   : > { %2941 = vmatpush1.bf16.msra.mxu0 %v4481_v11  ;;  %3087 = vmatpush1.bf16.msra.mxu1 %v4483_v12  ;;  %v1356_v11 = vld [vmem:[%s6081_s10 + $0x1b8] sm:$0xff]  ;;  %v4277_v12 = vcombine.low %v1343_v0, %v1347_v61  ;;  %v1391_v0 = vld [vmem:[%s6081_s10 + $0x2d0] sm:$0xff] }
 0x3a1   : > { %3129 = vmatprep.subr.bf16.mxu0 %v4238_v56  ;;  %3275 = vmatprep.subr.bf16.mxu1 %v4240_v50  ;;  %v4279_v56 = vcombine.low %v1344_v62, %v1348_v63  ;;  %v4286_v50 = vcombine.high %v1351_v9, %v1355_v36  ;;  %v4288_v21 = vcombine.high %v1352_v10, %v1356_v11  ;;  %v1395_v61 = vld [vmem:[%s6081_s10 + $0x2f0] sm:$0xff]  ;;  %v1392_v62 = vld [vmem:[%s6081_s10 + $0x2d8] sm:$0xff] }
 0x3a2   : > { %v1396_v63 = vld [vmem:[%s6081_s10 + $0x2f8] sm:$0xff] }
 0x3a3   : > { %2943 = vmatmul.mubr.bf16.vlgmr.msra.gmra.mrb[16].mxu0 %v5334_v4  ;;  %3089 = vmatmul.mubr.bf16.vlgmr.msra.gmra.mrb[16].mxu1 %v5334_v4 }
 0x3a4   : > { %3130 = vmatpush1.bf16.msra.mxu0 %v4237_v7  ;;  %3276 = vmatpush1.bf16.msra.mxu1 %v4239_v24  ;;  %v1364_v7 = vld [vmem:[%s6081_s10 + $0x1f8] sm:$0xff]  ;;  %v4285_v24 = vcombine.low %v1351_v9, %v1355_v36  ;;  %v1399_v9 = vld [vmem:[%s6081_s10 + $0x310] sm:$0xff] }
 0x3a5   : > { %3131 = vmatprep.subr.bf16.mxu0 %v4246_v32  ;;  %3277 = vmatprep.subr.bf16.mxu1 %v4248_v19  ;;  %v4287_v32 = vcombine.low %v1352_v10, %v1356_v11  ;;  %v4294_v19 = vcombine.high %v1359_v26, %v1363_v30  ;;  %v4296_v35 = vcombine.high %v1360_v5, %v1364_v7  ;;  %v1403_v36 = vld [vmem:[%s6081_s10 + $0x330] sm:$0xff]  ;;  %v1400_v10 = vld [vmem:[%s6081_s10 + $0x318] sm:$0xff] }
 0x3a6   : > { %2952 = vmatprep.mubr.bf16.mxu0 %v5340_v1  ;;  %3098 = vmatprep.mubr.bf16.mxu1 %v5340_v1  ;;  %v1404_v11 = vld [vmem:[%s6081_s10 + $0x338] sm:$0xff] }
 0x3a8   : > { %3132 = vmatpush1.bf16.msra.mxu0 %v4245_v17  ;;  %3278 = vmatpush1.bf16.msra.mxu1 %v4247_v41  ;;  %v1372_v17 = vld [vmem:[%s6081_s10 + $0x238] sm:$0xff]  ;;  %v4293_v41 = vcombine.low %v1359_v26, %v1363_v30  ;;  %v1407_v26 = vld [vmem:[%s6081_s10 + $0x350] sm:$0xff] }
 0x3a9   : > { %3133 = vmatprep.subr.bf16.mxu0 %v4254_v42  ;;  %3279 = vmatprep.subr.bf16.mxu1 %v4256_v27  ;;  %v4295_v42 = vcombine.low %v1360_v5, %v1364_v7  ;;  %v4302_v27 = vcombine.high %v1367_v33, %v1371_v38  ;;  %v4304_v34 = vcombine.high %v1368_v40, %v1372_v17  ;;  %v1411_v30 = vld [vmem:[%s6081_s10 + $0x370] sm:$0xff]  ;;  %v1408_v5 = vld [vmem:[%s6081_s10 + $0x358] sm:$0xff] }
 0x3aa   : > { %v1412_v7 = vld [vmem:[%s6081_s10 + $0x378] sm:$0xff] }
 0x3ab   : > { %2953 = vmatmul.mubr.bf16.gmra.mrb[20].mxu0 %v5338_v39  ;;  %3099 = vmatmul.mubr.bf16.gmra.mrb[20].mxu1 %v5338_v39 }
 0x3ac   : > { %3134 = vmatpush1.bf16.msra.mxu0 %v4253_v28  ;;  %3280 = vmatpush1.bf16.msra.mxu1 %v4255_v29  ;;  %v4301_v28 = vcombine.low %v1367_v33, %v1371_v38  ;;  %v4303_v29 = vcombine.low %v1368_v40, %v1372_v17  ;;  %v1415_v33 = vld [vmem:[%s6081_s10 + $0x390] sm:$0xff]  ;;  %v1416_v40 = vld [vmem:[%s6081_s10 + $0x398] sm:$0xff] }
 0x3ad   : > { %3135 = vmatprep.subr.bf16.mxu0 %v4262_v31  ;;  %3281 = vmatprep.subr.bf16.mxu1 %v4264_v51  ;;  %v4310_v31 = vcombine.high %v1375_v45, %v1379_v44  ;;  %v1419_v38 = vld [vmem:[%s6081_s10 + $0x3b0] sm:$0xff]  ;;  %v1420_v17 = vld [vmem:[%s6081_s10 + $0x3b8] sm:$0xff] }
 0x3ae   : > { %2962 = vmatprep.mubr.bf16.mxu0 %v5344_v15  ;;  %3108 = vmatprep.mubr.bf16.mxu1 %v5344_v15 }
 0x3b0   : > { %3136 = vmatpush1.bf16.msra.mxu0 %v4261_v53  ;;  %3282 = vmatpush1.bf16.msra.mxu1 %v4263_v54  ;;  %v4309_v53 = vcombine.low %v1375_v45, %v1379_v44  ;;  %v1423_v45 = vld [vmem:[%s6081_s10 + $0x3d0] sm:$0xff] }
 0x3b1   : > { %3137 = vmatprep.subr.bf16.mxu0 %v4270_v55  ;;  %3283 = vmatprep.subr.bf16.mxu1 %v4272_v59  ;;  %v4318_v55 = vcombine.high %v1383_v46, %v1387_v47  ;;  %v4320_v59 = vcombine.high %v1384_v49, %v1388_v57  ;;  %v1427_v44 = vld [vmem:[%s6081_s10 + $0x3f0] sm:$0xff] }
 0x3b3   : > { %2963 = vmatmul.mubr.bf16.gmra.mrb[24].mxu0 %v5342_v14  ;;  %3109 = vmatmul.mubr.bf16.gmra.mrb[24].mxu1 %v5342_v14 }
 0x3b4   : > { %3138 = vmatpush1.bf16.msra.mxu0 %v4269_v22  ;;  %3284 = vmatpush1.bf16.msra.mxu1 %v4271_v3  ;;  %v4317_v22 = vcombine.low %v1383_v46, %v1387_v47  ;;  %v4319_v3 = vcombine.low %v1384_v49, %v1388_v57  ;;  %v1431_v46 = vld [vmem:[%s6081_s10 + $0x410] sm:$0xff]  ;;  %v1432_v49 = vld [vmem:[%s6081_s10 + $0x418] sm:$0xff] }
 0x3b5   : > { %3139 = vmatprep.subr.bf16.mxu0 %v4278_v8  ;;  %3285 = vmatprep.subr.bf16.mxu1 %v4280_v25  ;;  %v4326_v8 = vcombine.high %v1391_v0, %v1395_v61  ;;  %v4328_v25 = vcombine.high %v1392_v62, %v1396_v63  ;;  %v1435_v47 = vld [vmem:[%s6081_s10 + $0x430] sm:$0xff]  ;;  %v1436_v57 = vld [vmem:[%s6081_s10 + $0x438] sm:$0xff] }
 0x3b6   : > { %2972 = vmatprep.mubr.bf16.mxu0 %v5348_v23  ;;  %3118 = vmatprep.mubr.bf16.mxu1 %v5348_v23 }
 0x3b8   : > { %3140 = vmatpush1.bf16.msra.mxu0 %v4277_v12  ;;  %3286 = vmatpush1.bf16.msra.mxu1 %v4279_v56  ;;  %v4325_v12 = vcombine.low %v1391_v0, %v1395_v61  ;;  %v4327_v56 = vcombine.low %v1392_v62, %v1396_v63  ;;  %v1439_v0 = vld [vmem:[%s6081_s10 + $0x450] sm:$0xff]  ;;  %v1440_v62 = vld [vmem:[%s6081_s10 + $0x458] sm:$0xff] }
 0x3b9   : > { %3141 = vmatprep.subr.bf16.mxu0 %v4286_v50  ;;  %3287 = vmatprep.subr.bf16.mxu1 %v4288_v21  ;;  %v4334_v50 = vcombine.high %v1399_v9, %v1403_v36  ;;  %v4336_v21 = vcombine.high %v1400_v10, %v1404_v11  ;;  %v1443_v61 = vld [vmem:[%s6081_s10 + $0x470] sm:$0xff]  ;;  %v1444_v63 = vld [vmem:[%s6081_s10 + $0x478] sm:$0xff] }
 0x3bb   : > { %2973 = vmatmul.mubr.bf16.gmra.mrb[28].mxu0 %v5346_v20  ;;  %3119 = vmatmul.mubr.bf16.gmra.mrb[28].mxu1 %v5346_v20 }
 0x3bc   : > { %3142 = vmatpush1.bf16.msra.mxu0 %v4285_v24  ;;  %3161 = vmatprep.mubr.bf16.mxu0 %v5364_v37  ;;  %v4333_v24 = vcombine.low %v1399_v9, %v1403_v36  ;;  %v1447_v9 = vld [vmem:[%s6081_s10 + $0x490] sm:$0xff] }
 0x3bd   : > { %3288 = vmatpush1.bf16.msra.mxu1 %v4287_v32  ;;  %3307 = vmatprep.mubr.bf16.mxu1 %v5364_v37  ;;  %v1380_v37 = vld [vmem:[%s6081_s10 + $0x278] sm:$0xff]  ;;  %v4335_v32 = vcombine.low %v1400_v10, %v1404_v11  ;;  %v1451_v36 = vld [vmem:[%s6081_s10 + $0x4b0] sm:$0xff] }
 0x3be   : > { %3143 = vmatprep.subr.bf16.mxu0 %v4294_v19  ;;  %3289 = vmatprep.subr.bf16.mxu1 %v4296_v35  ;;  %v4312_v51 = vcombine.high %v1376_v58, %v1380_v37  ;;  %v4311_v54 = vcombine.low %v1376_v58, %v1380_v37  ;;  %v4342_v19 = vcombine.high %v1407_v26, %v1411_v30  ;;  %v1424_v58 = vld [vmem:[%s6081_s10 + $0x3d8] sm:$0xff] }
 0x3bf   : > { %v4344_v35 = vcombine.high %v1408_v5, %v1412_v7  ;;  %v1428_v37 = vld [vmem:[%s6081_s10 + $0x3f8] sm:$0xff] }
 0x3c0   : > { %3144 = vmatpush1.bf16.msra.mxu0 %v4293_v41  ;;  %v4341_v41 = vcombine.low %v1407_v26, %v1411_v30  ;;  %v1448_v10 = vld [vmem:[%s6081_s10 + $0x498] sm:$0xff]  ;;  %v1459_v26 = vld [vmem:[%s6081_s10 + $0x4f0] sm:$0xff] }
 0x3c1   : > { %3290 = vmatpush1.bf16.msra.mxu1 %v4295_v42  ;;  %3145 = vmatprep.subr.bf16.mxu0 %v4302_v27  ;;  %v4343_v42 = vcombine.low %v1408_v5, %v1412_v7  ;;  %v4350_v27 = vcombine.high %v1415_v33, %v1419_v38  ;;  %v1452_v11 = vld [vmem:[%s6081_s10 + $0x4b8] sm:$0xff]  ;;  %v4381_v5 = vcombine.low %v1447_v9, %v1451_v36 }
 0x3c2   : > { %3291 = vmatprep.subr.bf16.mxu1 %v4304_v34  ;;  %v4352_v34 = vcombine.high %v1416_v40, %v1420_v17  ;;  %v1456_v30 = vld [vmem:[%s6081_s10 + $0x4d8] sm:$0xff]  ;;  %v4383_v7 = vcombine.low %v1448_v10, %v1452_v11 }
 0x3c4   : > { %3146 = vmatpush1.bf16.msra.mxu0 %v4301_v28  ;;  %v4349_v28 = vcombine.low %v1415_v33, %v1419_v38  ;;  %v1464_v33 = vld [vmem:[%s6081_s10 + $0x518] sm:$0xff] }
 0x3c5   : > { %3292 = vmatpush1.bf16.msra.mxu1 %v4303_v29  ;;  %3147 = vmatprep.subr.bf16.mxu0 %v4310_v31  ;;  %v4351_v29 = vcombine.low %v1416_v40, %v1420_v17  ;;  %v4358_v31 = vcombine.high %v1423_v45, %v1427_v44  ;;  %v1468_v38 = vld [vmem:[%s6081_s10 + $0x538] sm:$0xff] }
 0x3c6   : > { %3293 = vmatprep.subr.bf16.mxu1 %v4312_v51  ;;  %v4360_v51 = vcombine.high %v1424_v58, %v1428_v37 }
 0x3c8   : > { %3148 = vmatpush1.bf16.msra.mxu0 %v4309_v53  ;;  %v4357_v53 = vcombine.low %v1423_v45, %v1427_v44  ;;  %v4399_v44 = vcombine.low %v1464_v33, %v1468_v38 }
 0x3c9   : > { %3294 = vmatpush1.bf16.msra.mxu1 %v4311_v54  ;;  %3149 = vmatprep.subr.bf16.mxu0 %v4318_v55  ;;  %v4359_v54 = vcombine.low %v1424_v58, %v1428_v37  ;;  %v4366_v55 = vcombine.high %v1431_v46, %v1435_v47 }
 0x3ca   : > { %3295 = vmatprep.subr.bf16.mxu1 %v4320_v59  ;;  %v4368_v59 = vcombine.high %v1432_v49, %v1436_v57 }
 0x3cc   : > { %3150 = vmatpush1.bf16.msra.mxu0 %v4317_v22  ;;  %v4365_v22 = vcombine.low %v1431_v46, %v1435_v47 }
 0x3cd   : > { %3296 = vmatpush1.bf16.msra.mxu1 %v4319_v3  ;;  %3151 = vmatprep.subr.bf16.mxu0 %v4326_v8  ;;  %v4367_v3 = vcombine.low %v1432_v49, %v1436_v57  ;;  %v4374_v8 = vcombine.high %v1439_v0, %v1443_v61  ;;  %v1487_v57 = vld [vmem:[%s6081_s10 + $0x5d0] sm:$0xff] }
 0x3ce   : > { %3297 = vmatprep.subr.bf16.mxu1 %v4328_v25  ;;  %v4376_v25 = vcombine.high %v1440_v62, %v1444_v63 }
 0x3d0   : > { %3152 = vmatpush1.bf16.msra.mxu0 %v4325_v12  ;;  %v4373_v12 = vcombine.low %v1439_v0, %v1443_v61 }
 0x3d1   : > { %3298 = vmatpush1.bf16.msra.mxu1 %v4327_v56  ;;  %3153 = vmatprep.subr.bf16.mxu0 %v4334_v50  ;;  %v4375_v56 = vcombine.low %v1440_v62, %v1444_v63  ;;  %v4382_v50 = vcombine.high %v1447_v9, %v1451_v36  ;;  %v1495_v62 = vld [vmem:[%s6081_s10 + $0x610] sm:$0xff] }
 0x3d2   : > { %3299 = vmatprep.subr.bf16.mxu1 %v4336_v21  ;;  %v1455_v21 = vld [vmem:[%s6081_s10 + $0x4d0] sm:$0xff] }
 0x3d3   : > { %v4389_v40 = vcombine.low %v1455_v21, %v1459_v26  ;;  %v1499_v63 = vld [vmem:[%s6081_s10 + $0x630] sm:$0xff] }
 0x3d4   : > { %3154 = vmatpush1.bf16.msra.mxu0 %v4333_v24  ;;  %v4390_v24 = vcombine.high %v1455_v21, %v1459_v26  ;;  %v4430_v9 = vcombine.high %v1495_v62, %v1499_v63  ;;  %v1503_v36 = vld [vmem:[%s6081_s10 + $0x650] sm:$0xff] }
 0x3d5   : > { %3300 = vmatpush1.bf16.msra.mxu1 %v4335_v32  ;;  %3155 = vmatprep.subr.bf16.mxu0 %v4342_v19  ;;  %v1463_v19 = vld [vmem:[%s6081_s10 + $0x510] sm:$0xff] }
 0x3d6   : > { %3301 = vmatprep.subr.bf16.mxu1 %v4344_v35  ;;  %v1467_v35 = vld [vmem:[%s6081_s10 + $0x530] sm:$0xff] }
 0x3d7   : > { %v4397_v45 = vcombine.low %v1463_v19, %v1467_v35  ;;  %v1511_v21 = vld [vmem:[%s6081_s10 + $0x690] sm:$0xff] }
 0x3d8   : > { %3156 = vmatpush1.bf16.msra.mxu0 %v4341_v41  ;;  %v4398_v41 = vcombine.high %v1463_v19, %v1467_v35  ;;  %v1515_v26 = vld [vmem:[%s6081_s10 + $0x6b0] sm:$0xff] }
 0x3d9   : > { %3302 = vmatpush1.bf16.msra.mxu1 %v4343_v42  ;;  %3157 = vmatprep.subr.bf16.mxu0 %v4350_v27  ;;  %v1471_v42 = vld [vmem:[%s6081_s10 + $0x550] sm:$0xff] }
 0x3da   : > { %3303 = vmatprep.subr.bf16.mxu1 %v4352_v34  ;;  %v1475_v27 = vld [vmem:[%s6081_s10 + $0x570] sm:$0xff]  ;;  %v1472_v34 = vld [vmem:[%s6081_s10 + $0x558] sm:$0xff] }
 0x3db   : > { %v4406_v58 = vcombine.high %v1471_v42, %v1475_v27  ;;  %v4405_v46 = vcombine.low %v1471_v42, %v1475_v27  ;;  %v1519_v19 = vld [vmem:[%s6081_s10 + $0x6d0] sm:$0xff] }
 0x3dc   : > { %3158 = vmatpush1.bf16.msra.mxu0 %v4349_v28  ;;  %v1479_v28 = vld [vmem:[%s6081_s10 + $0x590] sm:$0xff] }
 0x3dd   : > { %3304 = vmatpush1.bf16.msra.mxu1 %v4351_v29  ;;  %3159 = vmatprep.subr.bf16.mxu0 %v4358_v31  ;;  %v1483_v29 = vld [vmem:[%s6081_s10 + $0x5b0] sm:$0xff]  ;;  %v1480_v31 = vld [vmem:[%s6081_s10 + $0x598] sm:$0xff] }
 0x3de   : > { %3305 = vmatprep.subr.bf16.mxu1 %v4360_v51  ;;  %v1484_v51 = vld [vmem:[%s6081_s10 + $0x5b8] sm:$0xff]  ;;  %v4414_v49 = vcombine.high %v1479_v28, %v1483_v29  ;;  %v1523_v35 = vld [vmem:[%s6081_s10 + $0x6f0] sm:$0xff] }
 0x3df   : > { %v1527_v42 = vld [vmem:[%s6081_s10 + $0x710] sm:$0xff] }
 0x3e0   : > { %3160 = vmatpush1.bf16.msra.mxu0 %v4357_v53  ;;  %v1491_v53 = vld [vmem:[%s6081_s10 + $0x5f0] sm:$0xff] }
 0x3e1   : > { %3306 = vmatpush1.bf16.msra.mxu1 %v4359_v54  ;;  %3202 = vmatprep.subr.bf16.mxu0 %v4366_v55  ;;  %v1488_v54 = vld [vmem:[%s6081_s10 + $0x5d8] sm:$0xff]  ;;  %v4413_v55 = vcombine.low %v1479_v28, %v1483_v29  ;;  %v4422_v0 = vcombine.high %v1487_v57, %v1491_v53  ;;  %v1531_v27 = vld [vmem:[%s6081_s10 + $0x730] sm:$0xff] }
 0x3e2   : > { %3348 = vmatprep.subr.bf16.mxu1 %v4368_v59  ;;  %v4415_v59 = vcombine.low %v1480_v31, %v1484_v51  ;;  %v1535_v28 = vld [vmem:[%s6081_s10 + $0x750] sm:$0xff] }
 0x3e3   : > { %3162 = vmatmul.mubr.bf16.vlgmr.msra.gmra.mrb[32].mxu0 %v5362_v18  ;;  %v1539_v29 = vld [vmem:[%s6081_s10 + $0x770] sm:$0xff] }
 0x3e4   : > { %3308 = vmatmul.mubr.bf16.vlgmr.msra.gmra.mrb[32].mxu1 %v5362_v18  ;;  %3171 = vmatprep.mubr.bf16.mxu0 %v5396_v52  ;;  %v4384_v18 = vcombine.high %v1448_v10, %v1452_v11  ;;  %v1507_v10 = vld [vmem:[%s6081_s10 + $0x670] sm:$0xff]  ;;  %v1504_v11 = vld [vmem:[%s6081_s10 + $0x658] sm:$0xff] }
 0x3e5   : > { %3203 = vmatpush1.bf16.msra.mxu0 %v4365_v22  ;;  %3317 = vmatprep.mubr.bf16.mxu1 %v5396_v52  ;;  %v1460_v52 = vld [vmem:[%s6081_s10 + $0x4f8] sm:$0xff] }
 0x3e6   : > { %3349 = vmatpush1.bf16.msra.mxu1 %v4367_v3  ;;  %3204 = vmatprep.subr.bf16.mxu0 %v4374_v8  ;;  %v4392_v32 = vcombine.high %v1456_v30, %v1460_v52  ;;  %v4391_v17 = vcombine.low %v1456_v30, %v1460_v52  ;;  %v1496_v22 = vld [vmem:[%s6081_s10 + $0x618] sm:$0xff]  ;;  %v4421_v8 = vcombine.low %v1487_v57, %v1491_v53  ;;  %v1543_v57 = vld [vmem:[%s6081_s10 + $0x790] sm:$0xff] }
 0x3e7   : > { %3350 = vmatprep.subr.bf16.mxu1 %v4376_v25  ;;  %v1500_v3 = vld [vmem:[%s6081_s10 + $0x638] sm:$0xff]  ;;  %v1547_v53 = vld [vmem:[%s6081_s10 + $0x7b0] sm:$0xff] }
 0x3e8   : > { %v1512_v30 = vld [vmem:[%s6081_s10 + $0x698] sm:$0xff] }
 0x3e9   : > { %3205 = vmatpush1.bf16.msra.mxu0 %v4373_v12  ;;  %v4429_v12 = vcombine.low %v1495_v62, %v1499_v63  ;;  %v1516_v52 = vld [vmem:[%s6081_s10 + $0x6b8] sm:$0xff]  ;;  %v1551_v62 = vld [vmem:[%s6081_s10 + $0x7d0] sm:$0xff] }
 0x3ea   : > { %3351 = vmatpush1.bf16.msra.mxu1 %v4375_v56  ;;  %3206 = vmatprep.subr.bf16.mxu0 %v4382_v50  ;;  %v4431_v56 = vcombine.low %v1496_v22, %v1500_v3  ;;  %v4438_v50 = vcombine.high %v1503_v36, %v1507_v10  ;;  %v1555_v63 = vld [vmem:[%s6081_s10 + $0x7f0] sm:$0xff] }
 0x3eb   : > { %3172 = vmatmul.mubr.bf16.gmra.mrb[36].mxu0 %v5394_v60  ;;  %3352 = vmatprep.subr.bf16.mxu1 %v4384_v18 }
 0x3ec   : > { %3318 = vmatmul.mubr.bf16.gmra.mrb[36].mxu1 %v5394_v60  ;;  %3181 = vmatprep.mubr.bf16.mxu0 %v5428_v16  ;;  %v4400_v60 = vcombine.high %v1464_v33, %v1468_v38  ;;  %v1520_v33 = vld [vmem:[%s6081_s10 + $0x6d8] sm:$0xff] }
 0x3ed   : > { %3207 = vmatpush1.bf16.msra.mxu0 %v4381_v5  ;;  %3327 = vmatprep.mubr.bf16.mxu1 %v5428_v16  ;;  %v1476_v16 = vld [vmem:[%s6081_s10 + $0x578] sm:$0xff]  ;;  %v4437_v5 = vcombine.low %v1503_v36, %v1507_v10  ;;  %v4485_v36 = vcombine.low %v1551_v62, %v1555_v63 }
 0x3ee   : > { %3353 = vmatpush1.bf16.msra.mxu1 %v4383_v7  ;;  %3208 = vmatprep.subr.bf16.mxu0 %v4390_v24  ;;  %v4408_v37 = vcombine.high %v1472_v34, %v1476_v16  ;;  %v4407_v47 = vcombine.low %v1472_v34, %v1476_v16  ;;  %v4446_v24 = vcombine.high %v1511_v21, %v1515_v26  ;;  %v1524_v38 = vld [vmem:[%s6081_s10 + $0x6f8] sm:$0xff] }
 0x3ef   : > { %3354 = vmatprep.subr.bf16.mxu1 %v4392_v32  ;;  %v4448_v32 = vcombine.high %v1512_v30, %v1516_v52  ;;  %v1528_v34 = vld [vmem:[%s6081_s10 + $0x718] sm:$0xff] }
 0x3f0   : > { %v1532_v16 = vld [vmem:[%s6081_s10 + $0x738] sm:$0xff] }
 0x3f1   : > { %3209 = vmatpush1.bf16.msra.mxu0 %v4389_v40  ;;  %v4445_v40 = vcombine.low %v1511_v21, %v1515_v26 }
 0x3f2   : > { %3355 = vmatpush1.bf16.msra.mxu1 %v4391_v17  ;;  %3210 = vmatprep.subr.bf16.mxu0 %v4398_v41  ;;  %v4447_v17 = vcombine.low %v1512_v30, %v1516_v52  ;;  %v4454_v41 = vcombine.high %v1519_v19, %v1523_v35 }
 0x3f3   : > { %3182 = vmatmul.mubr.bf16.gmra.mrb[40].mxu0 %v5426_v2  ;;  %3356 = vmatprep.subr.bf16.mxu1 %v4400_v60  ;;  %v4456_v60 = vcombine.high %v1520_v33, %v1524_v38 }
 0x3f4   : > { %3328 = vmatmul.mubr.bf16.gmra.mrb[40].mxu1 %v5426_v2  ;;  %3191 = vmatprep.mubr.bf16.mxu0 %v5460_v48  ;;  %v4416_v2 = vcombine.high %v1480_v31, %v1484_v51  ;;  %v1536_v31 = vld [vmem:[%s6081_s10 + $0x758] sm:$0xff] }
 0x3f5   : > { %3211 = vmatpush1.bf16.msra.mxu0 %v4397_v45  ;;  %3337 = vmatprep.mubr.bf16.mxu1 %v5460_v48  ;;  %v1492_v48 = vld [vmem:[%s6081_s10 + $0x5f8] sm:$0xff]  ;;  %v4453_v45 = vcombine.low %v1519_v19, %v1523_v35 }
 0x3f6   : > { %3357 = vmatpush1.bf16.msra.mxu1 %v4399_v44  ;;  %3212 = vmatprep.subr.bf16.mxu0 %v4406_v58  ;;  %v4424_v61 = vcombine.high %v1488_v54, %v1492_v48  ;;  %v4423_v25 = vcombine.low %v1488_v54, %v1492_v48  ;;  %v4455_v44 = vcombine.low %v1520_v33, %v1524_v38  ;;  %v1540_v51 = vld [vmem:[%s6081_s10 + $0x778] sm:$0xff] }
 0x3f7   : > { %3358 = vmatprep.subr.bf16.mxu1 %v4408_v37  ;;  %v4462_v58 = vcombine.high %v1527_v42, %v1531_v27  ;;  %v4464_v37 = vcombine.high %v1528_v34, %v1532_v16  ;;  %v1544_v54 = vld [vmem:[%s6081_s10 + $0x798] sm:$0xff] }
 0x3f8   : > { %v1548_v48 = vld [vmem:[%s6081_s10 + $0x7b8] sm:$0xff] }
 0x3f9   : > { %3213 = vmatpush1.bf16.msra.mxu0 %v4405_v46  ;;  %v4461_v46 = vcombine.low %v1527_v42, %v1531_v27 }
 0x3fa   : > { %3359 = vmatpush1.bf16.msra.mxu1 %v4407_v47  ;;  %3214 = vmatprep.subr.bf16.mxu0 %v4414_v49  ;;  %v4463_v47 = vcombine.low %v1528_v34, %v1532_v16  ;;  %v4470_v49 = vcombine.high %v1535_v28, %v1539_v29 }
 0x3fb   : > { %3192 = vmatmul.mubr.bf16.gmra.mrb[44].mxu0 %v5458_v43  ;;  %3360 = vmatprep.subr.bf16.mxu1 %v4416_v2  ;;  %v4472_v2 = vcombine.high %v1536_v31, %v1540_v51 }
 0x3fc   : > { %3338 = vmatmul.mubr.bf16.gmra.mrb[44].mxu1 %v5458_v43  ;;  %3234 = vmatprep.mubr.bf16.mxu0 %v5336_v6  ;;  %v4432_v43 = vcombine.high %v1496_v22, %v1500_v3  ;;  %v1552_v22 = vld [vmem:[%s6081_s10 + $0x7d8] sm:$0xff] }
 0x3fd   : > { %3215 = vmatpush1.bf16.msra.mxu0 %v4413_v55  ;;  %3380 = vmatprep.mubr.bf16.mxu1 %v5336_v6  ;;  %v1508_v6 = vld [vmem:[%s6081_s10 + $0x678] sm:$0xff]  ;;  %v4469_v55 = vcombine.low %v1535_v28, %v1539_v29 }
 0x3fe   : > { %3361 = vmatpush1.bf16.msra.mxu1 %v4415_v59  ;;  %3216 = vmatprep.subr.bf16.mxu0 %v4422_v0  ;;  %v4440_v18 = vcombine.high %v1504_v11, %v1508_v6  ;;  %v4439_v7 = vcombine.low %v1504_v11, %v1508_v6  ;;  %v4471_v59 = vcombine.low %v1536_v31, %v1540_v51  ;;  %v1556_v3 = vld [vmem:[%s6081_s10 + $0x7f8] sm:$0xff] }
 0x3ff   : > { %3362 = vmatprep.subr.bf16.mxu1 %v4424_v61  ;;  %v4478_v0 = vcombine.high %v1543_v57, %v1547_v53  ;;  %v4480_v61 = vcombine.high %v1544_v54, %v1548_v48  ;;  %v4487_v10 = vcombine.low %v1552_v22, %v1556_v3 }
 0x401   : > { %3217 = vmatpush1.bf16.msra.mxu0 %v4421_v8  ;;  %v4477_v8 = vcombine.low %v1543_v57, %v1547_v53 }
 0x402   : > { %3363 = vmatpush1.bf16.msra.mxu1 %v4423_v25  ;;  %3218 = vmatprep.subr.bf16.mxu0 %v4430_v9  ;;  %v4479_v25 = vcombine.low %v1544_v54, %v1548_v48  ;;  %v4486_v9 = vcombine.high %v1551_v62, %v1555_v63 }
 0x403   : > { %3364 = vmatprep.subr.bf16.mxu1 %v4432_v43  ;;  %v4488_v43 = vcombine.high %v1552_v22, %v1556_v3 }
 0x405   : > { %3219 = vmatpush1.bf16.msra.mxu0 %v4429_v12 }
 0x406   : > { %3365 = vmatpush1.bf16.msra.mxu1 %v4431_v56  ;;  %3220 = vmatprep.subr.bf16.mxu0 %v4438_v50 }
 0x407   : > { %3366 = vmatprep.subr.bf16.mxu1 %v4440_v18 }
 0x409   : > { %3221 = vmatpush1.bf16.msra.mxu0 %v4437_v5 }
 0x40a   : > { %3367 = vmatpush1.bf16.msra.mxu1 %v4439_v7  ;;  %3222 = vmatprep.subr.bf16.mxu0 %v4446_v24 }
 0x40b   : > { %3368 = vmatprep.subr.bf16.mxu1 %v4448_v32 }
 0x40d   : > { %3223 = vmatpush1.bf16.msra.mxu0 %v4445_v40 }
 0x40e   : > { %3369 = vmatpush1.bf16.msra.mxu1 %v4447_v17  ;;  %3224 = vmatprep.subr.bf16.mxu0 %v4454_v41 }
 0x40f   : > { %3370 = vmatprep.subr.bf16.mxu1 %v4456_v60 }
 0x411   : > { %3225 = vmatpush1.bf16.msra.mxu0 %v4453_v45 }
 0x412   : > { %3371 = vmatpush1.bf16.msra.mxu1 %v4455_v44  ;;  %3226 = vmatprep.subr.bf16.mxu0 %v4462_v58 }
 0x413   : > { %3372 = vmatprep.subr.bf16.mxu1 %v4464_v37 }
 0x415   : > { %3227 = vmatpush1.bf16.msra.mxu0 %v4461_v46 }
 0x416   : > { %3373 = vmatpush1.bf16.msra.mxu1 %v4463_v47  ;;  %3228 = vmatprep.subr.bf16.mxu0 %v4470_v49 }
 0x417   : > { %3374 = vmatprep.subr.bf16.mxu1 %v4472_v2 }
 0x419   : > { %3229 = vmatpush1.bf16.msra.mxu0 %v4469_v55 }
 0x41a   : > { %3375 = vmatpush1.bf16.msra.mxu1 %v4471_v59  ;;  %3230 = vmatprep.subr.bf16.mxu0 %v4478_v0 }
 0x41b   : > { %3376 = vmatprep.subr.bf16.mxu1 %v4480_v61 }
 0x41d   : > { %3231 = vmatpush1.bf16.msra.mxu0 %v4477_v8 }
 0x41e   : > { %3377 = vmatpush1.bf16.msra.mxu1 %v4479_v25  ;;  %3232 = vmatprep.subr.bf16.mxu0 %v4486_v9 }
 0x41f   : > { %3378 = vmatprep.subr.bf16.mxu1 %v4488_v43 }
 0x421   : > { %3233 = vmatpush1.bf16.msra.mxu0 %v4485_v36 }
 0x422   : > { %3379 = vmatpush1.bf16.msra.mxu1 %v4487_v10  ;;  %v4748_v10 = vmov 1966171168  }
 0x424   : > { %3235 = vmatmul.mubr.bf16.vlgmr.msra.gmra.mrb[32].mxu0 %v5334_v4 }
 0x425   : > { %3381 = vmatmul.mubr.bf16.vlgmr.msra.gmra.mrb[32].mxu1 %v5334_v4  ;;  %3244 = vmatprep.mubr.bf16.mxu0 %v5340_v1 }
 0x426   : > { %3390 = vmatprep.mubr.bf16.mxu1 %v5340_v1 }
 0x42c   : > { %3245 = vmatmul.mubr.bf16.gmra.mrb[36].mxu0 %v5338_v39 }
 0x42d   : > { %3391 = vmatmul.mubr.bf16.gmra.mrb[36].mxu1 %v5338_v39  ;;  %3254 = vmatprep.mubr.bf16.mxu0 %v5344_v15 }
 0x42e   : > { %3400 = vmatprep.mubr.bf16.mxu1 %v5344_v15 }
 0x434   : > { %3255 = vmatmul.mubr.bf16.gmra.mrb[40].mxu0 %v5342_v14 }
 0x435   : > { %3401 = vmatmul.mubr.bf16.gmra.mrb[40].mxu1 %v5342_v14  ;;  %3264 = vmatprep.mubr.bf16.mxu0 %v5348_v23 }
 0x436   : > { %3410 = vmatprep.mubr.bf16.mxu1 %v5348_v23 }
 0x43c   : > { %3265 = vmatmul.mubr.bf16.gmra.mrb[44].mxu0 %v5346_v20 }
 0x43d   : > { %3411 = vmatmul.mubr.bf16.gmra.mrb[44].mxu1 %v5346_v20 }
 0x476   : > { %v2944_v4 = vpop.f32.mrb[16].mxu0  ;;  %v3090_v1 = vpop.f32.mrb[16].mxu1 }
 0x477   : > { %v3808_v39 = vmul.f32 %v2944_v4, %v2944_v4  ;;  %v3810_v15 = vmul.f32 %v3090_v1, %v3090_v1  ;;  %v2946_v14 = vpop.f32.mrb[17].mxu0  ;;  %v3092_v11 = vpop.f32.mrb[17].mxu1 }
 0x478   : > { %v4528_v6 = vpack.c.bf16 %v2946_v14, %v2944_v4  ;;  %v3809_v23 = vmul.f32 %v2946_v14, %v2946_v14  ;;  %v4529_v12 = vpack.c.bf16 %v3092_v11, %v3090_v1  ;;  %v3811_v56 = vmul.f32 %v3092_v11, %v3092_v11  ;;  %v2948_v50 = vpop.f32.mrb[18].mxu0  ;;  %v3094_v20 = vpop.f32.mrb[18].mxu1 }
 0x479   : > { %v3645_v18 = vadd.f32 %v2948_v50, %v2944_v4  ;;  %v3816_v21 = vmul.f32 %v2948_v50, %v2948_v50  ;;  %v3671_v26 = vadd.f32 %v3094_v20, %v3090_v1  ;;  %v3818_v30 = vmul.f32 %v3094_v20, %v3094_v20  ;;  %v2950_v52 = vpop.f32.mrb[19].mxu0  ;;  %v3096_v5 = vpop.f32.mrb[19].mxu1 }
 0x47a   : > { %3613 = vst [vmem:[%s5998_s14] sm:$0xff] %v4528_v6  ;;  %3614 = vst [vmem:[%s5998_s14 + $0x8] sm:$0xff] %v4529_v12  ;;  %v4532_v7 = vpack.c.bf16 %v2950_v52, %v2948_v50  ;;  %v3658_v24 = vadd.f32 %v2950_v52, %v2946_v14  ;;  %v3817_v32 = vmul.f32 %v2950_v52, %v2950_v52  ;;  %v6007_v4 = vunpack.c.l.s4 %v4748_v10 }
 0x47b   : > { %v4533_v19 = vpack.c.bf16 %v3096_v5, %v3094_v20  ;;  %v3872_v35 = vadd.f32 %v3816_v21, %v3808_v39  ;;  %v3898_v33 = vadd.f32 %v3818_v30, %v3810_v15  ;;  %v3684_v38 = vadd.f32 %v3096_v5, %v3092_v11 }
 0x47c   : > { %v3819_v40 = vmul.f32 %v3096_v5, %v3096_v5  ;;  %3617 = vst [vmem:[%s5998_s14 + $0x20] sm:$0xff] %v4532_v7  ;;  %v3885_v17 = vadd.f32 %v3817_v32, %v3809_v23 }
 0x47d   : > { %3618 = vst [vmem:[%s5998_s14 + $0x28] sm:$0xff] %v4533_v19 }
 0x47e   : > { %v3911_v41 = vadd.f32 %v3819_v40, %v3811_v56  ;;  %v2954_v60 = vpop.f32.mrb[20].mxu0  ;;  %v3100_v42 = vpop.f32.mrb[20].mxu1 }
 0x47f   : > { %v3646_v27 = vadd.f32 %v3645_v18, %v2954_v60  ;;  %v3824_v34 = vmul.f32 %v2954_v60, %v2954_v60  ;;  %v3672_v16 = vadd.f32 %v3671_v26, %v3100_v42  ;;  %v3826_v45 = vmul.f32 %v3100_v42, %v3100_v42  ;;  %v2956_v44 = vpop.f32.mrb[21].mxu0  ;;  %v3102_v58 = vpop.f32.mrb[21].mxu1 }
 0x480   : > { %v4536_v37 = vpack.c.bf16 %v2956_v44, %v2954_v60  ;;  %v3659_v28 = vadd.f32 %v3658_v24, %v2956_v44  ;;  %v3825_v29 = vmul.f32 %v2956_v44, %v2956_v44  ;;  %v4537_v31 = vpack.c.bf16 %v3102_v58, %v3100_v42  ;;  %v2958_v51 = vpop.f32.mrb[22].mxu0  ;;  %v3104_v46 = vpop.f32.mrb[22].mxu1 }
 0x481   : > { %v3873_v47 = vadd.f32 %v3872_v35, %v3824_v34  ;;  %v3899_v49 = vadd.f32 %v3898_v33, %v3826_v45  ;;  %v3685_v2 = vadd.f32 %v3684_v38, %v3102_v58  ;;  %v3827_v57 = vmul.f32 %v3102_v58, %v3102_v58  ;;  %v2960_v53 = vpop.f32.mrb[23].mxu0  ;;  %v3106_v54 = vpop.f32.mrb[23].mxu1 }
 0x482   : > { %3621 = vst [vmem:[%s5998_s14 + $0x40] sm:$0xff] %v4536_v37  ;;  %v3886_v48 = vadd.f32 %v3885_v17, %v3825_v29  ;;  %3622 = vst [vmem:[%s5998_s14 + $0x48] sm:$0xff] %v4537_v31  ;;  %v3647_v55 = vadd.f32 %v3646_v27, %v2958_v51  ;;  %v3832_v59 = vmul.f32 %v2958_v51, %v2958_v51 }
 0x483   : > { %v3673_v0 = vadd.f32 %v3672_v16, %v3104_v46  ;;  %v3912_v61 = vadd.f32 %v3911_v41, %v3827_v57  ;;  %v3834_v62 = vmul.f32 %v3104_v46, %v3104_v46  ;;  %v4540_v63 = vpack.c.bf16 %v2960_v53, %v2958_v51 }
 0x484   : > { %v3660_v22 = vadd.f32 %v3659_v28, %v2960_v53  ;;  %v3874_v3 = vadd.f32 %v3873_v47, %v3832_v59  ;;  %v3833_v8 = vmul.f32 %v2960_v53, %v2960_v53  ;;  %v4541_v25 = vpack.c.bf16 %v3106_v54, %v3104_v46 }
 0x485   : > { %v3686_v9 = vadd.f32 %v3685_v2, %v3106_v54  ;;  %v3900_v43 = vadd.f32 %v3899_v49, %v3834_v62  ;;  %3625 = vst [vmem:[%s5998_s14 + $0x60] sm:$0xff] %v4540_v63  ;;  %v3835_v36 = vmul.f32 %v3106_v54, %v3106_v54  ;;  %v3763_v28 = vunpack.c.0.s8 %v6007_v4 }
 0x486   : > { %v3887_v1 = vadd.f32 %v3886_v48, %v3833_v8  ;;  %3626 = vst [vmem:[%s5998_s14 + $0x68] sm:$0xff] %v4541_v25  ;;  %v2964_v39 = vpop.f32.mrb[24].mxu0  ;;  %v3110_v15 = vpop.f32.mrb[24].mxu1 }
 0x487   : > { %v3913_v14 = vadd.f32 %v3912_v61, %v3835_v36  ;;  %v3648_v11 = vadd.f32 %v3647_v55, %v2964_v39  ;;  %v3840_v6 = vmul.f32 %v2964_v39, %v2964_v39  ;;  %v3674_v23 = vadd.f32 %v3673_v0, %v3110_v15  ;;  %v2966_v12 = vpop.f32.mrb[25].mxu0  ;;  %v3112_v56 = vpop.f32.mrb[25].mxu1 }
 0x488   : > { %v3842_v50 = vmul.f32 %v3110_v15, %v3110_v15  ;;  %v4544_v20 = vpack.c.bf16 %v2966_v12, %v2964_v39  ;;  %v3661_v18 = vadd.f32 %v3660_v22, %v2966_v12  ;;  %v3841_v21 = vmul.f32 %v2966_v12, %v2966_v12  ;;  %v2968_v26 = vpop.f32.mrb[26].mxu0  ;;  %v3114_v30 = vpop.f32.mrb[26].mxu1 }
 0x489   : > { %v3875_v52 = vadd.f32 %v3874_v3, %v3840_v6  ;;  %v4545_v5 = vpack.c.bf16 %v3112_v56, %v3110_v15  ;;  %v3687_v7 = vadd.f32 %v3686_v9, %v3112_v56  ;;  %v3843_v24 = vmul.f32 %v3112_v56, %v3112_v56  ;;  %v2970_v32 = vpop.f32.mrb[27].mxu0  ;;  %v3116_v19 = vpop.f32.mrb[27].mxu1 }
 0x48a   : > { %v3901_v35 = vadd.f32 %v3900_v43, %v3842_v50  ;;  %3629 = vst [vmem:[%s5998_s14 + $0x80] sm:$0xff] %v4544_v20  ;;  %v3888_v33 = vadd.f32 %v3887_v1, %v3841_v21  ;;  %v3649_v38 = vadd.f32 %v3648_v11, %v2968_v26  ;;  %v3848_v40 = vmul.f32 %v2968_v26, %v2968_v26 }
 0x48b   : > { %3630 = vst [vmem:[%s5998_s14 + $0x88] sm:$0xff] %v4545_v5  ;;  %v3914_v17 = vadd.f32 %v3913_v14, %v3843_v24  ;;  %v3675_v41 = vadd.f32 %v3674_v23, %v3114_v30  ;;  %v3850_v60 = vmul.f32 %v3114_v30, %v3114_v30  ;;  %v4548_v42 = vpack.c.bf16 %v2970_v32, %v2968_v26 }
 0x48c   : > { %v3876_v27 = vadd.f32 %v3875_v52, %v3848_v40  ;;  %v3662_v34 = vadd.f32 %v3661_v18, %v2970_v32  ;;  %v3849_v16 = vmul.f32 %v2970_v32, %v2970_v32  ;;  %v4549_v45 = vpack.c.bf16 %v3116_v19, %v3114_v30 }
 0x48d   : > { %v3902_v44 = vadd.f32 %v3901_v35, %v3850_v60  ;;  %3633 = vst [vmem:[%s5998_s14 + $0xa0] sm:$0xff] %v4548_v42  ;;  %v3688_v58 = vadd.f32 %v3687_v7, %v3116_v19  ;;  %v3851_v37 = vmul.f32 %v3116_v19, %v3116_v19 }
 0x48e   : > { %v3889_v29 = vadd.f32 %v3888_v33, %v3849_v16  ;;  %3634 = vst [vmem:[%s5998_s14 + $0xa8] sm:$0xff] %v4549_v45  ;;  %v2974_v31 = vpop.f32.mrb[28].mxu0  ;;  %v3120_v51 = vpop.f32.mrb[28].mxu1 }
 0x48f   : > { %v3915_v46 = vadd.f32 %v3914_v17, %v3851_v37  ;;  %v3650_v47 = vadd.f32 %v3649_v38, %v2974_v31  ;;  %v3856_v49 = vmul.f32 %v2974_v31, %v2974_v31  ;;  %v3676_v2 = vadd.f32 %v3675_v41, %v3120_v51  ;;  %v2976_v57 = vpop.f32.mrb[29].mxu0  ;;  %v3122_v53 = vpop.f32.mrb[29].mxu1 }
 0x490   : > { %v3858_v54 = vmul.f32 %v3120_v51, %v3120_v51  ;;  %v4552_v48 = vpack.c.bf16 %v2976_v57, %v2974_v31  ;;  %v3663_v55 = vadd.f32 %v3662_v34, %v2976_v57  ;;  %v3857_v59 = vmul.f32 %v2976_v57, %v2976_v57  ;;  %v2978_v0 = vpop.f32.mrb[30].mxu0  ;;  %v3124_v61 = vpop.f32.mrb[30].mxu1 }
 0x491   : > { %v3877_v62 = vadd.f32 %v3876_v27, %v3856_v49  ;;  %v4553_v63 = vpack.c.bf16 %v3122_v53, %v3120_v51  ;;  %v3689_v22 = vadd.f32 %v3688_v58, %v3122_v53  ;;  %v3859_v3 = vmul.f32 %v3122_v53, %v3122_v53  ;;  %v2980_v8 = vpop.f32.mrb[31].mxu0  ;;  %v3126_v25 = vpop.f32.mrb[31].mxu1 }
 0x492   : > { %v3903_v9 = vadd.f32 %v3902_v44, %v3858_v54  ;;  %3637 = vst [vmem:[%s5998_s14 + $0xc0] sm:$0xff] %v4552_v48  ;;  %v3890_v43 = vadd.f32 %v3889_v29, %v3857_v59  ;;  %v3651_v36 = vadd.f32 %v3650_v47, %v2978_v0  ;;  %v3864_v10 = vmul.f32 %v2978_v0, %v2978_v0 }
 0x493   : > { %3638 = vst [vmem:[%s5998_s14 + $0xc8] sm:$0xff] %v4553_v63  ;;  %v3916_v1 = vadd.f32 %v3915_v46, %v3859_v3  ;;  %v3677_v39 = vadd.f32 %v3676_v2, %v3124_v61  ;;  %v3866_v15 = vmul.f32 %v3124_v61, %v3124_v61  ;;  %v4556_v14 = vpack.c.bf16 %v2980_v8, %v2978_v0 }
 0x494   : > { %v3652_v11 = vrot.slane %v3651_v36, 4  ;;  %v3878_v6 = vadd.f32 %v3877_v62, %v3864_v10  ;;  %v3664_v23 = vadd.f32 %v3663_v55, %v2980_v8  ;;  %v3865_v12 = vmul.f32 %v2980_v8, %v2980_v8 }
 0x495   : > { %v3678_v56 = vrot.slane %v3677_v39, 4  ;;  %v3904_v50 = vadd.f32 %v3903_v9, %v3866_v15  ;;  %3641 = vst [vmem:[%s5998_s14 + $0xe0] sm:$0xff] %v4556_v14  ;;  %v4557_v20 = vpack.c.bf16 %v3126_v25, %v3124_v61  ;;  %v3690_v18 = vadd.f32 %v3689_v22, %v3126_v25 }
 0x496   : > { %v3653_v21 = vadd.f32 %v3652_v11, %v3651_v36  ;;  %v3879_v26 = vrot.slane %v3878_v6, 4  ;;  %v3665_v30 = vrot.slane %v3664_v23, 4  ;;  %v3891_v52 = vadd.f32 %v3890_v43, %v3865_v12 }
 0x497   : > { %v3679_v5 = vadd.f32 %v3678_v56, %v3677_v39  ;;  %v3905_v7 = vrot.slane %v3904_v50, 4  ;;  %3642 = vst [vmem:[%s5998_s14 + $0xe8] sm:$0xff] %v4557_v20  ;;  %v3691_v24 = vrot.slane %v3690_v18, 4  ;;  %v3867_v32 = vmul.f32 %v3126_v25, %v3126_v25 }
 0x498   : > { %v3654_v19 = vrot.slane %v3653_v21, 2  ;;  %v3880_v35 = vadd.f32 %v3879_v26, %v3878_v6  ;;  %v3666_v33 = vadd.f32 %v3665_v30, %v3664_v23  ;;  %v3892_v38 = vrot.slane %v3891_v52, 4 }
 0x499   : > { %v3680_v40 = vrot.slane %v3679_v5, 2  ;;  %v3906_v17 = vadd.f32 %v3905_v7, %v3904_v50  ;;  %v3692_v41 = vadd.f32 %v3691_v24, %v3690_v18  ;;  %v3917_v60 = vadd.f32 %v3916_v1, %v3867_v32 }
 0x49a   : > { %v3655_v42 = vadd.f32 %v3654_v19, %v3653_v21  ;;  %v3881_v27 = vrot.slane %v3880_v35, 2  ;;  %v3667_v34 = vrot.slane %v3666_v33, 2  ;;  %v3893_v16 = vadd.f32 %v3892_v38, %v3891_v52 }
 0x49b   : > { %v3681_v45 = vadd.f32 %v3680_v40, %v3679_v5  ;;  %v3907_v44 = vrot.slane %v3906_v17, 2  ;;  %v3693_v58 = vrot.slane %v3692_v41, 2  ;;  %v3918_v37 = vrot.slane %v3917_v60, 4 }
 0x49c   : > { %v3656_v29 = vrot.slane %v3655_v42, 1  ;;  %v3882_v31 = vadd.f32 %v3881_v27, %v3880_v35  ;;  %v3668_v51 = vadd.f32 %v3667_v34, %v3666_v33  ;;  %v3894_v46 = vrot.slane %v3893_v16, 2 }
 0x49d   : > { %v3682_v47 = vrot.slane %v3681_v45, 1  ;;  %v3908_v49 = vadd.f32 %v3907_v44, %v3906_v17  ;;  %v3694_v2 = vadd.f32 %v3693_v58, %v3692_v41  ;;  %v3919_v57 = vadd.f32 %v3918_v37, %v3917_v60 }
 0x49e   : > { %v3657_v53 = vadd.f32 %v3656_v29, %v3655_v42  ;;  %v3883_v54 = vrot.slane %v3882_v31, 1  ;;  %v3669_v48 = vrot.slane %v3668_v51, 1  ;;  %v3895_v55 = vadd.f32 %v3894_v46, %v3893_v16 }
 0x49f   : > { %v3683_v59 = vadd.f32 %v3682_v47, %v3681_v45  ;;  %v3909_v0 = vrot.slane %v3908_v49, 1  ;;  %v3695_v61 = vrot.slane %v3694_v2, 1  ;;  %v3920_v62 = vrot.slane %v3919_v57, 2 }
 0x4a0   : > { %v6022_v63 = vsub.s32 %v3763_v28, %v4840_v13  ;;  %v3884_v22 = vadd.f32 %v3883_v54, %v3882_v31  ;;  %v3670_v3 = vadd.f32 %v3669_v48, %v3668_v51  ;;  %v3896_v8 = vrot.slane %v3895_v55, 1 }
 0x4a1   : > { %v3696_v25 = vadd.f32 %v3695_v61, %v3694_v2  ;;  %v3921_v9 = vadd.f32 %v3920_v62, %v3919_v57  ;;  %v3910_v10 = vadd.f32 %v3909_v0, %v3908_v49 }
 0x4a2   : > { %v3757_v43 = vcombine.low %v3657_v53, %v3670_v3  ;;  %v3897_v36 = vadd.f32 %v3896_v8, %v3895_v55 }
 0x4a3   : > { %v3758_v1 = vcombine.low %v3683_v59, %v3696_v25  ;;  %v3922_v39 = vrot.slane %v3921_v9, 1 }
 0x4a4   : > { %v3767_v15 = vrot.slane %v3757_v43, %v6022_v63  ;;  %v3984_v14 = vcombine.low %v3884_v22, %v3897_v36 }
 0x4a5   : > { %v3774_v11 = vrot.slane %v3758_v1, %v6022_v63  ;;  %v3923_v6 = vadd.f32 %v3922_v39, %v3921_v9 }
 0x4a6   : > { %v3994_v4 = vrot.slane %v3984_v14, %v6022_v63 }
 0x4a7   : > { %v3789_v13 = vcombine.low %v3767_v15, %v3774_v11  ;;  %v3985_v28 = vcombine.low %v3910_v10, %v3923_v6 }
 0x4a9   : > { %v6028_v23 = vrot.slane %v3789_v13, %v6022_v63  ;;  %v4001_v12 = vrot.slane %v3985_v28, %v6022_v63 }
 0x4ab   : > { %v4016_v56 = vcombine.low %v3994_v4, %v4001_v12 }
 0x4ad   : > { %v6032_v50 = vrot.slane %v4016_v56, %v6022_v63 }
 0x4f7   : > { %v3236_v20 = vpop.f32.mrb[32].mxu0 }
 0x4f8   : > { %v3382_v18 = vpop.f32.mrb[32].mxu1  ;;  %v3238_v21 = vpop.f32.mrb[33].mxu0  ;;  %v3812_v26 = vmul.f32 %v3236_v20, %v3236_v20 }
 0x4f9   : > { %v3814_v30 = vmul.f32 %v3382_v18, %v3382_v18  ;;  %v4530_v52 = vpack.c.bf16 %v3238_v21, %v3236_v20  ;;  %v3384_v5 = vpop.f32.mrb[33].mxu1  ;;  %v3240_v7 = vpop.f32.mrb[34].mxu0  ;;  %v3813_v24 = vmul.f32 %v3238_v21, %v3238_v21 }
 0x4fa   : > { %v4531_v32 = vpack.c.bf16 %v3384_v5, %v3382_v18  ;;  %v3697_v19 = vadd.f32 %v3240_v7, %v3236_v20  ;;  %v3820_v35 = vmul.f32 %v3240_v7, %v3240_v7  ;;  %v3386_v33 = vpop.f32.mrb[34].mxu1  ;;  %v3242_v38 = vpop.f32.mrb[35].mxu0  ;;  %v3815_v44 = vmul.f32 %v3384_v5, %v3384_v5 }
 0x4fb   : > { %3615 = vst [vmem:[%s5998_s14 + $0x10] sm:$0xff] %v4530_v52  ;;  %v3723_v40 = vadd.f32 %v3386_v33, %v3382_v18  ;;  %v3822_v17 = vmul.f32 %v3386_v33, %v3386_v33  ;;  %v4534_v41 = vpack.c.bf16 %v3242_v38, %v3240_v7  ;;  %v3710_v60 = vadd.f32 %v3242_v38, %v3238_v21  ;;  %v3388_v42 = vpop.f32.mrb[35].mxu1 }
 0x4fc   : > { %3616 = vst [vmem:[%s5998_s14 + $0x18] sm:$0xff] %v4531_v32  ;;  %v3924_v27 = vadd.f32 %v3820_v35, %v3812_v26  ;;  %v3821_v34 = vmul.f32 %v3242_v38, %v3242_v38  ;;  %v4535_v16 = vpack.c.bf16 %v3388_v42, %v3386_v33  ;;  %v3736_v45 = vadd.f32 %v3388_v42, %v3384_v5 }
 0x4fd   : > { %v3950_v58 = vadd.f32 %v3822_v17, %v3814_v30  ;;  %3619 = vst [vmem:[%s5998_s14 + $0x30] sm:$0xff] %v4534_v41  ;;  %v3823_v37 = vmul.f32 %v3388_v42, %v3388_v42 }
 0x4fe   : > { %v3937_v29 = vadd.f32 %v3821_v34, %v3813_v24  ;;  %3620 = vst [vmem:[%s5998_s14 + $0x38] sm:$0xff] %v4535_v16 }
 0x4ff   : > { %v3963_v31 = vadd.f32 %v3823_v37, %v3815_v44  ;;  %v3246_v51 = vpop.f32.mrb[36].mxu0 }
 0x500   : > { %v3698_v46 = vadd.f32 %v3697_v19, %v3246_v51  ;;  %v3828_v47 = vmul.f32 %v3246_v51, %v3246_v51  ;;  %v3392_v49 = vpop.f32.mrb[36].mxu1  ;;  %v3248_v2 = vpop.f32.mrb[37].mxu0 }
 0x501   : > { %v3724_v57 = vadd.f32 %v3723_v40, %v3392_v49  ;;  %v3830_v53 = vmul.f32 %v3392_v49, %v3392_v49  ;;  %v4538_v54 = vpack.c.bf16 %v3248_v2, %v3246_v51  ;;  %v3711_v48 = vadd.f32 %v3710_v60, %v3248_v2  ;;  %v3394_v55 = vpop.f32.mrb[37].mxu1  ;;  %v3250_v59 = vpop.f32.mrb[38].mxu0 }
 0x502   : > { %v3925_v0 = vadd.f32 %v3924_v27, %v3828_v47  ;;  %v3829_v61 = vmul.f32 %v3248_v2, %v3248_v2  ;;  %v4539_v62 = vpack.c.bf16 %v3394_v55, %v3392_v49  ;;  %v3737_v22 = vadd.f32 %v3736_v45, %v3394_v55  ;;  %v3396_v3 = vpop.f32.mrb[38].mxu1  ;;  %v3252_v8 = vpop.f32.mrb[39].mxu0 }
 0x503   : > { %v3951_v25 = vadd.f32 %v3950_v58, %v3830_v53  ;;  %3623 = vst [vmem:[%s5998_s14 + $0x50] sm:$0xff] %v4538_v54  ;;  %v3831_v9 = vmul.f32 %v3394_v55, %v3394_v55  ;;  %v3699_v43 = vadd.f32 %v3698_v46, %v3250_v59  ;;  %v3836_v36 = vmul.f32 %v3250_v59, %v3250_v59  ;;  %v3398_v10 = vpop.f32.mrb[39].mxu1 }
 0x504   : > { %v3938_v1 = vadd.f32 %v3937_v29, %v3829_v61  ;;  %3624 = vst [vmem:[%s5998_s14 + $0x58] sm:$0xff] %v4539_v62  ;;  %v3725_v39 = vadd.f32 %v3724_v57, %v3396_v3  ;;  %v3838_v15 = vmul.f32 %v3396_v3, %v3396_v3  ;;  %v4542_v14 = vpack.c.bf16 %v3252_v8, %v3250_v59 }
 0x505   : > { %v3964_v11 = vadd.f32 %v3963_v31, %v3831_v9  ;;  %v3926_v6 = vadd.f32 %v3925_v0, %v3836_v36  ;;  %v3712_v4 = vadd.f32 %v3711_v48, %v3252_v8  ;;  %v3837_v13 = vmul.f32 %v3252_v8, %v3252_v8 }
 0x506   : > { %v3952_v28 = vadd.f32 %v3951_v25, %v3838_v15  ;;  %3627 = vst [vmem:[%s5998_s14 + $0x70] sm:$0xff] %v4542_v14  ;;  %v4543_v12 = vpack.c.bf16 %v3398_v10, %v3396_v3  ;;  %v3738_v56 = vadd.f32 %v3737_v22, %v3398_v10  ;;  %v3839_v20 = vmul.f32 %v3398_v10, %v3398_v10 }
 0x507   : > { %v3939_v18 = vadd.f32 %v3938_v1, %v3837_v13  ;;  %v3256_v21 = vpop.f32.mrb[40].mxu0 }
 0x508   : > { %3628 = vst [vmem:[%s5998_s14 + $0x78] sm:$0xff] %v4543_v12  ;;  %v3965_v26 = vadd.f32 %v3964_v11, %v3839_v20  ;;  %v3700_v30 = vadd.f32 %v3699_v43, %v3256_v21  ;;  %v3844_v52 = vmul.f32 %v3256_v21, %v3256_v21  ;;  %v3402_v5 = vpop.f32.mrb[40].mxu1  ;;  %v3258_v7 = vpop.f32.mrb[41].mxu0 }
 0x509   : > { %v3726_v24 = vadd.f32 %v3725_v39, %v3402_v5  ;;  %v3846_v32 = vmul.f32 %v3402_v5, %v3402_v5  ;;  %v4546_v19 = vpack.c.bf16 %v3258_v7, %v3256_v21  ;;  %v3713_v35 = vadd.f32 %v3712_v4, %v3258_v7  ;;  %v3404_v33 = vpop.f32.mrb[41].mxu1  ;;  %v3260_v38 = vpop.f32.mrb[42].mxu0 }
 0x50a   : > { %v3927_v40 = vadd.f32 %v3926_v6, %v3844_v52  ;;  %v3845_v17 = vmul.f32 %v3258_v7, %v3258_v7  ;;  %v4547_v41 = vpack.c.bf16 %v3404_v33, %v3402_v5  ;;  %v3739_v60 = vadd.f32 %v3738_v56, %v3404_v33  ;;  %v3406_v42 = vpop.f32.mrb[42].mxu1  ;;  %v3262_v27 = vpop.f32.mrb[43].mxu0 }
 0x50b   : > { %v3953_v34 = vadd.f32 %v3952_v28, %v3846_v32  ;;  %3631 = vst [vmem:[%s5998_s14 + $0x90] sm:$0xff] %v4546_v19  ;;  %v3847_v16 = vmul.f32 %v3404_v33, %v3404_v33  ;;  %v3701_v45 = vadd.f32 %v3700_v30, %v3260_v38  ;;  %v3852_v44 = vmul.f32 %v3260_v38, %v3260_v38  ;;  %v3408_v58 = vpop.f32.mrb[43].mxu1 }
 0x50c   : > { %v3940_v37 = vadd.f32 %v3939_v18, %v3845_v17  ;;  %3632 = vst [vmem:[%s5998_s14 + $0x98] sm:$0xff] %v4547_v41  ;;  %v3727_v29 = vadd.f32 %v3726_v24, %v3406_v42  ;;  %v3854_v31 = vmul.f32 %v3406_v42, %v3406_v42  ;;  %v4550_v51 = vpack.c.bf16 %v3262_v27, %v3260_v38 }
 0x50d   : > { %v3966_v46 = vadd.f32 %v3965_v26, %v3847_v16  ;;  %v3928_v47 = vadd.f32 %v3927_v40, %v3852_v44  ;;  %v3714_v49 = vadd.f32 %v3713_v35, %v3262_v27  ;;  %v3853_v2 = vmul.f32 %v3262_v27, %v3262_v27 }
 0x50e   : > { %v3954_v57 = vadd.f32 %v3953_v34, %v3854_v31  ;;  %3635 = vst [vmem:[%s5998_s14 + $0xb0] sm:$0xff] %v4550_v51  ;;  %v4551_v53 = vpack.c.bf16 %v3408_v58, %v3406_v42  ;;  %v3740_v54 = vadd.f32 %v3739_v60, %v3408_v58  ;;  %v3855_v48 = vmul.f32 %v3408_v58, %v3408_v58 }
 0x50f   : > { %v3941_v55 = vadd.f32 %v3940_v37, %v3853_v2  ;;  %v3266_v59 = vpop.f32.mrb[44].mxu0 }
 0x510   : > { %3636 = vst [vmem:[%s5998_s14 + $0xb8] sm:$0xff] %v4551_v53  ;;  %v3967_v0 = vadd.f32 %v3966_v46, %v3855_v48  ;;  %v3702_v61 = vadd.f32 %v3701_v45, %v3266_v59  ;;  %v3860_v62 = vmul.f32 %v3266_v59, %v3266_v59  ;;  %v3412_v22 = vpop.f32.mrb[44].mxu1  ;;  %v3268_v3 = vpop.f32.mrb[45].mxu0 }
 0x511   : > { %v3728_v8 = vadd.f32 %v3727_v29, %v3412_v22  ;;  %v3862_v25 = vmul.f32 %v3412_v22, %v3412_v22  ;;  %v4554_v9 = vpack.c.bf16 %v3268_v3, %v3266_v59  ;;  %v3715_v43 = vadd.f32 %v3714_v49, %v3268_v3  ;;  %v3414_v36 = vpop.f32.mrb[45].mxu1  ;;  %v3270_v10 = vpop.f32.mrb[46].mxu0 }
 0x512   : > { %v3929_v1 = vadd.f32 %v3928_v47, %v3860_v62  ;;  %v3861_v39 = vmul.f32 %v3268_v3, %v3268_v3  ;;  %v4555_v15 = vpack.c.bf16 %v3414_v36, %v3412_v22  ;;  %v3741_v14 = vadd.f32 %v3740_v54, %v3414_v36  ;;  %v3416_v11 = vpop.f32.mrb[46].mxu1  ;;  %v3272_v6 = vpop.f32.mrb[47].mxu0 }
 0x513   : > { %v3955_v4 = vadd.f32 %v3954_v57, %v3862_v25  ;;  %3639 = vst [vmem:[%s5998_s14 + $0xd0] sm:$0xff] %v4554_v9  ;;  %v3863_v13 = vmul.f32 %v3414_v36, %v3414_v36  ;;  %v3703_v28 = vadd.f32 %v3702_v61, %v3270_v10  ;;  %v3868_v12 = vmul.f32 %v3270_v10, %v3270_v10  ;;  %v3418_v56 = vpop.f32.mrb[47].mxu1 }
 0x514   : > { %v3942_v20 = vadd.f32 %v3941_v55, %v3861_v39  ;;  %3640 = vst [vmem:[%s5998_s14 + $0xd8] sm:$0xff] %v4555_v15  ;;  %v3729_v18 = vadd.f32 %v3728_v8, %v3416_v11  ;;  %v3870_v21 = vmul.f32 %v3416_v11, %v3416_v11  ;;  %v4558_v26 = vpack.c.bf16 %v3272_v6, %v3270_v10 }
 0x515   : > { %v3968_v30 = vadd.f32 %v3967_v0, %v3863_v13  ;;  %v3704_v52 = vrot.slane %v3703_v28, 4  ;;  %v3930_v5 = vadd.f32 %v3929_v1, %v3868_v12  ;;  %v3716_v7 = vadd.f32 %v3715_v43, %v3272_v6 }
 0x516   : > { %v3730_v24 = vrot.slane %v3729_v18, 4  ;;  %v3956_v32 = vadd.f32 %v3955_v4, %v3870_v21  ;;  %3643 = vst [vmem:[%s5998_s14 + $0xf0] sm:$0xff] %v4558_v26  ;;  %v3869_v19 = vmul.f32 %v3272_v6, %v3272_v6  ;;  %v4559_v35 = vpack.c.bf16 %v3418_v56, %v3416_v11 }
 0x517   : > { %v3705_v33 = vadd.f32 %v3704_v52, %v3703_v28  ;;  %v3931_v38 = vrot.slane %v3930_v5, 4  ;;  %v3717_v40 = vrot.slane %v3716_v7, 4  ;;  %v3742_v17 = vadd.f32 %v3741_v14, %v3418_v56 }
 0x518   : > { %v3731_v41 = vadd.f32 %v3730_v24, %v3729_v18  ;;  %v3957_v60 = vrot.slane %v3956_v32, 4  ;;  %v3943_v42 = vadd.f32 %v3942_v20, %v3869_v19  ;;  %3644 = vst [vmem:[%s5998_s14 + $0xf8] sm:$0xff] %v4559_v35  ;;  %v3871_v27 = vmul.f32 %v3418_v56, %v3418_v56 }
 0x519   : > { %v3706_v34 = vrot.slane %v3705_v33, 2  ;;  %v3932_v16 = vadd.f32 %v3931_v38, %v3930_v5  ;;  %v3718_v45 = vadd.f32 %v3717_v40, %v3716_v7  ;;  %v3743_v44 = vrot.slane %v3742_v17, 4 }
 0x51a   : > { %v3732_v58 = vrot.slane %v3731_v41, 2  ;;  %v3958_v37 = vadd.f32 %v3957_v60, %v3956_v32  ;;  %v3944_v29 = vrot.slane %v3943_v42, 4  ;;  %v3969_v31 = vadd.f32 %v3968_v30, %v3871_v27 }
 0x51b   : > { %v3707_v51 = vadd.f32 %v3706_v34, %v3705_v33  ;;  %v3933_v46 = vrot.slane %v3932_v16, 2  ;;  %v3719_v47 = vrot.slane %v3718_v45, 2  ;;  %v3744_v49 = vadd.f32 %v3743_v44, %v3742_v17 }
 0x51c   : > { %v3733_v2 = vadd.f32 %v3732_v58, %v3731_v41  ;;  %v3959_v57 = vrot.slane %v3958_v37, 2  ;;  %v3945_v53 = vadd.f32 %v3944_v29, %v3943_v42  ;;  %v3970_v54 = vrot.slane %v3969_v31, 4 }
 0x51d   : > { %v3708_v48 = vrot.slane %v3707_v51, 1  ;;  %v3934_v55 = vadd.f32 %v3933_v46, %v3932_v16  ;;  %v3720_v59 = vadd.f32 %v3719_v47, %v3718_v45  ;;  %v3745_v0 = vrot.slane %v3744_v49, 2 }
 0x51e   : > { %v3734_v61 = vrot.slane %v3733_v2, 1  ;;  %v3960_v62 = vadd.f32 %v3959_v57, %v3958_v37  ;;  %v3946_v22 = vrot.slane %v3945_v53, 2  ;;  %v3971_v3 = vadd.f32 %v3970_v54, %v3969_v31 }
 0x51f   : > { %v3709_v8 = vadd.f32 %v3708_v48, %v3707_v51  ;;  %v3935_v25 = vrot.slane %v3934_v55, 1  ;;  %v3721_v9 = vrot.slane %v3720_v59, 1  ;;  %v3746_v43 = vadd.f32 %v3745_v0, %v3744_v49 }
 0x520   : > { %v3961_v36 = vrot.slane %v3960_v62, 1  ;;  %v3947_v10 = vadd.f32 %v3946_v22, %v3945_v53  ;;  %v3972_v1 = vrot.slane %v3971_v3, 2  ;;  %v3735_v39 = vadd.f32 %v3734_v61, %v3733_v2 }
 0x521   : > { %v3722_v15 = vadd.f32 %v3721_v9, %v3720_v59  ;;  %v3747_v14 = vrot.slane %v3746_v43, 1  ;;  %v3936_v11 = vadd.f32 %v3935_v25, %v3934_v55 }
 0x522   : > { %v3948_v6 = vrot.slane %v3947_v10, 1  ;;  %v3973_v4 = vadd.f32 %v3972_v1, %v3971_v3  ;;  %v3962_v12 = vadd.f32 %v3961_v36, %v3960_v62 }
 0x523   : > { %v3759_v13 = vcombine.low %v3709_v8, %v3722_v15  ;;  %v3748_v28 = vadd.f32 %v3747_v14, %v3746_v43 }
 0x524   : > { %v3949_v56 = vadd.f32 %v3948_v6, %v3947_v10  ;;  %v3974_v20 = vrot.slane %v3973_v4, 1 }
 0x525   : > { %v3781_v18 = vrot.slane %v3759_v13, %v6022_v63  ;;  %v3760_v21 = vcombine.low %v3735_v39, %v3748_v28 }
 0x526   : > { %v3986_v26 = vcombine.low %v3936_v11, %v3949_v56  ;;  %v3975_v30 = vadd.f32 %v3974_v20, %v3973_v4 }
 0x527   : > { %v3788_v52 = vrot.slane %v3760_v21, %v6022_v63 }
 0x528   : > { %v4008_v5 = vrot.slane %v3986_v26, %v6022_v63  ;;  %v3987_v7 = vcombine.low %v3962_v12, %v3975_v30 }
 0x529   : > { %v3790_v24 = vcombine.low %v3781_v18, %v3788_v52 }
 0x52a   : > { %v4015_v32 = vrot.slane %v3987_v7, %v6022_v63 }
 0x52b   : > { %v3804_v19 = vrot.slane %v3790_v24, %v6022_v63 }
 0x52c   : > { %v4017_v35 = vcombine.low %v4008_v5, %v4015_v32 }
 0x52d   : > { %v3805_v33 = vcombine.low %v6028_v23, %v3804_v19 }
 0x52e   : > { %v4031_v38 = vrot.slane %v4017_v35, %v6022_v63 }
 0x52f   : > { %3807 = vst [vmem:[%s557_s30] ss:$2 sm:$0xff] %v3805_v33 }
 0x530   : > { %v4032_v40 = vcombine.low %v6032_v50, %v4031_v38 }
 0x532   : > { %4521 = vst [vmem:[%s557_s30 + $0x1] ss:$2 sm:$0xff] %v4032_v40 }
 0x533 PF: > { %s23_s23 = sadd.s32 1, %s4743_s23   ;;  %s6084_s21 = smov %s4739_s22 }
 0x534   : > { %p20_p6 = scmp.ge.s32.totalorder %s23_s23, 4   ;;  %s6085_s22 = smov %s6087_s24 }
 0x536   :  { %22 = sbr.rel (!%p20_p6) target bundleno = 2 (0x2), region = 119 }

// kernel: gcn_r_forward.13
= control target key start
LH: loop header
LB: loop body
LE: loop exit
PB: predicated region body
PF: predicated region fallthrough
CT: control target
= control target key end

     0   :  { %v3779_v36 = vmov 1983009808   ;;  %v45_v38 = vlaneseq  ;;  %s4982_s0 = inlined_call_operand.vmem [shape: f32[2,1024], index: 0, kind: input, shape index: {}]   ;;  %s4983_s1 = inlined_call_operand.vmem [shape: bf16[1024,512], index: 1, kind: input, shape index: {}]   ;;  %s4984_s2 = inlined_call_operand.vmem [shape: f32[1,512], index: 2, kind: input, shape index: {}]   ;;  %s4985_s3 = inlined_call_operand.vmem [shape: f32[1,512], index: 3, kind: input, shape index: {}]   ;;  %s4986_s4 = inlined_call_operand.vmem [shape: bf16[512,256], index: 4, kind: input, shape index: {}]   ;;  %s4987_s5 = inlined_call_operand.vmem [shape: f32[1,256], index: 5, kind: input, shape index: {}]   ;;  %s4988_s6 = inlined_call_operand.vmem [shape: f32[1,256], index: 6, kind: input, shape index: {}]   ;;  %s4989_s7 = inlined_call_operand.vmem [shape: f32[1,256], index: 7, kind: input, shape index: {}]   ;;  %s4990_s8 = inlined_call_operand.vmem [shape: bf16[256,40], index: 8, kind: input, shape index: {}]   ;;  %s4991_s9 = inlined_call_operand.vmem [shape: f32[1,40], index: 9, kind: input, shape index: {}]   ;;  %s4992_s10 = inlined_call_operand.hbm [shape: f32[2,40], index: 10, kind: output, shape index: {}]  }
   0x1   :  { %v3245_v0 = vld [vmem:[%s4983_s1 + $0x4] ss:$16 sps:$4 sm:$0xff]   ;;  %v3249_v2 = vld [vmem:[%s4983_s1] ss:$16 sps:$4 sm:$0xff]   ;;  %v43_v37 = vunpack.c.l.s4 %v3779_v36 }
   0x2   :  { %v3247_v1 = vld [vmem:[%s4983_s1 + $0x204] ss:$16 sps:$4 sm:$0xff]   ;;  %1627 = vmatprep.subr.bf16.mxu1 %v3245_v0  ;;  %v3250_v3 = vld [vmem:[%s4983_s1 + $0x200] ss:$16 sps:$4 sm:$0xff]   ;;  %v3953_v43 = vshrl.u32 %v45_v38, 7 }
   0x3   :  { %1668 = vmatprep.subr.bf16.mxu0 %v3247_v1  ;;  %v3251_v4 = vld [vmem:[%s4983_s1 + $0x24] ss:$16 sps:$4 sm:$0xff]   ;;  %1628 = vmatpush1.bf16.msra.mxu1 %v3249_v2  ;;  %v3255_v6 = vld [vmem:[%s4983_s1 + $0x20] ss:$16 sps:$4 sm:$0xff]   ;;  %v44_v42 = vunpack.c.0.s8 %v43_v37  ;;  %v3377_v37 = vld [vmem:[%s4983_s1 + $0xac] ss:$16 sps:$4 sm:$0xff]  }
   0x4   :  { %1669 = vmatpush1.bf16.msra.mxu0 %v3250_v3  ;;  %v3253_v5 = vld [vmem:[%s4983_s1 + $0x224] ss:$16 sps:$4 sm:$0xff]   ;;  %1629 = vmatprep.subr.bf16.mxu1 %v3251_v4  ;;  %v3256_v7 = vld [vmem:[%s4983_s1 + $0x220] ss:$16 sps:$4 sm:$0xff]  }
   0x5   :  { %1670 = vmatprep.subr.bf16.mxu0 %v3253_v5  ;;  %v3257_v8 = vld [vmem:[%s4983_s1 + $0x44] ss:$16 sps:$4 sm:$0xff]   ;;  %v3261_v10 = vld [vmem:[%s4983_s1 + $0x40] ss:$16 sps:$4 sm:$0xff]   ;;  %v3971_v49 = vsub.s32 %v44_v42, %v3953_v43  ;;  %v4128_v42 = vld [vmem:[%s4982_s0 + $0x8] sm:$0xff] }
   0x6   :  { %v3259_v9 = vld [vmem:[%s4983_s1 + $0x244] ss:$16 sps:$4 sm:$0xff]   ;;  %v3262_v11 = vld [vmem:[%s4983_s1 + $0x240] ss:$16 sps:$4 sm:$0xff]  }
   0x7   :  { %1630 = vmatpush1.bf16.msra.mxu1 %v3255_v6  ;;  %v3263_v12 = vld [vmem:[%s4983_s1 + $0x64] ss:$16 sps:$4 sm:$0xff]   ;;  %v3267_v14 = vld [vmem:[%s4983_s1 + $0x60] ss:$16 sps:$4 sm:$0xff]  }
   0x8   :  { %1671 = vmatpush1.bf16.msra.mxu0 %v3256_v7  ;;  %1631 = vmatprep.subr.bf16.mxu1 %v3257_v8  ;;  %v3265_v13 = vld [vmem:[%s4983_s1 + $0x264] ss:$16 sps:$4 sm:$0xff]   ;;  %v3268_v15 = vld [vmem:[%s4983_s1 + $0x260] ss:$16 sps:$4 sm:$0xff]  }
   0x9   :  { %1672 = vmatprep.subr.bf16.mxu0 %v3259_v9  ;;  %v3269_v16 = vld [vmem:[%s4983_s1 + $0x84] ss:$16 sps:$4 sm:$0xff]   ;;  %v3273_v18 = vld [vmem:[%s4983_s1 + $0x80] ss:$16 sps:$4 sm:$0xff]  }
   0xa   :  { %v3271_v17 = vld [vmem:[%s4983_s1 + $0x284] ss:$16 sps:$4 sm:$0xff]   ;;  %v3274_v19 = vld [vmem:[%s4983_s1 + $0x280] ss:$16 sps:$4 sm:$0xff]  }
   0xb   :  { %1632 = vmatpush1.bf16.msra.mxu1 %v3261_v10  ;;  %v3275_v20 = vld [vmem:[%s4983_s1 + $0xa4] ss:$16 sps:$4 sm:$0xff]   ;;  %v3279_v22 = vld [vmem:[%s4983_s1 + $0xa0] ss:$16 sps:$4 sm:$0xff]  }
   0xc   :  { %1673 = vmatpush1.bf16.msra.mxu0 %v3262_v11  ;;  %1633 = vmatprep.subr.bf16.mxu1 %v3263_v12  ;;  %v3277_v21 = vld [vmem:[%s4983_s1 + $0x2a4] ss:$16 sps:$4 sm:$0xff]   ;;  %v3280_v23 = vld [vmem:[%s4983_s1 + $0x2a0] ss:$16 sps:$4 sm:$0xff]  }
   0xd   :  { %1674 = vmatprep.subr.bf16.mxu0 %v3265_v13  ;;  %v3281_v24 = vld [vmem:[%s4983_s1 + $0xc4] ss:$16 sps:$4 sm:$0xff]   ;;  %v3285_v26 = vld [vmem:[%s4983_s1 + $0xc0] ss:$16 sps:$4 sm:$0xff]  }
   0xe   :  { %v3283_v25 = vld [vmem:[%s4983_s1 + $0x2c4] ss:$16 sps:$4 sm:$0xff]   ;;  %v3286_v27 = vld [vmem:[%s4983_s1 + $0x2c0] ss:$16 sps:$4 sm:$0xff]  }
   0xf   :  { %1634 = vmatpush1.bf16.msra.mxu1 %v3267_v14  ;;  %v3287_v28 = vld [vmem:[%s4983_s1 + $0xe4] ss:$16 sps:$4 sm:$0xff]   ;;  %v3291_v30 = vld [vmem:[%s4983_s1 + $0xe0] ss:$16 sps:$4 sm:$0xff]  }
  0x10   :  { %1675 = vmatpush1.bf16.msra.mxu0 %v3268_v15  ;;  %1635 = vmatprep.subr.bf16.mxu1 %v3269_v16  ;;  %v3289_v29 = vld [vmem:[%s4983_s1 + $0x2e4] ss:$16 sps:$4 sm:$0xff]   ;;  %v3292_v31 = vld [vmem:[%s4983_s1 + $0x2e0] ss:$16 sps:$4 sm:$0xff]   ;;  %v3347_v15 = vld [vmem:[%s4983_s1 + $0xc] ss:$16 sps:$4 sm:$0xff]  }
  0x11   :  { %1676 = vmatprep.subr.bf16.mxu0 %v3271_v17  ;;  %v3293_v32 = vld [vmem:[%s4983_s1 + $0x104] ss:$16 sps:$4 sm:$0xff]   ;;  %v3297_v34 = vld [vmem:[%s4983_s1 + $0x100] ss:$16 sps:$4 sm:$0xff]  }
  0x12   :  { %v3295_v33 = vld [vmem:[%s4983_s1 + $0x304] ss:$16 sps:$4 sm:$0xff]   ;;  %v3298_v35 = vld [vmem:[%s4983_s1 + $0x300] ss:$16 sps:$4 sm:$0xff]  }
  0x13   :  { %1636 = vmatpush1.bf16.msra.mxu1 %v3273_v18  ;;  %v3299_v39 = vld [vmem:[%s4983_s1 + $0x124] ss:$16 sps:$4 sm:$0xff]   ;;  %v3303_v41 = vld [vmem:[%s4983_s1 + $0x120] ss:$16 sps:$4 sm:$0xff]  }
  0x14   :  { %1677 = vmatpush1.bf16.msra.mxu0 %v3274_v19  ;;  %1637 = vmatprep.subr.bf16.mxu1 %v3275_v20  ;;  %v3301_v40 = vld [vmem:[%s4983_s1 + $0x324] ss:$16 sps:$4 sm:$0xff]   ;;  %v3304_v44 = vld [vmem:[%s4983_s1 + $0x320] ss:$16 sps:$4 sm:$0xff]   ;;  %v3345_v19 = vld [vmem:[%s4983_s1 + $0x8] ss:$16 sps:$4 sm:$0xff]  }
  0x15   :  { %1678 = vmatprep.subr.bf16.mxu0 %v3277_v21  ;;  %v3305_v45 = vld [vmem:[%s4983_s1 + $0x144] ss:$16 sps:$4 sm:$0xff]   ;;  %v3309_v47 = vld [vmem:[%s4983_s1 + $0x140] ss:$16 sps:$4 sm:$0xff]   ;;  %v3353_v21 = vld [vmem:[%s4983_s1 + $0x2c] ss:$16 sps:$4 sm:$0xff]  }
  0x16   :  { %v3307_v46 = vld [vmem:[%s4983_s1 + $0x344] ss:$16 sps:$4 sm:$0xff]   ;;  %v3310_v48 = vld [vmem:[%s4983_s1 + $0x340] ss:$16 sps:$4 sm:$0xff]  }
  0x17   :  { %1638 = vmatpush1.bf16.msra.mxu1 %v3279_v22  ;;  %v3311_v50 = vld [vmem:[%s4983_s1 + $0x164] ss:$16 sps:$4 sm:$0xff]   ;;  %v3315_v53 = vld [vmem:[%s4983_s1 + $0x160] ss:$16 sps:$4 sm:$0xff]  }
  0x18   :  { %1679 = vmatpush1.bf16.msra.mxu0 %v3280_v23  ;;  %1639 = vmatprep.subr.bf16.mxu1 %v3281_v24  ;;  %v3313_v51 = vld [vmem:[%s4983_s1 + $0x364] ss:$16 sps:$4 sm:$0xff]   ;;  %v3316_v56 = vld [vmem:[%s4983_s1 + $0x360] ss:$16 sps:$4 sm:$0xff]   ;;  %v3351_v23 = vld [vmem:[%s4983_s1 + $0x28] ss:$16 sps:$4 sm:$0xff]  }
  0x19   :  { %1680 = vmatprep.subr.bf16.mxu0 %v3283_v25  ;;  %v37_v52 = vld [vmem:[%s4982_s0] sm:$0xff]  ;;  %v3359_v25 = vld [vmem:[%s4983_s1 + $0x4c] ss:$16 sps:$4 sm:$0xff]  }
  0x1a   :  { %v48_v54 = vrot.slane %v37_v52, %v3971_v49  ;;  %v41_v55 = vcombine.high %v37_v52, %v37_v52  ;;  %v3317_v57 = vld [vmem:[%s4983_s1 + $0x184] ss:$16 sps:$4 sm:$0xff]   ;;  %v3321_v61 = vld [vmem:[%s4983_s1 + $0x180] ss:$16 sps:$4 sm:$0xff]  }
  0x1b   :  { %1640 = vmatpush1.bf16.msra.mxu1 %v3285_v26  ;;  %v3319_v58 = vld [vmem:[%s4983_s1 + $0x384] ss:$16 sps:$4 sm:$0xff]   ;;  %v3322_v0 = vld [vmem:[%s4983_s1 + $0x380] ss:$16 sps:$4 sm:$0xff]  }
  0x1c   :  { %1681 = vmatpush1.bf16.msra.mxu0 %v3286_v27  ;;  %1641 = vmatprep.subr.bf16.mxu1 %v3287_v28  ;;  %v56_v59 = vcombine.high %v48_v54, %v48_v54  ;;  %v55_v60 = vrot.slane %v41_v55, %v3971_v49  ;;  %v3323_v1 = vld [vmem:[%s4983_s1 + $0x1a4] ss:$16 sps:$4 sm:$0xff]   ;;  %v3327_v4 = vld [vmem:[%s4983_s1 + $0x1a0] ss:$16 sps:$4 sm:$0xff]   ;;  %v4047_v16 = vpack.c.bf16 %v48_v54, %v48_v54  ;;  %v3357_v27 = vld [vmem:[%s4983_s1 + $0x48] ss:$16 sps:$4 sm:$0xff]  }
  0x1d   :  { %1682 = vmatprep.subr.bf16.mxu0 %v3289_v29  ;;  %v3325_v2 = vld [vmem:[%s4983_s1 + $0x3a4] ss:$16 sps:$4 sm:$0xff]   ;;  %v3328_v5 = vld [vmem:[%s4983_s1 + $0x3a0] ss:$16 sps:$4 sm:$0xff]   ;;  %v3365_v29 = vld [vmem:[%s4983_s1 + $0x6c] ss:$16 sps:$4 sm:$0xff]  }
  0x1e   :  { %v84_v62 = vpack.c.bf16 %v56_v59, %v56_v59  ;;  %v57_v63 = vcombine.high %v55_v60, %v55_v60  ;;  %v3329_v6 = vld [vmem:[%s4983_s1 + $0x1c4] ss:$16 sps:$4 sm:$0xff]   ;;  %v3333_v8 = vld [vmem:[%s4983_s1 + $0x1c0] ss:$16 sps:$4 sm:$0xff]   ;;  %v4052_v18 = vpack.c.bf16 %v55_v60, %v55_v60  ;;  %v3395_v55 = vld [vmem:[%s4983_s1 + $0x10c] ss:$16 sps:$4 sm:$0xff]  }
  0x1f   :  { %1642 = vmatpush1.bf16.msra.mxu1 %v3291_v30  ;;  %v3331_v7 = vld [vmem:[%s4983_s1 + $0x3c4] ss:$16 sps:$4 sm:$0xff]   ;;  %v3334_v9 = vld [vmem:[%s4983_s1 + $0x3c0] ss:$16 sps:$4 sm:$0xff]   ;;  %v3401_v59 = vld [vmem:[%s4983_s1 + $0x12c] ss:$16 sps:$4 sm:$0xff]  }
  0x20   :  { %1683 = vmatpush1.bf16.msra.mxu0 %v3292_v31  ;;  %1643 = vmatprep.subr.bf16.mxu1 %v3293_v32  ;;  %v4008_v3 = vpack.c.bf16 %v57_v63, %v57_v63  ;;  %v3335_v10 = vld [vmem:[%s4983_s1 + $0x1e4] ss:$16 sps:$4 sm:$0xff]   ;;  %v3339_v12 = vld [vmem:[%s4983_s1 + $0x1e0] ss:$16 sps:$4 sm:$0xff]   ;;  %v3363_v31 = vld [vmem:[%s4983_s1 + $0x68] ss:$16 sps:$4 sm:$0xff]  }
  0x21   :  { %1684 = vmatprep.subr.bf16.mxu0 %v3295_v33  ;;  %1659 = vmatprep.mubr.bf16.mxu1 %v84_v62  ;;  %v3337_v11 = vld [vmem:[%s4983_s1 + $0x3e4] ss:$16 sps:$4 sm:$0xff]   ;;  %v3340_v13 = vld [vmem:[%s4983_s1 + $0x3e0] ss:$16 sps:$4 sm:$0xff]   ;;  %v3371_v33 = vld [vmem:[%s4983_s1 + $0x8c] ss:$16 sps:$4 sm:$0xff]  }
  0x22   :  { %1700 = vmatprep.mubr.bf16.mxu0 %v4008_v3  ;;  %v3344_v14 = vld [vmem:[%s4983_s1 + $0x404] ss:$16 sps:$4 sm:$0xff]   ;;  %v3342_v17 = vld [vmem:[%s4983_s1 + $0x400] ss:$16 sps:$4 sm:$0xff]   ;;  %v3407_v63 = vld [vmem:[%s4983_s1 + $0x14c] ss:$16 sps:$4 sm:$0xff]  }
  0x23   :  { %1644 = vmatpush1.bf16.msra.mxu1 %v3297_v34  ;;  %v3350_v20 = vld [vmem:[%s4983_s1 + $0x424] ss:$16 sps:$4 sm:$0xff]   ;;  %v3348_v22 = vld [vmem:[%s4983_s1 + $0x420] ss:$16 sps:$4 sm:$0xff]  }
  0x24   :  { %1685 = vmatpush1.bf16.msra.mxu0 %v3298_v35  ;;  %1645 = vmatprep.subr.bf16.mxu1 %v3299_v39  ;;  %v3356_v24 = vld [vmem:[%s4983_s1 + $0x444] ss:$16 sps:$4 sm:$0xff]   ;;  %v3354_v26 = vld [vmem:[%s4983_s1 + $0x440] ss:$16 sps:$4 sm:$0xff]   ;;  %v3369_v35 = vld [vmem:[%s4983_s1 + $0x88] ss:$16 sps:$4 sm:$0xff]  }
  0x25   :  { %1686 = vmatprep.subr.bf16.mxu0 %v3301_v40  ;;  %v3362_v28 = vld [vmem:[%s4983_s1 + $0x464] ss:$16 sps:$4 sm:$0xff]   ;;  %v3360_v30 = vld [vmem:[%s4983_s1 + $0x460] ss:$16 sps:$4 sm:$0xff]   ;;  %v3375_v39 = vld [vmem:[%s4983_s1 + $0xa8] ss:$16 sps:$4 sm:$0xff]  }
  0x26   :  { %v3368_v32 = vld [vmem:[%s4983_s1 + $0x484] ss:$16 sps:$4 sm:$0xff]   ;;  %v3366_v34 = vld [vmem:[%s4983_s1 + $0x480] ss:$16 sps:$4 sm:$0xff]  }
  0x27   :  { %1646 = vmatpush1.bf16.msra.mxu1 %v3303_v41  ;;  %v3374_v36 = vld [vmem:[%s4983_s1 + $0x4a4] ss:$16 sps:$4 sm:$0xff]   ;;  %v3372_v38 = vld [vmem:[%s4983_s1 + $0x4a0] ss:$16 sps:$4 sm:$0xff]   ;;  %v3383_v41 = vld [vmem:[%s4983_s1 + $0xcc] ss:$16 sps:$4 sm:$0xff]  }
  0x28   :  { %1687 = vmatpush1.bf16.msra.mxu0 %v3304_v44  ;;  %1647 = vmatprep.subr.bf16.mxu1 %v3305_v45  ;;  %v3380_v40 = vld [vmem:[%s4983_s1 + $0x4c4] ss:$16 sps:$4 sm:$0xff]   ;;  %v4132_v44 = vrot.slane %v4128_v42, %v3971_v49  ;;  %v3378_v45 = vld [vmem:[%s4983_s1 + $0x4c0] ss:$16 sps:$4 sm:$0xff]  }
  0x29   :  { %1688 = vmatprep.subr.bf16.mxu0 %v3307_v46  ;;  %v3381_v46 = vld [vmem:[%s4983_s1 + $0xc8] ss:$16 sps:$4 sm:$0xff]   ;;  %v3384_v52 = vld [vmem:[%s4983_s1 + $0x4e0] ss:$16 sps:$4 sm:$0xff]   ;;  %v3392_v54 = vld [vmem:[%s4983_s1 + $0x504] ss:$16 sps:$4 sm:$0xff]  }
  0x2a   :  { %v3396_v60 = vld [vmem:[%s4983_s1 + $0x520] ss:$16 sps:$4 sm:$0xff]  }
  0x2b   :  { %1648 = vmatpush1.bf16.msra.mxu1 %v3309_v47  ;;  %v73_v47 = vcombine.high %v4132_v44, %v4132_v44 }
  0x2c   :  { %1689 = vmatpush1.bf16.msra.mxu0 %v3310_v48  ;;  %1649 = vmatprep.subr.bf16.mxu1 %v3311_v50  ;;  %v3386_v48 = vld [vmem:[%s4983_s1 + $0x4e4] ss:$16 sps:$4 sm:$0xff]   ;;  %v3389_v50 = vld [vmem:[%s4983_s1 + $0xec] ss:$16 sps:$4 sm:$0xff]  }
  0x2d   :  { %1690 = vmatprep.subr.bf16.mxu0 %v3313_v51  ;;  %v4148_v51 = vpack.c.bf16 %v73_v47, %v73_v47  ;;  %v3465_v47 = vld [vmem:[%s4983_s1 + $0x288] ss:$16 sps:$4 sm:$0xff]  }
  0x2f   :  { %1650 = vmatpush1.bf16.msra.mxu1 %v3315_v53  ;;  %v3387_v53 = vld [vmem:[%s4983_s1 + $0xe8] ss:$16 sps:$4 sm:$0xff]  }
  0x30   :  { %1691 = vmatpush1.bf16.msra.mxu0 %v3316_v56  ;;  %1651 = vmatprep.subr.bf16.mxu1 %v3317_v57  ;;  %v3390_v56 = vld [vmem:[%s4983_s1 + $0x500] ss:$16 sps:$4 sm:$0xff]   ;;  %v3393_v57 = vld [vmem:[%s4983_s1 + $0x108] ss:$16 sps:$4 sm:$0xff]  }
  0x31   :  { %1692 = vmatprep.subr.bf16.mxu0 %v3319_v58  ;;  %v3398_v58 = vld [vmem:[%s4983_s1 + $0x524] ss:$16 sps:$4 sm:$0xff]  }
  0x33   :  { %1652 = vmatpush1.bf16.msra.mxu1 %v3321_v61  ;;  %v3399_v61 = vld [vmem:[%s4983_s1 + $0x128] ss:$16 sps:$4 sm:$0xff]  }
  0x34   :  { %1693 = vmatpush1.bf16.msra.mxu0 %v3322_v0  ;;  %1653 = vmatprep.subr.bf16.mxu1 %v3323_v1  ;;  %v3402_v0 = vld [vmem:[%s4983_s1 + $0x540] ss:$16 sps:$4 sm:$0xff]   ;;  %v3405_v1 = vld [vmem:[%s4983_s1 + $0x148] ss:$16 sps:$4 sm:$0xff]  }
  0x35   :  { %1694 = vmatprep.subr.bf16.mxu0 %v3325_v2  ;;  %v3410_v2 = vld [vmem:[%s4983_s1 + $0x564] ss:$16 sps:$4 sm:$0xff]  }
  0x37   :  { %1654 = vmatpush1.bf16.msra.mxu1 %v3327_v4  ;;  %v3413_v4 = vld [vmem:[%s4983_s1 + $0x16c] ss:$16 sps:$4 sm:$0xff]  }
  0x38   :  { %1695 = vmatpush1.bf16.msra.mxu0 %v3328_v5  ;;  %1655 = vmatprep.subr.bf16.mxu1 %v3329_v6  ;;  %v3408_v5 = vld [vmem:[%s4983_s1 + $0x560] ss:$16 sps:$4 sm:$0xff]   ;;  %v3411_v6 = vld [vmem:[%s4983_s1 + $0x168] ss:$16 sps:$4 sm:$0xff]  }
  0x39   :  { %1696 = vmatprep.subr.bf16.mxu0 %v3331_v7  ;;  %v3416_v7 = vld [vmem:[%s4983_s1 + $0x584] ss:$16 sps:$4 sm:$0xff]  }
  0x3b   :  { %1656 = vmatpush1.bf16.msra.mxu1 %v3333_v8  ;;  %v3419_v8 = vld [vmem:[%s4983_s1 + $0x18c] ss:$16 sps:$4 sm:$0xff]  }
  0x3c   :  { %1697 = vmatpush1.bf16.msra.mxu0 %v3334_v9  ;;  %1657 = vmatprep.subr.bf16.mxu1 %v3335_v10  ;;  %v3414_v9 = vld [vmem:[%s4983_s1 + $0x580] ss:$16 sps:$4 sm:$0xff]   ;;  %v3417_v10 = vld [vmem:[%s4983_s1 + $0x188] ss:$16 sps:$4 sm:$0xff]  }
  0x3d   :  { %1698 = vmatprep.subr.bf16.mxu0 %v3337_v11  ;;  %v3422_v11 = vld [vmem:[%s4983_s1 + $0x5a4] ss:$16 sps:$4 sm:$0xff]  }
  0x3f   :  { %1658 = vmatpush1.bf16.msra.mxu1 %v3339_v12  ;;  %v3425_v12 = vld [vmem:[%s4983_s1 + $0x1ac] ss:$16 sps:$4 sm:$0xff]  }
  0x40   :  { %1699 = vmatpush1.bf16.msra.mxu0 %v3340_v13  ;;  %1791 = vmatprep.subr.bf16.mxu1 %v3347_v15  ;;  %v3420_v13 = vld [vmem:[%s4983_s1 + $0x5a0] ss:$16 sps:$4 sm:$0xff]   ;;  %v3428_v15 = vld [vmem:[%s4983_s1 + $0x5c4] ss:$16 sps:$4 sm:$0xff]  }
  0x41   :  { %1709 = vmatprep.subr.bf16.mxu0 %v3344_v14  ;;  %v3423_v14 = vld [vmem:[%s4983_s1 + $0x1a8] ss:$16 sps:$4 sm:$0xff]  }
  0x42   :  { %1660 = vmatmul.mubr.bf16.vlgmr.msra.gmra.mrb[0].mxu1 %v4047_v16 }
  0x43   :  { %1701 = vmatmul.mubr.bf16.vlgmr.msra.gmra.mrb[0].mxu0 %v4052_v18  ;;  %1792 = vmatpush1.bf16.msra.mxu1 %v3345_v19  ;;  %v58_v19 = vcombine.high %v4128_v42, %v4128_v42  ;;  %v3459_v42 = vld [vmem:[%s4983_s1 + $0x268] ss:$16 sps:$4 sm:$0xff]  }
  0x44   :  { %1710 = vmatpush1.bf16.msra.mxu0 %v3342_v17  ;;  %1793 = vmatprep.subr.bf16.mxu1 %v3353_v21  ;;  %v3431_v17 = vld [vmem:[%s4983_s1 + $0x1cc] ss:$16 sps:$4 sm:$0xff]   ;;  %v3429_v21 = vld [vmem:[%s4983_s1 + $0x1c8] ss:$16 sps:$4 sm:$0xff]  }
  0x45   :  { %1711 = vmatprep.subr.bf16.mxu0 %v3350_v20  ;;  %1823 = vmatprep.mubr.bf16.mxu1 %v84_v62  ;;  %v3404_v62 = vld [vmem:[%s4983_s1 + $0x544] ss:$16 sps:$4 sm:$0xff]   ;;  %v3426_v20 = vld [vmem:[%s4983_s1 + $0x5c0] ss:$16 sps:$4 sm:$0xff]  }
  0x46   :  { %1741 = vmatprep.mubr.bf16.mxu0 %v4148_v51 }
  0x47   :  { %1794 = vmatpush1.bf16.msra.mxu1 %v3351_v23  ;;  %v3437_v23 = vld [vmem:[%s4983_s1 + $0x1ec] ss:$16 sps:$4 sm:$0xff]  }
  0x48   :  { %1712 = vmatpush1.bf16.msra.mxu0 %v3348_v22  ;;  %1795 = vmatprep.subr.bf16.mxu1 %v3359_v25  ;;  %v3434_v22 = vld [vmem:[%s4983_s1 + $0x5e4] ss:$16 sps:$4 sm:$0xff]   ;;  %v3432_v25 = vld [vmem:[%s4983_s1 + $0x5e0] ss:$16 sps:$4 sm:$0xff]  }
  0x49   :  { %1713 = vmatprep.subr.bf16.mxu0 %v3356_v24  ;;  %v4250_v24 = vrot.slane %v58_v19, %v3971_v49  ;;  %v3443_v49 = vld [vmem:[%s4983_s1 + $0x20c] ss:$16 sps:$4 sm:$0xff]   ;;  %v3510_v19 = vld [vmem:[%s4983_s1 + $0x780] ss:$16 sps:$4 sm:$0xff]  }
  0x4b   :  { %1796 = vmatpush1.bf16.msra.mxu1 %v3357_v27  ;;  %v3440_v27 = vld [vmem:[%s4983_s1 + $0x604] ss:$16 sps:$4 sm:$0xff]  }
  0x4c   :  { %1714 = vmatpush1.bf16.msra.mxu0 %v3354_v26  ;;  %1797 = vmatprep.subr.bf16.mxu1 %v3365_v29  ;;  %v3435_v26 = vld [vmem:[%s4983_s1 + $0x1e8] ss:$16 sps:$4 sm:$0xff]   ;;  %v4268_v29 = vpack.c.bf16 %v4132_v44, %v4132_v44  ;;  %v3464_v44 = vld [vmem:[%s4983_s1 + $0x684] ss:$16 sps:$4 sm:$0xff]  }
  0x4d   :  { %1715 = vmatprep.subr.bf16.mxu0 %v3362_v28  ;;  %v74_v28 = vcombine.high %v4250_v24, %v4250_v24 }
  0x4f   :  { %1798 = vmatpush1.bf16.msra.mxu1 %v3363_v31  ;;  %v3441_v31 = vld [vmem:[%s4983_s1 + $0x208] ss:$16 sps:$4 sm:$0xff]  }
  0x50   :  { %1716 = vmatpush1.bf16.msra.mxu0 %v3360_v30  ;;  %1799 = vmatprep.subr.bf16.mxu1 %v3371_v33  ;;  %v3438_v30 = vld [vmem:[%s4983_s1 + $0x600] ss:$16 sps:$4 sm:$0xff]   ;;  %v3449_v33 = vld [vmem:[%s4983_s1 + $0x22c] ss:$16 sps:$4 sm:$0xff]  }
  0x51   :  { %1717 = vmatprep.subr.bf16.mxu0 %v3368_v32  ;;  %v3446_v32 = vld [vmem:[%s4983_s1 + $0x624] ss:$16 sps:$4 sm:$0xff]  }
  0x53   :  { %1800 = vmatpush1.bf16.msra.mxu1 %v3369_v35  ;;  %v3444_v35 = vld [vmem:[%s4983_s1 + $0x620] ss:$16 sps:$4 sm:$0xff]  }
  0x54   :  { %1718 = vmatpush1.bf16.msra.mxu0 %v3366_v34  ;;  %1801 = vmatprep.subr.bf16.mxu1 %v3377_v37  ;;  %v4282_v34 = vpack.c.bf16 %v74_v28, %v74_v28  ;;  %v3452_v37 = vld [vmem:[%s4983_s1 + $0x644] ss:$16 sps:$4 sm:$0xff]   ;;  %v3525_v28 = vld [vmem:[%s4983_s1 + $0x3c8] ss:$16 sps:$4 sm:$0xff]  }
  0x55   :  { %1719 = vmatprep.subr.bf16.mxu0 %v3374_v36  ;;  %v3447_v36 = vld [vmem:[%s4983_s1 + $0x228] ss:$16 sps:$4 sm:$0xff]  }
  0x57   :  { %1802 = vmatpush1.bf16.msra.mxu1 %v3375_v39  ;;  %v3453_v39 = vld [vmem:[%s4983_s1 + $0x248] ss:$16 sps:$4 sm:$0xff]  }
  0x58   :  { %1720 = vmatpush1.bf16.msra.mxu0 %v3372_v38  ;;  %1803 = vmatprep.subr.bf16.mxu1 %v3383_v41  ;;  %v3450_v38 = vld [vmem:[%s4983_s1 + $0x640] ss:$16 sps:$4 sm:$0xff]  }
  0x59   :  { %1721 = vmatprep.subr.bf16.mxu0 %v3380_v40  ;;  %v3458_v40 = vld [vmem:[%s4983_s1 + $0x664] ss:$16 sps:$4 sm:$0xff]   ;;  %v3456_v41 = vld [vmem:[%s4983_s1 + $0x660] ss:$16 sps:$4 sm:$0xff]  }
  0x5b   :  { %1804 = vmatpush1.bf16.msra.mxu1 %v3381_v46  ;;  %v3462_v46 = vld [vmem:[%s4983_s1 + $0x680] ss:$16 sps:$4 sm:$0xff]  }
  0x5c   :  { %1722 = vmatpush1.bf16.msra.mxu0 %v3378_v45  ;;  %1805 = vmatprep.subr.bf16.mxu1 %v3389_v50  ;;  %v3467_v45 = vld [vmem:[%s4983_s1 + $0x28c] ss:$16 sps:$4 sm:$0xff]  }
  0x5d   :  { %1723 = vmatprep.subr.bf16.mxu0 %v3386_v48  ;;  %v3470_v48 = vld [vmem:[%s4983_s1 + $0x6a4] ss:$16 sps:$4 sm:$0xff]   ;;  %v3473_v50 = vld [vmem:[%s4983_s1 + $0x2ac] ss:$16 sps:$4 sm:$0xff]  }
  0x5f   :  { %1806 = vmatpush1.bf16.msra.mxu1 %v3387_v53  ;;  %v3471_v53 = vld [vmem:[%s4983_s1 + $0x2a8] ss:$16 sps:$4 sm:$0xff]  }
  0x60   :  { %1724 = vmatpush1.bf16.msra.mxu0 %v3384_v52  ;;  %1807 = vmatprep.subr.bf16.mxu1 %v3395_v55  ;;  %v3468_v52 = vld [vmem:[%s4983_s1 + $0x6a0] ss:$16 sps:$4 sm:$0xff]   ;;  %v3479_v55 = vld [vmem:[%s4983_s1 + $0x2cc] ss:$16 sps:$4 sm:$0xff]  }
  0x61   :  { %1725 = vmatprep.subr.bf16.mxu0 %v3392_v54  ;;  %v3476_v54 = vld [vmem:[%s4983_s1 + $0x6c4] ss:$16 sps:$4 sm:$0xff]  }
  0x63   :  { %1808 = vmatpush1.bf16.msra.mxu1 %v3393_v57  ;;  %v3477_v57 = vld [vmem:[%s4983_s1 + $0x2c8] ss:$16 sps:$4 sm:$0xff]  }
  0x64   :  { %1726 = vmatpush1.bf16.msra.mxu0 %v3390_v56  ;;  %1809 = vmatprep.subr.bf16.mxu1 %v3401_v59  ;;  %v3474_v56 = vld [vmem:[%s4983_s1 + $0x6c0] ss:$16 sps:$4 sm:$0xff]   ;;  %v3485_v59 = vld [vmem:[%s4983_s1 + $0x2ec] ss:$16 sps:$4 sm:$0xff]  }
  0x65   :  { %1727 = vmatprep.subr.bf16.mxu0 %v3398_v58  ;;  %v3482_v58 = vld [vmem:[%s4983_s1 + $0x6e4] ss:$16 sps:$4 sm:$0xff]  }
  0x67   :  { %1810 = vmatpush1.bf16.msra.mxu1 %v3399_v61  ;;  %v3483_v61 = vld [vmem:[%s4983_s1 + $0x2e8] ss:$16 sps:$4 sm:$0xff]  }
  0x68   :  { %1728 = vmatpush1.bf16.msra.mxu0 %v3396_v60  ;;  %1811 = vmatprep.subr.bf16.mxu1 %v3407_v63  ;;  %v3480_v60 = vld [vmem:[%s4983_s1 + $0x6e0] ss:$16 sps:$4 sm:$0xff]   ;;  %v3491_v63 = vld [vmem:[%s4983_s1 + $0x30c] ss:$16 sps:$4 sm:$0xff]  }
  0x69   :  { %1729 = vmatprep.subr.bf16.mxu0 %v3404_v62  ;;  %v3488_v62 = vld [vmem:[%s4983_s1 + $0x704] ss:$16 sps:$4 sm:$0xff]  }
  0x6b   :  { %1812 = vmatpush1.bf16.msra.mxu1 %v3405_v1  ;;  %v3489_v1 = vld [vmem:[%s4983_s1 + $0x308] ss:$16 sps:$4 sm:$0xff]  }
  0x6c   :  { %1730 = vmatpush1.bf16.msra.mxu0 %v3402_v0  ;;  %1813 = vmatprep.subr.bf16.mxu1 %v3413_v4  ;;  %v3486_v0 = vld [vmem:[%s4983_s1 + $0x700] ss:$16 sps:$4 sm:$0xff]   ;;  %v3497_v4 = vld [vmem:[%s4983_s1 + $0x32c] ss:$16 sps:$4 sm:$0xff]  }
  0x6d   :  { %1731 = vmatprep.subr.bf16.mxu0 %v3410_v2  ;;  %v3494_v2 = vld [vmem:[%s4983_s1 + $0x724] ss:$16 sps:$4 sm:$0xff]  }
  0x6f   :  { %1814 = vmatpush1.bf16.msra.mxu1 %v3411_v6  ;;  %v3495_v6 = vld [vmem:[%s4983_s1 + $0x328] ss:$16 sps:$4 sm:$0xff]  }
  0x70   :  { %1732 = vmatpush1.bf16.msra.mxu0 %v3408_v5  ;;  %1815 = vmatprep.subr.bf16.mxu1 %v3419_v8  ;;  %v3492_v5 = vld [vmem:[%s4983_s1 + $0x720] ss:$16 sps:$4 sm:$0xff]   ;;  %v3503_v8 = vld [vmem:[%s4983_s1 + $0x34c] ss:$16 sps:$4 sm:$0xff]  }
  0x71   :  { %1733 = vmatprep.subr.bf16.mxu0 %v3416_v7  ;;  %v3500_v7 = vld [vmem:[%s4983_s1 + $0x744] ss:$16 sps:$4 sm:$0xff]  }
  0x73   :  { %1816 = vmatpush1.bf16.msra.mxu1 %v3417_v10  ;;  %v3501_v10 = vld [vmem:[%s4983_s1 + $0x348] ss:$16 sps:$4 sm:$0xff]  }
  0x74   :  { %1734 = vmatpush1.bf16.msra.mxu0 %v3414_v9  ;;  %1817 = vmatprep.subr.bf16.mxu1 %v3425_v12  ;;  %v3498_v9 = vld [vmem:[%s4983_s1 + $0x740] ss:$16 sps:$4 sm:$0xff]   ;;  %v3509_v12 = vld [vmem:[%s4983_s1 + $0x36c] ss:$16 sps:$4 sm:$0xff]  }
  0x75   :  { %1735 = vmatprep.subr.bf16.mxu0 %v3422_v11  ;;  %v3506_v11 = vld [vmem:[%s4983_s1 + $0x764] ss:$16 sps:$4 sm:$0xff]  }
  0x77   :  { %1818 = vmatpush1.bf16.msra.mxu1 %v3423_v14  ;;  %v3507_v14 = vld [vmem:[%s4983_s1 + $0x368] ss:$16 sps:$4 sm:$0xff]  }
  0x78   :  { %1736 = vmatpush1.bf16.msra.mxu0 %v3420_v13  ;;  %1819 = vmatprep.subr.bf16.mxu1 %v3431_v17  ;;  %v3504_v13 = vld [vmem:[%s4983_s1 + $0x760] ss:$16 sps:$4 sm:$0xff]   ;;  %v3515_v17 = vld [vmem:[%s4983_s1 + $0x38c] ss:$16 sps:$4 sm:$0xff]  }
  0x79   :  { %1737 = vmatprep.subr.bf16.mxu0 %v3428_v15  ;;  %v3512_v15 = vld [vmem:[%s4983_s1 + $0x784] ss:$16 sps:$4 sm:$0xff]  }
  0x7b   :  { %1820 = vmatpush1.bf16.msra.mxu1 %v3429_v21  ;;  %v3518_v21 = vld [vmem:[%s4983_s1 + $0x7a4] ss:$16 sps:$4 sm:$0xff]  }
  0x7c   :  { %1738 = vmatpush1.bf16.msra.mxu0 %v3426_v20  ;;  %1821 = vmatprep.subr.bf16.mxu1 %v3437_v23  ;;  %v3513_v20 = vld [vmem:[%s4983_s1 + $0x388] ss:$16 sps:$4 sm:$0xff]   ;;  %v3516_v23 = vld [vmem:[%s4983_s1 + $0x7a0] ss:$16 sps:$4 sm:$0xff]  }
  0x7d   :  { %1739 = vmatprep.subr.bf16.mxu0 %v3434_v22  ;;  %v3521_v22 = vld [vmem:[%s4983_s1 + $0x3ac] ss:$16 sps:$4 sm:$0xff]  }
  0x7f   :  { %1822 = vmatpush1.bf16.msra.mxu1 %v3435_v26  ;;  %v3524_v26 = vld [vmem:[%s4983_s1 + $0x7c4] ss:$16 sps:$4 sm:$0xff]  }
  0x80   :  { %1740 = vmatpush1.bf16.msra.mxu0 %v3432_v25  ;;  %1832 = vmatprep.subr.bf16.mxu1 %v3443_v49  ;;  %v3519_v25 = vld [vmem:[%s4983_s1 + $0x3a8] ss:$16 sps:$4 sm:$0xff]   ;;  %v3522_v49 = vld [vmem:[%s4983_s1 + $0x7c0] ss:$16 sps:$4 sm:$0xff]  }
  0x81   :  { %1750 = vmatprep.subr.bf16.mxu0 %v3440_v27  ;;  %v3527_v27 = vld [vmem:[%s4983_s1 + $0x3cc] ss:$16 sps:$4 sm:$0xff]  }
  0x82   :  { %1824 = vmatmul.mubr.bf16.vlgmr.msra.gmra.mrb[4].mxu1 %v4047_v16  ;;  %v3455_v16 = vld [vmem:[%s4983_s1 + $0x24c] ss:$16 sps:$4 sm:$0xff]  }
  0x83   :  { %1742 = vmatmul.mubr.bf16.vlgmr.msra.gmra.mrb[0].mxu0 %v4268_v29  ;;  %1833 = vmatpush1.bf16.msra.mxu1 %v3441_v31  ;;  %v3533_v31 = vld [vmem:[%s4983_s1 + $0x3ec] ss:$16 sps:$4 sm:$0xff]  }
  0x84   :  { %1751 = vmatpush1.bf16.msra.mxu0 %v3438_v30  ;;  %1834 = vmatprep.subr.bf16.mxu1 %v3449_v33  ;;  %v3530_v30 = vld [vmem:[%s4983_s1 + $0x7e4] ss:$16 sps:$4 sm:$0xff]   ;;  %v3531_v33 = vld [vmem:[%s4983_s1 + $0x3e8] ss:$16 sps:$4 sm:$0xff]  }
  0x85   :  { %1752 = vmatprep.subr.bf16.mxu0 %v3446_v32  ;;  %1782 = vmatprep.mubr.bf16.mxu0 %v4282_v34  ;;  %v3528_v32 = vld [vmem:[%s4983_s1 + $0x7e0] ss:$16 sps:$4 sm:$0xff]  }
  0x86   :  { %1864 = vmatprep.mubr.bf16.mxu1 %v4008_v3  ;;  %v3461_v3 = vld [vmem:[%s4983_s1 + $0x26c] ss:$16 sps:$4 sm:$0xff]  }
  0x87   :  { %1835 = vmatpush1.bf16.msra.mxu1 %v3447_v36  ;;  %v3535_v36 = vld [vmem:[%s4983_s1 + $0x408] ss:$16 sps:$4 sm:$0xff]  }
  0x88   :  { %1753 = vmatpush1.bf16.msra.mxu0 %v3444_v35  ;;  %1836 = vmatprep.subr.bf16.mxu1 %v3455_v16  ;;  %v3537_v35 = vld [vmem:[%s4983_s1 + $0x40c] ss:$16 sps:$4 sm:$0xff]  }
  0x89   :  { %1754 = vmatprep.subr.bf16.mxu0 %v3452_v37  ;;  %v4470_v37 = vpack.c.bf16 %v4250_v24, %v4250_v24  ;;  %v3540_v16 = vld [vmem:[%s4983_s1 + $0x42c] ss:$16 sps:$4 sm:$0xff]  }
  0x8a   :  { %v3543_v24 = vld [vmem:[%s4983_s1 + $0x44c] ss:$16 sps:$4 sm:$0xff]  }
  0x8b   :  { %1837 = vmatpush1.bf16.msra.mxu1 %v3453_v39  ;;  %v3631_v39 = vld [vmem:[%s4986_s4] ss:$8 sps:$4 sm:$0xff]  }
  0x8c   :  { %1755 = vmatpush1.bf16.msra.mxu0 %v3450_v38  ;;  %1838 = vmatprep.subr.bf16.mxu1 %v3461_v3  ;;  %v3538_v38 = vld [vmem:[%s4983_s1 + $0x428] ss:$16 sps:$4 sm:$0xff]   ;;  %v3546_v3 = vld [vmem:[%s4983_s1 + $0x46c] ss:$16 sps:$4 sm:$0xff]  }
  0x8d   :  { %1756 = vmatprep.subr.bf16.mxu0 %v3458_v40  ;;  %v3633_v40 = vld [vmem:[%s4986_s4 + $0x4] ss:$8 sps:$4 sm:$0xff]  }
  0x8f   :  { %1839 = vmatpush1.bf16.msra.mxu1 %v3459_v42 }
  0x90   :  { %1757 = vmatpush1.bf16.msra.mxu0 %v3456_v41  ;;  %1840 = vmatprep.subr.bf16.mxu1 %v3467_v45  ;;  %v3544_v41 = vld [vmem:[%s4983_s1 + $0x468] ss:$16 sps:$4 sm:$0xff]  }
  0x91   :  { %1758 = vmatprep.subr.bf16.mxu0 %v3464_v44 }
  0x93   :  { %1841 = vmatpush1.bf16.msra.mxu1 %v3465_v47 }
  0x94   :  { %1759 = vmatpush1.bf16.msra.mxu0 %v3462_v46  ;;  %1842 = vmatprep.subr.bf16.mxu1 %v3473_v50 }
  0x95   :  { %1760 = vmatprep.subr.bf16.mxu0 %v3470_v48 }
  0x97   :  { %1843 = vmatpush1.bf16.msra.mxu1 %v3471_v53 }
  0x98   :  { %1761 = vmatpush1.bf16.msra.mxu0 %v3468_v52  ;;  %1844 = vmatprep.subr.bf16.mxu1 %v3479_v55 }
  0x99   :  { %1762 = vmatprep.subr.bf16.mxu0 %v3476_v54 }
  0x9b   :  { %1845 = vmatpush1.bf16.msra.mxu1 %v3477_v57 }
  0x9c   :  { %1763 = vmatpush1.bf16.msra.mxu0 %v3474_v56  ;;  %1846 = vmatprep.subr.bf16.mxu1 %v3485_v59 }
  0x9d   :  { %1764 = vmatprep.subr.bf16.mxu0 %v3482_v58 }
  0x9f   :  { %1847 = vmatpush1.bf16.msra.mxu1 %v3483_v61 }
  0xa0   :  { %1765 = vmatpush1.bf16.msra.mxu0 %v3480_v60  ;;  %1848 = vmatprep.subr.bf16.mxu1 %v3491_v63 }
  0xa1   :  { %1766 = vmatprep.subr.bf16.mxu0 %v3488_v62 }
  0xa3   :  { %1849 = vmatpush1.bf16.msra.mxu1 %v3489_v1 }
  0xa4   :  { %1767 = vmatpush1.bf16.msra.mxu0 %v3486_v0  ;;  %1850 = vmatprep.subr.bf16.mxu1 %v3497_v4 }
  0xa5   :  { %1768 = vmatprep.subr.bf16.mxu0 %v3494_v2 }
  0xa7   :  { %1851 = vmatpush1.bf16.msra.mxu1 %v3495_v6 }
  0xa8   :  { %1769 = vmatpush1.bf16.msra.mxu0 %v3492_v5  ;;  %1852 = vmatprep.subr.bf16.mxu1 %v3503_v8 }
  0xa9   :  { %1770 = vmatprep.subr.bf16.mxu0 %v3500_v7 }
  0xab   :  { %1853 = vmatpush1.bf16.msra.mxu1 %v3501_v10 }
  0xac   :  { %1771 = vmatpush1.bf16.msra.mxu0 %v3498_v9  ;;  %1854 = vmatprep.subr.bf16.mxu1 %v3509_v12 }
  0xad   :  { %1772 = vmatprep.subr.bf16.mxu0 %v3506_v11 }
  0xaf   :  { %1855 = vmatpush1.bf16.msra.mxu1 %v3507_v14 }
  0xb0   :  { %1773 = vmatpush1.bf16.msra.mxu0 %v3504_v13  ;;  %1856 = vmatprep.subr.bf16.mxu1 %v3515_v17 }
  0xb1   :  { %1774 = vmatprep.subr.bf16.mxu0 %v3512_v15 }
  0xb3   :  { %1857 = vmatpush1.bf16.msra.mxu1 %v3513_v20 }
  0xb4   :  { %1775 = vmatpush1.bf16.msra.mxu0 %v3510_v19  ;;  %1858 = vmatprep.subr.bf16.mxu1 %v3521_v22 }
  0xb5   :  { %1776 = vmatprep.subr.bf16.mxu0 %v3518_v21 }
  0xb7   :  { %1859 = vmatpush1.bf16.msra.mxu1 %v3519_v25 }
  0xb8   :  { %1777 = vmatpush1.bf16.msra.mxu0 %v3516_v23  ;;  %1860 = vmatprep.subr.bf16.mxu1 %v3527_v27 }
  0xb9   :  { %1778 = vmatprep.subr.bf16.mxu0 %v3524_v26 }
  0xbb   :  { %1861 = vmatpush1.bf16.msra.mxu1 %v3525_v28 }
  0xbc   :  { %1779 = vmatpush1.bf16.msra.mxu0 %v3522_v49  ;;  %1862 = vmatprep.subr.bf16.mxu1 %v3533_v31 }
  0xbd   :  { %1780 = vmatprep.subr.bf16.mxu0 %v3530_v30 }
  0xbf   :  { %1863 = vmatpush1.bf16.msra.mxu1 %v3531_v33 }
  0xc0   :  { %1781 = vmatpush1.bf16.msra.mxu0 %v3528_v32  ;;  %1873 = vmatprep.subr.bf16.mxu1 %v3537_v35 }
  0xc1   :  { %2505 = vmatprep.subr.bf16.mxu0 %v3633_v40 }
  0xc2   :  { %1865 = vmatmul.mubr.bf16.vlgmr.msra.gmra.mrb[4].mxu1 %v4052_v18  ;;  %v3541_v18 = vld [vmem:[%s4983_s1 + $0x448] ss:$16 sps:$4 sm:$0xff]  }
  0xc3   :  { %1783 = vmatmul.mubr.bf16.vlgmr.msra.gmra.mrb[0].mxu0 %v4470_v37  ;;  %1874 = vmatpush1.bf16.msra.mxu1 %v3535_v36 }
  0xc4   :  { %1905 = vmatprep.mubr.bf16.mxu1 %v4148_v51  ;;  %1875 = vmatprep.subr.bf16.mxu1 %v3540_v16 }
  0xc5   :  { %2506 = vmatpush1.bf16.msra.mxu0 %v3631_v39 }
  0xc7   :  { %1876 = vmatpush1.bf16.msra.mxu1 %v3538_v38 }
  0xc8   :  { %1877 = vmatprep.subr.bf16.mxu1 %v3543_v24 }
  0xcb   :  { %1878 = vmatpush1.bf16.msra.mxu1 %v3541_v18 }
  0xcc   :  { %15 = vsyncpa [#allocation3], 0  ;;  %1879 = vmatprep.subr.bf16.mxu1 %v3546_v3  ;;  %v3549_v51 = vld [vmem:[%s4983_s1 + $0x48c] ss:$16 sps:$4 sm:$0xff]   ;;  %v3547_v42 = vld [vmem:[%s4983_s1 + $0x488] ss:$16 sps:$4 sm:$0xff]  }
  0xcd   :  { %v3552_v44 = vld [vmem:[%s4983_s1 + $0x4ac] ss:$16 sps:$4 sm:$0xff]   ;;  %v3550_v45 = vld [vmem:[%s4983_s1 + $0x4a8] ss:$16 sps:$4 sm:$0xff]   ;;  %vm1957_vm0 = vcmask 1041408   ;;  %vm2840_vm7 = vcmask 320512  }
  0xce   :  { %v3555_v46 = vld [vmem:[%s4983_s1 + $0x4cc] ss:$16 sps:$4 sm:$0xff]   ;;  %v3553_v47 = vld [vmem:[%s4983_s1 + $0x4c8] ss:$16 sps:$4 sm:$0xff]  }
  0xcf   :  { %1880 = vmatpush1.bf16.msra.mxu1 %v3544_v41  ;;  %v3558_v48 = vld [vmem:[%s4983_s1 + $0x4ec] ss:$16 sps:$4 sm:$0xff]   ;;  %v3556_v50 = vld [vmem:[%s4983_s1 + $0x4e8] ss:$16 sps:$4 sm:$0xff]  }
  0xd0   :  { %1881 = vmatprep.subr.bf16.mxu1 %v3549_v51  ;;  %v3561_v52 = vld [vmem:[%s4983_s1 + $0x50c] ss:$16 sps:$4 sm:$0xff]   ;;  %v3559_v53 = vld [vmem:[%s4983_s1 + $0x508] ss:$16 sps:$4 sm:$0xff]  }
  0xd1   :  { %v3564_v54 = vld [vmem:[%s4983_s1 + $0x52c] ss:$16 sps:$4 sm:$0xff]   ;;  %v3562_v55 = vld [vmem:[%s4983_s1 + $0x528] ss:$16 sps:$4 sm:$0xff]  }
  0xd2   :  { %v3567_v56 = vld [vmem:[%s4983_s1 + $0x54c] ss:$16 sps:$4 sm:$0xff]   ;;  %v3565_v57 = vld [vmem:[%s4983_s1 + $0x548] ss:$16 sps:$4 sm:$0xff]  }
  0xd3   :  { %1882 = vmatpush1.bf16.msra.mxu1 %v3547_v42  ;;  %v3570_v58 = vld [vmem:[%s4983_s1 + $0x56c] ss:$16 sps:$4 sm:$0xff]   ;;  %v3568_v59 = vld [vmem:[%s4983_s1 + $0x568] ss:$16 sps:$4 sm:$0xff]  }
  0xd4   :  { %1883 = vmatprep.subr.bf16.mxu1 %v3552_v44  ;;  %v3573_v60 = vld [vmem:[%s4983_s1 + $0x58c] ss:$16 sps:$4 sm:$0xff]   ;;  %v3571_v61 = vld [vmem:[%s4983_s1 + $0x588] ss:$16 sps:$4 sm:$0xff]  }
  0xd5   :  { %v3576_v62 = vld [vmem:[%s4983_s1 + $0x5ac] ss:$16 sps:$4 sm:$0xff]   ;;  %v3574_v63 = vld [vmem:[%s4983_s1 + $0x5a8] ss:$16 sps:$4 sm:$0xff]  }
  0xd6   :  { %v3579_v0 = vld [vmem:[%s4983_s1 + $0x5cc] ss:$16 sps:$4 sm:$0xff]   ;;  %v3577_v1 = vld [vmem:[%s4983_s1 + $0x5c8] ss:$16 sps:$4 sm:$0xff]  }
  0xd7   :  { %1884 = vmatpush1.bf16.msra.mxu1 %v3550_v45  ;;  %v3582_v2 = vld [vmem:[%s4983_s1 + $0x5ec] ss:$16 sps:$4 sm:$0xff]   ;;  %v3580_v4 = vld [vmem:[%s4983_s1 + $0x5e8] ss:$16 sps:$4 sm:$0xff]  }
  0xd8   :  { %1885 = vmatprep.subr.bf16.mxu1 %v3555_v46  ;;  %v3585_v5 = vld [vmem:[%s4983_s1 + $0x60c] ss:$16 sps:$4 sm:$0xff]   ;;  %v3583_v6 = vld [vmem:[%s4983_s1 + $0x608] ss:$16 sps:$4 sm:$0xff]  }
  0xd9   :  { %v3588_v7 = vld [vmem:[%s4983_s1 + $0x62c] ss:$16 sps:$4 sm:$0xff]   ;;  %v3586_v8 = vld [vmem:[%s4983_s1 + $0x628] ss:$16 sps:$4 sm:$0xff]  }
  0xda   :  { %v3591_v9 = vld [vmem:[%s4983_s1 + $0x64c] ss:$16 sps:$4 sm:$0xff]   ;;  %v3589_v10 = vld [vmem:[%s4983_s1 + $0x648] ss:$16 sps:$4 sm:$0xff]  }
  0xdb   :  { %1886 = vmatpush1.bf16.msra.mxu1 %v3553_v47  ;;  %v3597_v11 = vld [vmem:[%s4983_s1 + $0x68c] ss:$16 sps:$4 sm:$0xff]   ;;  %v3595_v12 = vld [vmem:[%s4983_s1 + $0x688] ss:$16 sps:$4 sm:$0xff]  }
  0xdc   :  { %1887 = vmatprep.subr.bf16.mxu1 %v3558_v48  ;;  %v3600_v13 = vld [vmem:[%s4983_s1 + $0x6ac] ss:$16 sps:$4 sm:$0xff]   ;;  %v3598_v14 = vld [vmem:[%s4983_s1 + $0x6a8] ss:$16 sps:$4 sm:$0xff]  }
  0xdd   :  { %v3603_v15 = vld [vmem:[%s4983_s1 + $0x6cc] ss:$16 sps:$4 sm:$0xff]   ;;  %v3601_v20 = vld [vmem:[%s4983_s1 + $0x6c8] ss:$16 sps:$4 sm:$0xff]  }
  0xde   :  { %v3634_v22 = vld [vmem:[%s4986_s4 + $0x10] ss:$8 sps:$4 sm:$0xff]   ;;  %v3636_v23 = vld [vmem:[%s4986_s4 + $0x14] ss:$8 sps:$4 sm:$0xff]   ;;  %v3639_v27 = vld [vmem:[%s4986_s4 + $0x24] ss:$8 sps:$4 sm:$0xff]  }
  0xdf   :  { %1888 = vmatpush1.bf16.msra.mxu1 %v3556_v50  ;;  %v3606_v26 = vld [vmem:[%s4983_s1 + $0x6ec] ss:$16 sps:$4 sm:$0xff]   ;;  %2507 = vmatprep.subr.bf16.mxu0 %v3636_v23  ;;  %v3604_v49 = vld [vmem:[%s4983_s1 + $0x6e8] ss:$16 sps:$4 sm:$0xff]  }
  0xe0   :  { %1889 = vmatprep.subr.bf16.mxu1 %v3561_v52  ;;  %2508 = vmatpush1.bf16.msra.mxu0 %v3634_v22  ;;  %v3637_v28 = vld [vmem:[%s4986_s4 + $0x20] ss:$8 sps:$4 sm:$0xff]   ;;  %v3609_v30 = vld [vmem:[%s4983_s1 + $0x70c] ss:$16 sps:$4 sm:$0xff]   ;;  %v3640_v33 = vld [vmem:[%s4986_s4 + $0x30] ss:$8 sps:$4 sm:$0xff]  }
  0xe1   :  { %2509 = vmatprep.subr.bf16.mxu0 %v3639_v27  ;;  %v3642_v31 = vld [vmem:[%s4986_s4 + $0x34] ss:$8 sps:$4 sm:$0xff]   ;;  %v3607_v32 = vld [vmem:[%s4983_s1 + $0x708] ss:$16 sps:$4 sm:$0xff]   ;;  %v3645_v36 = vld [vmem:[%s4986_s4 + $0x44] ss:$8 sps:$4 sm:$0xff]  }
  0xe2   :  { %v3612_v35 = vld [vmem:[%s4983_s1 + $0x72c] ss:$16 sps:$4 sm:$0xff]   ;;  %v3610_v16 = vld [vmem:[%s4983_s1 + $0x728] ss:$16 sps:$4 sm:$0xff]  }
  0xe3   :  { %1890 = vmatpush1.bf16.msra.mxu1 %v3559_v53  ;;  %v3643_v38 = vld [vmem:[%s4986_s4 + $0x40] ss:$8 sps:$4 sm:$0xff]   ;;  %v3615_v24 = vld [vmem:[%s4983_s1 + $0x74c] ss:$16 sps:$4 sm:$0xff]   ;;  %v3646_v18 = vld [vmem:[%s4986_s4 + $0x50] ss:$8 sps:$4 sm:$0xff]  }
  0xe4   :  { %1891 = vmatprep.subr.bf16.mxu1 %v3564_v54  ;;  %2510 = vmatpush1.bf16.msra.mxu0 %v3637_v28  ;;  %v3648_v39 = vld [vmem:[%s4986_s4 + $0x54] ss:$8 sps:$4 sm:$0xff]   ;;  %v3613_v40 = vld [vmem:[%s4983_s1 + $0x748] ss:$16 sps:$4 sm:$0xff]   ;;  %v3651_v41 = vld [vmem:[%s4986_s4 + $0x64] ss:$8 sps:$4 sm:$0xff]  }
  0xe5   :  { %2511 = vmatprep.subr.bf16.mxu0 %v3642_v31  ;;  %v3618_v3 = vld [vmem:[%s4983_s1 + $0x76c] ss:$16 sps:$4 sm:$0xff]   ;;  %v3616_v51 = vld [vmem:[%s4983_s1 + $0x768] ss:$16 sps:$4 sm:$0xff]  }
  0xe6   :  { %v3649_v42 = vld [vmem:[%s4986_s4 + $0x60] ss:$8 sps:$4 sm:$0xff]   ;;  %v3621_v44 = vld [vmem:[%s4983_s1 + $0x78c] ss:$16 sps:$4 sm:$0xff]   ;;  %v3652_v47 = vld [vmem:[%s4986_s4 + $0x70] ss:$8 sps:$4 sm:$0xff]  }
  0xe7   :  { %1892 = vmatpush1.bf16.msra.mxu1 %v3562_v55  ;;  %v3654_v45 = vld [vmem:[%s4986_s4 + $0x74] ss:$8 sps:$4 sm:$0xff]   ;;  %v3619_v46 = vld [vmem:[%s4983_s1 + $0x788] ss:$16 sps:$4 sm:$0xff]   ;;  %v3657_v50 = vld [vmem:[%s4986_s4 + $0x84] ss:$8 sps:$4 sm:$0xff]  }
  0xe8   :  { %1893 = vmatprep.subr.bf16.mxu1 %v3567_v56  ;;  %2512 = vmatpush1.bf16.msra.mxu0 %v3640_v33  ;;  %v3624_v48 = vld [vmem:[%s4983_s1 + $0x7ac] ss:$16 sps:$4 sm:$0xff]   ;;  %v3622_v52 = vld [vmem:[%s4983_s1 + $0x7a8] ss:$16 sps:$4 sm:$0xff]  }
  0xe9   :  { %2513 = vmatprep.subr.bf16.mxu0 %v3645_v36  ;;  %v3655_v53 = vld [vmem:[%s4986_s4 + $0x80] ss:$8 sps:$4 sm:$0xff]   ;;  %v3627_v54 = vld [vmem:[%s4983_s1 + $0x7cc] ss:$16 sps:$4 sm:$0xff]  }
  0xea   :  { %v3660_v55 = vld [vmem:[%s4986_s4 + $0x94] ss:$8 sps:$4 sm:$0xff]   ;;  %v3625_v56 = vld [vmem:[%s4983_s1 + $0x7c8] ss:$16 sps:$4 sm:$0xff]  }
  0xeb   :  { %1894 = vmatpush1.bf16.msra.mxu1 %v3565_v57  ;;  %v3658_v57 = vld [vmem:[%s4986_s4 + $0x90] ss:$8 sps:$4 sm:$0xff]  }
  0xec   :  { %1895 = vmatprep.subr.bf16.mxu1 %v3570_v58  ;;  %2514 = vmatpush1.bf16.msra.mxu0 %v3643_v38  ;;  %v3630_v58 = vld [vmem:[%s4983_s1 + $0x7ec] ss:$16 sps:$4 sm:$0xff]  }
  0xed   :  { %2515 = vmatprep.subr.bf16.mxu0 %v3648_v39 }
  0xef   :  { %1896 = vmatpush1.bf16.msra.mxu1 %v3568_v59  ;;  %v3663_v59 = vld [vmem:[%s4986_s4 + $0xa4] ss:$8 sps:$4 sm:$0xff]  }
  0xf0   :  { %1897 = vmatprep.subr.bf16.mxu1 %v3573_v60  ;;  %2516 = vmatpush1.bf16.msra.mxu0 %v3646_v18  ;;  %v3628_v60 = vld [vmem:[%s4983_s1 + $0x7e8] ss:$16 sps:$4 sm:$0xff]  }
  0xf1   :  { %2517 = vmatprep.subr.bf16.mxu0 %v3651_v41 }
  0xf3   :  { %1898 = vmatpush1.bf16.msra.mxu1 %v3571_v61  ;;  %v3661_v61 = vld [vmem:[%s4986_s4 + $0xa0] ss:$8 sps:$4 sm:$0xff]  }
  0xf4   :  { %1899 = vmatprep.subr.bf16.mxu1 %v3576_v62  ;;  %2518 = vmatpush1.bf16.msra.mxu0 %v3649_v42  ;;  %v3666_v62 = vld [vmem:[%s4986_s4 + $0xb4] ss:$8 sps:$4 sm:$0xff]  }
  0xf5   :  { %2519 = vmatprep.subr.bf16.mxu0 %v3654_v45 }
  0xf7   :  { %1900 = vmatpush1.bf16.msra.mxu1 %v3574_v63  ;;  %v3664_v63 = vld [vmem:[%s4986_s4 + $0xb0] ss:$8 sps:$4 sm:$0xff]  }
  0xf8   :  { %1901 = vmatprep.subr.bf16.mxu1 %v3579_v0  ;;  %2520 = vmatpush1.bf16.msra.mxu0 %v3652_v47  ;;  %v3669_v0 = vld [vmem:[%s4986_s4 + $0xc4] ss:$8 sps:$4 sm:$0xff]  }
  0xf9   :  { %2521 = vmatprep.subr.bf16.mxu0 %v3657_v50 }
  0xfb   :  { %1902 = vmatpush1.bf16.msra.mxu1 %v3577_v1  ;;  %v3667_v1 = vld [vmem:[%s4986_s4 + $0xc0] ss:$8 sps:$4 sm:$0xff]  }
  0xfc   :  { %1903 = vmatprep.subr.bf16.mxu1 %v3582_v2  ;;  %2522 = vmatpush1.bf16.msra.mxu0 %v3655_v53  ;;  %v3672_v2 = vld [vmem:[%s4986_s4 + $0xd4] ss:$8 sps:$4 sm:$0xff]  }
  0xfd   :  { %2523 = vmatprep.subr.bf16.mxu0 %v3660_v55  ;;  %v4779_v55 = vld [vmem:[%s4984_s2] sm:$0xf]  ;;  %s3780_s2 = smov [#allocation2]  }
  0xff   :  { %1904 = vmatpush1.bf16.msra.mxu1 %v3580_v4  ;;  %v3670_v4 = vld [vmem:[%s4986_s4 + $0xd0] ss:$8 sps:$4 sm:$0xff]  }
 0x100   :  { %1914 = vmatprep.subr.bf16.mxu1 %v3585_v5  ;;  %2524 = vmatpush1.bf16.msra.mxu0 %v3658_v57  ;;  %v3673_v5 = vld [vmem:[%s4986_s4 + $0xe0] ss:$8 sps:$4 sm:$0xff]  }
 0x101   :  { %2525 = vmatprep.subr.bf16.mxu0 %v3663_v59  ;;  %v4787_v57 = vld [vmem:[%s4985_s3] sm:$0xf]  ;;  %s2848_s3 = sshll.u32 %s3780_s2, 4  ;;  %s2849_s3 = int_to_ptr.vmem [resolvable:$true] %s2848_s3 }
 0x102   :  { %1906 = vmatmul.mubr.bf16.vlgmr.msra.gmra.mrb[4].mxu1 %v4268_v29  ;;  %v3594_v29 = vld [vmem:[%s4983_s1 + $0x66c] ss:$16 sps:$4 sm:$0xff]   ;;  %p3760_p1 = scmp.lt.s32.totalorder %s2849_s3, %s2849_s3 }
 0x103   :  { %1915 = vmatpush1.bf16.msra.mxu1 %v3583_v6  ;;  %1946 = vmatprep.mubr.bf16.mxu1 %v4282_v34  ;;  %v3592_v34 = vld [vmem:[%s4983_s1 + $0x668] ss:$16 sps:$4 sm:$0xff]   ;;  %v3678_v6 = vld [vmem:[%s4986_s4 + $0xf4] ss:$8 sps:$4 sm:$0xff]   ;;  %s3755_s1 = scalar_lea.vmem %s2849_s3, 32 }
 0x104   :  { %1916 = vmatprep.subr.bf16.mxu1 %v3588_v7  ;;  %2526 = vmatpush1.bf16.msra.mxu0 %v3661_v61  ;;  %v3676_v7 = vld [vmem:[%s4986_s4 + $0xf0] ss:$8 sps:$4 sm:$0xff]   ;;  %p3756_p0 = scmp.ne.s32.totalorder %s2849_s3, %s3755_s1  ;;  %p3761_p2 = scmp.lt.s32.totalorder %s3755_s1, %s3755_s1 }
 0x105   :  { %2527 = vmatprep.subr.bf16.mxu0 %v3666_v62 }
 0x106   :  { %p3762_p3 = por %p3761_p2, %p3760_p1 }
 0x107   :  { %1917 = vmatpush1.bf16.msra.mxu1 %v3586_v8  ;;  %v3681_v8 = vld [vmem:[%s4986_s4 + $0x104] ss:$8 sps:$4 sm:$0xff]  }
 0x108   :  { %1918 = vmatprep.subr.bf16.mxu1 %v3591_v9  ;;  %2528 = vmatpush1.bf16.msra.mxu0 %v3664_v63  ;;  %p3763_p4 = pnand %p3762_p3, %p3756_p0 }
 0x109   :  { %2529 = vmatprep.subr.bf16.mxu0 %v3669_v0 }
 0x10b   :  { %1919 = vmatpush1.bf16.msra.mxu1 %v3589_v10 }
 0x10c   :  { %1920 = vmatprep.subr.bf16.mxu1 %v3594_v29  ;;  %2530 = vmatpush1.bf16.msra.mxu0 %v3667_v1 }
 0x10d   :  { %2531 = vmatprep.subr.bf16.mxu0 %v3672_v2 }
 0x10f   :  { %1921 = vmatpush1.bf16.msra.mxu1 %v3592_v34 }
 0x110   :  { %1922 = vmatprep.subr.bf16.mxu1 %v3597_v11  ;;  %2532 = vmatpush1.bf16.msra.mxu0 %v3670_v4 }
 0x113   :  { %1923 = vmatpush1.bf16.msra.mxu1 %v3595_v12 }
 0x114   :  { %1924 = vmatprep.subr.bf16.mxu1 %v3600_v13 }
 0x115   :  { %v4612_v17 = vpop.f32.mrb[0].mxu1 }
 0x116   :  { %v4614_v19 = vpop.f32.mrb[1].mxu1 }
 0x117   :  { %v1665_v21 = vpop.f32.mrb[2].mxu1  ;;  %1925 = vmatpush1.bf16.msra.mxu1 %v3598_v14 }
 0x118   :  { %v1666_v25 = vpop.f32.mrb[3].mxu1  ;;  %1926 = vmatprep.subr.bf16.mxu1 %v3603_v15 }
 0x11b   :  { %1927 = vmatpush1.bf16.msra.mxu1 %v3601_v20 }
 0x11c   :  { %1928 = vmatprep.subr.bf16.mxu1 %v3606_v26 }
 0x11f   :  { %1929 = vmatpush1.bf16.msra.mxu1 %v3604_v49 }
 0x120   :  { %1930 = vmatprep.subr.bf16.mxu1 %v3609_v30 }
 0x123   :  { %1931 = vmatpush1.bf16.msra.mxu1 %v3607_v32 }
 0x124   :  { %1932 = vmatprep.subr.bf16.mxu1 %v3612_v35 }
 0x127   :  { %1933 = vmatpush1.bf16.msra.mxu1 %v3610_v16 }
 0x128   :  { %1934 = vmatprep.subr.bf16.mxu1 %v3615_v24 }
 0x12b   :  { %1935 = vmatpush1.bf16.msra.mxu1 %v3613_v40 }
 0x12c   :  { %1936 = vmatprep.subr.bf16.mxu1 %v3618_v3 }
 0x12f   :  { %1937 = vmatpush1.bf16.msra.mxu1 %v3616_v51 }
 0x130   :  { %1938 = vmatprep.subr.bf16.mxu1 %v3621_v44 }
 0x133   :  { %1939 = vmatpush1.bf16.msra.mxu1 %v3619_v46 }
 0x134   :  { %1940 = vmatprep.subr.bf16.mxu1 %v3624_v48 }
 0x137   :  { %1941 = vmatpush1.bf16.msra.mxu1 %v3622_v52 }
 0x138   :  { %1942 = vmatprep.subr.bf16.mxu1 %v3627_v54  ;;  %v4774_v54 = vsub.s32 0, %v3953_v43 }
 0x13a   :  { %v2072_v63 = vrot.slane %v4787_v57, %v4774_v54 }
 0x13b   :  { %1943 = vmatpush1.bf16.msra.mxu1 %v3625_v56  ;;  %v4782_v56 = vsub.s32 1, %v3953_v43 }
 0x13c   :  { %1944 = vmatprep.subr.bf16.mxu1 %v3630_v58  ;;  %v2047_v58 = vrot.slane %v4779_v55, %v4774_v54 }
 0x13d   :  { %v2076_v1 = vrot.slane %v4787_v57, %v4782_v56 }
 0x13f   :  { %1945 = vmatpush1.bf16.msra.mxu1 %v3628_v60  ;;  %v2051_v60 = vrot.slane %v4779_v55, %v4782_v56 }
 0x142   :  { %1947 = vmatmul.mubr.bf16.vlgmr.msra.gmra.mrb[4].mxu1 %v4470_v37  ;;  %v3675_v37 = vld [vmem:[%s4986_s4 + $0xe4] ss:$8 sps:$4 sm:$0xff]  }
 0x143   :  { %2533 = vmatprep.subr.bf16.mxu0 %v3675_v37 }
 0x144   :  { %2534 = vmatpush1.bf16.msra.mxu0 %v3673_v5 }
 0x145   :  { %2535 = vmatprep.subr.bf16.mxu0 %v3678_v6 }
 0x148   :  { %2536 = vmatpush1.bf16.msra.mxu0 %v3676_v7 }
 0x149   :  { %2546 = vmatprep.subr.bf16.mxu0 %v3681_v8 }
 0x196   :  { %v1784_v9 = vpop.f32.mrb[0].mxu0 }
 0x197   :  { %v3215_v10 = vadd.f32 %v1784_v9, %v4612_v17  ;;  %v1786_v29 = vpop.f32.mrb[1].mxu0 }
 0x198   :  { %v3216_v34 = vadd.f32 %v1786_v29, %v4614_v19  ;;  %v1788_v11 = vpop.f32.mrb[2].mxu0  ;;  %v3679_v29 = vld [vmem:[%s4986_s4 + $0x100] ss:$8 sps:$4 sm:$0xff]  }
 0x199   :  { %v1958_v12 = vsel %vm1957_vm0, %v3215_v10, 0.0  ;;  %v1789_v13 = vpop.f32.mrb[3].mxu0  ;;  %v3684_v11 = vld [vmem:[%s4986_s4 + $0x114] ss:$8 sps:$4 sm:$0xff]  }
 0x19a   :  { %v1959_v14 = vrot.slane %v1958_v12, 4  ;;  %v1965_v15 = vsel %vm1957_vm0, %v3216_v34, 0.0  ;;  %v3687_v13 = vld [vmem:[%s4986_s4 + $0x124] ss:$8 sps:$4 sm:$0xff]  }
 0x19b   :  { %v1966_v20 = vrot.slane %v1965_v15, 4 }
 0x19c   :  { %v1960_v21 = vadd.f32 %v1959_v14, %v1958_v12  ;;  %v3682_v12 = vld [vmem:[%s4986_s4 + $0x110] ss:$8 sps:$4 sm:$0xff]   ;;  %v3685_v14 = vld [vmem:[%s4986_s4 + $0x120] ss:$8 sps:$4 sm:$0xff]  }
 0x19d   :  { %v1967_v22 = vadd.f32 %v1966_v20, %v1965_v15  ;;  %v3690_v15 = vld [vmem:[%s4986_s4 + $0x134] ss:$8 sps:$4 sm:$0xff]   ;;  %v3688_v20 = vld [vmem:[%s4986_s4 + $0x130] ss:$8 sps:$4 sm:$0xff]  }
 0x19e   :  { %v1961_v23 = vrot.slane %v1960_v21, 2 }
 0x19f   :  { %v1968_v25 = vrot.slane %v1967_v22, 2 }
 0x1a0   :  { %v1962_v26 = vadd.f32 %v1961_v23, %v1960_v21  ;;  %v3693_v21 = vld [vmem:[%s4986_s4 + $0x144] ss:$8 sps:$4 sm:$0xff]   ;;  %v3696_v23 = vld [vmem:[%s4986_s4 + $0x154] ss:$8 sps:$4 sm:$0xff]  }
 0x1a1   :  { %v1969_v27 = vadd.f32 %v1968_v25, %v1967_v22  ;;  %v3691_v22 = vld [vmem:[%s4986_s4 + $0x140] ss:$8 sps:$4 sm:$0xff]   ;;  %v3694_v25 = vld [vmem:[%s4986_s4 + $0x150] ss:$8 sps:$4 sm:$0xff]  }
 0x1a2   :  { %v1963_v49 = vrot.slane %v1962_v26, 1 }
 0x1a3   :  { %v1970_v28 = vrot.slane %v1969_v27, 1 }
 0x1a4   :  { %v1964_v17 = vadd.f32 %v1963_v49, %v1962_v26  ;;  %v3699_v26 = vld [vmem:[%s4986_s4 + $0x164] ss:$8 sps:$4 sm:$0xff]   ;;  %v3702_v49 = vld [vmem:[%s4986_s4 + $0x174] ss:$8 sps:$4 sm:$0xff]  }
 0x1a5   :  { %v1971_v30 = vadd.f32 %v1970_v28, %v1969_v27  ;;  %v3697_v27 = vld [vmem:[%s4986_s4 + $0x160] ss:$8 sps:$4 sm:$0xff]   ;;  %v3700_v28 = vld [vmem:[%s4986_s4 + $0x170] ss:$8 sps:$4 sm:$0xff]  }
 0x1a6   :  { %v1987_v31 = vmul.f32 0.5, %v1964_v17  ;;  %v3705_v17 = vld [vmem:[%s4986_s4 + $0x184] ss:$8 sps:$4 sm:$0xff]  }
 0x1a7   :  { %v1988_v19 = vmul.f32 0.5, %v1971_v30  ;;  %v3703_v30 = vld [vmem:[%s4986_s4 + $0x180] ss:$8 sps:$4 sm:$0xff]  }
 0x1a8   :  { %v1991_v32 = vsub.f32 %v3215_v10, %v1987_v31  ;;  %v3708_v31 = vld [vmem:[%s4986_s4 + $0x194] ss:$8 sps:$4 sm:$0xff]  }
 0x1a9   :  { %v1992_v33 = vsub.f32 %v3216_v34, %v1988_v19  ;;  %v3706_v19 = vld [vmem:[%s4986_s4 + $0x190] ss:$8 sps:$4 sm:$0xff]  }
 0x1aa   :  { %v1995_v35 = vmul.f32 %v1991_v32, %v1991_v32 }
 0x1ab   :  { %v1996_v36 = vmul.f32 %v1992_v33, %v1992_v33 }
 0x1ac   :  { %v1999_v16 = vsel %vm1957_vm0, %v1995_v35, 0.0  ;;  %v3714_v35 = vld [vmem:[%s4986_s4 + $0x1b4] ss:$8 sps:$4 sm:$0xff]  }
 0x1ad   :  { %v2000_v38 = vrot.slane %v1999_v16, 4  ;;  %v2006_v24 = vsel %vm1957_vm0, %v1996_v36, 0.0  ;;  %v3712_v36 = vld [vmem:[%s4986_s4 + $0x1b0] ss:$8 sps:$4 sm:$0xff]  }
 0x1ae   :  { %v2007_v39 = vrot.slane %v2006_v24, 4 }
 0x1af   :  { %v2001_v40 = vadd.f32 %v2000_v38, %v1999_v16  ;;  %v3717_v16 = vld [vmem:[%s4986_s4 + $0x1c4] ss:$8 sps:$4 sm:$0xff]   ;;  %v3715_v38 = vld [vmem:[%s4986_s4 + $0x1c0] ss:$8 sps:$4 sm:$0xff]  }
 0x1b0   :  { %v2008_v18 = vadd.f32 %v2007_v39, %v2006_v24  ;;  %v3720_v24 = vld [vmem:[%s4986_s4 + $0x1d4] ss:$8 sps:$4 sm:$0xff]   ;;  %v3718_v39 = vld [vmem:[%s4986_s4 + $0x1d0] ss:$8 sps:$4 sm:$0xff]  }
 0x1b1   :  { %v2002_v3 = vrot.slane %v2001_v40, 2 }
 0x1b2   :  { %v2009_v41 = vrot.slane %v2008_v18, 2 }
 0x1b3   :  { %v2003_v51 = vadd.f32 %v2002_v3, %v2001_v40  ;;  %v3723_v40 = vld [vmem:[%s4986_s4 + $0x1e4] ss:$8 sps:$4 sm:$0xff]   ;;  %v3726_v3 = vld [vmem:[%s4986_s4 + $0x1f4] ss:$8 sps:$4 sm:$0xff]  }
 0x1b4   :  { %v2010_v42 = vadd.f32 %v2009_v41, %v2008_v18  ;;  %v3721_v18 = vld [vmem:[%s4986_s4 + $0x1e0] ss:$8 sps:$4 sm:$0xff]   ;;  %v3724_v41 = vld [vmem:[%s4986_s4 + $0x1f0] ss:$8 sps:$4 sm:$0xff]  }
 0x1b5   :  { %v2004_v44 = vrot.slane %v2003_v51, 1 }
 0x1b6   :  { %v2011_v45 = vrot.slane %v2010_v42, 1 }
 0x1b7   :  { %v2005_v46 = vadd.f32 %v2004_v44, %v2003_v51 }
 0x1b8   :  { %v2012_v47 = vadd.f32 %v2011_v45, %v2010_v42 }
 0x1b9   :  { %v2027_v48 = vmul.f32 0.5, %v2005_v46 }
 0x1ba   :  { %v2028_v50 = vmul.f32 0.5, %v2012_v47 }
 0x1bb   :  { %v2031_v52 = vadd.f32 1e-05, %v2027_v48 }
 0x1bc   :  { %v2032_v53 = vadd.f32 1e-05, %v2028_v50 }
 0x1bd   :  { %3743 = vrsqrt.f32 %v2031_v52 }
 0x1be   :  { %3745 = vrsqrt.f32 %v2032_v53 }
 0x1c7   :  { %v3744_v59 = vpop.eup %3743 }
 0x1c8   :  { %v3746_v61 = vpop.eup %3745  ;;  %v2039_v62 = vmul.f32 %v3744_v59, %v1991_v32  ;;  %v3711_v32 = vld [vmem:[%s4986_s4 + $0x1a4] ss:$8 sps:$4 sm:$0xff]  }
 0x1c9   :  { %v2040_v0 = vmul.f32 %v3746_v61, %v1992_v33  ;;  %v3709_v33 = vld [vmem:[%s4986_s4 + $0x1a0] ss:$8 sps:$4 sm:$0xff]  }
 0x1ca   :  { %v2064_v2 = vmul.f32 %v2047_v58, %v2039_v62 }
 0x1cb   :  { %v2065_v4 = vmul.f32 %v2051_v60, %v2040_v0 }
 0x1cc   :  { %v2089_v37 = vadd.f32 %v2072_v63, %v2064_v2 }
 0x1cd   :  { %v2090_v5 = vadd.f32 %v2076_v1, %v2065_v4 }
 0x1ce   :  { %vm2093_vm1 = vcmp.ge.f32.partialorder %v2089_v37, 0.0  ;;  %v2097_v6 = vmul.f32 0.2, %v2089_v37 }
 0x1cf   :  { %vm2094_vm2 = vcmp.ge.f32.partialorder %v2090_v5, 0.0  ;;  %v2098_v7 = vmul.f32 0.2, %v2090_v5 }
 0x1d0   :  { %v2101_v8 = vsel %vm2093_vm1, %v2089_v37, %v2097_v6 }
 0x1d1   :  { %v2102_v9 = vsel %vm2094_vm2, %v2090_v5, %v2098_v7  ;;  %v2105_v34 = vpack.c.bf16 %v2101_v8, %v2101_v8 }
 0x1d2   :  { %v2106_v10 = vpack.c.bf16 %v2102_v9, %v2102_v9 }
 0x1d4   :  { %2537 = vmatprep.mubr.bf16.mxu0 %v2106_v10 }
 0x1d5   :  { %2538 = vmatmul.mubr.bf16.vlgmr.msra.gmra.mrb[4].mxu0 %v2105_v34 }
 0x1d6   :  { %2547 = vmatpush1.bf16.msra.mxu0 %v3679_v29 }
 0x1d7   :  { %2548 = vmatprep.subr.bf16.mxu0 %v3684_v11 }
 0x1da   :  { %2549 = vmatpush1.bf16.msra.mxu0 %v3682_v12 }
 0x1db   :  { %2550 = vmatprep.subr.bf16.mxu0 %v3687_v13 }
 0x1de   :  { %2551 = vmatpush1.bf16.msra.mxu0 %v3685_v14 }
 0x1df   :  { %2552 = vmatprep.subr.bf16.mxu0 %v3690_v15 }
 0x1e2   :  { %2553 = vmatpush1.bf16.msra.mxu0 %v3688_v20 }
 0x1e3   :  { %2554 = vmatprep.subr.bf16.mxu0 %v3693_v21 }
 0x1e6   :  { %2555 = vmatpush1.bf16.msra.mxu0 %v3691_v22 }
 0x1e7   :  { %2556 = vmatprep.subr.bf16.mxu0 %v3696_v23 }
 0x1ea   :  { %2557 = vmatpush1.bf16.msra.mxu0 %v3694_v25 }
 0x1eb   :  { %2558 = vmatprep.subr.bf16.mxu0 %v3699_v26 }
 0x1ee   :  { %2559 = vmatpush1.bf16.msra.mxu0 %v3697_v27 }
 0x1ef   :  { %2560 = vmatprep.subr.bf16.mxu0 %v3702_v49 }
 0x1f2   :  { %2561 = vmatpush1.bf16.msra.mxu0 %v3700_v28  ;;  %v2054_v28 = vsub.s32 2, %v3953_v43 }
 0x1f3   :  { %2562 = vmatprep.subr.bf16.mxu0 %v3705_v17  ;;  %v2058_v17 = vsub.s32 3, %v3953_v43 }
 0x1f6   :  { %2563 = vmatpush1.bf16.msra.mxu0 %v3703_v30  ;;  %v2055_v30 = vrot.slane %v4779_v55, %v2054_v28 }
 0x1f7   :  { %2564 = vmatprep.subr.bf16.mxu0 %v3708_v31 }
 0x1fa   :  { %2565 = vmatpush1.bf16.msra.mxu0 %v3706_v19  ;;  %v2059_v19 = vrot.slane %v4779_v55, %v2058_v17  ;;  %v3727_v55 = vld [vmem:[%s4990_s8 + $0x40] sm:$0xff]  }
 0x1fb   :  { %2566 = vmatprep.subr.bf16.mxu0 %v3711_v32  ;;  %3193 = vmatprep.subr.bf16.mxu1 %v3727_v55 }
 0x1fe   :  { %2567 = vmatpush1.bf16.msra.mxu0 %v3709_v33 }
 0x1ff   :  { %2568 = vmatprep.subr.bf16.mxu0 %v3714_v35  ;;  %v2080_v35 = vrot.slane %v4787_v57, %v2054_v28 }
 0x202   :  { %2569 = vmatpush1.bf16.msra.mxu0 %v3712_v36 }
 0x203   :  { %2570 = vmatprep.subr.bf16.mxu0 %v3717_v16  ;;  %v2084_v16 = vrot.slane %v4787_v57, %v2058_v17  ;;  %v3728_v57 = vld [vmem:[%s4990_s8] sm:$0xff]  }
 0x204   :  { %3194 = vmatpush3.bf16.msra.mxu1 %v3728_v57  ;;  %v2587_v57 = vld [vmem:[%s4988_s6] sm:$0x3] }
 0x206   :  { %2571 = vmatpush1.bf16.msra.mxu0 %v3715_v38 }
 0x207   :  { %2572 = vmatprep.subr.bf16.mxu0 %v3720_v24 }
 0x20a   :  { %2573 = vmatpush1.bf16.msra.mxu0 %v3718_v39 }
 0x20b   :  { %2574 = vmatprep.subr.bf16.mxu0 %v3723_v40 }
 0x20e   :  { %2575 = vmatpush1.bf16.msra.mxu0 %v3721_v18 }
 0x20f   :  { %2576 = vmatprep.subr.bf16.mxu0 %v3726_v3 }
 0x212   :  { %2577 = vmatpush1.bf16.msra.mxu0 %v3724_v41 }
 0x215   :  { %v1948_v51 = vpop.f32.mrb[4].mxu1 }
 0x216   :  { %v1972_v42 = vsel %vm1957_vm0, %v1948_v51, 0.0  ;;  %v1950_v44 = vpop.f32.mrb[5].mxu1 }
 0x217   :  { %v1973_v45 = vrot.slane %v1972_v42, 4  ;;  %v1979_v46 = vsel %vm1957_vm0, %v1950_v44, 0.0  ;;  %v1952_v47 = vpop.f32.mrb[6].mxu1 }
 0x218   :  { %v1980_v48 = vrot.slane %v1979_v46, 4  ;;  %v1953_v50 = vpop.f32.mrb[7].mxu1  ;;  %v3732_v47 = vld [vmem:[%s4990_s8 + $0x10] sm:$0xff]  }
 0x219   :  { %v1974_v52 = vadd.f32 %v1973_v45, %v1972_v42  ;;  %v3730_v45 = vld [vmem:[%s4990_s8 + $0x8] sm:$0xff]   ;;  %v3734_v50 = vld [vmem:[%s4990_s8 + $0x18] sm:$0xff]  }
 0x21a   :  { %v1981_v53 = vadd.f32 %v1980_v48, %v1979_v46  ;;  %v3731_v46 = vld [vmem:[%s4990_s8 + $0x50] sm:$0xff]   ;;  %v3733_v48 = vld [vmem:[%s4990_s8 + $0x58] sm:$0xff]  }
 0x21b   :  { %v1975_v58 = vrot.slane %v1974_v52, 2 }
 0x21c   :  { %v1982_v59 = vrot.slane %v1981_v53, 2 }
 0x21d   :  { %v1976_v60 = vadd.f32 %v1975_v58, %v1974_v52  ;;  %v3735_v52 = vld [vmem:[%s4990_s8 + $0x60] sm:$0xff]   ;;  %v3737_v58 = vld [vmem:[%s4990_s8 + $0x68] sm:$0xff]  }
 0x21e   :  { %v1983_v61 = vadd.f32 %v1982_v59, %v1981_v53  ;;  %v3736_v53 = vld [vmem:[%s4990_s8 + $0x20] sm:$0xff]   ;;  %v3738_v59 = vld [vmem:[%s4990_s8 + $0x28] sm:$0xff]  }
 0x21f   :  { %v1977_v62 = vrot.slane %v1976_v60, 1 }
 0x220   :  { %v1984_v63 = vrot.slane %v1983_v61, 1 }
 0x221   :  { %v1978_v0 = vadd.f32 %v1977_v62, %v1976_v60  ;;  %v3739_v60 = vld [vmem:[%s4990_s8 + $0x70] sm:$0xff]   ;;  %v3741_v62 = vld [vmem:[%s4990_s8 + $0x78] sm:$0xff]  }
 0x222   :  { %v1985_v1 = vadd.f32 %v1984_v63, %v1983_v61  ;;  %v3740_v61 = vld [vmem:[%s4990_s8 + $0x30] sm:$0xff]   ;;  %v3742_v63 = vld [vmem:[%s4990_s8 + $0x38] sm:$0xff]  }
 0x223   :  { %v1989_v2 = vmul.f32 0.5, %v1978_v0  ;;  %v2173_v0 = vld [vmem:[%s4987_s5] sm:$0x3] }
 0x224   :  { %v1990_v4 = vmul.f32 0.5, %v1985_v1  ;;  %v2178_v1 = vrot.slane %v2173_v0, %v4774_v54 }
 0x225   :  { %v1993_v37 = vsub.f32 %v1948_v51, %v1989_v2  ;;  %v2182_v2 = vrot.slane %v2173_v0, %v4782_v56 }
 0x226   :  { %v1994_v5 = vsub.f32 %v1950_v44, %v1990_v4  ;;  %v3729_v44 = vld [vmem:[%s4990_s8 + $0x48] sm:$0xff]  }
 0x227   :  { %v1997_v6 = vmul.f32 %v1993_v37, %v1993_v37  ;;  %3195 = vmatprep.subr.bf16.mxu1 %v3729_v44  ;;  %v2588_v44 = vld [vmem:[%s4989_s7] sm:$0x3] }
 0x228   :  { %v1998_v7 = vmul.f32 %v1994_v5, %v1994_v5  ;;  %3196 = vmatpush3.bf16.msra.mxu1 %v3730_v45  ;;  %v2635_v45 = vrot.slane %v2587_v57, %v4774_v54 }
 0x229   :  { %v2013_v8 = vsel %vm1957_vm0, %v1997_v6, 0.0  ;;  %3197 = vmatprep.subr.bf16.mxu1 %v3731_v46 }
 0x22a   :  { %v2014_v9 = vrot.slane %v2013_v8, 4  ;;  %v2020_v10 = vsel %vm1957_vm0, %v1998_v7, 0.0 }
 0x22b   :  { %v2021_v29 = vrot.slane %v2020_v10, 4 }
 0x22c   :  { %v2015_v34 = vadd.f32 %v2014_v9, %v2013_v8  ;;  %3198 = vmatpush3.bf16.msra.mxu1 %v3732_v47  ;;  %v2639_v47 = vrot.slane %v2587_v57, %v4782_v56 }
 0x22d   :  { %v2022_v11 = vadd.f32 %v2021_v29, %v2020_v10  ;;  %3199 = vmatprep.subr.bf16.mxu1 %v3733_v48 }
 0x22e   :  { %v2016_v12 = vrot.slane %v2015_v34, 2 }
 0x22f   :  { %v2023_v13 = vrot.slane %v2022_v11, 2 }
 0x230   :  { %v2017_v14 = vadd.f32 %v2016_v12, %v2015_v34  ;;  %3200 = vmatpush3.bf16.msra.mxu1 %v3734_v50 }
 0x231   :  { %v2024_v15 = vadd.f32 %v2023_v13, %v2022_v11  ;;  %3201 = vmatprep.subr.bf16.mxu1 %v3735_v52  ;;  %v2648_v52 = vrot.slane %v2588_v44, %v4774_v54  ;;  %v3176_v54 = vld [vmem:[%s4991_s9] ss:$0 sm:$0xff] }
 0x232   :  { %v2018_v20 = vrot.slane %v2017_v14, 1 }
 0x233   :  { %v2025_v21 = vrot.slane %v2024_v15, 1 }
 0x234   :  { %v2019_v22 = vadd.f32 %v2018_v20, %v2017_v14  ;;  %3202 = vmatpush3.bf16.msra.mxu1 %v3736_v53 }
 0x235   :  { %v2026_v23 = vadd.f32 %v2025_v21, %v2024_v15  ;;  %3203 = vmatprep.subr.bf16.mxu1 %v3737_v58  ;;  %v2652_v58 = vrot.slane %v2588_v44, %v4782_v56 }
 0x236   :  { %v2029_v25 = vmul.f32 0.5, %v2019_v22 }
 0x237   :  { %v2030_v26 = vmul.f32 0.5, %v2026_v23 }
 0x238   :  { %v2033_v27 = vadd.f32 1e-05, %v2029_v25  ;;  %3204 = vmatpush3.bf16.msra.mxu1 %v3738_v59 }
 0x239   :  { %v2034_v49 = vadd.f32 1e-05, %v2030_v26  ;;  %3205 = vmatprep.subr.bf16.mxu1 %v3739_v60 }
 0x23a   :  { %3747 = vrsqrt.f32 %v2033_v27 }
 0x23b   :  { %3749 = vrsqrt.f32 %v2034_v49 }
 0x23c   :  { %3206 = vmatpush3.bf16.msra.mxu1 %v3740_v61 }
 0x23d   :  { %3207 = vmatprep.subr.bf16.mxu1 %v3741_v62 }
 0x240   :  { %3208 = vmatpush3.bf16.msra.mxu1 %v3742_v63 }
 0x244   :  { %v3748_v31 = vpop.eup %3747 }
 0x245   :  { %v3750_v32 = vpop.eup %3749  ;;  %v2041_v33 = vmul.f32 %v3748_v31, %v1993_v37 }
 0x246   :  { %v2042_v36 = vmul.f32 %v3750_v32, %v1994_v5 }
 0x247   :  { %v2066_v38 = vmul.f32 %v2055_v30, %v2041_v33 }
 0x248   :  { %v2067_v24 = vmul.f32 %v2059_v19, %v2042_v36 }
 0x249   :  { %v2091_v39 = vadd.f32 %v2080_v35, %v2066_v38 }
 0x24a   :  { %v2092_v40 = vadd.f32 %v2084_v16, %v2067_v24 }
 0x24b   :  { %vm2095_vm3 = vcmp.ge.f32.partialorder %v2091_v39, 0.0  ;;  %v2099_v18 = vmul.f32 0.2, %v2091_v39 }
 0x24c   :  { %vm2096_vm4 = vcmp.ge.f32.partialorder %v2092_v40, 0.0  ;;  %v2100_v43 = vmul.f32 0.2, %v2092_v40 }
 0x24d   :  { %v2103_v3 = vsel %vm2095_vm3, %v2091_v39, %v2099_v18 }
 0x24e   :  { %v2104_v41 = vsel %vm2096_vm4, %v2092_v40, %v2100_v43  ;;  %v2107_v42 = vpack.c.bf16 %v2103_v3, %v2103_v3 }
 0x24f   :  { %v2108_v51 = vpack.c.bf16 %v2104_v41, %v2104_v41 }
 0x251   :  { %2578 = vmatprep.mubr.bf16.mxu0 %v2108_v51 }
 0x252   :  { %2579 = vmatmul.mubr.bf16.vlgmr.msra.gmra.mrb[4].mxu0 %v2107_v42 }
 0x325   :  { %v2580_v4 = vpop.f32.mrb[4].mxu0 }
 0x326   :  { %v3217_v37 = vadd.f32 %v2580_v4, %v2178_v1  ;;  %v2582_v5 = vpop.f32.mrb[5].mxu0 }
 0x327   :  { %v3218_v6 = vadd.f32 %v2582_v5, %v2182_v2  ;;  %v2584_v7 = vpop.f32.mrb[6].mxu0 }
 0x328   :  { %v2589_v8 = vsel %vm1957_vm0, %v3217_v37, 0.0  ;;  %v2585_v9 = vpop.f32.mrb[7].mxu0 }
 0x329   :  { %v2590_v10 = vrot.slane %v2589_v8, 4  ;;  %v2596_v29 = vsel %vm1957_vm0, %v3218_v6, 0.0 }
 0x32a   :  { %v2597_v34 = vrot.slane %v2596_v29, 4 }
 0x32b   :  { %v2591_v11 = vadd.f32 %v2590_v10, %v2589_v8 }
 0x32c   :  { %v2598_v12 = vadd.f32 %v2597_v34, %v2596_v29 }
 0x32d   :  { %v2592_v13 = vrot.slane %v2591_v11, 2 }
 0x32e   :  { %v2599_v14 = vrot.slane %v2598_v12, 2 }
 0x32f   :  { %v2593_v15 = vadd.f32 %v2592_v13, %v2591_v11 }
 0x330   :  { %v2600_v20 = vadd.f32 %v2599_v14, %v2598_v12 }
 0x331   :  { %v2594_v21 = vrot.slane %v2593_v15, 1 }
 0x332   :  { %v2601_v22 = vrot.slane %v2600_v20, 1 }
 0x333   :  { %v2595_v23 = vadd.f32 %v2594_v21, %v2593_v15 }
 0x334   :  { %v2602_v25 = vadd.f32 %v2601_v22, %v2600_v20 }
 0x335   :  { %v2603_v26 = vmul.f32 0.5, %v2595_v23 }
 0x336   :  { %v2604_v27 = vmul.f32 0.5, %v2602_v25 }
 0x337   :  { %v2605_v49 = vsub.f32 %v3217_v37, %v2603_v26 }
 0x338   :  { %v2606_v28 = vsub.f32 %v3218_v6, %v2604_v27 }
 0x339   :  { %v2607_v17 = vmul.f32 %v2605_v49, %v2605_v49 }
 0x33a   :  { %v2608_v30 = vmul.f32 %v2606_v28, %v2606_v28 }
 0x33b   :  { %v2609_v31 = vsel %vm1957_vm0, %v2607_v17, 0.0 }
 0x33c   :  { %v2610_v19 = vrot.slane %v2609_v31, 4  ;;  %v2616_v32 = vsel %vm1957_vm0, %v2608_v30, 0.0 }
 0x33d   :  { %v2617_v33 = vrot.slane %v2616_v32, 4 }
 0x33e   :  { %v2611_v35 = vadd.f32 %v2610_v19, %v2609_v31 }
 0x33f   :  { %v2618_v36 = vadd.f32 %v2617_v33, %v2616_v32 }
 0x340   :  { %v2612_v16 = vrot.slane %v2611_v35, 2 }
 0x341   :  { %v2619_v38 = vrot.slane %v2618_v36, 2 }
 0x342   :  { %v2613_v24 = vadd.f32 %v2612_v16, %v2611_v35 }
 0x343   :  { %v2620_v39 = vadd.f32 %v2619_v38, %v2618_v36 }
 0x344   :  { %v2614_v40 = vrot.slane %v2613_v24, 1 }
 0x345   :  { %v2621_v18 = vrot.slane %v2620_v39, 1 }
 0x346   :  { %v2615_v43 = vadd.f32 %v2614_v40, %v2613_v24 }
 0x347   :  { %v2622_v3 = vadd.f32 %v2621_v18, %v2620_v39 }
 0x348   :  { %v2623_v41 = vmul.f32 0.5, %v2615_v43 }
 0x349   :  { %v2624_v51 = vmul.f32 0.5, %v2622_v3 }
 0x34a   :  { %v2625_v42 = vadd.f32 1e-05, %v2623_v41 }
 0x34b   :  { %v2626_v55 = vadd.f32 1e-05, %v2624_v51 }
 0x34c   :  { %3751 = vrsqrt.f32 %v2625_v42 }
 0x34d   :  { %3753 = vrsqrt.f32 %v2626_v55 }
 0x356   :  { %v3752_v46 = vpop.eup %3751 }
 0x357   :  { %v3754_v48 = vpop.eup %3753  ;;  %v2629_v50 = vmul.f32 %v3752_v46, %v2605_v49 }
 0x358   :  { %v2630_v53 = vmul.f32 %v3754_v48, %v2606_v28 }
 0x359   :  { %v2642_v59 = vmul.f32 %v2635_v45, %v2629_v50 }
 0x35a   :  { %v2643_v60 = vmul.f32 %v2639_v47, %v2630_v53 }
 0x35b   :  { %v2655_v61 = vadd.f32 %v2648_v52, %v2642_v59 }
 0x35c   :  { %v2656_v62 = vadd.f32 %v2652_v58, %v2643_v60 }
 0x35d   :  { %vm2657_vm5 = vcmp.ge.f32.partialorder %v2655_v61, 0.0  ;;  %v2659_v63 = vmul.f32 0.2, %v2655_v61 }
 0x35e   :  { %vm2658_vm6 = vcmp.ge.f32.partialorder %v2656_v62, 0.0  ;;  %v2660_v0 = vmul.f32 0.2, %v2656_v62 }
 0x35f   :  { %v2661_v1 = vsel %vm2657_vm5, %v2655_v61, %v2659_v63 }
 0x360   :  { %v2662_v2 = vsel %vm2658_vm6, %v2656_v62, %v2660_v0  ;;  %v2663_v37 = vpack.c.bf16 %v2661_v1, %v2661_v1 }
 0x361   :  { %v2664_v4 = vpack.c.bf16 %v2662_v2, %v2662_v2 }
 0x363   :  { %2832 = vmatprep.mubr.bf16.mxu1 %v2664_v4 }
 0x364   :  { %2833 = vmatmul.mubr.bf16.vlgmr.msra.gmra.mrb[8].mxu1 %v2663_v37 }
 0x437   :  { %v3209_v5 = vpop.f32.mrb[8].mxu1 }
 0x438   :  { %v3210_v56 = vpop.f32.mrb[9].mxu1 }
 0x439   :  { %v3211_v6 = vadd.f32 %v3210_v56, %v3209_v5  ;;  %v3212_v7 = vpop.f32.mrb[10].mxu1 }
 0x43a   :  { %v3213_v8 = vpop.f32.mrb[11].mxu1 }
 0x43b   :  { %v2835_v9 = vadd.f32 %v3211_v6, %v3176_v54 }
 0x43d   :  { %2841 = vst.msk [vmem:[#allocation2] sm:$0x3] %vm2840_vm7, %v2835_v9 }
 0x43e   :  { %3766 = shalt.err (!%p3763_p4)
}
 0x43f   :  { %s3767_s9 = scalar_lea.hbm %s4992_s10, 32 }
 0x440   :  { %p3768_p5 = scmp.ne.s32.totalorder %s4992_s10, %s3767_s9  ;;  %p3771_p6 = scmp.lt.u32.totalorder %s3767_s9, %s4992_s10 }
 0x442   :  { %p3773_p7 = pnand %p3771_p6, %p3768_p5 }
 0x444   :  { %3776 = shalt.err (!%p3773_p7)
}
 0x445   :  { %2851 = dma.vmem_to_hbm [thread:$0]  %s2849_s3, 32, %s4992_s10, [#allocation3]  }
 0x446   :  { %3777 = dma.done.wait [#allocation3], 32  }
 0x447   :  { %3778 = vsyncadd [#allocation3], 4294967264 }
 0x448   :  { %2855 = vsyncpa [#allocation3], 1 }

</bundles_post_ra>
